<compile_context>
chip_gen: v7x
topology: tpu7x:2x2x1
jax: 0.10.0
libtpu: 0.0.40
codegen_flags: <defaults>
</compile_context>

<pallas_src>
import jax
import jax.numpy as jnp
from jax import lax
from jax.experimental import pallas as pl
from jax.experimental.pallas import tpu as pltpu

EPS = 1e-5


def _pick_row_tile(rows, align=16, max_tile=1024):
    """Largest divisor of `rows` that is a multiple of `align` and <= max_tile."""
    best = align
    t = align
    while t <= max_tile:
        if rows % t == 0:
            best = t
        t += align
    return best


def basic_block(x_nchw, gamma1, beta1, w1_hwio, cb1, gamma2, beta2, w2_hwio, cb2):
    """x_nchw: (N, C, H, W) float32.  w*_hwio: (3, 3, Cin, Cout)."""
    N, C, H, W = x_nchw.shape
    assert w1_hwio.shape == (3, 3, C, C) and w2_hwio.shape == (3, 3, C, C), (
        "identity residual path requires Cin == Cout, stride 1, no downsample")

    Cp = ((C + 127) // 128) * 128        # lane-dense channel padding (>=128)
    Np = ((N + 15) // 16) * 16           # batch padded so row shifts are bf16-tile aligned
    Hp, Wp = H + 2, W + 2                # 1-pixel zero halo
    R = Hp * Wp * Np                     # flattened row count (multiple of 16)
    G = (Wp + 1) * Np                    # guard rows = max |tap shift| (multiple of 16)
    inv_count = 1.0 / float(N * H * W)   # real elements per channel (halo/pad rows are 0)

    TR = _pick_row_tile(R)               # row tile (multiple of 16, divides R)
    NT = R // TR

    # Constant flat-row offset of each of the 9 conv taps (ky, kx).
    shifts = [((ky - 1) * Wp + (kx - 1)) * Np for ky in range(3) for kx in range(3)]

    # ---------------- wrapper-side layout plumbing (plain XLA) ----------------
    # NCHW -> (H, W, N, C); zero-pad spatial halo, batch tail and channel tail.
    x_hwnc = jnp.transpose(x_nchw, (2, 3, 0, 1)).astype(jnp.float32)
    x2d = jnp.pad(x_hwnc, ((1, 1), (1, 1), (0, Np - N), (0, Cp - C))).reshape(R, Cp)

    # 1.0 on real (h, w, n) rows; 0.0 on halo rows and padded-batch rows.
    mask2d = jnp.pad(jnp.ones((H, W, N), jnp.float32),
                     ((1, 1), (1, 1), (0, Np - N))).reshape(R, 1)

    def prep_w(w):   # (3,3,C,C) HWIO -> (9, Cp, Cp) bf16 (zero-padded channels)
        wp = jnp.pad(w.astype(jnp.float32),
                     ((0, 0), (0, 0), (0, Cp - C), (0, Cp - C)))
        return wp.reshape(9, Cp, Cp).astype(jnp.bfloat16)

    def prep_vec(v):  # (C,) -> (1, Cp) f32 (zero-padded)
        return jnp.pad(v.astype(jnp.float32), (0, Cp - C)).reshape(1, Cp)

    w1r, w2r = prep_w(w1_hwio), prep_w(w2_hwio)
    g1r, b1r = prep_vec(gamma1), prep_vec(beta1)
    g2r, b2r, cb2r = prep_vec(gamma2), prep_vec(beta2), prep_vec(cb2)
    # cb1 is intentionally not passed: exactly cancelled by training-mode BN2.
    del cb1

    # ------------------------------- the kernel -------------------------------
    def kernel(x_ref, mask_ref, g1_ref, be1_ref, w1_ref,
               g2_ref, be2_ref, w2_ref, cb2_ref, out_ref, act_ref):

        # Zero only the two small guard bands of the bf16 activation buffer (once);
        # the interior is fully overwritten before each conv.
        act_ref[0:G, :] = jnp.zeros((G, Cp), jnp.bfloat16)
        act_ref[G + R:, :] = jnp.zeros((G, Cp), jnp.bfloat16)

        def affine_from_stats(s1, s2, g_ref, be_ref):
            # Single-pass batch statistics: halo / padded rows contribute 0, so
            # column sums / real-count give mean and E[x^2].
            # NOTE: E[x^2]-E[x]^2 can cancel in f32 when |mean| >> std.
            mean = s1 * inv_count
            var = s2 * inv_count - mean * mean
            scale = g_ref[...] * lax.rsqrt(var + EPS)        # (1, Cp), EUP rsqrt
            offset = be_ref[...] - mean * scale
            return scale, offset

        def bn_relu_to_act(src_ref, scale, offset):
            # Row-tiled: normalize + affine + ReLU, re-zero halo rows, cast to
            # bf16 ONCE into the guarded activation buffer.
            def body(t, carry):
                r0 = pl.multiple_of(t * TR, 16)
                v = src_ref[pl.ds(r0, TR), :]
                m = mask_ref[pl.ds(r0, TR), :]
                act_ref[pl.ds(G + r0, TR), :] = (
                    jnp.maximum(v * scale + offset, 0.0) * m).astype(jnp.bfloat16)
                return carry
            lax.fori_loop(0, NT, body, 0)

        def tap_sum(w_ref, r0):
            # 9 taps = value-sum of aligned constant-offset bf16 slices x (Cp,Cp)
            # MXU dots with f32 accumulation; no intermediate VMEM accumulator
            # (lets v7x accumulate in the MRB, single store per tile).
            acc = jnp.dot(act_ref[pl.ds(G + shifts[0] + r0, TR), :], w_ref[0],
                          preferred_element_type=jnp.float32)
            for tap in range(1, 9):
                acc = acc + jnp.dot(act_ref[pl.ds(G + shifts[tap] + r0, TR), :],
                                    w_ref[tap], preferred_element_type=jnp.float32)
            return acc

        zcol = jnp.zeros((1, Cp), jnp.float32)

        # ---- BN1: stats pass over x, then apply + ReLU into act_ref ----
        def x_stats_body(t, carry):
            s1, s2 = carry
            r0 = pl.multiple_of(t * TR, 16)
            v = x_ref[pl.ds(r0, TR), :]
            return (s1 + jnp.sum(v, axis=0, keepdims=True),
                    s2 + jnp.sum(v * v, axis=0, keepdims=True))
        s1, s2 = lax.fori_loop(0, NT, x_stats_body, (zcol, zcol))
        scale1, offset1 = affine_from_stats(s1, s2, g1_ref, be1_ref)
        bn_relu_to_act(x_ref, scale1, offset1)

        # ---- conv1, row-tiled, fused with BN2 statistics.  conv1 bias dropped:
        # a per-channel constant before training-mode BN is an exact no-op. ----
        def conv1_body(t, carry):
            s1, s2 = carry
            r0 = pl.multiple_of(t * TR, 16)
            y = tap_sum(w1_ref, r0) * mask_ref[pl.ds(r0, TR), :]
            out_ref[pl.ds(r0, TR), :] = y          # out_ref doubles as conv1 scratch
            return (s1 + jnp.sum(y, axis=0, keepdims=True),
                    s2 + jnp.sum(y * y, axis=0, keepdims=True))
        s1, s2 = lax.fori_loop(0, NT, conv1_body, (zcol, zcol))
        scale2, offset2 = affine_from_stats(s1, s2, g2_ref, be2_ref)

        # ---- BN2 apply + ReLU (reads the conv1 output back from a ref) ----
        bn_relu_to_act(out_ref, scale2, offset2)

        # ---- conv2 + bias + identity residual, row-tiled final store ----
        cb2v = cb2_ref[...]
        def conv2_body(t, carry):
            r0 = pl.multiple_of(t * TR, 16)
            out_ref[pl.ds(r0, TR), :] = (tap_sum(w2_ref, r0) + cb2v
                                         + x_ref[pl.ds(r0, TR), :])
            return carry
        lax.fori_loop(0, NT, conv2_body, 0)

    # VMEM footprint / cost bookkeeping (static).
    in_bytes = (R * Cp * 4) + (R * 4) + (2 * 9 * Cp * Cp * 2) + (5 * Cp * 4)
    out_bytes = R * Cp * 4
    act_bytes = (R + 2 * G) * Cp * 2
    vmem_limit = int(min(max((in_bytes + out_bytes + act_bytes) * 3 // 2 + (2 << 20),
                             16 << 20), 64 << 20))
    cost = pl.CostEstimate(
        flops=2 * 9 * 2 * R * Cp * Cp,          # two 3x3 convs as 9 matmuls each
        transcendentals=2 * Cp,                 # two per-channel rsqrt passes
        bytes_accessed=in_bytes + out_bytes)

    vmem = pl.BlockSpec(memory_space=pltpu.MemorySpace.VMEM)
    out2d = pl.pallas_call(
        kernel,
        out_shape=jax.ShapeDtypeStruct((R, Cp), jnp.float32),
        in_specs=[vmem] * 9,
        out_specs=vmem,
        scratch_shapes=[
            pltpu.VMEM((R + 2 * G, Cp), jnp.bfloat16),   # guarded bf16 activation buffer
        ],
        compiler_params=pltpu.CompilerParams(vmem_limit_bytes=vmem_limit),
        cost_estimate=cost,
    )(x2d, mask2d, g1r, b1r, w1r, g2r, b2r, w2r, cb2r)

    # (R, Cp) -> (H+2, W+2, Np, Cp) -> strip halo / batch pad / channel pad -> NCHW
    out = out2d.reshape(Hp, Wp, Np, Cp)[1:H + 1, 1:W + 1, :N, :C]
    return jnp.transpose(out, (2, 3, 0, 1))


def basic_block_reference(x, gamma1, beta1, w1_hwio, cb1, gamma2, beta2, w2_hwio, cb2):
    """Pure-JAX reference matching the PyTorch forward (training-mode BN)."""
    def bn(v, g, b):
        m = jnp.mean(v, axis=(0, 2, 3), keepdims=True)
        var = jnp.mean((v - m) ** 2, axis=(0, 2, 3), keepdims=True)
        return (v - m) / jnp.sqrt(var + EPS) * g.reshape(1, -1, 1, 1) + b.reshape(1, -1, 1, 1)

    def conv(v, w_hwio, b):
        w_oihw = jnp.transpose(w_hwio, (3, 2, 0, 1))
        y = jax.lax.conv_general_dilated(
            v, w_oihw, window_strides=(1, 1), padding=((1, 1), (1, 1)),
            dimension_numbers=("NCHW", "OIHW", "NCHW"))
        return y + b.reshape(1, -1, 1, 1)

    out = jnp.maximum(bn(x, gamma1, beta1), 0.0)
    out = conv(out, w1_hwio, cb1)
    out = jnp.maximum(bn(out, gamma2, beta2), 0.0)
    out = conv(out, w2_hwio, cb2)
    return out + x


if __name__ == "__main__":
    key = jax.random.PRNGKey(0)
    ks = jax.random.split(key, 10)
    N, C, H, W = 2, 4, 16, 16

    x = jax.random.normal(ks[0], (N, C, H, W), jnp.float32)
    gamma1 = 1.0 + 0.1 * jax.random.normal(ks[1], (C,), jnp.float32)
    beta1 = 0.1 * jax.random.normal(ks[2], (C,), jnp.float32)
    w1 = 0.1 * jax.random.normal(ks[3], (3, 3, C, C), jnp.float32)
    cb1 = 0.1 * jax.random.normal(ks[4], (C,), jnp.float32)
    gamma2 = 1.0 + 0.1 * jax.random.normal(ks[5], (C,), jnp.float32)
    beta2 = 0.1 * jax.random.normal(ks[6], (C,), jnp.float32)
    w2 = 0.1 * jax.random.normal(ks[7], (3, 3, C, C), jnp.float32)
    cb2 = 0.1 * jax.random.normal(ks[8], (C,), jnp.float32)

    out = basic_block(x, gamma1, beta1, w1, cb1, gamma2, beta2, w2, cb2)
    out = jax.block_until_ready(out)

    ref = basic_block_reference(x, gamma1, beta1, w1, cb1, gamma2, beta2, w2, cb2)
    ref = jax.block_until_ready(ref)

    # bf16 MXU inputs with f32 accumulation -> slightly looser tolerance than pure f32.
    if not jnp.allclose(out, ref, rtol=2e-2, atol=2e-2):
        max_err = float(jnp.max(jnp.abs(out - ref)))
        raise AssertionError(f"Pallas output mismatch vs reference, max abs err={max_err}")

    print("KERNEL_OK")
</pallas_src>

<mosaic_0001>
module attributes {stable_mosaic.version = 11 : i64} {
  func.func @kernel(%arg0: memref<5184x128xf32, #tpu.memory_space<vmem>>, %arg1: memref<5184x1xf32, #tpu.memory_space<vmem>>, %arg2: memref<1x128xf32, #tpu.memory_space<vmem>>, %arg3: memref<1x128xf32, #tpu.memory_space<vmem>>, %arg4: memref<9x128x128xbf16, #tpu.memory_space<vmem>>, %arg5: memref<1x128xf32, #tpu.memory_space<vmem>>, %arg6: memref<1x128xf32, #tpu.memory_space<vmem>>, %arg7: memref<9x128x128xbf16, #tpu.memory_space<vmem>>, %arg8: memref<1x128xf32, #tpu.memory_space<vmem>>, %arg9: memref<5184x128xf32, #tpu.memory_space<vmem>>, %arg10: memref<5792x128xbf16, #tpu.memory_space<vmem>>) attributes {dimension_semantics = [], scalar_prefetch = 0 : i64, scratch_operands = 1 : i64, tpu.core_type = #tpu.core_type<tc>} {
    %cst = arith.constant 0.000000e+00 : bf16
    %0 = vector.broadcast %cst : bf16 to vector<304x128xbf16>
    %c0 = arith.constant 0 : index
    %c0_0 = arith.constant 0 : index
    %1 = vector.load %arg10[%c0, %c0_0] : memref<5792x128xbf16, #tpu.memory_space<vmem>>, vector<304x128xbf16>
    tpu.vector_store %arg10[%c0, %c0_0], %0 {strides = array<i32>} : memref<5792x128xbf16, #tpu.memory_space<vmem>>, vector<304x128xbf16>,
    %cst_1 = arith.constant 0.000000e+00 : bf16
    %2 = vector.broadcast %cst_1 : bf16 to vector<304x128xbf16>
    %c5488 = arith.constant 5488 : index
    %c0_2 = arith.constant 0 : index
    %3 = vector.load %arg10[%c5488, %c0_2] : memref<5792x128xbf16, #tpu.memory_space<vmem>>, vector<304x128xbf16>
    tpu.vector_store %arg10[%c5488, %c0_2], %2 {strides = array<i32>} : memref<5792x128xbf16, #tpu.memory_space<vmem>>, vector<304x128xbf16>,
    %cst_3 = arith.constant 0.000000e+00 : f32
    %4 = vector.broadcast %cst_3 : f32 to vector<1x128xf32>
    %c0_i32 = arith.constant 0 : i32
    %c6_i32 = arith.constant 6 : i32
    %5 = arith.addi %c0_i32, %c6_i32 : i32
    %c1_i32 = arith.constant 1 : i32
    %6:2 = scf.for %arg11 = %c0_i32 to %5 step %c1_i32 iter_args(%arg12 = %4, %arg13 = %4) -> (vector<1x128xf32>, vector<1x128xf32>)  : i32 {
      %c864_i32 = arith.constant 864 : i32
      %41 = arith.muli %arg11, %c864_i32 : i32
      %42 = tpu.assume_multiple %41, 16 : i32
      %43 = arith.index_cast %42 : i32 to index
      %c0_37 = arith.constant 0 : index
      %44 = vector.load %arg0[%43, %c0_37] : memref<5184x128xf32, #tpu.memory_space<vmem>>, vector<864x128xf32>
      %cst_38 = arith.constant dense<0.000000e+00> : vector<128xf32>
      %45 = vector.multi_reduction <add>, %44, %cst_38 [0] : vector<864x128xf32> to vector<128xf32>
      %46 = vector.shape_cast %45 : vector<128xf32> to vector<1x128xf32>
      %47 = arith.addf %arg12, %46 : vector<1x128xf32>
      %48 = arith.mulf %44, %44 : vector<864x128xf32>
      %cst_39 = arith.constant dense<0.000000e+00> : vector<128xf32>
      %49 = vector.multi_reduction <add>, %48, %cst_39 [0] : vector<864x128xf32> to vector<128xf32>
      %50 = vector.shape_cast %49 : vector<128xf32> to vector<1x128xf32>
      %51 = arith.addf %arg13, %50 : vector<1x128xf32>
      scf.yield %47, %51 : vector<1x128xf32>, vector<1x128xf32>
    }
    %c6_i32_4 = arith.constant 6 : i32
    %cst_5 = arith.constant 0.001953125 : f32
    %7 = vector.broadcast %cst_5 : f32 to vector<1x128xf32>
    %8 = arith.mulf %6#0, %7 : vector<1x128xf32>
    %cst_6 = arith.constant 0.001953125 : f32
    %9 = vector.broadcast %cst_6 : f32 to vector<1x128xf32>
    %10 = arith.mulf %6#1, %9 : vector<1x128xf32>
    %11 = arith.mulf %8, %8 : vector<1x128xf32>
    %12 = arith.subf %10, %11 : vector<1x128xf32>
    %c0_7 = arith.constant 0 : index
    %c0_8 = arith.constant 0 : index
    %13 = vector.load %arg2[%c0_7, %c0_8] : memref<1x128xf32, #tpu.memory_space<vmem>>, vector<1x128xf32>
    %cst_9 = arith.constant 9.99999974E-6 : f32
    %14 = vector.broadcast %cst_9 : f32 to vector<1x128xf32>
    %15 = arith.addf %12, %14 : vector<1x128xf32>
    %16 = math.rsqrt %15 : vector<1x128xf32>
    %17 = arith.mulf %13, %16 : vector<1x128xf32>
    %c0_10 = arith.constant 0 : index
    %c0_11 = arith.constant 0 : index
    %18 = vector.load %arg3[%c0_10, %c0_11] : memref<1x128xf32, #tpu.memory_space<vmem>>, vector<1x128xf32>
    %19 = arith.mulf %8, %17 : vector<1x128xf32>
    %20 = arith.subf %18, %19 : vector<1x128xf32>
    %c0_i32_12 = arith.constant 0 : i32
    %c6_i32_13 = arith.constant 6 : i32
    %21 = arith.addi %c0_i32_12, %c6_i32_13 : i32
    %c1_i32_14 = arith.constant 1 : i32
    scf.for %arg11 = %c0_i32_12 to %21 step %c1_i32_14  : i32 {
      %c864_i32 = arith.constant 864 : i32
      %41 = arith.muli %arg11, %c864_i32 : i32
      %42 = tpu.assume_multiple %41, 16 : i32
      %43 = arith.index_cast %42 : i32 to index
      %c0_37 = arith.constant 0 : index
      %44 = vector.load %arg0[%43, %c0_37] : memref<5184x128xf32, #tpu.memory_space<vmem>>, vector<864x128xf32>
      %45 = arith.index_cast %42 : i32 to index
      %c0_38 = arith.constant 0 : index
      %46 = vector.load %arg1[%45, %c0_38] : memref<5184x1xf32, #tpu.memory_space<vmem>>, vector<864x1xf32>
      %47 = vector.broadcast %17 : vector<1x128xf32> to vector<864x128xf32>
      %48 = arith.mulf %44, %47 : vector<864x128xf32>
      %49 = vector.broadcast %20 : vector<1x128xf32> to vector<864x128xf32>
      %50 = arith.addf %48, %49 : vector<864x128xf32>
      %cst_39 = arith.constant 0.000000e+00 : f32
      %51 = vector.broadcast %cst_39 : f32 to vector<864x128xf32>
      %52 = arith.maximumf %50, %51 : vector<864x128xf32>
      %53 = vector.broadcast %46 : vector<864x1xf32> to vector<864x128xf32>
      %54 = arith.mulf %52, %53 : vector<864x128xf32>
      %55 = arith.truncf %54 : vector<864x128xf32> to vector<864x128xbf16>
      %c304_i32 = arith.constant 304 : i32
      %56 = arith.addi %c304_i32, %42 : i32
      %57 = arith.index_cast %56 : i32 to index
      %c0_40 = arith.constant 0 : index
      %58 = vector.load %arg10[%57, %c0_40] : memref<5792x128xbf16, #tpu.memory_space<vmem>>, vector<864x128xbf16>
      tpu.vector_store %arg10[%57, %c0_40], %55 {strides = array<i32>} : memref<5792x128xbf16, #tpu.memory_space<vmem>>, vector<864x128xbf16>,
    }
    %c6_i32_15 = arith.constant 6 : i32
    %c0_i32_16 = arith.constant 0 : i32
    %c6_i32_17 = arith.constant 6 : i32
    %22 = arith.addi %c0_i32_16, %c6_i32_17 : i32
    %c1_i32_18 = arith.constant 1 : i32
    %23:2 = scf.for %arg11 = %c0_i32_16 to %22 step %c1_i32_18 iter_args(%arg12 = %4, %arg13 = %4) -> (vector<1x128xf32>, vector<1x128xf32>)  : i32 {
      %c864_i32 = arith.constant 864 : i32
      %41 = arith.muli %arg11, %c864_i32 : i32
      %42 = tpu.assume_multiple %41, 16 : i32
      %c0_i32_37 = arith.constant 0 : i32
      %43 = arith.addi %c0_i32_37, %42 : i32
      %44 = arith.index_cast %43 : i32 to index
      %c0_38 = arith.constant 0 : index
      %45 = vector.load %arg10[%44, %c0_38] : memref<5792x128xbf16, #tpu.memory_space<vmem>>, vector<864x128xbf16>
      %c0_39 = arith.constant 0 : index
      %c0_40 = arith.constant 0 : index
      %c0_41 = arith.constant 0 : index
      %46 = vector.load %arg4[%c0_39, %c0_40, %c0_41] : memref<9x128x128xbf16, #tpu.memory_space<vmem>>, vector<1x128x128xbf16>
      %47 = vector.shape_cast %46 : vector<1x128x128xbf16> to vector<128x128xbf16>
      %cst_42 = arith.constant dense<0.000000e+00> : vector<864x128xf32>
      %48 = tpu.matmul %45, %47, %cst_42 {dimension_numbers = #tpu.dot_dimension_numbers<[1], [0], [0], [1], [0, 0, 1, 1], [], []>} : vector<864x128xbf16>, vector<128x128xbf16>, vector<864x128xf32> -> vector<864x128xf32>
      %c16_i32 = arith.constant 16 : i32
      %49 = arith.addi %c16_i32, %42 : i32
      %50 = arith.index_cast %49 : i32 to index
      %c0_43 = arith.constant 0 : index
      %51 = vector.load %arg10[%50, %c0_43] : memref<5792x128xbf16, #tpu.memory_space<vmem>>, vector<864x128xbf16>
      %c1 = arith.constant 1 : index
      %c0_44 = arith.constant 0 : index
      %c0_45 = arith.constant 0 : index
      %52 = vector.load %arg4[%c1, %c0_44, %c0_45] : memref<9x128x128xbf16, #tpu.memory_space<vmem>>, vector<1x128x128xbf16>
      %53 = vector.shape_cast %52 : vector<1x128x128xbf16> to vector<128x128xbf16>
      %cst_46 = arith.constant dense<0.000000e+00> : vector<864x128xf32>
      %54 = tpu.matmul %51, %53, %cst_46 {dimension_numbers = #tpu.dot_dimension_numbers<[1], [0], [0], [1], [0, 0, 1, 1], [], []>} : vector<864x128xbf16>, vector<128x128xbf16>, vector<864x128xf32> -> vector<864x128xf32>
      %55 = arith.addf %48, %54 : vector<864x128xf32>
      %c32_i32 = arith.constant 32 : i32
      %56 = arith.addi %c32_i32, %42 : i32
      %57 = arith.index_cast %56 : i32 to index
      %c0_47 = arith.constant 0 : index
      %58 = vector.load %arg10[%57, %c0_47] : memref<5792x128xbf16, #tpu.memory_space<vmem>>, vector<864x128xbf16>
      %c2 = arith.constant 2 : index
      %c0_48 = arith.constant 0 : index
      %c0_49 = arith.constant 0 : index
      %59 = vector.load %arg4[%c2, %c0_48, %c0_49] : memref<9x128x128xbf16, #tpu.memory_space<vmem>>, vector<1x128x128xbf16>
      %60 = vector.shape_cast %59 : vector<1x128x128xbf16> to vector<128x128xbf16>
      %cst_50 = arith.constant dense<0.000000e+00> : vector<864x128xf32>
      %61 = tpu.matmul %58, %60, %cst_50 {dimension_numbers = #tpu.dot_dimension_numbers<[1], [0], [0], [1], [0, 0, 1, 1], [], []>} : vector<864x128xbf16>, vector<128x128xbf16>, vector<864x128xf32> -> vector<864x128xf32>
      %62 = arith.addf %55, %61 : vector<864x128xf32>
      %c288_i32 = arith.constant 288 : i32
      %63 = arith.addi %c288_i32, %42 : i32
      %64 = arith.index_cast %63 : i32 to index
      %c0_51 = arith.constant 0 : index
      %65 = vector.load %arg10[%64, %c0_51] : memref<5792x128xbf16, #tpu.memory_space<vmem>>, vector<864x128xbf16>
      %c3 = arith.constant 3 : index
      %c0_52 = arith.constant 0 : index
      %c0_53 = arith.constant 0 : index
      %66 = vector.load %arg4[%c3, %c0_52, %c0_53] : memref<9x128x128xbf16, #tpu.memory_space<vmem>>, vector<1x128x128xbf16>
      %67 = vector.shape_cast %66 : vector<1x128x128xbf16> to vector<128x128xbf16>
      %cst_54 = arith.constant dense<0.000000e+00> : vector<864x128xf32>
      %68 = tpu.matmul %65, %67, %cst_54 {dimension_numbers = #tpu.dot_dimension_numbers<[1], [0], [0], [1], [0, 0, 1, 1], [], []>} : vector<864x128xbf16>, vector<128x128xbf16>, vector<864x128xf32> -> vector<864x128xf32>
      %69 = arith.addf %62, %68 : vector<864x128xf32>
      %c304_i32 = arith.constant 304 : i32
      %70 = arith.addi %c304_i32, %42 : i32
      %71 = arith.index_cast %70 : i32 to index
      %c0_55 = arith.constant 0 : index
      %72 = vector.load %arg10[%71, %c0_55] : memref<5792x128xbf16, #tpu.memory_space<vmem>>, vector<864x128xbf16>
      %c4 = arith.constant 4 : index
      %c0_56 = arith.constant 0 : index
      %c0_57 = arith.constant 0 : index
      %73 = vector.load %arg4[%c4, %c0_56, %c0_57] : memref<9x128x128xbf16, #tpu.memory_space<vmem>>, vector<1x128x128xbf16>
      %74 = vector.shape_cast %73 : vector<1x128x128xbf16> to vector<128x128xbf16>
      %cst_58 = arith.constant dense<0.000000e+00> : vector<864x128xf32>
      %75 = tpu.matmul %72, %74, %cst_58 {dimension_numbers = #tpu.dot_dimension_numbers<[1], [0], [0], [1], [0, 0, 1, 1], [], []>} : vector<864x128xbf16>, vector<128x128xbf16>, vector<864x128xf32> -> vector<864x128xf32>
      %76 = arith.addf %69, %75 : vector<864x128xf32>
      %c320_i32 = arith.constant 320 : i32
      %77 = arith.addi %c320_i32, %42 : i32
      %78 = arith.index_cast %77 : i32 to index
      %c0_59 = arith.constant 0 : index
      %79 = vector.load %arg10[%78, %c0_59] : memref<5792x128xbf16, #tpu.memory_space<vmem>>, vector<864x128xbf16>
      %c5 = arith.constant 5 : index
      %c0_60 = arith.constant 0 : index
      %c0_61 = arith.constant 0 : index
      %80 = vector.load %arg4[%c5, %c0_60, %c0_61] : memref<9x128x128xbf16, #tpu.memory_space<vmem>>, vector<1x128x128xbf16>
      %81 = vector.shape_cast %80 : vector<1x128x128xbf16> to vector<128x128xbf16>
      %cst_62 = arith.constant dense<0.000000e+00> : vector<864x128xf32>
      %82 = tpu.matmul %79, %81, %cst_62 {dimension_numbers = #tpu.dot_dimension_numbers<[1], [0], [0], [1], [0, 0, 1, 1], [], []>} : vector<864x128xbf16>, vector<128x128xbf16>, vector<864x128xf32> -> vector<864x128xf32>
      %83 = arith.addf %76, %82 : vector<864x128xf32>
      %c576_i32 = arith.constant 576 : i32
      %84 = arith.addi %c576_i32, %42 : i32
      %85 = arith.index_cast %84 : i32 to index
      %c0_63 = arith.constant 0 : index
      %86 = vector.load %arg10[%85, %c0_63] : memref<5792x128xbf16, #tpu.memory_space<vmem>>, vector<864x128xbf16>
      %c6 = arith.constant 6 : index
      %c0_64 = arith.constant 0 : index
      %c0_65 = arith.constant 0 : index
      %87 = vector.load %arg4[%c6, %c0_64, %c0_65] : memref<9x128x128xbf16, #tpu.memory_space<vmem>>, vector<1x128x128xbf16>
      %88 = vector.shape_cast %87 : vector<1x128x128xbf16> to vector<128x128xbf16>
      %cst_66 = arith.constant dense<0.000000e+00> : vector<864x128xf32>
      %89 = tpu.matmul %86, %88, %cst_66 {dimension_numbers = #tpu.dot_dimension_numbers<[1], [0], [0], [1], [0, 0, 1, 1], [], []>} : vector<864x128xbf16>, vector<128x128xbf16>, vector<864x128xf32> -> vector<864x128xf32>
      %90 = arith.addf %83, %89 : vector<864x128xf32>
      %c592_i32 = arith.constant 592 : i32
      %91 = arith.addi %c592_i32, %42 : i32
      %92 = arith.index_cast %91 : i32 to index
      %c0_67 = arith.constant 0 : index
      %93 = vector.load %arg10[%92, %c0_67] : memref<5792x128xbf16, #tpu.memory_space<vmem>>, vector<864x128xbf16>
      %c7 = arith.constant 7 : index
      %c0_68 = arith.constant 0 : index
      %c0_69 = arith.constant 0 : index
      %94 = vector.load %arg4[%c7, %c0_68, %c0_69] : memref<9x128x128xbf16, #tpu.memory_space<vmem>>, vector<1x128x128xbf16>
      %95 = vector.shape_cast %94 : vector<1x128x128xbf16> to vector<128x128xbf16>
      %cst_70 = arith.constant dense<0.000000e+00> : vector<864x128xf32>
      %96 = tpu.matmul %93, %95, %cst_70 {dimension_numbers = #tpu.dot_dimension_numbers<[1], [0], [0], [1], [0, 0, 1, 1], [], []>} : vector<864x128xbf16>, vector<128x128xbf16>, vector<864x128xf32> -> vector<864x128xf32>
      %97 = arith.addf %90, %96 : vector<864x128xf32>
      %c608_i32 = arith.constant 608 : i32
      %98 = arith.addi %c608_i32, %42 : i32
      %99 = arith.index_cast %98 : i32 to index
      %c0_71 = arith.constant 0 : index
      %100 = vector.load %arg10[%99, %c0_71] : memref<5792x128xbf16, #tpu.memory_space<vmem>>, vector<864x128xbf16>
      %c8 = arith.constant 8 : index
      %c0_72 = arith.constant 0 : index
      %c0_73 = arith.constant 0 : index
      %101 = vector.load %arg4[%c8, %c0_72, %c0_73] : memref<9x128x128xbf16, #tpu.memory_space<vmem>>, vector<1x128x128xbf16>
      %102 = vector.shape_cast %101 : vector<1x128x128xbf16> to vector<128x128xbf16>
      %cst_74 = arith.constant dense<0.000000e+00> : vector<864x128xf32>
      %103 = tpu.matmul %100, %102, %cst_74 {dimension_numbers = #tpu.dot_dimension_numbers<[1], [0], [0], [1], [0, 0, 1, 1], [], []>} : vector<864x128xbf16>, vector<128x128xbf16>, vector<864x128xf32> -> vector<864x128xf32>
      %104 = arith.addf %97, %103 : vector<864x128xf32>
      %105 = arith.index_cast %42 : i32 to index
      %c0_75 = arith.constant 0 : index
      %106 = vector.load %arg1[%105, %c0_75] : memref<5184x1xf32, #tpu.memory_space<vmem>>, vector<864x1xf32>
      %107 = vector.broadcast %106 : vector<864x1xf32> to vector<864x128xf32>
      %108 = arith.mulf %104, %107 : vector<864x128xf32>
      %109 = arith.index_cast %42 : i32 to index
      %c0_76 = arith.constant 0 : index
      %110 = vector.load %arg9[%109, %c0_76] : memref<5184x128xf32, #tpu.memory_space<vmem>>, vector<864x128xf32>
      tpu.vector_store %arg9[%109, %c0_76], %108 {strides = array<i32>} : memref<5184x128xf32, #tpu.memory_space<vmem>>, vector<864x128xf32>,
      %cst_77 = arith.constant dense<0.000000e+00> : vector<128xf32>
      %111 = vector.multi_reduction <add>, %108, %cst_77 [0] : vector<864x128xf32> to vector<128xf32>
      %112 = vector.shape_cast %111 : vector<128xf32> to vector<1x128xf32>
      %113 = arith.addf %arg12, %112 : vector<1x128xf32>
      %114 = arith.mulf %108, %108 : vector<864x128xf32>
      %cst_78 = arith.constant dense<0.000000e+00> : vector<128xf32>
      %115 = vector.multi_reduction <add>, %114, %cst_78 [0] : vector<864x128xf32> to vector<128xf32>
      %116 = vector.shape_cast %115 : vector<128xf32> to vector<1x128xf32>
      %117 = arith.addf %arg13, %116 : vector<1x128xf32>
      scf.yield %113, %117 : vector<1x128xf32>, vector<1x128xf32>
    }
    %c6_i32_19 = arith.constant 6 : i32
    %cst_20 = arith.constant 0.001953125 : f32
    %24 = vector.broadcast %cst_20 : f32 to vector<1x128xf32>
    %25 = arith.mulf %23#0, %24 : vector<1x128xf32>
    %cst_21 = arith.constant 0.001953125 : f32
    %26 = vector.broadcast %cst_21 : f32 to vector<1x128xf32>
    %27 = arith.mulf %23#1, %26 : vector<1x128xf32>
    %28 = arith.mulf %25, %25 : vector<1x128xf32>
    %29 = arith.subf %27, %28 : vector<1x128xf32>
    %c0_22 = arith.constant 0 : index
    %c0_23 = arith.constant 0 : index
    %30 = vector.load %arg5[%c0_22, %c0_23] : memref<1x128xf32, #tpu.memory_space<vmem>>, vector<1x128xf32>
    %cst_24 = arith.constant 9.99999974E-6 : f32
    %31 = vector.broadcast %cst_24 : f32 to vector<1x128xf32>
    %32 = arith.addf %29, %31 : vector<1x128xf32>
    %33 = math.rsqrt %32 : vector<1x128xf32>
    %34 = arith.mulf %30, %33 : vector<1x128xf32>
    %c0_25 = arith.constant 0 : index
    %c0_26 = arith.constant 0 : index
    %35 = vector.load %arg6[%c0_25, %c0_26] : memref<1x128xf32, #tpu.memory_space<vmem>>, vector<1x128xf32>
    %36 = arith.mulf %25, %34 : vector<1x128xf32>
    %37 = arith.subf %35, %36 : vector<1x128xf32>
    %c0_i32_27 = arith.constant 0 : i32
    %c6_i32_28 = arith.constant 6 : i32
    %38 = arith.addi %c0_i32_27, %c6_i32_28 : i32
    %c1_i32_29 = arith.constant 1 : i32
    scf.for %arg11 = %c0_i32_27 to %38 step %c1_i32_29  : i32 {
      %c864_i32 = arith.constant 864 : i32
      %41 = arith.muli %arg11, %c864_i32 : i32
      %42 = tpu.assume_multiple %41, 16 : i32
      %43 = arith.index_cast %42 : i32 to index
      %c0_37 = arith.constant 0 : index
      %44 = vector.load %arg9[%43, %c0_37] : memref<5184x128xf32, #tpu.memory_space<vmem>>, vector<864x128xf32>
      %45 = arith.index_cast %42 : i32 to index
      %c0_38 = arith.constant 0 : index
      %46 = vector.load %arg1[%45, %c0_38] : memref<5184x1xf32, #tpu.memory_space<vmem>>, vector<864x1xf32>
      %47 = vector.broadcast %34 : vector<1x128xf32> to vector<864x128xf32>
      %48 = arith.mulf %44, %47 : vector<864x128xf32>
      %49 = vector.broadcast %37 : vector<1x128xf32> to vector<864x128xf32>
      %50 = arith.addf %48, %49 : vector<864x128xf32>
      %cst_39 = arith.constant 0.000000e+00 : f32
      %51 = vector.broadcast %cst_39 : f32 to vector<864x128xf32>
      %52 = arith.maximumf %50, %51 : vector<864x128xf32>
      %53 = vector.broadcast %46 : vector<864x1xf32> to vector<864x128xf32>
      %54 = arith.mulf %52, %53 : vector<864x128xf32>
      %55 = arith.truncf %54 : vector<864x128xf32> to vector<864x128xbf16>
      %c304_i32 = arith.constant 304 : i32
      %56 = arith.addi %c304_i32, %42 : i32
      %57 = arith.index_cast %56 : i32 to index
      %c0_40 = arith.constant 0 : index
      %58 = vector.load %arg10[%57, %c0_40] : memref<5792x128xbf16, #tpu.memory_space<vmem>>, vector<864x128xbf16>
      tpu.vector_store %arg10[%57, %c0_40], %55 {strides = array<i32>} : memref<5792x128xbf16, #tpu.memory_space<vmem>>, vector<864x128xbf16>,
    }
    %c6_i32_30 = arith.constant 6 : i32
    %c0_31 = arith.constant 0 : index
    %c0_32 = arith.constant 0 : index
    %39 = vector.load %arg8[%c0_31, %c0_32] : memref<1x128xf32, #tpu.memory_space<vmem>>, vector<1x128xf32>
    %c0_i32_33 = arith.constant 0 : i32
    %c6_i32_34 = arith.constant 6 : i32
    %40 = arith.addi %c0_i32_33, %c6_i32_34 : i32
    %c1_i32_35 = arith.constant 1 : i32
    scf.for %arg11 = %c0_i32_33 to %40 step %c1_i32_35  : i32 {
      %c864_i32 = arith.constant 864 : i32
      %41 = arith.muli %arg11, %c864_i32 : i32
      %42 = tpu.assume_multiple %41, 16 : i32
      %c0_i32_37 = arith.constant 0 : i32
      %43 = arith.addi %c0_i32_37, %42 : i32
      %44 = arith.index_cast %43 : i32 to index
      %c0_38 = arith.constant 0 : index
      %45 = vector.load %arg10[%44, %c0_38] : memref<5792x128xbf16, #tpu.memory_space<vmem>>, vector<864x128xbf16>
      %c0_39 = arith.constant 0 : index
      %c0_40 = arith.constant 0 : index
      %c0_41 = arith.constant 0 : index
      %46 = vector.load %arg7[%c0_39, %c0_40, %c0_41] : memref<9x128x128xbf16, #tpu.memory_space<vmem>>, vector<1x128x128xbf16>
      %47 = vector.shape_cast %46 : vector<1x128x128xbf16> to vector<128x128xbf16>
      %cst_42 = arith.constant dense<0.000000e+00> : vector<864x128xf32>
      %48 = tpu.matmul %45, %47, %cst_42 {dimension_numbers = #tpu.dot_dimension_numbers<[1], [0], [0], [1], [0, 0, 1, 1], [], []>} : vector<864x128xbf16>, vector<128x128xbf16>, vector<864x128xf32> -> vector<864x128xf32>
      %c16_i32 = arith.constant 16 : i32
      %49 = arith.addi %c16_i32, %42 : i32
      %50 = arith.index_cast %49 : i32 to index
      %c0_43 = arith.constant 0 : index
      %51 = vector.load %arg10[%50, %c0_43] : memref<5792x128xbf16, #tpu.memory_space<vmem>>, vector<864x128xbf16>
      %c1 = arith.constant 1 : index
      %c0_44 = arith.constant 0 : index
      %c0_45 = arith.constant 0 : index
      %52 = vector.load %arg7[%c1, %c0_44, %c0_45] : memref<9x128x128xbf16, #tpu.memory_space<vmem>>, vector<1x128x128xbf16>
      %53 = vector.shape_cast %52 : vector<1x128x128xbf16> to vector<128x128xbf16>
      %cst_46 = arith.constant dense<0.000000e+00> : vector<864x128xf32>
      %54 = tpu.matmul %51, %53, %cst_46 {dimension_numbers = #tpu.dot_dimension_numbers<[1], [0], [0], [1], [0, 0, 1, 1], [], []>} : vector<864x128xbf16>, vector<128x128xbf16>, vector<864x128xf32> -> vector<864x128xf32>
      %55 = arith.addf %48, %54 : vector<864x128xf32>
      %c32_i32 = arith.constant 32 : i32
      %56 = arith.addi %c32_i32, %42 : i32
      %57 = arith.index_cast %56 : i32 to index
      %c0_47 = arith.constant 0 : index
      %58 = vector.load %arg10[%57, %c0_47] : memref<5792x128xbf16, #tpu.memory_space<vmem>>, vector<864x128xbf16>
      %c2 = arith.constant 2 : index
      %c0_48 = arith.constant 0 : index
      %c0_49 = arith.constant 0 : index
      %59 = vector.load %arg7[%c2, %c0_48, %c0_49] : memref<9x128x128xbf16, #tpu.memory_space<vmem>>, vector<1x128x128xbf16>
      %60 = vector.shape_cast %59 : vector<1x128x128xbf16> to vector<128x128xbf16>
      %cst_50 = arith.constant dense<0.000000e+00> : vector<864x128xf32>
      %61 = tpu.matmul %58, %60, %cst_50 {dimension_numbers = #tpu.dot_dimension_numbers<[1], [0], [0], [1], [0, 0, 1, 1], [], []>} : vector<864x128xbf16>, vector<128x128xbf16>, vector<864x128xf32> -> vector<864x128xf32>
      %62 = arith.addf %55, %61 : vector<864x128xf32>
      %c288_i32 = arith.constant 288 : i32
      %63 = arith.addi %c288_i32, %42 : i32
      %64 = arith.index_cast %63 : i32 to index
      %c0_51 = arith.constant 0 : index
      %65 = vector.load %arg10[%64, %c0_51] : memref<5792x128xbf16, #tpu.memory_space<vmem>>, vector<864x128xbf16>
      %c3 = arith.constant 3 : index
      %c0_52 = arith.constant 0 : index
      %c0_53 = arith.constant 0 : index
      %66 = vector.load %arg7[%c3, %c0_52, %c0_53] : memref<9x128x128xbf16, #tpu.memory_space<vmem>>, vector<1x128x128xbf16>
      %67 = vector.shape_cast %66 : vector<1x128x128xbf16> to vector<128x128xbf16>
      %cst_54 = arith.constant dense<0.000000e+00> : vector<864x128xf32>
      %68 = tpu.matmul %65, %67, %cst_54 {dimension_numbers = #tpu.dot_dimension_numbers<[1], [0], [0], [1], [0, 0, 1, 1], [], []>} : vector<864x128xbf16>, vector<128x128xbf16>, vector<864x128xf32> -> vector<864x128xf32>
      %69 = arith.addf %62, %68 : vector<864x128xf32>
      %c304_i32 = arith.constant 304 : i32
      %70 = arith.addi %c304_i32, %42 : i32
      %71 = arith.index_cast %70 : i32 to index
      %c0_55 = arith.constant 0 : index
      %72 = vector.load %arg10[%71, %c0_55] : memref<5792x128xbf16, #tpu.memory_space<vmem>>, vector<864x128xbf16>
      %c4 = arith.constant 4 : index
      %c0_56 = arith.constant 0 : index
      %c0_57 = arith.constant 0 : index
      %73 = vector.load %arg7[%c4, %c0_56, %c0_57] : memref<9x128x128xbf16, #tpu.memory_space<vmem>>, vector<1x128x128xbf16>
      %74 = vector.shape_cast %73 : vector<1x128x128xbf16> to vector<128x128xbf16>
      %cst_58 = arith.constant dense<0.000000e+00> : vector<864x128xf32>
      %75 = tpu.matmul %72, %74, %cst_58 {dimension_numbers = #tpu.dot_dimension_numbers<[1], [0], [0], [1], [0, 0, 1, 1], [], []>} : vector<864x128xbf16>, vector<128x128xbf16>, vector<864x128xf32> -> vector<864x128xf32>
      %76 = arith.addf %69, %75 : vector<864x128xf32>
      %c320_i32 = arith.constant 320 : i32
      %77 = arith.addi %c320_i32, %42 : i32
      %78 = arith.index_cast %77 : i32 to index
      %c0_59 = arith.constant 0 : index
      %79 = vector.load %arg10[%78, %c0_59] : memref<5792x128xbf16, #tpu.memory_space<vmem>>, vector<864x128xbf16>
      %c5 = arith.constant 5 : index
      %c0_60 = arith.constant 0 : index
      %c0_61 = arith.constant 0 : index
      %80 = vector.load %arg7[%c5, %c0_60, %c0_61] : memref<9x128x128xbf16, #tpu.memory_space<vmem>>, vector<1x128x128xbf16>
      %81 = vector.shape_cast %80 : vector<1x128x128xbf16> to vector<128x128xbf16>
      %cst_62 = arith.constant dense<0.000000e+00> : vector<864x128xf32>
      %82 = tpu.matmul %79, %81, %cst_62 {dimension_numbers = #tpu.dot_dimension_numbers<[1], [0], [0], [1], [0, 0, 1, 1], [], []>} : vector<864x128xbf16>, vector<128x128xbf16>, vector<864x128xf32> -> vector<864x128xf32>
      %83 = arith.addf %76, %82 : vector<864x128xf32>
      %c576_i32 = arith.constant 576 : i32
      %84 = arith.addi %c576_i32, %42 : i32
      %85 = arith.index_cast %84 : i32 to index
      %c0_63 = arith.constant 0 : index
      %86 = vector.load %arg10[%85, %c0_63] : memref<5792x128xbf16, #tpu.memory_space<vmem>>, vector<864x128xbf16>
      %c6 = arith.constant 6 : index
      %c0_64 = arith.constant 0 : index
      %c0_65 = arith.constant 0 : index
      %87 = vector.load %arg7[%c6, %c0_64, %c0_65] : memref<9x128x128xbf16, #tpu.memory_space<vmem>>, vector<1x128x128xbf16>
      %88 = vector.shape_cast %87 : vector<1x128x128xbf16> to vector<128x128xbf16>
      %cst_66 = arith.constant dense<0.000000e+00> : vector<864x128xf32>
      %89 = tpu.matmul %86, %88, %cst_66 {dimension_numbers = #tpu.dot_dimension_numbers<[1], [0], [0], [1], [0, 0, 1, 1], [], []>} : vector<864x128xbf16>, vector<128x128xbf16>, vector<864x128xf32> -> vector<864x128xf32>
      %90 = arith.addf %83, %89 : vector<864x128xf32>
      %c592_i32 = arith.constant 592 : i32
      %91 = arith.addi %c592_i32, %42 : i32
      %92 = arith.index_cast %91 : i32 to index
      %c0_67 = arith.constant 0 : index
      %93 = vector.load %arg10[%92, %c0_67] : memref<5792x128xbf16, #tpu.memory_space<vmem>>, vector<864x128xbf16>
      %c7 = arith.constant 7 : index
      %c0_68 = arith.constant 0 : index
      %c0_69 = arith.constant 0 : index
      %94 = vector.load %arg7[%c7, %c0_68, %c0_69] : memref<9x128x128xbf16, #tpu.memory_space<vmem>>, vector<1x128x128xbf16>
      %95 = vector.shape_cast %94 : vector<1x128x128xbf16> to vector<128x128xbf16>
      %cst_70 = arith.constant dense<0.000000e+00> : vector<864x128xf32>
      %96 = tpu.matmul %93, %95, %cst_70 {dimension_numbers = #tpu.dot_dimension_numbers<[1], [0], [0], [1], [0, 0, 1, 1], [], []>} : vector<864x128xbf16>, vector<128x128xbf16>, vector<864x128xf32> -> vector<864x128xf32>
      %97 = arith.addf %90, %96 : vector<864x128xf32>
      %c608_i32 = arith.constant 608 : i32
      %98 = arith.addi %c608_i32, %42 : i32
      %99 = arith.index_cast %98 : i32 to index
      %c0_71 = arith.constant 0 : index
      %100 = vector.load %arg10[%99, %c0_71] : memref<5792x128xbf16, #tpu.memory_space<vmem>>, vector<864x128xbf16>
      %c8 = arith.constant 8 : index
      %c0_72 = arith.constant 0 : index
      %c0_73 = arith.constant 0 : index
      %101 = vector.load %arg7[%c8, %c0_72, %c0_73] : memref<9x128x128xbf16, #tpu.memory_space<vmem>>, vector<1x128x128xbf16>
      %102 = vector.shape_cast %101 : vector<1x128x128xbf16> to vector<128x128xbf16>
      %cst_74 = arith.constant dense<0.000000e+00> : vector<864x128xf32>
      %103 = tpu.matmul %100, %102, %cst_74 {dimension_numbers = #tpu.dot_dimension_numbers<[1], [0], [0], [1], [0, 0, 1, 1], [], []>} : vector<864x128xbf16>, vector<128x128xbf16>, vector<864x128xf32> -> vector<864x128xf32>
      %104 = arith.addf %97, %103 : vector<864x128xf32>
      %105 = vector.broadcast %39 : vector<1x128xf32> to vector<864x128xf32>
      %106 = arith.addf %104, %105 : vector<864x128xf32>
      %107 = arith.index_cast %42 : i32 to index
      %c0_75 = arith.constant 0 : index
      %108 = vector.load %arg0[%107, %c0_75] : memref<5184x128xf32, #tpu.memory_space<vmem>>, vector<864x128xf32>
      %109 = arith.addf %106, %108 : vector<864x128xf32>
      %110 = arith.index_cast %42 : i32 to index
      %c0_76 = arith.constant 0 : index
      %111 = vector.load %arg9[%110, %c0_76] : memref<5184x128xf32, #tpu.memory_space<vmem>>, vector<864x128xf32>
      tpu.vector_store %arg9[%110, %c0_76], %109 {strides = array<i32>} : memref<5184x128xf32, #tpu.memory_space<vmem>>, vector<864x128xf32>,
    }
    %c6_i32_36 = arith.constant 6 : i32
    return
  }
}

</mosaic_0001>

<bundles_post_ra>
// kernel: tpu_custom_call.1
= control target key start
LH: loop header
LB: loop body
LE: loop exit
PB: predicated region body
PF: predicated region fallthrough
CT: control target
= control target key end

     0   :  { %14 = vsyncpa [#allocation4], 0  ;;  %s26397_s0 = inlined_call_operand.vmem [shape: f32[5184,128], index: 0, kind: input, shape index: {}]   ;;  %s26398_s1 = inlined_call_operand.vmem [shape: f32[5184,1], index: 1, kind: input, shape index: {}]   ;;  %s26399_s2 = inlined_call_operand.vmem [shape: f32[1,128], index: 2, kind: input, shape index: {}]   ;;  %s26400_s3 = inlined_call_operand.vmem [shape: f32[1,128], index: 3, kind: input, shape index: {}]   ;;  %s26401_s4 = inlined_call_operand.hbm [shape: bf16[9,128,128], index: 4, kind: input, shape index: {}]   ;;  %s26402_s5 = inlined_call_operand.vmem [shape: f32[1,128], index: 5, kind: input, shape index: {}]   ;;  %s26403_s6 = inlined_call_operand.vmem [shape: f32[1,128], index: 6, kind: input, shape index: {}]   ;;  %s26404_s7 = inlined_call_operand.hbm [shape: bf16[9,128,128], index: 7, kind: input, shape index: {}]   ;;  %s26405_s8 = inlined_call_operand.vmem [shape: f32[1,128], index: 8, kind: input, shape index: {}]   ;;  %s26406_s9 = inlined_call_operand.hbm [shape: f32[5184,128], index: 9, kind: output, shape index: {}]  }
   0x1   :  { %15 = vsyncpa [#allocation7], 0 }
   0x2   :  { %16 = vsyncpa [#allocation5], 0  ;;  %s22772_s30 = smov [#allocation3]   ;;  %s22628_s13 = scalar_lea.hbm %s26401_s4, 9216 }
   0x3   :  { %s30_s10 = sshll.u32 %s22772_s30, 4  ;;  %p22629_p0 = scmp.ne.s32.totalorder %s26401_s4, %s22628_s13  ;;  %s31_s10 = int_to_ptr.vmem [resolvable:$true] %s30_s10 }
   0x4   :  { %p22632_p1 = scmp.lt.u32.totalorder %s22628_s13, %s26401_s4 }
   0x6   :  { %p22634_p2 = pnand %p22632_p1, %p22629_p0 }
   0x8   :  { %22637 = shalt.err (!%p22634_p2)
}
   0x9   :  { %s22638_s18 = scalar_lea.vmem %s31_s10, 9216  ;;  %p22643_p4 = scmp.lt.s32.totalorder %s31_s10, %s31_s10 }
   0xa   :  { %p22639_p3 = scmp.ne.s32.totalorder %s31_s10, %s22638_s18  ;;  %p22644_p5 = scmp.lt.s32.totalorder %s22638_s18, %s22638_s18 }
   0xc   :  { %p22645_p6 = por %p22644_p5, %p22643_p4 }
   0xe   :  { %p22646_p7 = pnand %p22645_p6, %p22639_p3 }
  0x10   :  { %22649 = shalt.err (!%p22646_p7)
}
  0x11   :  { %s22773_s19 = smov 64   ;;  %s22774_s20 = smov 4  }
  0x12   :  { %36 = dma.hbm_to_vmem [thread:$0]  %s26401_s4, 9216, %s31_s10, [#allocation4], %s22773_s19, %s22773_s19, %s22774_s20  }
  0x13   :  { %s22775_s23 = smov [#allocation6]   ;;  %s22650_s27 = scalar_lea.hbm %s26404_s7, 9216 }
  0x14   :  { %s46_s24 = sshll.u32 %s22775_s23, 4  ;;  %p22651_p8 = scmp.ne.s32.totalorder %s26404_s7, %s22650_s27  ;;  %s47_s24 = int_to_ptr.vmem [resolvable:$true] %s46_s24 }
  0x15   :  { %p22654_p9 = scmp.lt.u32.totalorder %s22650_s27, %s26404_s7 }
  0x17   :  { %p22656_p10 = pnand %p22654_p9, %p22651_p8 }
  0x19   :  { %22659 = shalt.err (!%p22656_p10)
}
  0x1a   :  { %s22660_s12 = scalar_lea.vmem %s47_s24, 9216  ;;  %p22665_p12 = scmp.lt.s32.totalorder %s47_s24, %s47_s24 }
  0x1b   :  { %p22661_p11 = scmp.ne.s32.totalorder %s47_s24, %s22660_s12  ;;  %p22666_p13 = scmp.lt.s32.totalorder %s22660_s12, %s22660_s12 }
  0x1d   :  { %p22667_p0 = por %p22666_p13, %p22665_p12 }
  0x1f   :  { %p22668_p1 = pnand %p22667_p0, %p22661_p11 }
  0x21   :  { %22671 = shalt.err (!%p22668_p1)
}
  0x22   :  { %52 = dma.hbm_to_vmem [thread:$0]  %s26404_s7, 9216, %s47_s24, [#allocation7], %s22773_s19, %s22773_s19, %s22774_s20  }
  0x23   :  { %22730 = dma.done.wait [#allocation4], 9216  }
  0x24   :  { %22731 = vsyncadd [#allocation4], 4294958080 }
  0x25   :  { %22732 = dma.done.wait [#allocation7], 9216  }
  0x26   :  { %22733 = vsyncadd [#allocation7], 4294958080  ;;  %v22776_v0 = vmov 0   ;;  %v22857_v1 = vmov 0.0   ;;  %v22859_v2 = vmov 0.0   ;;  %s22861_s7 = smov 0  }
  0x27   :  { %62 = vst [vmem:[#allocation2] sm:$0xff] %v22776_v0  ;;  %63 = vst [vmem:[#allocation2 + $0x8] sm:$0xff] %v22776_v0 }
  0x28   :  { %64 = vst [vmem:[#allocation2 + $0x10] sm:$0xff] %v22776_v0  ;;  %65 = vst [vmem:[#allocation2 + $0x18] sm:$0xff] %v22776_v0 }
  0x29   :  { %66 = vst [vmem:[#allocation2 + $0x20] sm:$0xff] %v22776_v0  ;;  %67 = vst [vmem:[#allocation2 + $0x28] sm:$0xff] %v22776_v0 }
  0x2a   :  { %68 = vst [vmem:[#allocation2 + $0x30] sm:$0xff] %v22776_v0  ;;  %69 = vst [vmem:[#allocation2 + $0x38] sm:$0xff] %v22776_v0 }
  0x2b   :  { %70 = vst [vmem:[#allocation2 + $0x40] sm:$0xff] %v22776_v0  ;;  %71 = vst [vmem:[#allocation2 + $0x48] sm:$0xff] %v22776_v0 }
  0x2c   :  { %72 = vst [vmem:[#allocation2 + $0x50] sm:$0xff] %v22776_v0  ;;  %73 = vst [vmem:[#allocation2 + $0x58] sm:$0xff] %v22776_v0 }
  0x2d   :  { %74 = vst [vmem:[#allocation2 + $0x60] sm:$0xff] %v22776_v0  ;;  %75 = vst [vmem:[#allocation2 + $0x68] sm:$0xff] %v22776_v0 }
  0x2e   :  { %76 = vst [vmem:[#allocation2 + $0x70] sm:$0xff] %v22776_v0  ;;  %77 = vst [vmem:[#allocation2 + $0x78] sm:$0xff] %v22776_v0 }
  0x2f   :  { %78 = vst [vmem:[#allocation2 + $0x80] sm:$0xff] %v22776_v0  ;;  %79 = vst [vmem:[#allocation2 + $0x88] sm:$0xff] %v22776_v0 }
  0x30   :  { %80 = vst [vmem:[#allocation2 + $0x90] sm:$0xff] %v22776_v0  ;;  %81 = vst [vmem:[#allocation2 + $0xab8] sm:$0xff] %v22776_v0 }
  0x31   :  { %82 = vst [vmem:[#allocation2 + $0xac0] sm:$0xff] %v22776_v0  ;;  %83 = vst [vmem:[#allocation2 + $0xac8] sm:$0xff] %v22776_v0 }
  0x32   :  { %84 = vst [vmem:[#allocation2 + $0xad0] sm:$0xff] %v22776_v0  ;;  %85 = vst [vmem:[#allocation2 + $0xad8] sm:$0xff] %v22776_v0 }
  0x33   :  { %86 = vst [vmem:[#allocation2 + $0xae0] sm:$0xff] %v22776_v0  ;;  %87 = vst [vmem:[#allocation2 + $0xae8] sm:$0xff] %v22776_v0 }
  0x34   :  { %88 = vst [vmem:[#allocation2 + $0xaf0] sm:$0xff] %v22776_v0  ;;  %89 = vst [vmem:[#allocation2 + $0xaf8] sm:$0xff] %v22776_v0 }
  0x35   :  { %90 = vst [vmem:[#allocation2 + $0xb00] sm:$0xff] %v22776_v0  ;;  %91 = vst [vmem:[#allocation2 + $0xb08] sm:$0xff] %v22776_v0 }
  0x36   :  { %92 = vst [vmem:[#allocation2 + $0xb10] sm:$0xff] %v22776_v0  ;;  %93 = vst [vmem:[#allocation2 + $0xb18] sm:$0xff] %v22776_v0 }
  0x37   :  { %94 = vst [vmem:[#allocation2 + $0xb20] sm:$0xff] %v22776_v0  ;;  %95 = vst [vmem:[#allocation2 + $0xb28] sm:$0xff] %v22776_v0 }
  0x38   :  { %96 = vst [vmem:[#allocation2 + $0xb30] sm:$0xff] %v22776_v0  ;;  %97 = vst [vmem:[#allocation2 + $0xb38] sm:$0xff] %v22776_v0 }
  0x39   :  { %98 = vst [vmem:[#allocation2 + $0xb40] sm:$0xff] %v22776_v0  ;;  %99 = vst [vmem:[#allocation2 + $0xb48] sm:$0xff] %v22776_v0 }
  0x3a LB: > { %s108_s13 = smul.u32 864, %s22746_s7  ;;  %s105_s7 = sadd.s32 1, %s22746_s7   ;;  %s22746_s7 = sphi %s22861_s7, %s105_s7   ;;  %v22742_v2 = vphi %v22859_v2, %v26410_v2   ;;  %v22738_v1 = vphi %v22857_v1, %v26409_v1  }
  0x3b   : > { %p102_p2 = scmp.ge.s32.totalorder %s105_s7, 6  }
  0x3c   : > { %s22876_s16 = scalar_lea.vmem %s26397_s0, %s108_s13  ;;  %s23010_s21 = smov (%p102_p2), 0  }
  0x3d   : > { %v110_v3 = vld [vmem:[%s22876_s16] sm:$0xff]  ;;  %v111_v4 = vld [vmem:[%s22876_s16 + $0x8] sm:$0xff]  ;;  %v112_v5 = vld [vmem:[%s22876_s16 + $0x10] sm:$0xff] }
  0x3e   : > { %v113_v6 = vld [vmem:[%s22876_s16 + $0x18] sm:$0xff]  ;;  %v218_v7 = vadd.f32 %v111_v4, %v110_v3  ;;  %v332_v8 = vmul.f32 %v110_v3, %v110_v3  ;;  %v333_v9 = vmul.f32 %v111_v4, %v111_v4  ;;  %v334_v10 = vmul.f32 %v112_v5, %v112_v5  ;;  %v114_v11 = vld [vmem:[%s22876_s16 + $0x20] sm:$0xff]  ;;  %v115_v15 = vld [vmem:[%s22876_s16 + $0x28] sm:$0xff] }
  0x3f   : > { %v335_v13 = vmul.f32 %v113_v6, %v113_v6  ;;  %v336_v17 = vmul.f32 %v114_v11, %v114_v11  ;;  %v116_v19 = vld [vmem:[%s22876_s16 + $0x30] sm:$0xff]  ;;  %v337_v21 = vmul.f32 %v115_v15, %v115_v15  ;;  %v117_v23 = vld [vmem:[%s22876_s16 + $0x38] sm:$0xff]  ;;  %v118_v27 = vld [vmem:[%s22876_s16 + $0x40] sm:$0xff] }
  0x40   : > { %v219_v12 = vadd.f32 %v218_v7, %v112_v5  ;;  %v440_v14 = vadd.f32 %v333_v9, %v332_v8  ;;  %v338_v25 = vmul.f32 %v116_v19, %v116_v19  ;;  %v339_v29 = vmul.f32 %v117_v23, %v117_v23  ;;  %v119_v31 = vld [vmem:[%s22876_s16 + $0x48] sm:$0xff]  ;;  %v120_v35 = vld [vmem:[%s22876_s16 + $0x50] sm:$0xff]  ;;  %v121_v39 = vld [vmem:[%s22876_s16 + $0x58] sm:$0xff] }
  0x41   : > { %v340_v33 = vmul.f32 %v118_v27, %v118_v27  ;;  %v341_v37 = vmul.f32 %v119_v31, %v119_v31  ;;  %v342_v41 = vmul.f32 %v120_v35, %v120_v35  ;;  %v122_v43 = vld [vmem:[%s22876_s16 + $0x60] sm:$0xff]  ;;  %v343_v45 = vmul.f32 %v121_v39, %v121_v39  ;;  %v123_v47 = vld [vmem:[%s22876_s16 + $0x68] sm:$0xff]  ;;  %v124_v51 = vld [vmem:[%s22876_s16 + $0x70] sm:$0xff] }
  0x42   : > { %v220_v16 = vadd.f32 %v219_v12, %v113_v6  ;;  %v441_v18 = vadd.f32 %v440_v14, %v334_v10  ;;  %v344_v49 = vmul.f32 %v122_v43, %v122_v43  ;;  %v345_v53 = vmul.f32 %v123_v47, %v123_v47  ;;  %v125_v55 = vld [vmem:[%s22876_s16 + $0x78] sm:$0xff]  ;;  %v126_v59 = vld [vmem:[%s22876_s16 + $0x80] sm:$0xff]  ;;  %v127_v63 = vld [vmem:[%s22876_s16 + $0x88] sm:$0xff] }
  0x43   : > { %v346_v57 = vmul.f32 %v124_v51, %v124_v51  ;;  %v347_v61 = vmul.f32 %v125_v55, %v125_v55  ;;  %v348_v3 = vmul.f32 %v126_v59, %v126_v59  ;;  %v128_v5 = vld [vmem:[%s22876_s16 + $0x90] sm:$0xff]  ;;  %v349_v7 = vmul.f32 %v127_v63, %v127_v63  ;;  %v129_v9 = vld [vmem:[%s22876_s16 + $0x98] sm:$0xff] }
  0x44   : > { %v221_v20 = vadd.f32 %v220_v16, %v114_v11  ;;  %v442_v22 = vadd.f32 %v441_v18, %v335_v13  ;;  %v350_v11 = vmul.f32 %v128_v5, %v128_v5  ;;  %v130_v13 = vld [vmem:[%s22876_s16 + $0xa0] sm:$0xff] }
  0x46   : > { %v222_v24 = vadd.f32 %v221_v20, %v115_v15  ;;  %v443_v26 = vadd.f32 %v442_v22, %v336_v17  ;;  %v351_v15 = vmul.f32 %v129_v9, %v129_v9  ;;  %v131_v17 = vld [vmem:[%s22876_s16 + $0xa8] sm:$0xff] }
  0x48   : > { %v223_v28 = vadd.f32 %v222_v24, %v116_v19  ;;  %v444_v30 = vadd.f32 %v443_v26, %v337_v21  ;;  %v352_v19 = vmul.f32 %v130_v13, %v130_v13  ;;  %v132_v21 = vld [vmem:[%s22876_s16 + $0xb0] sm:$0xff] }
  0x4a   : > { %v224_v32 = vadd.f32 %v223_v28, %v117_v23  ;;  %v445_v34 = vadd.f32 %v444_v30, %v338_v25  ;;  %v353_v23 = vmul.f32 %v131_v17, %v131_v17  ;;  %v133_v25 = vld [vmem:[%s22876_s16 + $0xb8] sm:$0xff] }
  0x4c   : > { %v225_v36 = vadd.f32 %v224_v32, %v118_v27  ;;  %v446_v38 = vadd.f32 %v445_v34, %v339_v29  ;;  %v354_v27 = vmul.f32 %v132_v21, %v132_v21  ;;  %v134_v29 = vld [vmem:[%s22876_s16 + $0xc0] sm:$0xff] }
  0x4e   : > { %v226_v40 = vadd.f32 %v225_v36, %v119_v31  ;;  %v447_v42 = vadd.f32 %v446_v38, %v340_v33  ;;  %v355_v31 = vmul.f32 %v133_v25, %v133_v25  ;;  %v135_v33 = vld [vmem:[%s22876_s16 + $0xc8] sm:$0xff] }
  0x50   : > { %v227_v44 = vadd.f32 %v226_v40, %v120_v35  ;;  %v448_v46 = vadd.f32 %v447_v42, %v341_v37  ;;  %v356_v35 = vmul.f32 %v134_v29, %v134_v29  ;;  %v136_v37 = vld [vmem:[%s22876_s16 + $0xd0] sm:$0xff] }
  0x52   : > { %v228_v48 = vadd.f32 %v227_v44, %v121_v39  ;;  %v449_v50 = vadd.f32 %v448_v46, %v342_v41  ;;  %v357_v39 = vmul.f32 %v135_v33, %v135_v33  ;;  %v137_v41 = vld [vmem:[%s22876_s16 + $0xd8] sm:$0xff] }
  0x54   : > { %v229_v52 = vadd.f32 %v228_v48, %v122_v43  ;;  %v450_v54 = vadd.f32 %v449_v50, %v343_v45  ;;  %v358_v43 = vmul.f32 %v136_v37, %v136_v37  ;;  %v138_v45 = vld [vmem:[%s22876_s16 + $0xe0] sm:$0xff] }
  0x56   : > { %v230_v56 = vadd.f32 %v229_v52, %v123_v47  ;;  %v451_v58 = vadd.f32 %v450_v54, %v344_v49  ;;  %v359_v47 = vmul.f32 %v137_v41, %v137_v41  ;;  %v139_v49 = vld [vmem:[%s22876_s16 + $0xe8] sm:$0xff] }
  0x58   : > { %v231_v60 = vadd.f32 %v230_v56, %v124_v51  ;;  %v452_v62 = vadd.f32 %v451_v58, %v345_v53  ;;  %v360_v51 = vmul.f32 %v138_v45, %v138_v45  ;;  %v140_v53 = vld [vmem:[%s22876_s16 + $0xf0] sm:$0xff] }
  0x5a   : > { %v232_v0 = vadd.f32 %v231_v60, %v125_v55  ;;  %v453_v4 = vadd.f32 %v452_v62, %v346_v57  ;;  %v361_v55 = vmul.f32 %v139_v49, %v139_v49  ;;  %v141_v57 = vld [vmem:[%s22876_s16 + $0xf8] sm:$0xff] }
  0x5c   : > { %v233_v6 = vadd.f32 %v232_v0, %v126_v59  ;;  %v454_v8 = vadd.f32 %v453_v4, %v347_v61  ;;  %v362_v59 = vmul.f32 %v140_v53, %v140_v53  ;;  %v142_v61 = vld [vmem:[%s22876_s16 + $0x100] sm:$0xff] }
  0x5e   : > { %v234_v10 = vadd.f32 %v233_v6, %v127_v63  ;;  %v455_v12 = vadd.f32 %v454_v8, %v348_v3  ;;  %v363_v63 = vmul.f32 %v141_v57, %v141_v57  ;;  %v143_v3 = vld [vmem:[%s22876_s16 + $0x108] sm:$0xff] }
  0x60   : > { %v235_v14 = vadd.f32 %v234_v10, %v128_v5  ;;  %v456_v16 = vadd.f32 %v455_v12, %v349_v7  ;;  %v364_v5 = vmul.f32 %v142_v61, %v142_v61  ;;  %v144_v7 = vld [vmem:[%s22876_s16 + $0x110] sm:$0xff] }
  0x62   : > { %v236_v18 = vadd.f32 %v235_v14, %v129_v9  ;;  %v457_v20 = vadd.f32 %v456_v16, %v350_v11  ;;  %v365_v9 = vmul.f32 %v143_v3, %v143_v3  ;;  %v145_v11 = vld [vmem:[%s22876_s16 + $0x118] sm:$0xff] }
  0x64   : > { %v237_v22 = vadd.f32 %v236_v18, %v130_v13  ;;  %v458_v24 = vadd.f32 %v457_v20, %v351_v15  ;;  %v366_v13 = vmul.f32 %v144_v7, %v144_v7  ;;  %v146_v15 = vld [vmem:[%s22876_s16 + $0x120] sm:$0xff] }
  0x66   : > { %v238_v26 = vadd.f32 %v237_v22, %v131_v17  ;;  %v459_v28 = vadd.f32 %v458_v24, %v352_v19  ;;  %v367_v17 = vmul.f32 %v145_v11, %v145_v11  ;;  %v147_v19 = vld [vmem:[%s22876_s16 + $0x128] sm:$0xff] }
  0x68   : > { %v239_v30 = vadd.f32 %v238_v26, %v132_v21  ;;  %v460_v32 = vadd.f32 %v459_v28, %v353_v23  ;;  %v368_v21 = vmul.f32 %v146_v15, %v146_v15  ;;  %v148_v23 = vld [vmem:[%s22876_s16 + $0x130] sm:$0xff] }
  0x6a   : > { %v240_v34 = vadd.f32 %v239_v30, %v133_v25  ;;  %v461_v36 = vadd.f32 %v460_v32, %v354_v27  ;;  %v369_v25 = vmul.f32 %v147_v19, %v147_v19  ;;  %v149_v27 = vld [vmem:[%s22876_s16 + $0x138] sm:$0xff] }
  0x6c   : > { %v241_v38 = vadd.f32 %v240_v34, %v134_v29  ;;  %v462_v40 = vadd.f32 %v461_v36, %v355_v31  ;;  %v370_v29 = vmul.f32 %v148_v23, %v148_v23  ;;  %v150_v31 = vld [vmem:[%s22876_s16 + $0x140] sm:$0xff] }
  0x6e   : > { %v242_v42 = vadd.f32 %v241_v38, %v135_v33  ;;  %v463_v44 = vadd.f32 %v462_v40, %v356_v35  ;;  %v371_v33 = vmul.f32 %v149_v27, %v149_v27  ;;  %v151_v35 = vld [vmem:[%s22876_s16 + $0x148] sm:$0xff] }
  0x70   : > { %v243_v46 = vadd.f32 %v242_v42, %v136_v37  ;;  %v464_v48 = vadd.f32 %v463_v44, %v357_v39  ;;  %v372_v37 = vmul.f32 %v150_v31, %v150_v31  ;;  %v152_v39 = vld [vmem:[%s22876_s16 + $0x150] sm:$0xff] }
  0x72   : > { %v244_v50 = vadd.f32 %v243_v46, %v137_v41  ;;  %v465_v52 = vadd.f32 %v464_v48, %v358_v43  ;;  %v373_v41 = vmul.f32 %v151_v35, %v151_v35  ;;  %v153_v43 = vld [vmem:[%s22876_s16 + $0x158] sm:$0xff] }
  0x74   : > { %v245_v54 = vadd.f32 %v244_v50, %v138_v45  ;;  %v466_v56 = vadd.f32 %v465_v52, %v359_v47  ;;  %v374_v45 = vmul.f32 %v152_v39, %v152_v39  ;;  %v154_v47 = vld [vmem:[%s22876_s16 + $0x160] sm:$0xff] }
  0x76   : > { %v246_v58 = vadd.f32 %v245_v54, %v139_v49  ;;  %v467_v60 = vadd.f32 %v466_v56, %v360_v51  ;;  %v375_v49 = vmul.f32 %v153_v43, %v153_v43  ;;  %v155_v51 = vld [vmem:[%s22876_s16 + $0x168] sm:$0xff] }
  0x78   : > { %v247_v62 = vadd.f32 %v246_v58, %v140_v53  ;;  %v468_v0 = vadd.f32 %v467_v60, %v361_v55  ;;  %v376_v53 = vmul.f32 %v154_v47, %v154_v47  ;;  %v156_v55 = vld [vmem:[%s22876_s16 + $0x170] sm:$0xff] }
  0x7a   : > { %v248_v4 = vadd.f32 %v247_v62, %v141_v57  ;;  %v469_v6 = vadd.f32 %v468_v0, %v362_v59  ;;  %v377_v57 = vmul.f32 %v155_v51, %v155_v51  ;;  %v157_v59 = vld [vmem:[%s22876_s16 + $0x178] sm:$0xff] }
  0x7c   : > { %v249_v8 = vadd.f32 %v248_v4, %v142_v61  ;;  %v470_v10 = vadd.f32 %v469_v6, %v363_v63  ;;  %v378_v61 = vmul.f32 %v156_v55, %v156_v55  ;;  %v158_v63 = vld [vmem:[%s22876_s16 + $0x180] sm:$0xff] }
  0x7e   : > { %v250_v12 = vadd.f32 %v249_v8, %v143_v3  ;;  %v471_v14 = vadd.f32 %v470_v10, %v364_v5  ;;  %v379_v3 = vmul.f32 %v157_v59, %v157_v59  ;;  %v159_v5 = vld [vmem:[%s22876_s16 + $0x188] sm:$0xff] }
  0x80   : > { %v251_v16 = vadd.f32 %v250_v12, %v144_v7  ;;  %v472_v18 = vadd.f32 %v471_v14, %v365_v9  ;;  %v380_v7 = vmul.f32 %v158_v63, %v158_v63  ;;  %v160_v9 = vld [vmem:[%s22876_s16 + $0x190] sm:$0xff] }
  0x82   : > { %v252_v20 = vadd.f32 %v251_v16, %v145_v11  ;;  %v473_v22 = vadd.f32 %v472_v18, %v366_v13  ;;  %v381_v11 = vmul.f32 %v159_v5, %v159_v5  ;;  %v161_v13 = vld [vmem:[%s22876_s16 + $0x198] sm:$0xff] }
  0x84   : > { %v253_v24 = vadd.f32 %v252_v20, %v146_v15  ;;  %v474_v26 = vadd.f32 %v473_v22, %v367_v17  ;;  %v382_v15 = vmul.f32 %v160_v9, %v160_v9  ;;  %v162_v17 = vld [vmem:[%s22876_s16 + $0x1a0] sm:$0xff] }
  0x86   : > { %v254_v28 = vadd.f32 %v253_v24, %v147_v19  ;;  %v475_v30 = vadd.f32 %v474_v26, %v368_v21  ;;  %v383_v19 = vmul.f32 %v161_v13, %v161_v13  ;;  %v163_v21 = vld [vmem:[%s22876_s16 + $0x1a8] sm:$0xff] }
  0x88   : > { %v255_v32 = vadd.f32 %v254_v28, %v148_v23  ;;  %v476_v34 = vadd.f32 %v475_v30, %v369_v25  ;;  %v384_v23 = vmul.f32 %v162_v17, %v162_v17  ;;  %v164_v25 = vld [vmem:[%s22876_s16 + $0x1b0] sm:$0xff] }
  0x8a   : > { %v256_v36 = vadd.f32 %v255_v32, %v149_v27  ;;  %v477_v38 = vadd.f32 %v476_v34, %v370_v29  ;;  %v385_v27 = vmul.f32 %v163_v21, %v163_v21  ;;  %v165_v29 = vld [vmem:[%s22876_s16 + $0x1b8] sm:$0xff] }
  0x8c   : > { %v257_v40 = vadd.f32 %v256_v36, %v150_v31  ;;  %v478_v42 = vadd.f32 %v477_v38, %v371_v33  ;;  %v386_v31 = vmul.f32 %v164_v25, %v164_v25  ;;  %v166_v33 = vld [vmem:[%s22876_s16 + $0x1c0] sm:$0xff] }
  0x8e   : > { %v258_v44 = vadd.f32 %v257_v40, %v151_v35  ;;  %v479_v46 = vadd.f32 %v478_v42, %v372_v37  ;;  %v387_v35 = vmul.f32 %v165_v29, %v165_v29  ;;  %v167_v37 = vld [vmem:[%s22876_s16 + $0x1c8] sm:$0xff] }
  0x90   : > { %v259_v48 = vadd.f32 %v258_v44, %v152_v39  ;;  %v480_v50 = vadd.f32 %v479_v46, %v373_v41  ;;  %v388_v39 = vmul.f32 %v166_v33, %v166_v33  ;;  %v168_v41 = vld [vmem:[%s22876_s16 + $0x1d0] sm:$0xff] }
  0x92   : > { %v260_v52 = vadd.f32 %v259_v48, %v153_v43  ;;  %v481_v54 = vadd.f32 %v480_v50, %v374_v45  ;;  %v389_v43 = vmul.f32 %v167_v37, %v167_v37  ;;  %v169_v45 = vld [vmem:[%s22876_s16 + $0x1d8] sm:$0xff] }
  0x94   : > { %v261_v56 = vadd.f32 %v260_v52, %v154_v47  ;;  %v482_v58 = vadd.f32 %v481_v54, %v375_v49  ;;  %v390_v47 = vmul.f32 %v168_v41, %v168_v41  ;;  %v170_v49 = vld [vmem:[%s22876_s16 + $0x1e0] sm:$0xff] }
  0x96   : > { %v262_v60 = vadd.f32 %v261_v56, %v155_v51  ;;  %v483_v62 = vadd.f32 %v482_v58, %v376_v53  ;;  %v391_v51 = vmul.f32 %v169_v45, %v169_v45  ;;  %v171_v53 = vld [vmem:[%s22876_s16 + $0x1e8] sm:$0xff] }
  0x98   : > { %v263_v0 = vadd.f32 %v262_v60, %v156_v55  ;;  %v484_v4 = vadd.f32 %v483_v62, %v377_v57  ;;  %v392_v55 = vmul.f32 %v170_v49, %v170_v49  ;;  %v172_v57 = vld [vmem:[%s22876_s16 + $0x1f0] sm:$0xff] }
  0x9a   : > { %v264_v6 = vadd.f32 %v263_v0, %v157_v59  ;;  %v485_v8 = vadd.f32 %v484_v4, %v378_v61  ;;  %v393_v59 = vmul.f32 %v171_v53, %v171_v53  ;;  %v173_v61 = vld [vmem:[%s22876_s16 + $0x1f8] sm:$0xff] }
  0x9c   : > { %v265_v10 = vadd.f32 %v264_v6, %v158_v63  ;;  %v486_v12 = vadd.f32 %v485_v8, %v379_v3  ;;  %v394_v63 = vmul.f32 %v172_v57, %v172_v57  ;;  %v174_v3 = vld [vmem:[%s22876_s16 + $0x200] sm:$0xff] }
  0x9e   : > { %v266_v14 = vadd.f32 %v265_v10, %v159_v5  ;;  %v487_v16 = vadd.f32 %v486_v12, %v380_v7  ;;  %v395_v5 = vmul.f32 %v173_v61, %v173_v61  ;;  %v175_v7 = vld [vmem:[%s22876_s16 + $0x208] sm:$0xff] }
  0xa0   : > { %v267_v18 = vadd.f32 %v266_v14, %v160_v9  ;;  %v488_v20 = vadd.f32 %v487_v16, %v381_v11  ;;  %v396_v9 = vmul.f32 %v174_v3, %v174_v3  ;;  %v176_v11 = vld [vmem:[%s22876_s16 + $0x210] sm:$0xff] }
  0xa2   : > { %v268_v22 = vadd.f32 %v267_v18, %v161_v13  ;;  %v489_v24 = vadd.f32 %v488_v20, %v382_v15  ;;  %v397_v13 = vmul.f32 %v175_v7, %v175_v7  ;;  %v177_v15 = vld [vmem:[%s22876_s16 + $0x218] sm:$0xff] }
  0xa4   : > { %v269_v26 = vadd.f32 %v268_v22, %v162_v17  ;;  %v490_v28 = vadd.f32 %v489_v24, %v383_v19  ;;  %v398_v17 = vmul.f32 %v176_v11, %v176_v11  ;;  %v178_v19 = vld [vmem:[%s22876_s16 + $0x220] sm:$0xff] }
  0xa6   : > { %v270_v30 = vadd.f32 %v269_v26, %v163_v21  ;;  %v491_v32 = vadd.f32 %v490_v28, %v384_v23  ;;  %v399_v21 = vmul.f32 %v177_v15, %v177_v15  ;;  %v179_v23 = vld [vmem:[%s22876_s16 + $0x228] sm:$0xff] }
  0xa8   : > { %v271_v34 = vadd.f32 %v270_v30, %v164_v25  ;;  %v492_v36 = vadd.f32 %v491_v32, %v385_v27  ;;  %v400_v25 = vmul.f32 %v178_v19, %v178_v19  ;;  %v180_v27 = vld [vmem:[%s22876_s16 + $0x230] sm:$0xff] }
  0xaa   : > { %v272_v38 = vadd.f32 %v271_v34, %v165_v29  ;;  %v493_v40 = vadd.f32 %v492_v36, %v386_v31  ;;  %v401_v29 = vmul.f32 %v179_v23, %v179_v23  ;;  %v181_v31 = vld [vmem:[%s22876_s16 + $0x238] sm:$0xff] }
  0xac   : > { %v273_v42 = vadd.f32 %v272_v38, %v166_v33  ;;  %v494_v44 = vadd.f32 %v493_v40, %v387_v35  ;;  %v402_v33 = vmul.f32 %v180_v27, %v180_v27  ;;  %v182_v35 = vld [vmem:[%s22876_s16 + $0x240] sm:$0xff] }
  0xae   : > { %v274_v46 = vadd.f32 %v273_v42, %v167_v37  ;;  %v495_v48 = vadd.f32 %v494_v44, %v388_v39  ;;  %v403_v37 = vmul.f32 %v181_v31, %v181_v31  ;;  %v183_v39 = vld [vmem:[%s22876_s16 + $0x248] sm:$0xff] }
  0xb0   : > { %v275_v50 = vadd.f32 %v274_v46, %v168_v41  ;;  %v496_v52 = vadd.f32 %v495_v48, %v389_v43  ;;  %v404_v41 = vmul.f32 %v182_v35, %v182_v35  ;;  %v184_v43 = vld [vmem:[%s22876_s16 + $0x250] sm:$0xff] }
  0xb2   : > { %v276_v54 = vadd.f32 %v275_v50, %v169_v45  ;;  %v497_v56 = vadd.f32 %v496_v52, %v390_v47  ;;  %v405_v45 = vmul.f32 %v183_v39, %v183_v39  ;;  %v185_v47 = vld [vmem:[%s22876_s16 + $0x258] sm:$0xff] }
  0xb4   : > { %v277_v58 = vadd.f32 %v276_v54, %v170_v49  ;;  %v498_v60 = vadd.f32 %v497_v56, %v391_v51  ;;  %v406_v49 = vmul.f32 %v184_v43, %v184_v43  ;;  %v186_v51 = vld [vmem:[%s22876_s16 + $0x260] sm:$0xff] }
  0xb6   : > { %v278_v62 = vadd.f32 %v277_v58, %v171_v53  ;;  %v499_v0 = vadd.f32 %v498_v60, %v392_v55  ;;  %v407_v53 = vmul.f32 %v185_v47, %v185_v47  ;;  %v187_v55 = vld [vmem:[%s22876_s16 + $0x268] sm:$0xff] }
  0xb8   : > { %v279_v4 = vadd.f32 %v278_v62, %v172_v57  ;;  %v500_v6 = vadd.f32 %v499_v0, %v393_v59  ;;  %v408_v57 = vmul.f32 %v186_v51, %v186_v51  ;;  %v188_v59 = vld [vmem:[%s22876_s16 + $0x270] sm:$0xff] }
  0xba   : > { %v280_v8 = vadd.f32 %v279_v4, %v173_v61  ;;  %v501_v10 = vadd.f32 %v500_v6, %v394_v63  ;;  %v409_v61 = vmul.f32 %v187_v55, %v187_v55  ;;  %v189_v63 = vld [vmem:[%s22876_s16 + $0x278] sm:$0xff] }
  0xbc   : > { %v281_v12 = vadd.f32 %v280_v8, %v174_v3  ;;  %v502_v14 = vadd.f32 %v501_v10, %v395_v5  ;;  %v410_v3 = vmul.f32 %v188_v59, %v188_v59  ;;  %v190_v5 = vld [vmem:[%s22876_s16 + $0x280] sm:$0xff] }
  0xbe   : > { %v282_v16 = vadd.f32 %v281_v12, %v175_v7  ;;  %v503_v18 = vadd.f32 %v502_v14, %v396_v9  ;;  %v411_v7 = vmul.f32 %v189_v63, %v189_v63  ;;  %v191_v9 = vld [vmem:[%s22876_s16 + $0x288] sm:$0xff] }
  0xc0   : > { %v283_v20 = vadd.f32 %v282_v16, %v176_v11  ;;  %v504_v22 = vadd.f32 %v503_v18, %v397_v13  ;;  %v412_v11 = vmul.f32 %v190_v5, %v190_v5  ;;  %v192_v13 = vld [vmem:[%s22876_s16 + $0x290] sm:$0xff] }
  0xc2   : > { %v284_v24 = vadd.f32 %v283_v20, %v177_v15  ;;  %v505_v26 = vadd.f32 %v504_v22, %v398_v17  ;;  %v413_v15 = vmul.f32 %v191_v9, %v191_v9  ;;  %v193_v17 = vld [vmem:[%s22876_s16 + $0x298] sm:$0xff] }
  0xc4   : > { %v285_v28 = vadd.f32 %v284_v24, %v178_v19  ;;  %v506_v30 = vadd.f32 %v505_v26, %v399_v21  ;;  %v414_v19 = vmul.f32 %v192_v13, %v192_v13  ;;  %v194_v21 = vld [vmem:[%s22876_s16 + $0x2a0] sm:$0xff] }
  0xc6   : > { %v286_v32 = vadd.f32 %v285_v28, %v179_v23  ;;  %v507_v34 = vadd.f32 %v506_v30, %v400_v25  ;;  %v415_v23 = vmul.f32 %v193_v17, %v193_v17  ;;  %v195_v25 = vld [vmem:[%s22876_s16 + $0x2a8] sm:$0xff] }
  0xc8   : > { %v287_v36 = vadd.f32 %v286_v32, %v180_v27  ;;  %v508_v38 = vadd.f32 %v507_v34, %v401_v29  ;;  %v416_v27 = vmul.f32 %v194_v21, %v194_v21  ;;  %v196_v29 = vld [vmem:[%s22876_s16 + $0x2b0] sm:$0xff] }
  0xca   : > { %v288_v40 = vadd.f32 %v287_v36, %v181_v31  ;;  %v509_v42 = vadd.f32 %v508_v38, %v402_v33  ;;  %v417_v31 = vmul.f32 %v195_v25, %v195_v25  ;;  %v197_v33 = vld [vmem:[%s22876_s16 + $0x2b8] sm:$0xff] }
  0xcc   : > { %v289_v44 = vadd.f32 %v288_v40, %v182_v35  ;;  %v510_v46 = vadd.f32 %v509_v42, %v403_v37  ;;  %v418_v35 = vmul.f32 %v196_v29, %v196_v29  ;;  %v198_v37 = vld [vmem:[%s22876_s16 + $0x2c0] sm:$0xff] }
  0xce   : > { %v290_v48 = vadd.f32 %v289_v44, %v183_v39  ;;  %v511_v50 = vadd.f32 %v510_v46, %v404_v41  ;;  %v419_v39 = vmul.f32 %v197_v33, %v197_v33  ;;  %v199_v41 = vld [vmem:[%s22876_s16 + $0x2c8] sm:$0xff] }
  0xd0   : > { %v291_v52 = vadd.f32 %v290_v48, %v184_v43  ;;  %v512_v54 = vadd.f32 %v511_v50, %v405_v45  ;;  %v420_v43 = vmul.f32 %v198_v37, %v198_v37  ;;  %v200_v45 = vld [vmem:[%s22876_s16 + $0x2d0] sm:$0xff] }
  0xd2   : > { %v292_v56 = vadd.f32 %v291_v52, %v185_v47  ;;  %v513_v58 = vadd.f32 %v512_v54, %v406_v49  ;;  %v421_v47 = vmul.f32 %v199_v41, %v199_v41  ;;  %v201_v49 = vld [vmem:[%s22876_s16 + $0x2d8] sm:$0xff] }
  0xd4   : > { %v293_v60 = vadd.f32 %v292_v56, %v186_v51  ;;  %v514_v62 = vadd.f32 %v513_v58, %v407_v53  ;;  %v422_v51 = vmul.f32 %v200_v45, %v200_v45  ;;  %v202_v53 = vld [vmem:[%s22876_s16 + $0x2e0] sm:$0xff] }
  0xd6   : > { %v294_v0 = vadd.f32 %v293_v60, %v187_v55  ;;  %v515_v4 = vadd.f32 %v514_v62, %v408_v57  ;;  %v423_v55 = vmul.f32 %v201_v49, %v201_v49  ;;  %v203_v57 = vld [vmem:[%s22876_s16 + $0x2e8] sm:$0xff] }
  0xd8   : > { %v295_v6 = vadd.f32 %v294_v0, %v188_v59  ;;  %v516_v8 = vadd.f32 %v515_v4, %v409_v61  ;;  %v424_v59 = vmul.f32 %v202_v53, %v202_v53  ;;  %v204_v61 = vld [vmem:[%s22876_s16 + $0x2f0] sm:$0xff] }
  0xda   : > { %v296_v10 = vadd.f32 %v295_v6, %v189_v63  ;;  %v517_v12 = vadd.f32 %v516_v8, %v410_v3  ;;  %v425_v63 = vmul.f32 %v203_v57, %v203_v57  ;;  %v205_v3 = vld [vmem:[%s22876_s16 + $0x2f8] sm:$0xff] }
  0xdc   : > { %v297_v14 = vadd.f32 %v296_v10, %v190_v5  ;;  %v518_v16 = vadd.f32 %v517_v12, %v411_v7  ;;  %v426_v5 = vmul.f32 %v204_v61, %v204_v61  ;;  %v206_v7 = vld [vmem:[%s22876_s16 + $0x300] sm:$0xff] }
  0xde   : > { %v298_v18 = vadd.f32 %v297_v14, %v191_v9  ;;  %v519_v20 = vadd.f32 %v518_v16, %v412_v11  ;;  %v427_v9 = vmul.f32 %v205_v3, %v205_v3  ;;  %v207_v11 = vld [vmem:[%s22876_s16 + $0x308] sm:$0xff] }
  0xe0   : > { %v299_v22 = vadd.f32 %v298_v18, %v192_v13  ;;  %v520_v24 = vadd.f32 %v519_v20, %v413_v15  ;;  %v428_v13 = vmul.f32 %v206_v7, %v206_v7  ;;  %v208_v15 = vld [vmem:[%s22876_s16 + $0x310] sm:$0xff] }
  0xe2   : > { %v300_v26 = vadd.f32 %v299_v22, %v193_v17  ;;  %v521_v28 = vadd.f32 %v520_v24, %v414_v19  ;;  %v429_v17 = vmul.f32 %v207_v11, %v207_v11  ;;  %v209_v19 = vld [vmem:[%s22876_s16 + $0x318] sm:$0xff] }
  0xe4   : > { %v301_v30 = vadd.f32 %v300_v26, %v194_v21  ;;  %v522_v32 = vadd.f32 %v521_v28, %v415_v23  ;;  %v430_v21 = vmul.f32 %v208_v15, %v208_v15  ;;  %v210_v23 = vld [vmem:[%s22876_s16 + $0x320] sm:$0xff] }
  0xe6   : > { %v302_v34 = vadd.f32 %v301_v30, %v195_v25  ;;  %v523_v36 = vadd.f32 %v522_v32, %v416_v27  ;;  %v431_v25 = vmul.f32 %v209_v19, %v209_v19  ;;  %v211_v27 = vld [vmem:[%s22876_s16 + $0x328] sm:$0xff] }
  0xe8   : > { %v303_v38 = vadd.f32 %v302_v34, %v196_v29  ;;  %v524_v40 = vadd.f32 %v523_v36, %v417_v31  ;;  %v432_v29 = vmul.f32 %v210_v23, %v210_v23  ;;  %v212_v31 = vld [vmem:[%s22876_s16 + $0x330] sm:$0xff] }
  0xea   : > { %v304_v42 = vadd.f32 %v303_v38, %v197_v33  ;;  %v525_v44 = vadd.f32 %v524_v40, %v418_v35  ;;  %v433_v33 = vmul.f32 %v211_v27, %v211_v27  ;;  %v213_v35 = vld [vmem:[%s22876_s16 + $0x338] sm:$0xff] }
  0xec   : > { %v305_v46 = vadd.f32 %v304_v42, %v198_v37  ;;  %v526_v48 = vadd.f32 %v525_v44, %v419_v39  ;;  %v434_v37 = vmul.f32 %v212_v31, %v212_v31  ;;  %v214_v39 = vld [vmem:[%s22876_s16 + $0x340] sm:$0xff] }
  0xee   : > { %v306_v50 = vadd.f32 %v305_v46, %v199_v41  ;;  %v527_v52 = vadd.f32 %v526_v48, %v420_v43  ;;  %v435_v41 = vmul.f32 %v213_v35, %v213_v35  ;;  %v215_v43 = vld [vmem:[%s22876_s16 + $0x348] sm:$0xff] }
  0xf0   : > { %v307_v54 = vadd.f32 %v306_v50, %v200_v45  ;;  %v528_v56 = vadd.f32 %v527_v52, %v421_v47  ;;  %v436_v45 = vmul.f32 %v214_v39, %v214_v39  ;;  %v216_v47 = vld [vmem:[%s22876_s16 + $0x350] sm:$0xff] }
  0xf2   : > { %v308_v58 = vadd.f32 %v307_v54, %v201_v49  ;;  %v529_v60 = vadd.f32 %v528_v56, %v422_v51  ;;  %v437_v49 = vmul.f32 %v215_v43, %v215_v43  ;;  %v217_v51 = vld [vmem:[%s22876_s16 + $0x358] sm:$0xff] }
  0xf3   : > { %v439_v56 = vmul.f32 %v217_v51, %v217_v51 }
  0xf4   : > { %v309_v62 = vadd.f32 %v308_v58, %v202_v53  ;;  %v530_v0 = vadd.f32 %v529_v60, %v423_v55  ;;  %v438_v53 = vmul.f32 %v216_v47, %v216_v47 }
  0xf6   : > { %v310_v4 = vadd.f32 %v309_v62, %v203_v57  ;;  %v531_v6 = vadd.f32 %v530_v0, %v424_v59 }
  0xf8   : > { %v311_v8 = vadd.f32 %v310_v4, %v204_v61  ;;  %v532_v10 = vadd.f32 %v531_v6, %v425_v63 }
  0xfa   : > { %v312_v12 = vadd.f32 %v311_v8, %v205_v3  ;;  %v533_v14 = vadd.f32 %v532_v10, %v426_v5 }
  0xfc   : > { %v313_v16 = vadd.f32 %v312_v12, %v206_v7  ;;  %v534_v18 = vadd.f32 %v533_v14, %v427_v9 }
  0xfe   : > { %v314_v20 = vadd.f32 %v313_v16, %v207_v11  ;;  %v535_v22 = vadd.f32 %v534_v18, %v428_v13 }
 0x100   : > { %v315_v24 = vadd.f32 %v314_v20, %v208_v15  ;;  %v536_v26 = vadd.f32 %v535_v22, %v429_v17  ;;  %v23003_v20 = vld [vmem:[%s26400_s3] sm:$0x1] (%p102_p2) }
 0x102   : > { %v316_v28 = vadd.f32 %v315_v24, %v209_v19  ;;  %v537_v30 = vadd.f32 %v536_v26, %v430_v21 }
 0x104   : > { %v317_v32 = vadd.f32 %v316_v28, %v210_v23  ;;  %v538_v34 = vadd.f32 %v537_v30, %v431_v25 }
 0x106   : > { %v318_v36 = vadd.f32 %v317_v32, %v211_v27  ;;  %v539_v38 = vadd.f32 %v538_v34, %v432_v29 }
 0x108   : > { %v319_v40 = vadd.f32 %v318_v36, %v212_v31  ;;  %v540_v42 = vadd.f32 %v539_v38, %v433_v33 }
 0x10a   : > { %v320_v44 = vadd.f32 %v319_v40, %v213_v35  ;;  %v541_v46 = vadd.f32 %v540_v42, %v434_v37 }
 0x10c   : > { %v321_v48 = vadd.f32 %v320_v44, %v214_v39  ;;  %v542_v50 = vadd.f32 %v541_v46, %v435_v41 }
 0x10e   : > { %v322_v52 = vadd.f32 %v321_v48, %v215_v43  ;;  %v543_v54 = vadd.f32 %v542_v50, %v436_v45 }
 0x110   : > { %v323_v55 = vadd.f32 %v322_v52, %v216_v47  ;;  %v544_v57 = vadd.f32 %v543_v54, %v437_v49 }
 0x112   : > { %v324_v58 = vadd.f32 %v323_v55, %v217_v51  ;;  %v545_v59 = vadd.f32 %v544_v57, %v438_v53 }
 0x114   : > { %v325_v60 = vrot.slane %v324_v58, 4  ;;  %v546_v61 = vadd.f32 %v545_v59, %v439_v56 }
 0x116   : > { %v326_v62 = vadd.f32 %v325_v60, %v324_v58  ;;  %v547_v63 = vrot.slane %v546_v61, 4 }
 0x118   : > { %v327_v0 = vrot.slane %v326_v62, 2  ;;  %v548_v3 = vadd.f32 %v547_v63, %v546_v61 }
 0x11a   : > { %v328_v4 = vadd.f32 %v327_v0, %v326_v62  ;;  %v549_v5 = vrot.slane %v548_v3, 2 }
 0x11c   : > { %v329_v6 = vrot.slane %v328_v4, 1  ;;  %v550_v7 = vadd.f32 %v549_v5, %v548_v3 }
 0x11e   : > { %v330_v8 = vadd.f32 %v329_v6, %v328_v4  ;;  %v551_v9 = vrot.slane %v550_v7, 1  ;;  %104 = sbr.rel (!%p102_p2) target bundleno = 58 (0x3a), region = 144 }
 0x120   : > { %v331_v10 = vadd.f32 %v22742_v2, %v330_v8   ;;  %v552_v11 = vadd.f32 %v551_v9, %v550_v7 }
 0x122   : > { %v553_v12 = vadd.f32 %v22738_v1, %v552_v11   ;;  %v26410_v2 = vmov %v331_v10  ;;  %v554_v13 = vmul.f32 (%p102_p2), 0.001953125, %v331_v10 }
 0x123   :  { %v558_v2 = vld [vmem:[%s26399_s2] sm:$0x1] (%p102_p2) }
 0x124   : > { %v26409_v1 = vmov %v553_v12  ;;  %v555_v14 = vmul.f32 (%p102_p2), 0.001953125, %v553_v12  ;;  %v556_v15 = vmul.f32 (%p102_p2), %v554_v13, %v554_v13 }
 0x126   :  { %v557_v16 = vsub.f32 %v555_v14, %v556_v15 }
 0x128   :  { %v559_v17 = vadd.f32 1e-05, %v557_v16 }
 0x12a   :  { %22458 = vrsqrt.f32 %v559_v17 }
 0x134   :  { %v22459_v18 = vpop.eup %22458 }
 0x135   :  { %v22998_v19 = vmul.f32 %v22459_v18, %v558_v2 }
 0x137   :  { %v23006_v21 = vmul.f32 %v22998_v19, %v554_v13 }
 0x139   :  { %v564_v1 = vsub.f32 %v23003_v20, %v23006_v21 }
 0x13a LB: > { %v22777_v22 = vmov 0   ;;  %s23016_s2 = smul.u32 864, %s22750_s21  ;;  %v791_v15 = vlaneseq  ;;  %s570_s21 = sadd.s32 1, %s22750_s21   ;;  %s22750_s21 = sphi %s23010_s21, %s570_s21  }
 0x13b   : > { %22461 = vset.pattern.permute.xlu1 %v22777_v22  ;;  %22460 = vset.pattern.permute.xlu0 %v22777_v22  ;;  %p567_p3 = scmp.ge.s32.totalorder %s570_s21, 6  }
 0x13c   : > { %s23022_s23 = scalar_lea.vmem %s26398_s1, %s23016_s2  ;;  %v792_v2 = vshrl.u32 %v791_v15, 7  ;;  %s23090_s26 = scalar_lea.vmem %s26397_s0, %s23016_s2 }
 0x13d   : > { %v684_v23 = vld [vmem:[%s23022_s23 + $0x10] sm:$0xff]  ;;  %v682_v24 = vld [vmem:[%s23022_s23] sm:$0xff]  ;;  %v685_v25 = vld [vmem:[%s23022_s23 + $0x18] sm:$0xff]  ;;  %s1828_s27 = sadd.s32 304, %s23016_s2  ;;  %s23541_s11 = smov (%p567_p3), 0  }
 0x13e   : > { %1138 = vperm.xlu1 %22461, %v684_v23   ;;  %1128 = vperm.xlu0 %22460, %v682_v24   ;;  %v683_v26 = vld [vmem:[%s23022_s23 + $0x8] sm:$0xff]  ;;  %v686_v28 = vld [vmem:[%s23022_s23 + $0x20] sm:$0xff]  ;;  %v689_v29 = vld [vmem:[%s23022_s23 + $0x38] sm:$0xff]  ;;  %v23082_v23 = vsub.s32 0, %v792_v2  ;;  %s23128_s28 = sshra.s32 %s1828_s27, 4 }
 0x13f   : > { %v687_v27 = vld [vmem:[%s23022_s23 + $0x28] sm:$0xff]  ;;  %v688_v30 = vld [vmem:[%s23022_s23 + $0x30] sm:$0xff]  ;;  %v690_v32 = vld [vmem:[%s23022_s23 + $0x40] sm:$0xff]  ;;  %s17102_s29 = sshll.u32 %s23128_s28, 3 }
 0x140   : > { %v691_v31 = vld [vmem:[%s23022_s23 + $0x48] sm:$0xff]  ;;  %v693_v33 = vld [vmem:[%s23022_s23 + $0x58] sm:$0xff]  ;;  %v692_v34 = vld [vmem:[%s23022_s23 + $0x50] sm:$0xff]  ;;  %26411 = vst [vmem:[#allocation12_spill] sm:$0xff] %v23082_v23  ;;  %s23149_s30 = scalar_lea.vmem [#allocation2], %s17102_s29 }
 0x141   : > { %v695_v35 = vld [vmem:[%s23022_s23 + $0x68] sm:$0xff]  ;;  %v694_v36 = vld [vmem:[%s23022_s23 + $0x60] sm:$0xff]  ;;  %v697_v37 = vld [vmem:[%s23022_s23 + $0x78] sm:$0xff] }
 0x142   : > { %1143 = vperm.xlu1 %22461, %v685_v25   ;;  %1133 = vperm.xlu0 %22460, %v683_v26   ;;  %v696_v38 = vld [vmem:[%s23022_s23 + $0x70] sm:$0xff]  ;;  %v699_v39 = vld [vmem:[%s23022_s23 + $0x88] sm:$0xff]  ;;  %v698_v40 = vld [vmem:[%s23022_s23 + $0x80] sm:$0xff]  ;;  %v23094_v26 = vrot.slane %v22998_v19, %v23082_v23 }
 0x143   : > { %v701_v41 = vld [vmem:[%s23022_s23 + $0x98] sm:$0xff]  ;;  %v700_v42 = vld [vmem:[%s23022_s23 + $0x90] sm:$0xff]  ;;  %v703_v43 = vld [vmem:[%s23022_s23 + $0xa8] sm:$0xff] }
 0x144   : > { %v702_v44 = vld [vmem:[%s23022_s23 + $0xa0] sm:$0xff]  ;;  %v705_v45 = vld [vmem:[%s23022_s23 + $0xb8] sm:$0xff]  ;;  %v704_v46 = vld [vmem:[%s23022_s23 + $0xb0] sm:$0xff] }
 0x145   : > { %v707_v47 = vld [vmem:[%s23022_s23 + $0xc8] sm:$0xff]  ;;  %v706_v48 = vld [vmem:[%s23022_s23 + $0xc0] sm:$0xff]  ;;  %v709_v49 = vld [vmem:[%s23022_s23 + $0xd8] sm:$0xff] }
 0x146   : > { %1153 = vperm.xlu1 %22461, %v687_v27   ;;  %1148 = vperm.xlu0 %22460, %v686_v28   ;;  %v708_v50 = vld [vmem:[%s23022_s23 + $0xd0] sm:$0xff]  ;;  %v711_v51 = vld [vmem:[%s23022_s23 + $0xe8] sm:$0xff]  ;;  %v710_v52 = vld [vmem:[%s23022_s23 + $0xe0] sm:$0xff] }
 0x147   : > { %v713_v53 = vld [vmem:[%s23022_s23 + $0xf8] sm:$0xff]  ;;  %v712_v54 = vld [vmem:[%s23022_s23 + $0xf0] sm:$0xff]  ;;  %v715_v55 = vld [vmem:[%s23022_s23 + $0x108] sm:$0xff] }
 0x148   : > { %v714_v56 = vld [vmem:[%s23022_s23 + $0x100] sm:$0xff]  ;;  %v717_v57 = vld [vmem:[%s23022_s23 + $0x118] sm:$0xff]  ;;  %v716_v58 = vld [vmem:[%s23022_s23 + $0x110] sm:$0xff] }
 0x149   : > { %v719_v59 = vld [vmem:[%s23022_s23 + $0x128] sm:$0xff]  ;;  %v718_v60 = vld [vmem:[%s23022_s23 + $0x120] sm:$0xff]  ;;  %v721_v61 = vld [vmem:[%s23022_s23 + $0x138] sm:$0xff] }
 0x14a   : > { %1163 = vperm.xlu1 %22461, %v689_v29   ;;  %1158 = vperm.xlu0 %22460, %v688_v30   ;;  %v720_v62 = vld [vmem:[%s23022_s23 + $0x130] sm:$0xff]  ;;  %v723_v63 = vld [vmem:[%s23022_s23 + $0x148] sm:$0xff]  ;;  %v722_v0 = vld [vmem:[%s23022_s23 + $0x140] sm:$0xff] }
 0x14b   : > { %v725_v3 = vld [vmem:[%s23022_s23 + $0x158] sm:$0xff]  ;;  %v724_v4 = vld [vmem:[%s23022_s23 + $0x150] sm:$0xff]  ;;  %v727_v5 = vld [vmem:[%s23022_s23 + $0x168] sm:$0xff] }
 0x14c   : > { %v726_v6 = vld [vmem:[%s23022_s23 + $0x160] sm:$0xff]  ;;  %v729_v7 = vld [vmem:[%s23022_s23 + $0x178] sm:$0xff]  ;;  %v728_v8 = vld [vmem:[%s23022_s23 + $0x170] sm:$0xff] }
 0x14d   : > { %v731_v9 = vld [vmem:[%s23022_s23 + $0x188] sm:$0xff]  ;;  %v730_v10 = vld [vmem:[%s23022_s23 + $0x180] sm:$0xff]  ;;  %v733_v11 = vld [vmem:[%s23022_s23 + $0x198] sm:$0xff] }
 0x14e   : > { %1173 = vperm.xlu1 %22461, %v691_v31   ;;  %1168 = vperm.xlu0 %22460, %v690_v32   ;;  %v732_v12 = vld [vmem:[%s23022_s23 + $0x190] sm:$0xff]  ;;  %v735_v13 = vld [vmem:[%s23022_s23 + $0x1a8] sm:$0xff]  ;;  %v734_v14 = vld [vmem:[%s23022_s23 + $0x1a0] sm:$0xff] }
 0x14f   : > { %v737_v16 = vld [vmem:[%s23022_s23 + $0x1b8] sm:$0xff]  ;;  %v736_v17 = vld [vmem:[%s23022_s23 + $0x1b0] sm:$0xff]  ;;  %v739_v18 = vld [vmem:[%s23022_s23 + $0x1c8] sm:$0xff] }
 0x150   : > { %v738_v22 = vld [vmem:[%s23022_s23 + $0x1c0] sm:$0xff]  ;;  %v741_v24 = vld [vmem:[%s23022_s23 + $0x1d8] sm:$0xff]  ;;  %v740_v25 = vld [vmem:[%s23022_s23 + $0x1d0] sm:$0xff] }
 0x151   : > { %v743_v27 = vld [vmem:[%s23022_s23 + $0x1e8] sm:$0xff]  ;;  %v575_v28 = vld [vmem:[%s23090_s26 + $0x10] sm:$0xff]  ;;  %v573_v29 = vld [vmem:[%s23090_s26] sm:$0xff] }
 0x152   : > { %1183 = vperm.xlu1 %22461, %v693_v33   ;;  %1178 = vperm.xlu0 %22460, %v692_v34   ;;  %v742_v30 = vld [vmem:[%s23022_s23 + $0x1e0] sm:$0xff]  ;;  %v576_v31 = vld [vmem:[%s23090_s26 + $0x18] sm:$0xff]  ;;  %v574_v32 = vld [vmem:[%s23090_s26 + $0x8] sm:$0xff]  ;;  %v23106_v33 = vrot.slane %v564_v1, %v23082_v23  ;;  %v798_v34 = vmul.f32 %v23094_v26, %v575_v28 }
 0x153   : > { %v750_v2 = vld [vmem:[%s23022_s23 + $0x220] sm:$0xff] }
 0x156   : > { %1193 = vperm.xlu1 %22461, %v695_v35   ;;  %1188 = vperm.xlu0 %22460, %v694_v36   ;;  %v796_v35 = vmul.f32 %v23094_v26, %v573_v29  ;;  %v799_v36 = vmul.f32 %v23094_v26, %v576_v31 }
 0x15a   : > { %1203 = vperm.xlu1 %22461, %v697_v37   ;;  %1198 = vperm.xlu0 %22460, %v696_v38   ;;  %v797_v37 = vmul.f32 %v23094_v26, %v574_v32  ;;  %v578_v38 = vld [vmem:[%s23090_s26 + $0x28] sm:$0xff] }
 0x15e   : > { %1213 = vperm.xlu1 %22461, %v699_v39   ;;  %1208 = vperm.xlu0 %22460, %v698_v40   ;;  %v745_v39 = vld [vmem:[%s23022_s23 + $0x1f8] sm:$0xff]  ;;  %v744_v40 = vld [vmem:[%s23022_s23 + $0x1f0] sm:$0xff] }
 0x162   : > { %1223 = vperm.xlu1 %22461, %v701_v41   ;;  %1218 = vperm.xlu0 %22460, %v700_v42   ;;  %v577_v41 = vld [vmem:[%s23090_s26 + $0x20] sm:$0xff]  ;;  %v912_v42 = vadd.f32 %v23106_v33, %v798_v34 }
 0x166   : > { %1233 = vperm.xlu1 %22461, %v703_v43   ;;  %1228 = vperm.xlu0 %22460, %v702_v44   ;;  %v910_v43 = vadd.f32 %v23106_v33, %v796_v35  ;;  %v801_v44 = vmul.f32 %v23094_v26, %v578_v38  ;;  %v585_v38 = vld [vmem:[%s23090_s26 + $0x60] sm:$0xff] }
 0x16a   : > { %1243 = vperm.xlu1 %22461, %v705_v45   ;;  %1238 = vperm.xlu0 %22460, %v704_v46   ;;  %v580_v45 = vld [vmem:[%s23090_s26 + $0x38] sm:$0xff]  ;;  %v913_v46 = vadd.f32 %v23106_v33, %v799_v36 }
 0x16e   : > { %1253 = vperm.xlu1 %22461, %v707_v47   ;;  %1248 = vperm.xlu0 %22460, %v706_v48   ;;  %v911_v47 = vadd.f32 %v23106_v33, %v797_v37  ;;  %v800_v48 = vmul.f32 %v23094_v26, %v577_v41  ;;  %v586_v37 = vld [vmem:[%s23090_s26 + $0x68] sm:$0xff] }
 0x172   : > { %1263 = vperm.xlu1 %22461, %v709_v49   ;;  %1258 = vperm.xlu0 %22460, %v708_v50   ;;  %v579_v49 = vld [vmem:[%s23090_s26 + $0x30] sm:$0xff]  ;;  %v747_v50 = vld [vmem:[%s23022_s23 + $0x208] sm:$0xff] }
 0x176   : > { %1273 = vperm.xlu1 %22461, %v711_v51   ;;  %1268 = vperm.xlu0 %22460, %v710_v52   ;;  %v746_v51 = vld [vmem:[%s23022_s23 + $0x200] sm:$0xff]  ;;  %v803_v52 = vmul.f32 %v23094_v26, %v580_v45 }
 0x17a   : > { %1283 = vperm.xlu1 %22461, %v713_v53   ;;  %1278 = vperm.xlu0 %22460, %v712_v54   ;;  %v1020_v54 = vmax.f32 %v912_v42, 0.0 }
 0x17e   : > { %1293 = vperm.xlu1 %22461, %v715_v55   ;;  %1288 = vperm.xlu0 %22460, %v714_v56   ;;  %v915_v56 = vadd.f32 %v23106_v33, %v801_v44 }
 0x182   : > { %1303 = vperm.xlu1 %22461, %v717_v57   ;;  %1298 = vperm.xlu0 %22460, %v716_v58   ;;  %v802_v57 = vmul.f32 %v23094_v26, %v579_v49  ;;  %v582_v58 = vld [vmem:[%s23090_s26 + $0x48] sm:$0xff] }
 0x186   : > { %1313 = vperm.xlu1 %22461, %v719_v59   ;;  %1308 = vperm.xlu0 %22460, %v718_v60   ;;  %v1018_v59 = vmax.f32 %v910_v43, 0.0  ;;  %v1021_v60 = vmax.f32 %v913_v46, 0.0  ;;  %v809_v46 = vmul.f32 %v23094_v26, %v586_v37 }
 0x18a   : > { %1323 = vperm.xlu1 %22461, %v721_v61   ;;  %1318 = vperm.xlu0 %22460, %v720_v62   ;;  %v1019_v61 = vmax.f32 %v911_v47, 0.0  ;;  %v914_v62 = vadd.f32 %v23106_v33, %v800_v48  ;;  %v808_v47 = vmul.f32 %v23094_v26, %v585_v38 }
 0x18c   : > { %v1022_v15 = vmax.f32 %v914_v62, 0.0 }
 0x18e   : > { %1333 = vperm.xlu1 %22461, %v723_v63   ;;  %1328 = vperm.xlu0 %22460, %v722_v0   ;;  %v581_v63 = vld [vmem:[%s23090_s26 + $0x40] sm:$0xff]  ;;  %v749_v0 = vld [vmem:[%s23022_s23 + $0x218] sm:$0xff] }
 0x192   : > { %1343 = vperm.xlu1 %22461, %v725_v3   ;;  %1338 = vperm.xlu0 %22460, %v724_v4   ;;  %v748_v3 = vld [vmem:[%s23022_s23 + $0x210] sm:$0xff]  ;;  %v917_v4 = vadd.f32 %v23106_v33, %v803_v52  ;;  %v588_v52 = vld [vmem:[%s23090_s26 + $0x78] sm:$0xff] }
 0x193   : > { %v811_v62 = vmul.f32 %v23094_v26, %v588_v52 }
 0x194   : > { %v1025_v28 = vmax.f32 %v917_v4, 0.0 }
 0x196   : > { %1353 = vperm.xlu1 %22461, %v727_v5   ;;  %1348 = vperm.xlu0 %22460, %v726_v6   ;;  %v805_v5 = vmul.f32 %v23094_v26, %v582_v58 }
 0x198   : > { %v919_v29 = vadd.f32 %v23106_v33, %v805_v5  ;;  %v590_v5 = vld [vmem:[%s23090_s26 + $0x88] sm:$0xff] }
 0x19a   : > { %1363 = vperm.xlu1 %22461, %v729_v7   ;;  %1358 = vperm.xlu0 %22460, %v728_v8   ;;  %v1027_v44 = vmax.f32 %v919_v29, 0.0 }
 0x19e   : > { %1373 = vperm.xlu1 %22461, %v731_v9   ;;  %1368 = vperm.xlu0 %22460, %v730_v10   ;;  %v1023_v9 = vmax.f32 %v915_v56, 0.0  ;;  %v916_v10 = vadd.f32 %v23106_v33, %v802_v57 }
 0x1a0   : > { %v1024_v35 = vmax.f32 %v916_v10, 0.0 }
 0x1a2   : > { %1383 = vperm.xlu1 %22461, %v733_v11   ;;  %1378 = vperm.xlu0 %22460, %v732_v12   ;;  %v804_v11 = vmul.f32 %v23094_v26, %v581_v63 }
 0x1a6   : > { %1393 = vperm.xlu1 %22461, %v735_v13   ;;  %1388 = vperm.xlu0 %22460, %v734_v14  }
 0x1aa   : > { %1403 = vperm.xlu1 %22461, %v737_v16   ;;  %1398 = vperm.xlu0 %22460, %v736_v17   ;;  %v584_v16 = vld [vmem:[%s23090_s26 + $0x58] sm:$0xff]  ;;  %v751_v17 = vld [vmem:[%s23022_s23 + $0x228] sm:$0xff] }
 0x1ab   : > { %v807_v31 = vmul.f32 %v23094_v26, %v584_v16 }
 0x1ad   : > { %v921_v45 = vadd.f32 %v23106_v33, %v807_v31 }
 0x1ae   : > { %1413 = vperm.xlu1 %22461, %v739_v18   ;;  %1408 = vperm.xlu0 %22460, %v738_v22   ;;  %v583_v18 = vld [vmem:[%s23090_s26 + $0x50] sm:$0xff] }
 0x1af   : > { %v806_v36 = vmul.f32 %v23094_v26, %v583_v18 }
 0x1b2   : > { %1423 = vperm.xlu1 %22461, %v741_v24   ;;  %1418 = vperm.xlu0 %22460, %v740_v25  }
 0x1b6   : > { %1433 = vperm.xlu1 %22461, %v743_v27   ;;  %1428 = vperm.xlu0 %22460, %v742_v30   ;;  %v918_v30 = vadd.f32 %v23106_v33, %v804_v11 }
 0x1ba   : > { %1443 = vperm.xlu1 %22461, %v745_v39   ;;  %1438 = vperm.xlu0 %22460, %v744_v40   ;;  %v753_v39 = vld [vmem:[%s23022_s23 + $0x238] sm:$0xff]  ;;  %v752_v40 = vld [vmem:[%s23022_s23 + $0x230] sm:$0xff] }
 0x1bd   : > { %v1139_v53 = vpop.permute.xlu1 %1138  ;;  %v1129_v55 = vpop.permute.xlu0 %1128 }
 0x1be   : > { %1453 = vperm.xlu1 %22461, %v747_v50   ;;  %1448 = vperm.xlu0 %22460, %v746_v51   ;;  %v1668_v6 = vmul.f32 %v1139_v53, %v1020_v54  ;;  %v1666_v12 = vmul.f32 %v1129_v55, %v1018_v59  ;;  %v1026_v50 = vmax.f32 %v918_v30, 0.0  ;;  %v920_v51 = vadd.f32 %v23106_v33, %v806_v36  ;;  %v755_v53 = vld [vmem:[%s23022_s23 + $0x248] sm:$0xff]  ;;  %v754_v54 = vld [vmem:[%s23022_s23 + $0x240] sm:$0xff]  ;;  %v587_v55 = vld [vmem:[%s23090_s26 + $0x70] sm:$0xff] }
 0x1bf   : > { %v1029_v59 = vmax.f32 %v921_v45, 0.0  ;;  %v810_v4 = vmul.f32 %v23094_v26, %v587_v55  ;;  %v596_v55 = vld [vmem:[%s23090_s26 + $0xb8] sm:$0xff] }
 0x1c1   : > { %v1144_v7 = vpop.permute.xlu1 %1143  ;;  %v1134_v8 = vpop.permute.xlu0 %1133  ;;  %v924_v18 = vadd.f32 %v23106_v33, %v810_v4 }
 0x1c2   : > { %v1669_v13 = vmul.f32 %v1144_v7, %v1021_v60  ;;  %v1667_v14 = vmul.f32 %v1134_v8, %v1019_v61  ;;  %1463 = vperm.xlu1 %22461, %v749_v0   ;;  %1458 = vperm.xlu0 %22460, %v748_v3   ;;  %v923_v60 = vadd.f32 %v23106_v33, %v809_v46  ;;  %v1028_v3 = vmax.f32 %v920_v51, 0.0  ;;  %v757_v7 = vld [vmem:[%s23022_s23 + $0x258] sm:$0xff]  ;;  %v756_v8 = vld [vmem:[%s23022_s23 + $0x250] sm:$0xff] }
 0x1c3   : > { %v922_v61 = vadd.f32 %v23106_v33, %v808_v47  ;;  %v1032_v38 = vmax.f32 %v924_v18, 0.0 }
 0x1c4   : > { %v1775_v22 = vpack.c.bf16 %v1669_v13, %v1668_v6  ;;  %v1774_v24 = vpack.c.bf16 %v1667_v14, %v1666_v12  ;;  %v589_v6 = vld [vmem:[%s23090_s26 + $0x80] sm:$0xff]  ;;  %v1031_v12 = vmax.f32 %v923_v60, 0.0  ;;  %v925_v13 = vadd.f32 %v23106_v33, %v811_v62 }
 0x1c5   : > { %v1154_v25 = vpop.permute.xlu1 %1153  ;;  %v1149_v27 = vpop.permute.xlu0 %1148  ;;  %v813_v14 = vmul.f32 %v23094_v26, %v590_v5 }
 0x1c6   : > { %1834 = vst [vmem:[%s23149_s30 + $0x8] sm:$0xff] %v1775_v22  ;;  %1833 = vst [vmem:[%s23149_s30] sm:$0xff] %v1774_v24  ;;  %v1671_v32 = vmul.f32 %v1154_v25, %v1023_v9  ;;  %v1670_v34 = vmul.f32 %v1149_v27, %v1022_v15  ;;  %1473 = vperm.xlu1 %22461, %v751_v17   ;;  %1468 = vperm.xlu0 %22460, %v750_v2   ;;  %v1030_v2 = vmax.f32 %v922_v61, 0.0  ;;  %v592_v22 = vld [vmem:[%s23090_s26 + $0x98] sm:$0xff]  ;;  %v759_v24 = vld [vmem:[%s23022_s23 + $0x268] sm:$0xff] }
 0x1c7   : > { %v812_v15 = vmul.f32 %v23094_v26, %v589_v6  ;;  %v758_v25 = vld [vmem:[%s23022_s23 + $0x260] sm:$0xff]  ;;  %v591_v27 = vld [vmem:[%s23090_s26 + $0x90] sm:$0xff]  ;;  %v1033_v31 = vmax.f32 %v925_v13, 0.0 }
 0x1c8   : > { %v1776_v41 = vpack.c.bf16 %v1671_v32, %v1670_v34  ;;  %v927_v32 = vadd.f32 %v23106_v33, %v813_v14 }
 0x1c9   : > { %v1164_v42 = vpop.permute.xlu1 %1163  ;;  %v1159_v43 = vpop.permute.xlu0 %1158  ;;  %v926_v34 = vadd.f32 %v23106_v33, %v812_v15 }
 0x1ca   : > { %1835 = vst [vmem:[%s23149_s30 + $0x10] sm:$0xff] %v1776_v41  ;;  %v1673_v48 = vmul.f32 %v1164_v42, %v1025_v28  ;;  %v1672_v49 = vmul.f32 %v1159_v43, %v1024_v35  ;;  %1483 = vperm.xlu1 %22461, %v753_v39   ;;  %1478 = vperm.xlu0 %22460, %v752_v40   ;;  %v594_v40 = vld [vmem:[%s23090_s26 + $0xa8] sm:$0xff]  ;;  %v593_v41 = vld [vmem:[%s23090_s26 + $0xa0] sm:$0xff]  ;;  %v761_v42 = vld [vmem:[%s23022_s23 + $0x278] sm:$0xff]  ;;  %v1035_v47 = vmax.f32 %v927_v32, 0.0 }
 0x1cb   : > { %v815_v35 = vmul.f32 %v23094_v26, %v592_v22  ;;  %v814_v39 = vmul.f32 %v23094_v26, %v591_v27  ;;  %v760_v43 = vld [vmem:[%s23022_s23 + $0x270] sm:$0xff]  ;;  %v600_v27 = vld [vmem:[%s23090_s26 + $0xd8] sm:$0xff] }
 0x1cc   : > { %v1777_v56 = vpack.c.bf16 %v1673_v48, %v1672_v49  ;;  %v817_v49 = vmul.f32 %v23094_v26, %v594_v40 }
 0x1cd   : > { %v1174_v57 = vpop.permute.xlu1 %1173  ;;  %v1169_v58 = vpop.permute.xlu0 %1168  ;;  %v929_v48 = vadd.f32 %v23106_v33, %v815_v35 }
 0x1ce   : > { %1836 = vst [vmem:[%s23149_s30 + $0x18] sm:$0xff] %v1777_v56  ;;  %v1675_v63 = vmul.f32 %v1174_v57, %v1027_v44  ;;  %v1674_v0 = vmul.f32 %v1169_v58, %v1026_v50  ;;  %1493 = vperm.xlu1 %22461, %v755_v53   ;;  %1488 = vperm.xlu0 %22460, %v754_v54   ;;  %v1034_v53 = vmax.f32 %v926_v34, 0.0  ;;  %v763_v56 = vld [vmem:[%s23022_s23 + $0x288] sm:$0xff]  ;;  %v762_v57 = vld [vmem:[%s23022_s23 + $0x280] sm:$0xff]  ;;  %v595_v58 = vld [vmem:[%s23090_s26 + $0xb0] sm:$0xff] }
 0x1cf   : > { %v816_v50 = vmul.f32 %v23094_v26, %v593_v41  ;;  %v928_v54 = vadd.f32 %v23106_v33, %v814_v39  ;;  %v1037_v62 = vmax.f32 %v929_v48, 0.0 }
 0x1d0   : > { %v1778_v9 = vpack.c.bf16 %v1675_v63, %v1674_v0  ;;  %v931_v63 = vadd.f32 %v23106_v33, %v817_v49 }
 0x1d1   : > { %v1184_v10 = vpop.permute.xlu1 %1183  ;;  %v1179_v11 = vpop.permute.xlu0 %1178  ;;  %v930_v0 = vadd.f32 %v23106_v33, %v816_v50  ;;  %v1036_v6 = vmax.f32 %v928_v54, 0.0 }
 0x1d2   : > { %1837 = vst [vmem:[%s23149_s30 + $0x20] sm:$0xff] %v1778_v9  ;;  %v1677_v16 = vmul.f32 %v1184_v10, %v1029_v59  ;;  %v1676_v17 = vmul.f32 %v1179_v11, %v1028_v3  ;;  %1503 = vperm.xlu1 %22461, %v757_v7   ;;  %1498 = vperm.xlu0 %22460, %v756_v8   ;;  %v598_v8 = vld [vmem:[%s23090_s26 + $0xc8] sm:$0xff]  ;;  %v597_v9 = vld [vmem:[%s23090_s26 + $0xc0] sm:$0xff]  ;;  %v765_v10 = vld [vmem:[%s23022_s23 + $0x298] sm:$0xff]  ;;  %v1039_v15 = vmax.f32 %v931_v63, 0.0 }
 0x1d3   : > { %v819_v3 = vmul.f32 %v23094_v26, %v596_v55  ;;  %v818_v7 = vmul.f32 %v23094_v26, %v595_v58  ;;  %v764_v11 = vld [vmem:[%s23022_s23 + $0x290] sm:$0xff]  ;;  %v604_v58 = vld [vmem:[%s23090_s26 + $0xf8] sm:$0xff] }
 0x1d4   : > { %v1779_v28 = vpack.c.bf16 %v1677_v16, %v1676_v17  ;;  %v821_v17 = vmul.f32 %v23094_v26, %v598_v8 }
 0x1d5   : > { %v1194_v29 = vpop.permute.xlu1 %1193  ;;  %v1189_v30 = vpop.permute.xlu0 %1188  ;;  %v933_v16 = vadd.f32 %v23106_v33, %v819_v3 }
 0x1d6   : > { %1838 = vst [vmem:[%s23149_s30 + $0x28] sm:$0xff] %v1779_v28  ;;  %v1679_v36 = vmul.f32 %v1194_v29, %v1031_v12  ;;  %v1678_v37 = vmul.f32 %v1189_v30, %v1030_v2  ;;  %1513 = vperm.xlu1 %22461, %v759_v24   ;;  %1508 = vperm.xlu0 %22460, %v758_v25   ;;  %v1038_v24 = vmax.f32 %v930_v0, 0.0  ;;  %v767_v28 = vld [vmem:[%s23022_s23 + $0x2a8] sm:$0xff]  ;;  %v766_v29 = vld [vmem:[%s23022_s23 + $0x2a0] sm:$0xff]  ;;  %v599_v30 = vld [vmem:[%s23090_s26 + $0xd0] sm:$0xff] }
 0x1d7   : > { %v820_v2 = vmul.f32 %v23094_v26, %v597_v9  ;;  %v932_v25 = vadd.f32 %v23106_v33, %v818_v7  ;;  %v1041_v35 = vmax.f32 %v933_v16, 0.0 }
 0x1d8   : > { %v1780_v44 = vpack.c.bf16 %v1679_v36, %v1678_v37  ;;  %v935_v36 = vadd.f32 %v23106_v33, %v821_v17 }
 0x1d9   : > { %v1204_v45 = vpop.permute.xlu1 %1203  ;;  %v1199_v46 = vpop.permute.xlu0 %1198  ;;  %v934_v37 = vadd.f32 %v23106_v33, %v820_v2  ;;  %v1040_v41 = vmax.f32 %v932_v25, 0.0 }
 0x1da   : > { %1839 = vst [vmem:[%s23149_s30 + $0x30] sm:$0xff] %v1780_v44  ;;  %v1681_v51 = vmul.f32 %v1204_v45, %v1033_v31  ;;  %v1680_v52 = vmul.f32 %v1199_v46, %v1032_v38  ;;  %1523 = vperm.xlu1 %22461, %v761_v42   ;;  %1518 = vperm.xlu0 %22460, %v760_v43   ;;  %v602_v43 = vld [vmem:[%s23090_s26 + $0xe8] sm:$0xff]  ;;  %v601_v44 = vld [vmem:[%s23090_s26 + $0xe0] sm:$0xff]  ;;  %v769_v45 = vld [vmem:[%s23022_s23 + $0x2b8] sm:$0xff]  ;;  %v1043_v50 = vmax.f32 %v935_v36, 0.0 }
 0x1db   : > { %v823_v38 = vmul.f32 %v23094_v26, %v600_v27  ;;  %v822_v42 = vmul.f32 %v23094_v26, %v599_v30  ;;  %v768_v46 = vld [vmem:[%s23022_s23 + $0x2b0] sm:$0xff]  ;;  %v608_v30 = vld [vmem:[%s23090_s26 + $0x118] sm:$0xff] }
 0x1dc   : > { %v1781_v59 = vpack.c.bf16 %v1681_v51, %v1680_v52  ;;  %v825_v52 = vmul.f32 %v23094_v26, %v602_v43 }
 0x1dd   : > { %v1214_v60 = vpop.permute.xlu1 %1213  ;;  %v1209_v61 = vpop.permute.xlu0 %1208  ;;  %v937_v51 = vadd.f32 %v23106_v33, %v823_v38 }
 0x1de   : > { %1840 = vst [vmem:[%s23149_s30 + $0x38] sm:$0xff] %v1781_v59  ;;  %v1683_v4 = vmul.f32 %v1214_v60, %v1035_v47  ;;  %v1682_v5 = vmul.f32 %v1209_v61, %v1034_v53  ;;  %1533 = vperm.xlu1 %22461, %v763_v56   ;;  %1528 = vperm.xlu0 %22460, %v762_v57   ;;  %v1042_v56 = vmax.f32 %v934_v37, 0.0  ;;  %v771_v59 = vld [vmem:[%s23022_s23 + $0x2c8] sm:$0xff]  ;;  %v770_v60 = vld [vmem:[%s23022_s23 + $0x2c0] sm:$0xff]  ;;  %v603_v61 = vld [vmem:[%s23090_s26 + $0xf0] sm:$0xff] }
 0x1df   : > { %v824_v53 = vmul.f32 %v23094_v26, %v601_v44  ;;  %v936_v57 = vadd.f32 %v23106_v33, %v822_v42  ;;  %v1045_v3 = vmax.f32 %v937_v51, 0.0 }
 0x1e0   : > { %v1782_v12 = vpack.c.bf16 %v1683_v4, %v1682_v5  ;;  %v939_v4 = vadd.f32 %v23106_v33, %v825_v52 }
 0x1e1   : > { %v1224_v13 = vpop.permute.xlu1 %1223  ;;  %v1219_v14 = vpop.permute.xlu0 %1218  ;;  %v938_v5 = vadd.f32 %v23106_v33, %v824_v53  ;;  %v1044_v9 = vmax.f32 %v936_v57, 0.0 }
 0x1e2   : > { %1841 = vst [vmem:[%s23149_s30 + $0x40] sm:$0xff] %v1782_v12  ;;  %v1685_v18 = vmul.f32 %v1224_v13, %v1037_v62  ;;  %v1684_v22 = vmul.f32 %v1219_v14, %v1036_v6  ;;  %1543 = vperm.xlu1 %22461, %v765_v10   ;;  %1538 = vperm.xlu0 %22460, %v764_v11   ;;  %v606_v11 = vld [vmem:[%s23090_s26 + $0x108] sm:$0xff]  ;;  %v605_v12 = vld [vmem:[%s23090_s26 + $0x100] sm:$0xff]  ;;  %v773_v13 = vld [vmem:[%s23022_s23 + $0x2d8] sm:$0xff]  ;;  %v1047_v2 = vmax.f32 %v939_v4, 0.0 }
 0x1e3   : > { %v827_v6 = vmul.f32 %v23094_v26, %v604_v58  ;;  %v826_v10 = vmul.f32 %v23094_v26, %v603_v61  ;;  %v772_v14 = vld [vmem:[%s23022_s23 + $0x2d0] sm:$0xff]  ;;  %v612_v61 = vld [vmem:[%s23090_s26 + $0x138] sm:$0xff] }
 0x1e4   : > { %v1783_v31 = vpack.c.bf16 %v1685_v18, %v1684_v22  ;;  %v829_v22 = vmul.f32 %v23094_v26, %v606_v11 }
 0x1e5   : > { %v1234_v32 = vpop.permute.xlu1 %1233  ;;  %v1229_v34 = vpop.permute.xlu0 %1228  ;;  %v941_v18 = vadd.f32 %v23106_v33, %v827_v6 }
 0x1e6   : > { %1842 = vst [vmem:[%s23149_s30 + $0x48] sm:$0xff] %v1783_v31  ;;  %v1687_v39 = vmul.f32 %v1234_v32, %v1039_v15  ;;  %v1686_v40 = vmul.f32 %v1229_v34, %v1038_v24  ;;  %1553 = vperm.xlu1 %22461, %v767_v28   ;;  %1548 = vperm.xlu0 %22460, %v766_v29   ;;  %v1046_v28 = vmax.f32 %v938_v5, 0.0  ;;  %v775_v31 = vld [vmem:[%s23022_s23 + $0x2e8] sm:$0xff]  ;;  %v774_v32 = vld [vmem:[%s23022_s23 + $0x2e0] sm:$0xff]  ;;  %v607_v34 = vld [vmem:[%s23090_s26 + $0x110] sm:$0xff] }
 0x1e7   : > { %v828_v24 = vmul.f32 %v23094_v26, %v605_v12  ;;  %v940_v29 = vadd.f32 %v23106_v33, %v826_v10  ;;  %v1049_v38 = vmax.f32 %v941_v18, 0.0 }
 0x1e8   : > { %v1784_v47 = vpack.c.bf16 %v1687_v39, %v1686_v40  ;;  %v943_v39 = vadd.f32 %v23106_v33, %v829_v22 }
 0x1e9   : > { %v1244_v48 = vpop.permute.xlu1 %1243  ;;  %v1239_v49 = vpop.permute.xlu0 %1238  ;;  %v942_v40 = vadd.f32 %v23106_v33, %v828_v24  ;;  %v1048_v44 = vmax.f32 %v940_v29, 0.0 }
 0x1ea   : > { %1843 = vst [vmem:[%s23149_s30 + $0x50] sm:$0xff] %v1784_v47  ;;  %v1689_v54 = vmul.f32 %v1244_v48, %v1041_v35  ;;  %v1688_v55 = vmul.f32 %v1239_v49, %v1040_v41  ;;  %1563 = vperm.xlu1 %22461, %v769_v45   ;;  %1558 = vperm.xlu0 %22460, %v768_v46   ;;  %v610_v46 = vld [vmem:[%s23090_s26 + $0x128] sm:$0xff]  ;;  %v609_v47 = vld [vmem:[%s23090_s26 + $0x120] sm:$0xff]  ;;  %v777_v48 = vld [vmem:[%s23022_s23 + $0x2f8] sm:$0xff]  ;;  %v1051_v53 = vmax.f32 %v943_v39, 0.0 }
 0x1eb   : > { %v831_v41 = vmul.f32 %v23094_v26, %v608_v30  ;;  %v830_v45 = vmul.f32 %v23094_v26, %v607_v34  ;;  %v776_v49 = vld [vmem:[%s23022_s23 + $0x2f0] sm:$0xff]  ;;  %v616_v34 = vld [vmem:[%s23090_s26 + $0x158] sm:$0xff] }
 0x1ec   : > { %v1785_v62 = vpack.c.bf16 %v1689_v54, %v1688_v55  ;;  %v833_v55 = vmul.f32 %v23094_v26, %v610_v46 }
 0x1ed   : > { %v1254_v63 = vpop.permute.xlu1 %1253  ;;  %v1249_v0 = vpop.permute.xlu0 %1248  ;;  %v945_v54 = vadd.f32 %v23106_v33, %v831_v41 }
 0x1ee   : > { %1844 = vst [vmem:[%s23149_s30 + $0x58] sm:$0xff] %v1785_v62  ;;  %v1691_v7 = vmul.f32 %v1254_v63, %v1043_v50  ;;  %v1690_v8 = vmul.f32 %v1249_v0, %v1042_v56  ;;  %1573 = vperm.xlu1 %22461, %v771_v59   ;;  %1568 = vperm.xlu0 %22460, %v770_v60   ;;  %v1050_v59 = vmax.f32 %v942_v40, 0.0  ;;  %v779_v62 = vld [vmem:[%s23022_s23 + $0x308] sm:$0xff]  ;;  %v778_v63 = vld [vmem:[%s23022_s23 + $0x300] sm:$0xff]  ;;  %v611_v0 = vld [vmem:[%s23090_s26 + $0x130] sm:$0xff] }
 0x1ef   : > { %v832_v56 = vmul.f32 %v23094_v26, %v609_v47  ;;  %v944_v60 = vadd.f32 %v23106_v33, %v830_v45  ;;  %v1053_v6 = vmax.f32 %v945_v54, 0.0 }
 0x1f0   : > { %v1786_v15 = vpack.c.bf16 %v1691_v7, %v1690_v8  ;;  %v947_v7 = vadd.f32 %v23106_v33, %v833_v55 }
 0x1f1   : > { %v1264_v16 = vpop.permute.xlu1 %1263  ;;  %v1259_v17 = vpop.permute.xlu0 %1258  ;;  %v946_v8 = vadd.f32 %v23106_v33, %v832_v56  ;;  %v1052_v12 = vmax.f32 %v944_v60, 0.0 }
 0x1f2   : > { %1845 = vst [vmem:[%s23149_s30 + $0x60] sm:$0xff] %v1786_v15  ;;  %v1693_v25 = vmul.f32 %v1264_v16, %v1045_v3  ;;  %v1692_v27 = vmul.f32 %v1259_v17, %v1044_v9  ;;  %1583 = vperm.xlu1 %22461, %v773_v13   ;;  %1578 = vperm.xlu0 %22460, %v772_v14   ;;  %v614_v14 = vld [vmem:[%s23090_s26 + $0x148] sm:$0xff]  ;;  %v613_v15 = vld [vmem:[%s23090_s26 + $0x140] sm:$0xff]  ;;  %v781_v16 = vld [vmem:[%s23022_s23 + $0x318] sm:$0xff]  ;;  %v1055_v24 = vmax.f32 %v947_v7, 0.0 }
 0x1f3   : > { %v835_v9 = vmul.f32 %v23094_v26, %v612_v61  ;;  %v834_v13 = vmul.f32 %v23094_v26, %v611_v0  ;;  %v780_v17 = vld [vmem:[%s23022_s23 + $0x310] sm:$0xff]  ;;  %v620_v0 = vld [vmem:[%s23090_s26 + $0x178] sm:$0xff] }
 0x1f4   : > { %v1787_v35 = vpack.c.bf16 %v1693_v25, %v1692_v27  ;;  %v837_v27 = vmul.f32 %v23094_v26, %v614_v14 }
 0x1f5   : > { %v1274_v36 = vpop.permute.xlu1 %1273  ;;  %v1269_v37 = vpop.permute.xlu0 %1268  ;;  %v949_v25 = vadd.f32 %v23106_v33, %v835_v9 }
 0x1f6   : > { %1846 = vst [vmem:[%s23149_s30 + $0x68] sm:$0xff] %v1787_v35  ;;  %v1695_v42 = vmul.f32 %v1274_v36, %v1047_v2  ;;  %v1694_v43 = vmul.f32 %v1269_v37, %v1046_v28  ;;  %1593 = vperm.xlu1 %22461, %v775_v31   ;;  %1588 = vperm.xlu0 %22460, %v774_v32   ;;  %v1054_v31 = vmax.f32 %v946_v8, 0.0  ;;  %v783_v35 = vld [vmem:[%s23022_s23 + $0x328] sm:$0xff]  ;;  %v782_v36 = vld [vmem:[%s23022_s23 + $0x320] sm:$0xff]  ;;  %v615_v37 = vld [vmem:[%s23090_s26 + $0x150] sm:$0xff] }
 0x1f7   : > { %v836_v28 = vmul.f32 %v23094_v26, %v613_v15  ;;  %v948_v32 = vadd.f32 %v23106_v33, %v834_v13  ;;  %v1057_v41 = vmax.f32 %v949_v25, 0.0 }
 0x1f8   : > { %v1788_v50 = vpack.c.bf16 %v1695_v42, %v1694_v43  ;;  %v951_v42 = vadd.f32 %v23106_v33, %v837_v27 }
 0x1f9   : > { %v1284_v51 = vpop.permute.xlu1 %1283  ;;  %v1279_v52 = vpop.permute.xlu0 %1278  ;;  %v950_v43 = vadd.f32 %v23106_v33, %v836_v28  ;;  %v1056_v47 = vmax.f32 %v948_v32, 0.0 }
 0x1fa   : > { %1847 = vst [vmem:[%s23149_s30 + $0x70] sm:$0xff] %v1788_v50  ;;  %v1697_v57 = vmul.f32 %v1284_v51, %v1049_v38  ;;  %v1696_v58 = vmul.f32 %v1279_v52, %v1048_v44  ;;  %1603 = vperm.xlu1 %22461, %v777_v48   ;;  %1598 = vperm.xlu0 %22460, %v776_v49   ;;  %v618_v49 = vld [vmem:[%s23090_s26 + $0x168] sm:$0xff]  ;;  %v617_v50 = vld [vmem:[%s23090_s26 + $0x160] sm:$0xff]  ;;  %v785_v51 = vld [vmem:[%s23022_s23 + $0x338] sm:$0xff]  ;;  %v1059_v56 = vmax.f32 %v951_v42, 0.0 }
 0x1fb   : > { %v839_v44 = vmul.f32 %v23094_v26, %v616_v34  ;;  %v838_v48 = vmul.f32 %v23094_v26, %v615_v37  ;;  %v784_v52 = vld [vmem:[%s23022_s23 + $0x330] sm:$0xff]  ;;  %v624_v37 = vld [vmem:[%s23090_s26 + $0x198] sm:$0xff] }
 0x1fc   : > { %v1789_v3 = vpack.c.bf16 %v1697_v57, %v1696_v58  ;;  %v841_v58 = vmul.f32 %v23094_v26, %v618_v49 }
 0x1fd   : > { %v1294_v4 = vpop.permute.xlu1 %1293  ;;  %v1289_v5 = vpop.permute.xlu0 %1288  ;;  %v953_v57 = vadd.f32 %v23106_v33, %v839_v44  ;;  %v847_v44 = vmul.f32 %v23094_v26, %v624_v37 }
 0x1fe   : > { %1848 = vst [vmem:[%s23149_s30 + $0x78] sm:$0xff] %v1789_v3  ;;  %v1699_v10 = vmul.f32 %v1294_v4, %v1051_v53  ;;  %v1698_v11 = vmul.f32 %v1289_v5, %v1050_v59  ;;  %1613 = vperm.xlu1 %22461, %v779_v62   ;;  %1608 = vperm.xlu0 %22460, %v778_v63   ;;  %v1058_v62 = vmax.f32 %v950_v43, 0.0  ;;  %v787_v3 = vld [vmem:[%s23022_s23 + $0x348] sm:$0xff]  ;;  %v786_v4 = vld [vmem:[%s23022_s23 + $0x340] sm:$0xff]  ;;  %v619_v5 = vld [vmem:[%s23090_s26 + $0x170] sm:$0xff] }
 0x1ff   : > { %v840_v59 = vmul.f32 %v23094_v26, %v617_v50  ;;  %v952_v63 = vadd.f32 %v23106_v33, %v838_v48  ;;  %v1061_v9 = vmax.f32 %v953_v57, 0.0  ;;  %v626_v50 = vld [vmem:[%s23090_s26 + $0x1a8] sm:$0xff]  ;;  %v961_v57 = vadd.f32 %v23106_v33, %v847_v44 }
 0x200   : > { %v1790_v2 = vpack.c.bf16 %v1699_v10, %v1698_v11  ;;  %v955_v10 = vadd.f32 %v23106_v33, %v841_v58 }
 0x201   : > { %v1304_v18 = vpop.permute.xlu1 %1303  ;;  %v1299_v22 = vpop.permute.xlu0 %1298  ;;  %v954_v11 = vadd.f32 %v23106_v33, %v840_v59  ;;  %v1060_v15 = vmax.f32 %v952_v63, 0.0  ;;  %v628_v63 = vld [vmem:[%s23090_s26 + $0x1b8] sm:$0xff] }
 0x202   : > { %1849 = vst [vmem:[%s23149_s30 + $0x80] sm:$0xff] %v1790_v2  ;;  %v1701_v29 = vmul.f32 %v1304_v18, %v1053_v6  ;;  %v1700_v30 = vmul.f32 %v1299_v22, %v1052_v12  ;;  %1623 = vperm.xlu1 %22461, %v781_v16   ;;  %1618 = vperm.xlu0 %22460, %v780_v17   ;;  %v622_v17 = vld [vmem:[%s23090_s26 + $0x188] sm:$0xff]  ;;  %v621_v2 = vld [vmem:[%s23090_s26 + $0x180] sm:$0xff]  ;;  %v789_v18 = vld [vmem:[%s23022_s23 + $0x358] sm:$0xff]  ;;  %v1063_v28 = vmax.f32 %v955_v10, 0.0 }
 0x203   : > { %v843_v12 = vmul.f32 %v23094_v26, %v620_v0  ;;  %v842_v16 = vmul.f32 %v23094_v26, %v619_v5  ;;  %v788_v22 = vld [vmem:[%s23022_s23 + $0x350] sm:$0xff] }
 0x204   : > { %v1791_v38 = vpack.c.bf16 %v1701_v29, %v1700_v30  ;;  %v845_v30 = vmul.f32 %v23094_v26, %v622_v17  ;;  %v627_v0 = vld [vmem:[%s23090_s26 + $0x1b0] sm:$0xff] }
 0x205   : > { %v1314_v39 = vpop.permute.xlu1 %1313  ;;  %v1309_v40 = vpop.permute.xlu0 %1308  ;;  %v957_v29 = vadd.f32 %v23106_v33, %v843_v12 }
 0x206   : > { %1850 = vst [vmem:[%s23149_s30 + $0x88] sm:$0xff] %v1791_v38  ;;  %v1703_v45 = vmul.f32 %v1314_v39, %v1055_v24  ;;  %v1702_v46 = vmul.f32 %v1309_v40, %v1054_v31  ;;  %1633 = vperm.xlu1 %22461, %v783_v35   ;;  %1628 = vperm.xlu0 %22460, %v782_v36   ;;  %v1062_v35 = vmax.f32 %v954_v11, 0.0  ;;  %v623_v38 = vld [vmem:[%s23090_s26 + $0x190] sm:$0xff] }
 0x207   : > { %v844_v31 = vmul.f32 %v23094_v26, %v621_v2  ;;  %v956_v36 = vadd.f32 %v23106_v33, %v842_v16  ;;  %v959_v42 = vadd.f32 %v23106_v33, %v845_v30  ;;  %v1065_v48 = vmax.f32 %v957_v29, 0.0 }
 0x208   : > { %v1792_v53 = vpack.c.bf16 %v1703_v45, %v1702_v46  ;;  %v846_v45 = vmul.f32 %v23094_v26, %v623_v38 }
 0x209   : > { %v1324_v54 = vpop.permute.xlu1 %1323  ;;  %v1319_v55 = vpop.permute.xlu0 %1318  ;;  %v958_v43 = vadd.f32 %v23106_v33, %v844_v31  ;;  %v1064_v49 = vmax.f32 %v956_v36, 0.0  ;;  %v632_v31 = vld [vmem:[%s23090_s26 + $0x1d8] sm:$0xff] }
 0x20a   : > { %1851 = vst [vmem:[%s23149_s30 + $0x90] sm:$0xff] %v1792_v53  ;;  %v1705_v60 = vmul.f32 %v1324_v54, %v1057_v41  ;;  %v1704_v61 = vmul.f32 %v1319_v55, %v1056_v47  ;;  %1643 = vperm.xlu1 %22461, %v785_v51   ;;  %1638 = vperm.xlu0 %22460, %v784_v52   ;;  %v625_v51 = vld [vmem:[%s23090_s26 + $0x1a0] sm:$0xff]  ;;  %v1067_v55 = vmax.f32 %v959_v42, 0.0 }
 0x20b   : > { %v960_v58 = vadd.f32 %v23106_v33, %v846_v45  ;;  %v634_v45 = vld [vmem:[%s23090_s26 + $0x1e8] sm:$0xff] }
 0x20c   : > { %v1793_v6 = vpack.c.bf16 %v1705_v60, %v1704_v61  ;;  %v849_v61 = vmul.f32 %v23094_v26, %v626_v50 }
 0x20d   : > { %v1334_v7 = vpop.permute.xlu1 %1333  ;;  %v1329_v8 = vpop.permute.xlu0 %1328 }
 0x20e   : > { %1852 = vst [vmem:[%s23149_s30 + $0x98] sm:$0xff] %v1793_v6  ;;  %v1707_v13 = vmul.f32 %v1334_v7, %v1059_v56  ;;  %v1706_v14 = vmul.f32 %v1329_v8, %v1058_v62  ;;  %1653 = vperm.xlu1 %22461, %v787_v3   ;;  %1648 = vperm.xlu0 %22460, %v786_v4   ;;  %v1066_v56 = vmax.f32 %v958_v43, 0.0  ;;  %v1069_v6 = vmax.f32 %v961_v57, 0.0 }
 0x20f   : > { %v848_v62 = vmul.f32 %v23094_v26, %v625_v51  ;;  %v1068_v7 = vmax.f32 %v960_v58, 0.0  ;;  %v851_v8 = vmul.f32 %v23094_v26, %v628_v63  ;;  %v963_v12 = vadd.f32 %v23106_v33, %v849_v61  ;;  %v636_v58 = vld [vmem:[%s23090_s26 + $0x1f8] sm:$0xff] }
 0x210   : > { %v1794_v24 = vpack.c.bf16 %v1707_v13, %v1706_v14  ;;  %v630_v14 = vld [vmem:[%s23090_s26 + $0x1c8] sm:$0xff]  ;;  %v855_v43 = vmul.f32 %v23094_v26, %v632_v31 }
 0x211   : > { %v1344_v25 = vpop.permute.xlu1 %1343  ;;  %v1339_v27 = vpop.permute.xlu0 %1338  ;;  %v962_v13 = vadd.f32 %v23106_v33, %v848_v62  ;;  %v1071_v29 = vmax.f32 %v963_v12, 0.0 }
 0x212   : > { %1853 = vst [vmem:[%s23149_s30 + $0xa0] sm:$0xff] %v1794_v24  ;;  %v1709_v32 = vmul.f32 %v1344_v25, %v1061_v9  ;;  %v1708_v34 = vmul.f32 %v1339_v27, %v1060_v15  ;;  %1663 = vperm.xlu1 %22461, %v789_v18   ;;  %1658 = vperm.xlu0 %22460, %v788_v22   ;;  %v629_v15 = vld [vmem:[%s23090_s26 + $0x1c0] sm:$0xff] }
 0x213   : > { %v850_v9 = vmul.f32 %v23094_v26, %v627_v0  ;;  %v965_v18 = vadd.f32 %v23106_v33, %v851_v8  ;;  %v853_v24 = vmul.f32 %v23094_v26, %v630_v14  ;;  %v852_v25 = vmul.f32 %v23094_v26, %v629_v15 }
 0x214   : > { %v1795_v39 = vpack.c.bf16 %v1709_v32, %v1708_v34  ;;  %v1070_v30 = vmax.f32 %v962_v13, 0.0  ;;  %v631_v32 = vld [vmem:[%s23090_s26 + $0x1d0] sm:$0xff] }
 0x215   : > { %v1354_v40 = vpop.permute.xlu1 %1353  ;;  %v1349_v41 = vpop.permute.xlu0 %1348  ;;  %v964_v22 = vadd.f32 %v23106_v33, %v850_v9  ;;  %v1073_v37 = vmax.f32 %v965_v18, 0.0  ;;  %v854_v44 = vmul.f32 %v23094_v26, %v631_v32  ;;  %v638_v9 = vld [vmem:[%s23090_s26 + $0x208] sm:$0xff] }
 0x216   : > { %1854 = vst [vmem:[%s23149_s30 + $0xa8] sm:$0xff] %v1795_v39  ;;  %v1711_v46 = vmul.f32 %v1354_v40, %v1063_v28  ;;  %v1710_v47 = vmul.f32 %v1349_v41, %v1062_v35  ;;  %v967_v39 = vadd.f32 %v23106_v33, %v853_v24  ;;  %v966_v40 = vadd.f32 %v23106_v33, %v852_v25  ;;  %v640_v25 = vld [vmem:[%s23090_s26 + $0x218] sm:$0xff] }
 0x217   : > { %v1072_v38 = vmax.f32 %v964_v22, 0.0  ;;  %v968_v57 = vadd.f32 %v23106_v33, %v854_v44  ;;  %v861_v22 = vmul.f32 %v23094_v26, %v638_v9 }
 0x218   : > { %v1796_v52 = vpack.c.bf16 %v1711_v46, %v1710_v47  ;;  %v633_v46 = vld [vmem:[%s23090_s26 + $0x1e0] sm:$0xff]  ;;  %v1075_v50 = vmax.f32 %v967_v39, 0.0  ;;  %v1074_v51 = vmax.f32 %v966_v40, 0.0  ;;  %v642_v40 = vld [vmem:[%s23090_s26 + $0x228] sm:$0xff] }
 0x219   : > { %v1364_v53 = vpop.permute.xlu1 %1363  ;;  %v1359_v54 = vpop.permute.xlu0 %1358  ;;  %v1076_v8 = vmax.f32 %v968_v57, 0.0 }
 0x21a   : > { %1855 = vst [vmem:[%s23149_s30 + $0xb0] sm:$0xff] %v1796_v52  ;;  %v1713_v59 = vmul.f32 %v1364_v53, %v1065_v48  ;;  %v1712_v60 = vmul.f32 %v1359_v54, %v1064_v49  ;;  %v857_v52 = vmul.f32 %v23094_v26, %v634_v45  ;;  %v856_v53 = vmul.f32 %v23094_v26, %v633_v46 }
 0x21c   : > { %v1797_v3 = vpack.c.bf16 %v1713_v59, %v1712_v60  ;;  %v635_v59 = vld [vmem:[%s23090_s26 + $0x1f0] sm:$0xff]  ;;  %v971_v63 = vadd.f32 %v23106_v33, %v857_v52  ;;  %v970_v0 = vadd.f32 %v23106_v33, %v856_v53  ;;  %v644_v53 = vld [vmem:[%s23090_s26 + $0x238] sm:$0xff] }
 0x21d   : > { %v1374_v4 = vpop.permute.xlu1 %1373  ;;  %v1369_v5 = vpop.permute.xlu0 %1368 }
 0x21e   : > { %1856 = vst [vmem:[%s23149_s30 + $0xb8] sm:$0xff] %v1797_v3  ;;  %v1715_v10 = vmul.f32 %v1374_v4, %v1067_v55  ;;  %v1714_v11 = vmul.f32 %v1369_v5, %v1066_v56  ;;  %v969_v56 = vadd.f32 %v23106_v33, %v855_v43  ;;  %v859_v3 = vmul.f32 %v23094_v26, %v636_v58 }
 0x21f   : > { %v858_v4 = vmul.f32 %v23094_v26, %v635_v59  ;;  %v1079_v14 = vmax.f32 %v971_v63, 0.0  ;;  %v1078_v15 = vmax.f32 %v970_v0, 0.0  ;;  %v867_v0 = vmul.f32 %v23094_v26, %v644_v53 }
 0x220   : > { %v1798_v16 = vpack.c.bf16 %v1715_v10, %v1714_v11  ;;  %v637_v10 = vld [vmem:[%s23090_s26 + $0x200] sm:$0xff] }
 0x221   : > { %v1384_v17 = vpop.permute.xlu1 %1383  ;;  %v1379_v2 = vpop.permute.xlu0 %1378  ;;  %v860_v24 = vmul.f32 %v23094_v26, %v637_v10 }
 0x222   : > { %1857 = vst [vmem:[%s23149_s30 + $0xc0] sm:$0xff] %v1798_v16  ;;  %v1717_v27 = vmul.f32 %v1384_v17, %v1069_v6  ;;  %v1716_v28 = vmul.f32 %v1379_v2, %v1068_v7  ;;  %v1077_v7 = vmax.f32 %v969_v56, 0.0  ;;  %v973_v16 = vadd.f32 %v23106_v33, %v859_v3 }
 0x223   : > { %v972_v17 = vadd.f32 %v23106_v33, %v858_v4  ;;  %v974_v39 = vadd.f32 %v23106_v33, %v860_v24  ;;  %v646_v4 = vld [vmem:[%s23090_s26 + $0x248] sm:$0xff] }
 0x224   : > { %v1799_v34 = vpack.c.bf16 %v1717_v27, %v1716_v28  ;;  %v639_v27 = vld [vmem:[%s23090_s26 + $0x210] sm:$0xff]  ;;  %v1081_v31 = vmax.f32 %v973_v16, 0.0 }
 0x225   : > { %v1394_v35 = vpop.permute.xlu1 %1393  ;;  %v1389_v36 = vpop.permute.xlu0 %1388  ;;  %v1080_v32 = vmax.f32 %v972_v17, 0.0  ;;  %v1082_v52 = vmax.f32 %v974_v39, 0.0  ;;  %v648_v17 = vld [vmem:[%s23090_s26 + $0x258] sm:$0xff] }
 0x226   : > { %1858 = vst [vmem:[%s23149_s30 + $0xc8] sm:$0xff] %v1799_v34  ;;  %v1719_v41 = vmul.f32 %v1394_v35, %v1071_v29  ;;  %v1718_v42 = vmul.f32 %v1389_v36, %v1070_v30  ;;  %v863_v34 = vmul.f32 %v23094_v26, %v640_v25  ;;  %v862_v35 = vmul.f32 %v23094_v26, %v639_v27 }
 0x228   : > { %v1800_v47 = vpack.c.bf16 %v1719_v41, %v1718_v42  ;;  %v641_v41 = vld [vmem:[%s23090_s26 + $0x220] sm:$0xff]  ;;  %v977_v45 = vadd.f32 %v23106_v33, %v863_v34  ;;  %v976_v46 = vadd.f32 %v23106_v33, %v862_v35  ;;  %v650_v35 = vld [vmem:[%s23090_s26 + $0x268] sm:$0xff] }
 0x229   : > { %v1404_v48 = vpop.permute.xlu1 %1403  ;;  %v1399_v49 = vpop.permute.xlu0 %1398 }
 0x22a   : > { %1859 = vst [vmem:[%s23149_s30 + $0xd0] sm:$0xff] %v1800_v47  ;;  %v1721_v54 = vmul.f32 %v1404_v48, %v1073_v37  ;;  %v1720_v55 = vmul.f32 %v1399_v49, %v1072_v38  ;;  %v975_v38 = vadd.f32 %v23106_v33, %v861_v22  ;;  %v865_v47 = vmul.f32 %v23094_v26, %v642_v40 }
 0x22b   : > { %v864_v48 = vmul.f32 %v23094_v26, %v641_v41  ;;  %v1085_v58 = vmax.f32 %v977_v45, 0.0  ;;  %v1084_v59 = vmax.f32 %v976_v46, 0.0  ;;  %v873_v46 = vmul.f32 %v23094_v26, %v650_v35 }
 0x22c   : > { %v1801_v60 = vpack.c.bf16 %v1721_v54, %v1720_v55  ;;  %v643_v54 = vld [vmem:[%s23090_s26 + $0x230] sm:$0xff] }
 0x22d   : > { %v1414_v61 = vpop.permute.xlu1 %1413  ;;  %v1409_v62 = vpop.permute.xlu0 %1408  ;;  %v866_v3 = vmul.f32 %v23094_v26, %v643_v54 }
 0x22e   : > { %1860 = vst [vmem:[%s23149_s30 + $0xd8] sm:$0xff] %v1801_v60  ;;  %v1723_v5 = vmul.f32 %v1414_v61, %v1075_v50  ;;  %v1722_v6 = vmul.f32 %v1409_v62, %v1074_v51  ;;  %v1083_v51 = vmax.f32 %v975_v38, 0.0  ;;  %v979_v60 = vadd.f32 %v23106_v33, %v865_v47 }
 0x22f   : > { %v978_v61 = vadd.f32 %v23106_v33, %v864_v48  ;;  %v980_v16 = vadd.f32 %v23106_v33, %v866_v3  ;;  %v652_v48 = vld [vmem:[%s23090_s26 + $0x278] sm:$0xff] }
 0x230   : > { %v1802_v11 = vpack.c.bf16 %v1723_v5, %v1722_v6  ;;  %v645_v5 = vld [vmem:[%s23090_s26 + $0x240] sm:$0xff]  ;;  %v1087_v9 = vmax.f32 %v979_v60, 0.0 }
 0x231   : > { %v1424_v12 = vpop.permute.xlu1 %1423  ;;  %v1419_v13 = vpop.permute.xlu0 %1418  ;;  %v1086_v10 = vmax.f32 %v978_v61, 0.0  ;;  %v1088_v34 = vmax.f32 %v980_v16, 0.0  ;;  %v654_v61 = vld [vmem:[%s23090_s26 + $0x288] sm:$0xff] }
 0x232   : > { %1861 = vst [vmem:[%s23149_s30 + $0xe0] sm:$0xff] %v1802_v11  ;;  %v1725_v2 = vmul.f32 %v1424_v12, %v1077_v7  ;;  %v1724_v18 = vmul.f32 %v1419_v13, %v1076_v8  ;;  %v869_v11 = vmul.f32 %v23094_v26, %v646_v4  ;;  %v868_v12 = vmul.f32 %v23094_v26, %v645_v5 }
 0x234   : > { %v1803_v28 = vpack.c.bf16 %v1725_v2, %v1724_v18  ;;  %v647_v2 = vld [vmem:[%s23090_s26 + $0x250] sm:$0xff]  ;;  %v983_v25 = vadd.f32 %v23106_v33, %v869_v11  ;;  %v982_v27 = vadd.f32 %v23106_v33, %v868_v12  ;;  %v656_v12 = vld [vmem:[%s23090_s26 + $0x298] sm:$0xff] }
 0x235   : > { %v1434_v29 = vpop.permute.xlu1 %1433  ;;  %v1429_v30 = vpop.permute.xlu0 %1428 }
 0x236   : > { %1862 = vst [vmem:[%s23149_s30 + $0xe8] sm:$0xff] %v1803_v28  ;;  %v1727_v36 = vmul.f32 %v1434_v29, %v1079_v14  ;;  %v1726_v37 = vmul.f32 %v1429_v30, %v1078_v15  ;;  %v981_v15 = vadd.f32 %v23106_v33, %v867_v0  ;;  %v871_v28 = vmul.f32 %v23094_v26, %v648_v17 }
 0x237   : > { %v870_v29 = vmul.f32 %v23094_v26, %v647_v2  ;;  %v1091_v40 = vmax.f32 %v983_v25, 0.0  ;;  %v1090_v41 = vmax.f32 %v982_v27, 0.0  ;;  %v879_v27 = vmul.f32 %v23094_v26, %v656_v12 }
 0x238   : > { %v1804_v42 = vpack.c.bf16 %v1727_v36, %v1726_v37  ;;  %v649_v36 = vld [vmem:[%s23090_s26 + $0x260] sm:$0xff] }
 0x239   : > { %v1444_v43 = vpop.permute.xlu1 %1443  ;;  %v1439_v44 = vpop.permute.xlu0 %1438  ;;  %v872_v47 = vmul.f32 %v23094_v26, %v649_v36 }
 0x23a   : > { %1863 = vst [vmem:[%s23149_s30 + $0xf0] sm:$0xff] %v1804_v42  ;;  %v1729_v49 = vmul.f32 %v1444_v43, %v1081_v31  ;;  %v1728_v50 = vmul.f32 %v1439_v44, %v1080_v32  ;;  %v1089_v32 = vmax.f32 %v981_v15, 0.0  ;;  %v985_v42 = vadd.f32 %v23106_v33, %v871_v28 }
 0x23b   : > { %v984_v43 = vadd.f32 %v23106_v33, %v870_v29  ;;  %v986_v60 = vadd.f32 %v23106_v33, %v872_v47  ;;  %v658_v29 = vld [vmem:[%s23090_s26 + $0x2a8] sm:$0xff] }
 0x23c   : > { %v1805_v55 = vpack.c.bf16 %v1729_v49, %v1728_v50  ;;  %v651_v49 = vld [vmem:[%s23090_s26 + $0x270] sm:$0xff]  ;;  %v1093_v53 = vmax.f32 %v985_v42, 0.0 }
 0x23d   : > { %v1454_v56 = vpop.permute.xlu1 %1453  ;;  %v1449_v57 = vpop.permute.xlu0 %1448  ;;  %v1092_v54 = vmax.f32 %v984_v43, 0.0  ;;  %v1094_v11 = vmax.f32 %v986_v60, 0.0  ;;  %v660_v43 = vld [vmem:[%s23090_s26 + $0x2b8] sm:$0xff] }
 0x23e   : > { %1864 = vst [vmem:[%s23149_s30 + $0xf8] sm:$0xff] %v1805_v55  ;;  %v1731_v62 = vmul.f32 %v1454_v56, %v1083_v51  ;;  %v1730_v63 = vmul.f32 %v1449_v57, %v1082_v52  ;;  %v875_v55 = vmul.f32 %v23094_v26, %v652_v48  ;;  %v874_v56 = vmul.f32 %v23094_v26, %v651_v49 }
 0x240   : > { %v1806_v6 = vpack.c.bf16 %v1731_v62, %v1730_v63  ;;  %v653_v62 = vld [vmem:[%s23090_s26 + $0x280] sm:$0xff]  ;;  %v989_v4 = vadd.f32 %v23106_v33, %v875_v55  ;;  %v988_v5 = vadd.f32 %v23106_v33, %v874_v56  ;;  %v662_v56 = vld [vmem:[%s23090_s26 + $0x2c8] sm:$0xff] }
 0x241   : > { %v1464_v7 = vpop.permute.xlu1 %1463  ;;  %v1459_v8 = vpop.permute.xlu0 %1458 }
 0x242   : > { %1865 = vst [vmem:[%s23149_s30 + $0x100] sm:$0xff] %v1806_v6  ;;  %v1733_v13 = vmul.f32 %v1464_v7, %v1085_v58  ;;  %v1732_v14 = vmul.f32 %v1459_v8, %v1084_v59  ;;  %v987_v59 = vadd.f32 %v23106_v33, %v873_v46  ;;  %v877_v6 = vmul.f32 %v23094_v26, %v654_v61 }
 0x243   : > { %v876_v7 = vmul.f32 %v23094_v26, %v653_v62  ;;  %v1097_v17 = vmax.f32 %v989_v4, 0.0  ;;  %v1096_v2 = vmax.f32 %v988_v5, 0.0  ;;  %v885_v5 = vmul.f32 %v23094_v26, %v662_v56 }
 0x244   : > { %v1807_v18 = vpack.c.bf16 %v1733_v13, %v1732_v14  ;;  %v655_v13 = vld [vmem:[%s23090_s26 + $0x290] sm:$0xff] }
 0x245   : > { %v1474_v22 = vpop.permute.xlu1 %1473  ;;  %v1469_v24 = vpop.permute.xlu0 %1468  ;;  %v878_v28 = vmul.f32 %v23094_v26, %v655_v13 }
 0x246   : > { %1866 = vst [vmem:[%s23149_s30 + $0x108] sm:$0xff] %v1807_v18  ;;  %v1735_v30 = vmul.f32 %v1474_v22, %v1087_v9  ;;  %v1734_v31 = vmul.f32 %v1469_v24, %v1086_v10  ;;  %v1095_v10 = vmax.f32 %v987_v59, 0.0  ;;  %v991_v18 = vadd.f32 %v23106_v33, %v877_v6 }
 0x247   : > { %v990_v22 = vadd.f32 %v23106_v33, %v876_v7  ;;  %v992_v42 = vadd.f32 %v23106_v33, %v878_v28  ;;  %v664_v7 = vld [vmem:[%s23090_s26 + $0x2d8] sm:$0xff] }
 0x248   : > { %v1808_v37 = vpack.c.bf16 %v1735_v30, %v1734_v31  ;;  %v657_v30 = vld [vmem:[%s23090_s26 + $0x2a0] sm:$0xff]  ;;  %v1099_v35 = vmax.f32 %v991_v18, 0.0 }
 0x249   : > { %v1484_v38 = vpop.permute.xlu1 %1483  ;;  %v1479_v39 = vpop.permute.xlu0 %1478  ;;  %v1098_v36 = vmax.f32 %v990_v22, 0.0  ;;  %v1100_v55 = vmax.f32 %v992_v42, 0.0  ;;  %v666_v22 = vld [vmem:[%s23090_s26 + $0x2e8] sm:$0xff] }
 0x24a   : > { %1867 = vst [vmem:[%s23149_s30 + $0x110] sm:$0xff] %v1808_v37  ;;  %v1737_v44 = vmul.f32 %v1484_v38, %v1089_v32  ;;  %v1736_v45 = vmul.f32 %v1479_v39, %v1088_v34  ;;  %v881_v37 = vmul.f32 %v23094_v26, %v658_v29  ;;  %v880_v38 = vmul.f32 %v23094_v26, %v657_v30 }
 0x24c   : > { %v1809_v50 = vpack.c.bf16 %v1737_v44, %v1736_v45  ;;  %v659_v44 = vld [vmem:[%s23090_s26 + $0x2b0] sm:$0xff]  ;;  %v995_v48 = vadd.f32 %v23106_v33, %v881_v37  ;;  %v994_v49 = vadd.f32 %v23106_v33, %v880_v38  ;;  %v668_v38 = vld [vmem:[%s23090_s26 + $0x2f8] sm:$0xff] }
 0x24d   : > { %v1494_v51 = vpop.permute.xlu1 %1493  ;;  %v1489_v52 = vpop.permute.xlu0 %1488 }
 0x24e   : > { %1868 = vst [vmem:[%s23149_s30 + $0x118] sm:$0xff] %v1809_v50  ;;  %v1739_v57 = vmul.f32 %v1494_v51, %v1091_v40  ;;  %v1738_v58 = vmul.f32 %v1489_v52, %v1090_v41  ;;  %v993_v41 = vadd.f32 %v23106_v33, %v879_v27  ;;  %v883_v50 = vmul.f32 %v23094_v26, %v660_v43 }
 0x24f   : > { %v882_v51 = vmul.f32 %v23094_v26, %v659_v44  ;;  %v1103_v61 = vmax.f32 %v995_v48, 0.0  ;;  %v1102_v62 = vmax.f32 %v994_v49, 0.0  ;;  %v891_v49 = vmul.f32 %v23094_v26, %v668_v38 }
 0x250   : > { %v1810_v63 = vpack.c.bf16 %v1739_v57, %v1738_v58  ;;  %v661_v57 = vld [vmem:[%s23090_s26 + $0x2c0] sm:$0xff] }
 0x251   : > { %v1504_v0 = vpop.permute.xlu1 %1503  ;;  %v1499_v3 = vpop.permute.xlu0 %1498  ;;  %v884_v6 = vmul.f32 %v23094_v26, %v661_v57 }
 0x252   : > { %1869 = vst [vmem:[%s23149_s30 + $0x120] sm:$0xff] %v1810_v63  ;;  %v1741_v8 = vmul.f32 %v1504_v0, %v1093_v53  ;;  %v1740_v9 = vmul.f32 %v1499_v3, %v1092_v54  ;;  %v1101_v54 = vmax.f32 %v993_v41, 0.0  ;;  %v997_v63 = vadd.f32 %v23106_v33, %v883_v50 }
 0x253   : > { %v996_v0 = vadd.f32 %v23106_v33, %v882_v51  ;;  %v998_v18 = vadd.f32 %v23106_v33, %v884_v6  ;;  %v670_v51 = vld [vmem:[%s23090_s26 + $0x308] sm:$0xff] }
 0x254   : > { %v1811_v14 = vpack.c.bf16 %v1741_v8, %v1740_v9  ;;  %v663_v8 = vld [vmem:[%s23090_s26 + $0x2d0] sm:$0xff]  ;;  %v1105_v12 = vmax.f32 %v997_v63, 0.0 }
 0x255   : > { %v1514_v15 = vpop.permute.xlu1 %1513  ;;  %v1509_v16 = vpop.permute.xlu0 %1508  ;;  %v1104_v13 = vmax.f32 %v996_v0, 0.0  ;;  %v1106_v37 = vmax.f32 %v998_v18, 0.0  ;;  %v672_v0 = vld [vmem:[%s23090_s26 + $0x318] sm:$0xff] }
 0x256   : > { %1870 = vst [vmem:[%s23149_s30 + $0x128] sm:$0xff] %v1811_v14  ;;  %v1743_v24 = vmul.f32 %v1514_v15, %v1095_v10  ;;  %v1742_v25 = vmul.f32 %v1509_v16, %v1094_v11  ;;  %v887_v14 = vmul.f32 %v23094_v26, %v664_v7  ;;  %v886_v15 = vmul.f32 %v23094_v26, %v663_v8 }
 0x258   : > { %v1812_v31 = vpack.c.bf16 %v1743_v24, %v1742_v25  ;;  %v665_v24 = vld [vmem:[%s23090_s26 + $0x2e0] sm:$0xff]  ;;  %v1001_v29 = vadd.f32 %v23106_v33, %v887_v14  ;;  %v1000_v30 = vadd.f32 %v23106_v33, %v886_v15  ;;  %v674_v15 = vld [vmem:[%s23090_s26 + $0x328] sm:$0xff] }
 0x259   : > { %v1524_v32 = vpop.permute.xlu1 %1523  ;;  %v1519_v34 = vpop.permute.xlu0 %1518 }
 0x25a   : > { %1871 = vst [vmem:[%s23149_s30 + $0x130] sm:$0xff] %v1812_v31  ;;  %v1745_v39 = vmul.f32 %v1524_v32, %v1097_v17  ;;  %v1744_v40 = vmul.f32 %v1519_v34, %v1096_v2  ;;  %v999_v2 = vadd.f32 %v23106_v33, %v885_v5  ;;  %v889_v31 = vmul.f32 %v23094_v26, %v666_v22 }
 0x25b   : > { %v888_v32 = vmul.f32 %v23094_v26, %v665_v24  ;;  %v1109_v43 = vmax.f32 %v1001_v29, 0.0  ;;  %v1108_v44 = vmax.f32 %v1000_v30, 0.0  ;;  %v897_v30 = vmul.f32 %v23094_v26, %v674_v15 }
 0x25c   : > { %v1813_v45 = vpack.c.bf16 %v1745_v39, %v1744_v40  ;;  %v667_v39 = vld [vmem:[%s23090_s26 + $0x2f0] sm:$0xff] }
 0x25d   : > { %v1534_v46 = vpop.permute.xlu1 %1533  ;;  %v1529_v47 = vpop.permute.xlu0 %1528  ;;  %v890_v50 = vmul.f32 %v23094_v26, %v667_v39 }
 0x25e   : > { %1872 = vst [vmem:[%s23149_s30 + $0x138] sm:$0xff] %v1813_v45  ;;  %v1747_v52 = vmul.f32 %v1534_v46, %v1099_v35  ;;  %v1746_v53 = vmul.f32 %v1529_v47, %v1098_v36  ;;  %v1107_v36 = vmax.f32 %v999_v2, 0.0  ;;  %v1003_v45 = vadd.f32 %v23106_v33, %v889_v31 }
 0x25f   : > { %v1002_v46 = vadd.f32 %v23106_v33, %v888_v32  ;;  %v1004_v63 = vadd.f32 %v23106_v33, %v890_v50  ;;  %v676_v32 = vld [vmem:[%s23090_s26 + $0x338] sm:$0xff] }
 0x260   : > { %v1814_v58 = vpack.c.bf16 %v1747_v52, %v1746_v53  ;;  %v669_v52 = vld [vmem:[%s23090_s26 + $0x300] sm:$0xff]  ;;  %v1111_v56 = vmax.f32 %v1003_v45, 0.0 }
 0x261   : > { %v1544_v59 = vpop.permute.xlu1 %1543  ;;  %v1539_v60 = vpop.permute.xlu0 %1538  ;;  %v1110_v57 = vmax.f32 %v1002_v46, 0.0  ;;  %v1112_v14 = vmax.f32 %v1004_v63, 0.0  ;;  %v678_v46 = vld [vmem:[%s23090_s26 + $0x348] sm:$0xff] }
 0x262   : > { %1873 = vst [vmem:[%s23149_s30 + $0x140] sm:$0xff] %v1814_v58  ;;  %v1749_v3 = vmul.f32 %v1544_v59, %v1101_v54  ;;  %v1748_v4 = vmul.f32 %v1539_v60, %v1100_v55  ;;  %v893_v58 = vmul.f32 %v23094_v26, %v670_v51  ;;  %v892_v59 = vmul.f32 %v23094_v26, %v669_v52 }
 0x264   : > { %v1815_v9 = vpack.c.bf16 %v1749_v3, %v1748_v4  ;;  %v671_v3 = vld [vmem:[%s23090_s26 + $0x310] sm:$0xff]  ;;  %v1007_v7 = vadd.f32 %v23106_v33, %v893_v58  ;;  %v1006_v8 = vadd.f32 %v23106_v33, %v892_v59  ;;  %v680_v59 = vld [vmem:[%s23090_s26 + $0x358] sm:$0xff] }
 0x265   : > { %v1554_v10 = vpop.permute.xlu1 %1553  ;;  %v1549_v11 = vpop.permute.xlu0 %1548 }
 0x266   : > { %1874 = vst [vmem:[%s23149_s30 + $0x148] sm:$0xff] %v1815_v9  ;;  %v1751_v16 = vmul.f32 %v1554_v10, %v1103_v61  ;;  %v1750_v17 = vmul.f32 %v1549_v11, %v1102_v62  ;;  %v1005_v62 = vadd.f32 %v23106_v33, %v891_v49  ;;  %v895_v9 = vmul.f32 %v23094_v26, %v672_v0 }
 0x267   : > { %v894_v10 = vmul.f32 %v23094_v26, %v671_v3  ;;  %v1115_v22 = vmax.f32 %v1007_v7, 0.0  ;;  %v1114_v24 = vmax.f32 %v1006_v8, 0.0  ;;  %v903_v8 = vmul.f32 %v23094_v26, %v680_v59 }
 0x268   : > { %v1816_v25 = vpack.c.bf16 %v1751_v16, %v1750_v17  ;;  %v673_v16 = vld [vmem:[%s23090_s26 + $0x320] sm:$0xff] }
 0x269   : > { %v1564_v27 = vpop.permute.xlu1 %1563  ;;  %v1559_v28 = vpop.permute.xlu0 %1558  ;;  %v896_v31 = vmul.f32 %v23094_v26, %v673_v16 }
 0x26a   : > { %1875 = vst [vmem:[%s23149_s30 + $0x150] sm:$0xff] %v1816_v25  ;;  %v1753_v34 = vmul.f32 %v1564_v27, %v1105_v12  ;;  %v1752_v35 = vmul.f32 %v1559_v28, %v1104_v13  ;;  %v1113_v13 = vmax.f32 %v1005_v62, 0.0  ;;  %v1009_v25 = vadd.f32 %v23106_v33, %v895_v9 }
 0x26b   : > { %v1008_v27 = vadd.f32 %v23106_v33, %v894_v10  ;;  %v1010_v45 = vadd.f32 %v23106_v33, %v896_v31 }
 0x26c   : > { %v1817_v40 = vpack.c.bf16 %v1753_v34, %v1752_v35  ;;  %v675_v34 = vld [vmem:[%s23090_s26 + $0x330] sm:$0xff]  ;;  %v1117_v38 = vmax.f32 %v1009_v25, 0.0 }
 0x26d   : > { %v1574_v41 = vpop.permute.xlu1 %1573  ;;  %v1569_v42 = vpop.permute.xlu0 %1568  ;;  %v1116_v39 = vmax.f32 %v1008_v27, 0.0  ;;  %v1118_v58 = vmax.f32 %v1010_v45, 0.0 }
 0x26e   : > { %1876 = vst [vmem:[%s23149_s30 + $0x158] sm:$0xff] %v1817_v40  ;;  %v1755_v47 = vmul.f32 %v1574_v41, %v1107_v36  ;;  %v1754_v48 = vmul.f32 %v1569_v42, %v1106_v37  ;;  %v899_v40 = vmul.f32 %v23094_v26, %v676_v32  ;;  %v898_v41 = vmul.f32 %v23094_v26, %v675_v34 }
 0x270   : > { %v1818_v53 = vpack.c.bf16 %v1755_v47, %v1754_v48  ;;  %v677_v47 = vld [vmem:[%s23090_s26 + $0x340] sm:$0xff]  ;;  %v1013_v51 = vadd.f32 %v23106_v33, %v899_v40  ;;  %v1012_v52 = vadd.f32 %v23106_v33, %v898_v41 }
 0x271   : > { %v1584_v54 = vpop.permute.xlu1 %1583  ;;  %v1579_v55 = vpop.permute.xlu0 %1578 }
 0x272   : > { %1877 = vst [vmem:[%s23149_s30 + $0x160] sm:$0xff] %v1818_v53  ;;  %v1757_v60 = vmul.f32 %v1584_v54, %v1109_v43  ;;  %v1756_v61 = vmul.f32 %v1579_v55, %v1108_v44  ;;  %v1011_v44 = vadd.f32 %v23106_v33, %v897_v30  ;;  %v901_v53 = vmul.f32 %v23094_v26, %v678_v46 }
 0x273   : > { %v900_v54 = vmul.f32 %v23094_v26, %v677_v47  ;;  %v1121_v0 = vmax.f32 %v1013_v51, 0.0  ;;  %v1120_v3 = vmax.f32 %v1012_v52, 0.0 }
 0x274   : > { %v1819_v4 = vpack.c.bf16 %v1757_v60, %v1756_v61  ;;  %v679_v60 = vld [vmem:[%s23090_s26 + $0x350] sm:$0xff] }
 0x275   : > { %v1594_v5 = vpop.permute.xlu1 %1593  ;;  %v1589_v6 = vpop.permute.xlu0 %1588  ;;  %v902_v9 = vmul.f32 %v23094_v26, %v679_v60 }
 0x276   : > { %1878 = vst [vmem:[%s23149_s30 + $0x168] sm:$0xff] %v1819_v4  ;;  %v1759_v11 = vmul.f32 %v1594_v5, %v1111_v56  ;;  %v1758_v12 = vmul.f32 %v1589_v6, %v1110_v57  ;;  %v1119_v57 = vmax.f32 %v1011_v44, 0.0  ;;  %v1015_v4 = vadd.f32 %v23106_v33, %v901_v53 }
 0x277   : > { %v1014_v5 = vadd.f32 %v23106_v33, %v900_v54 }
 0x278   : > { %v1820_v17 = vpack.c.bf16 %v1759_v11, %v1758_v12 }
 0x279   : > { %v1604_v2 = vpop.permute.xlu1 %1603  ;;  %v1599_v18 = vpop.permute.xlu0 %1598 }
 0x27a   : > { %1879 = vst [vmem:[%s23149_s30 + $0x170] sm:$0xff] %v1820_v17  ;;  %v1761_v28 = vmul.f32 %v1604_v2, %v1113_v13  ;;  %v1760_v29 = vmul.f32 %v1599_v18, %v1112_v14  ;;  %v1123_v13 = vmax.f32 %v1015_v4, 0.0  ;;  %v1122_v14 = vmax.f32 %v1014_v5, 0.0 }
 0x27b   : > { %v1017_v17 = vadd.f32 %v23106_v33, %v903_v8  ;;  %v1016_v2 = vadd.f32 %v23106_v33, %v902_v9  ;;  %v23537_v33 = vmov (%p567_p3), 0.0  }
 0x27c   : > { %v1821_v35 = vpack.c.bf16 %v1761_v28, %v1760_v29 }
 0x27d   : > { %v1614_v36 = vpop.permute.xlu1 %1613  ;;  %v1609_v37 = vpop.permute.xlu0 %1608  ;;  %v1125_v27 = vmax.f32 %v1017_v17, 0.0  ;;  %v1124_v28 = vmax.f32 %v1016_v2, 0.0 }
 0x27e   : > { %1880 = vst [vmem:[%s23149_s30 + $0x178] sm:$0xff] %v1821_v35  ;;  %v1763_v42 = vmul.f32 %v1614_v36, %v1115_v22  ;;  %v1762_v43 = vmul.f32 %v1609_v37, %v1114_v24  ;;  %v23539_v36 = vmov (%p567_p3), 0.0  }
 0x280   : > { %v1822_v48 = vpack.c.bf16 %v1763_v42, %v1762_v43 }
 0x281   : > { %v1624_v49 = vpop.permute.xlu1 %1623  ;;  %v1619_v50 = vpop.permute.xlu0 %1618 }
 0x282   : > { %1881 = vst [vmem:[%s23149_s30 + $0x180] sm:$0xff] %v1822_v48  ;;  %v1765_v55 = vmul.f32 %v1624_v49, %v1117_v38  ;;  %v1764_v56 = vmul.f32 %v1619_v50, %v1116_v39 }
 0x284   : > { %v1823_v61 = vpack.c.bf16 %v1765_v55, %v1764_v56 }
 0x285   : > { %v1634_v62 = vpop.permute.xlu1 %1633  ;;  %v1629_v63 = vpop.permute.xlu0 %1628 }
 0x286   : > { %1882 = vst [vmem:[%s23149_s30 + $0x188] sm:$0xff] %v1823_v61  ;;  %v1767_v6 = vmul.f32 %v1634_v62, %v1119_v57  ;;  %v1766_v7 = vmul.f32 %v1629_v63, %v1118_v58 }
 0x288   : > { %v1824_v10 = vpack.c.bf16 %v1767_v6, %v1766_v7 }
 0x289   : > { %v1644_v11 = vpop.permute.xlu1 %1643  ;;  %v1639_v12 = vpop.permute.xlu0 %1638 }
 0x28a   : > { %1883 = vst [vmem:[%s23149_s30 + $0x190] sm:$0xff] %v1824_v10  ;;  %v1769_v15 = vmul.f32 %v1644_v11, %v1121_v0  ;;  %v1768_v16 = vmul.f32 %v1639_v12, %v1120_v3 }
 0x28c   : > { %v1825_v18 = vpack.c.bf16 %v1769_v15, %v1768_v16 }
 0x28d   : > { %v1654_v22 = vpop.permute.xlu1 %1653  ;;  %v1649_v24 = vpop.permute.xlu0 %1648 }
 0x28e   : > { %1884 = vst [vmem:[%s23149_s30 + $0x198] sm:$0xff] %v1825_v18  ;;  %v1771_v25 = vmul.f32 %v1654_v22, %v1123_v13  ;;  %v1770_v26 = vmul.f32 %v1649_v24, %v1122_v14 }
 0x290   : > { %v1826_v29 = vpack.c.bf16 %v1771_v25, %v1770_v26  ;;  %569 = sbr.rel (!%p567_p3) target bundleno = 314 (0x13a), region = 155 }
 0x291   : > { %v1664_v30 = vpop.permute.xlu1 %1663  ;;  %v1659_v31 = vpop.permute.xlu0 %1658 }
 0x292   : > { %1885 = vst [vmem:[%s23149_s30 + $0x1a0] sm:$0xff] %v1826_v29  ;;  %v1773_v32 = vmul.f32 %v1664_v30, %v1125_v27  ;;  %v1772_v34 = vmul.f32 %v1659_v31, %v1124_v28 }
 0x294   : > { %v1827_v35 = vpack.c.bf16 %v1773_v32, %v1772_v34 }
 0x296   : > { %1886 = vst [vmem:[%s23149_s30 + $0x1a8] sm:$0xff] %v1827_v35 }
 0x297 LB: > { %26412 = vst [vmem:[#allocation13_spill] sm:$0xff] %v22754_v33  ;;  %26413 = vst [vmem:[#allocation14_spill] sm:$0xff] %v22758_v36  ;;  %v22464_v37 = vld [vmem:[#allocation3 + $0x40] sm:$0xff]   ;;  %v22466_v19 = vld [vmem:[#allocation3 + $0x48] sm:$0xff]   ;;  %s23553_s12 = smul.u32 864, %s22762_s11  ;;  %s1892_s11 = sadd.s32 1, %s22762_s11   ;;  %s22762_s11 = sphi %s23541_s11, %s1892_s11   ;;  %v22758_v36 = vphi %v23539_v36, %v26519_v36   ;;  %v22754_v33 = vphi %v23537_v33, %v26518_v33  }
 0x298   : > { %v22465_v38 = vld [vmem:[#allocation3 + $0x100] sm:$0xff]   ;;  %18383 = vmatprep.subr.bf16.mxu1 %v22464_v37  ;;  %v22467_v20 = vld [vmem:[#allocation3 + $0x108] sm:$0xff]   ;;  %v22468_v21 = vld [vmem:[#allocation3 + $0x50] sm:$0xff]   ;;  %p1889_p4 = scmp.ge.s32.totalorder %s1892_s11, 6  }
 0x299   : > { %18879 = vmatprep.subr.bf16.mxu0 %v22465_v38  ;;  %18384 = vmatpush3.bf16.msra.mxu1 %v22464_v37  ;;  %s1970_s4 = sadd.s32 16, %s23553_s12  ;;  %v22469_v1 = vld [vmem:[#allocation3 + $0x110] sm:$0xff]   ;;  %v22470_v39 = vld [vmem:[#allocation3 + $0x58] sm:$0xff]   ;;  %s4466_s13 = sadd.s32 304, %s23553_s12  ;;  %v22472_v41 = vld [vmem:[#allocation3 + $0x60] sm:$0xff]  }
 0x29a   : > { %18880 = vmatpush3.bf16.msra.mxu0 %v22465_v38  ;;  %18385 = vmatprep.subr.bf16.mxu1 %v22466_v19  ;;  %s1971_s10 = sshra.s32 %s1970_s4, 4  ;;  %v22471_v40 = vld [vmem:[#allocation3 + $0x118] sm:$0xff]   ;;  %s4467_s14 = sshra.s32 %s4466_s13, 4  ;;  %v22473_v42 = vld [vmem:[#allocation3 + $0x120] sm:$0xff]   ;;  %v22474_v43 = vld [vmem:[#allocation3 + $0x68] sm:$0xff]  }
 0x29b   : > { %18881 = vmatprep.subr.bf16.mxu0 %v22467_v20  ;;  %s17104_s7 = sshll.u32 %s1971_s10, 3  ;;  %s17139_s15 = sshll.u32 %s4467_s14, 3  ;;  %v22475_v46 = vld [vmem:[#allocation3 + $0x128] sm:$0xff]   ;;  %v22476_v47 = vld [vmem:[#allocation3 + $0x70] sm:$0xff]   ;;  %v22478_v49 = vld [vmem:[#allocation3 + $0x78] sm:$0xff]  }
 0x29c   : > { %s23557_s16 = scalar_lea.vmem [#allocation2], %s17104_s7  ;;  %s23560_s17 = scalar_lea.vmem [#allocation2], %s17139_s15  ;;  %v22477_v48 = vld [vmem:[#allocation3 + $0x130] sm:$0xff]   ;;  %v22479_v50 = vld [vmem:[#allocation3 + $0x138] sm:$0xff]   ;;  %v22481_v51 = vld [vmem:[#allocation3] sm:$0xff]  }
 0x29d   : > { %18386 = vmatpush3.bf16.msra.mxu1 %v22466_v19  ;;  %v1975_v44 = vld [vmem:[%s23557_s16] sm:$0xff]  ;;  %v22480_v52 = vld [vmem:[#allocation3 + $0x140] sm:$0xff]   ;;  %v1976_v53 = vld [vmem:[%s23557_s16 + $0x8] sm:$0xff]  ;;  %s5163_s18 = sadd.s32 320, %s23553_s12  ;;  %s1896_s2 = sshra.s32 %s23553_s12, 4 }
 0x29e   : > { %18882 = vmatpush3.bf16.msra.mxu0 %v22467_v20  ;;  %18387 = vmatprep.subr.bf16.mxu1 %v22468_v21  ;;  %v4471_v45 = vld [vmem:[%s23560_s17] sm:$0xff]  ;;  %v4472_v54 = vld [vmem:[%s23560_s17 + $0x8] sm:$0xff]  ;;  %v1977_v55 = vld [vmem:[%s23557_s16 + $0x10] sm:$0xff]  ;;  %s5164_s19 = sshra.s32 %s5163_s18, 4  ;;  %s17103_s3 = sshll.u32 %s1896_s2, 3 }
 0x29f   : > { %18883 = vmatprep.subr.bf16.mxu0 %v22469_v1  ;;  %18399 = vmatprep.mubr.bf16.mxu1 %v1975_v44  ;;  %v4473_v56 = vld [vmem:[%s23560_s17 + $0x10] sm:$0xff]  ;;  %v22482_v57 = vld [vmem:[#allocation3 + $0x148] sm:$0xff]   ;;  %v22483_v59 = vld [vmem:[#allocation3 + $0x150] sm:$0xff]   ;;  %s17148_s20 = sshll.u32 %s5164_s19, 3  ;;  %s23683_s22 = scalar_lea.vmem [#allocation2], %s17103_s3 }
 0x2a0   : > { %18895 = vmatprep.mubr.bf16.mxu0 %v4471_v45  ;;  %v22484_v58 = vld [vmem:[#allocation3 + $0x8] sm:$0xff]   ;;  %v22487_v60 = vld [vmem:[#allocation3 + $0x10] sm:$0xff]   ;;  %v22485_v3 = vld [vmem:[#allocation3 + $0x158] sm:$0xff]   ;;  %s23625_s21 = scalar_lea.vmem [#allocation2], %s17148_s20  ;;  %s5860_s23 = sadd.s32 576, %s23553_s12 }
 0x2a1   : > { %18388 = vmatpush3.bf16.msra.mxu1 %v22468_v21  ;;  %v1978_v61 = vld [vmem:[%s23557_s16 + $0x18] sm:$0xff]  ;;  %v1979_v63 = vld [vmem:[%s23557_s16 + $0x20] sm:$0xff]  ;;  %v22490_v4 = vld [vmem:[#allocation3 + $0x18] sm:$0xff]   ;;  %s5861_s24 = sshra.s32 %s5860_s23, 4  ;;  %s3072_s27 = sadd.s32 32, %s23553_s12 }
 0x2a2   : > { %18884 = vmatpush3.bf16.msra.mxu0 %v22469_v1  ;;  %18389 = vmatprep.subr.bf16.mxu1 %v22470_v39  ;;  %v4474_v62 = vld [vmem:[%s23560_s17 + $0x18] sm:$0xff]  ;;  %v4475_v0 = vld [vmem:[%s23560_s17 + $0x20] sm:$0xff]  ;;  %v22486_v5 = vld [vmem:[#allocation3 + $0x160] sm:$0xff]   ;;  %s17157_s25 = sshll.u32 %s5861_s24, 3  ;;  %s3073_s28 = sshra.s32 %s3072_s27, 4 }
 0x2a3   : > { %18885 = vmatprep.subr.bf16.mxu0 %v22471_v40  ;;  %v1980_v6 = vld [vmem:[%s23557_s16 + $0x28] sm:$0xff]  ;;  %v1981_v8 = vld [vmem:[%s23557_s16 + $0x30] sm:$0xff]  ;;  %v22488_v10 = vld [vmem:[#allocation3 + $0x168] sm:$0xff]   ;;  %s23747_s26 = scalar_lea.vmem [#allocation2], %s17157_s25  ;;  %s17121_s29 = sshll.u32 %s3073_s28, 3 }
 0x2a4   : > { %v4476_v7 = vld [vmem:[%s23560_s17 + $0x28] sm:$0xff]  ;;  %v4477_v9 = vld [vmem:[%s23560_s17 + $0x30] sm:$0xff]  ;;  %v22489_v12 = vld [vmem:[#allocation3 + $0x170] sm:$0xff]   ;;  %s23805_s30 = scalar_lea.vmem [#allocation2], %s17121_s29  ;;  %s23854_s7 = scalar_lea.vmem %s26398_s1, %s23553_s12 }
 0x2a5   : > { %18390 = vmatpush3.bf16.msra.mxu1 %v22470_v39  ;;  %v22493_v11 = vld [vmem:[#allocation3 + $0x20] sm:$0xff]   ;;  %v1982_v13 = vld [vmem:[%s23557_s16 + $0x38] sm:$0xff]  ;;  %v1983_v15 = vld [vmem:[%s23557_s16 + $0x40] sm:$0xff]  ;;  %s6557_s13 = sadd.s32 592, %s23553_s12  ;;  %s3769_s18 = sadd.s32 288, %s23553_s12 }
 0x2a6   : > { %18886 = vmatpush3.bf16.msra.mxu0 %v22471_v40  ;;  %18391 = vmatprep.subr.bf16.mxu1 %v22472_v41  ;;  %v4478_v14 = vld [vmem:[%s23560_s17 + $0x38] sm:$0xff]  ;;  %v4479_v17 = vld [vmem:[%s23560_s17 + $0x40] sm:$0xff]  ;;  %v22491_v2 = vld [vmem:[#allocation3 + $0x178] sm:$0xff]   ;;  %s6558_s14 = sshra.s32 %s6557_s13, 4  ;;  %s3770_s19 = sshra.s32 %s3769_s18, 4 }
 0x2a7   : > { %18887 = vmatprep.subr.bf16.mxu0 %v22473_v42  ;;  %v22495_v16 = vld [vmem:[#allocation3 + $0x28] sm:$0xff]   ;;  %v23579_v18 = vld [vmem:[#allocation3 + $0x180] sm:$0xff]   ;;  %v1984_v22 = vld [vmem:[%s23557_s16 + $0x48] sm:$0xff]  ;;  %s17166_s15 = sshll.u32 %s6558_s14, 3  ;;  %s17130_s20 = sshll.u32 %s3770_s19, 3 }
 0x2a8   : > { %v4480_v24 = vld [vmem:[%s23560_s17 + $0x48] sm:$0xff]  ;;  %v1985_v25 = vld [vmem:[%s23557_s16 + $0x50] sm:$0xff]  ;;  %v1986_v27 = vld [vmem:[%s23557_s16 + $0x58] sm:$0xff]  ;;  %s7254_s2 = sadd.s32 608, %s23553_s12  ;;  %s24809_s11 = smov (%p1889_p4), 0  }
 0x2a9   : > { %18392 = vmatpush3.bf16.msra.mxu1 %v22472_v41  ;;  %v4481_v26 = vld [vmem:[%s23560_s17 + $0x50] sm:$0xff]  ;;  %v4482_v28 = vld [vmem:[%s23560_s17 + $0x58] sm:$0xff]  ;;  %v1987_v29 = vld [vmem:[%s23557_s16 + $0x60] sm:$0xff]  ;;  %s7255_s3 = sshra.s32 %s7254_s2, 4 }
 0x2aa   : > { %18888 = vmatpush3.bf16.msra.mxu0 %v22473_v42  ;;  %18393 = vmatprep.subr.bf16.mxu1 %v22474_v43  ;;  %v4483_v30 = vld [vmem:[%s23560_s17 + $0x60] sm:$0xff]  ;;  %v1988_v32 = vld [vmem:[%s23557_s16 + $0x68] sm:$0xff]  ;;  %v1989_v35 = vld [vmem:[%s23557_s16 + $0x70] sm:$0xff] }
 0x2ab   : > { %18889 = vmatprep.subr.bf16.mxu0 %v22475_v46  ;;  %v22497_v31 = vld [vmem:[#allocation3 + $0x30] sm:$0xff]   ;;  %v4484_v34 = vld [vmem:[%s23560_s17 + $0x68] sm:$0xff]  ;;  %v4485_v37 = vld [vmem:[%s23560_s17 + $0x70] sm:$0xff] }
 0x2ac   : > { %v1990_v38 = vld [vmem:[%s23557_s16 + $0x78] sm:$0xff]  ;;  %v1991_v20 = vld [vmem:[%s23557_s16 + $0x80] sm:$0xff]  ;;  %v1992_v1 = vld [vmem:[%s23557_s16 + $0x88] sm:$0xff] }
 0x2ad   : > { %18394 = vmatpush3.bf16.msra.mxu1 %v22474_v43  ;;  %v4486_v19 = vld [vmem:[%s23560_s17 + $0x78] sm:$0xff]  ;;  %v4487_v21 = vld [vmem:[%s23560_s17 + $0x80] sm:$0xff]  ;;  %v4488_v39 = vld [vmem:[%s23560_s17 + $0x88] sm:$0xff] }
 0x2ae   : > { %18890 = vmatpush3.bf16.msra.mxu0 %v22475_v46  ;;  %18395 = vmatprep.subr.bf16.mxu1 %v22476_v47  ;;  %v1993_v40 = vld [vmem:[%s23557_s16 + $0x90] sm:$0xff]  ;;  %v22499_v42 = vld [vmem:[#allocation3 + $0x38] sm:$0xff]   ;;  %v1994_v43 = vld [vmem:[%s23557_s16 + $0x98] sm:$0xff] }
 0x2af   : > { %18891 = vmatprep.subr.bf16.mxu0 %v22477_v48  ;;  %v4489_v41 = vld [vmem:[%s23560_s17 + $0x90] sm:$0xff]  ;;  %v4490_v44 = vld [vmem:[%s23560_s17 + $0x98] sm:$0xff]  ;;  %v1995_v45 = vld [vmem:[%s23557_s16 + $0xa0] sm:$0xff] }
 0x2b0   : > { %v4491_v46 = vld [vmem:[%s23560_s17 + $0xa0] sm:$0xff]  ;;  %v4514_v23 = vld [vmem:[%s23560_s17 + $0x158] sm:$0xff] }
 0x2b1   : > { %18396 = vmatpush3.bf16.msra.mxu1 %v22476_v47  ;;  %v1996_v47 = vld [vmem:[%s23557_s16 + $0xa8] sm:$0xff] }
 0x2b2   : > { %18892 = vmatpush3.bf16.msra.mxu0 %v22477_v48  ;;  %18397 = vmatprep.subr.bf16.mxu1 %v22478_v49  ;;  %v4492_v48 = vld [vmem:[%s23560_s17 + $0xa8] sm:$0xff] }
 0x2b3   : > { %18893 = vmatprep.subr.bf16.mxu0 %v22479_v50 }
 0x2b5   : > { %18398 = vmatpush3.bf16.msra.mxu1 %v22478_v49  ;;  %v1997_v49 = vld [vmem:[%s23557_s16 + $0xb0] sm:$0xff] }
 0x2b6   : > { %18894 = vmatpush3.bf16.msra.mxu0 %v22479_v50  ;;  %18507 = vmatprep.subr.bf16.mxu1 %v22481_v51  ;;  %v4493_v50 = vld [vmem:[%s23560_s17 + $0xb0] sm:$0xff] }
 0x2b7   : > { %19003 = vmatprep.subr.bf16.mxu0 %v22480_v52 }
 0x2b8   : > { %18400 = vmatmul.mubr.bf16.vlgmr.msra.gmra.mrb[0].mxu1 %v1976_v53  ;;  %v1999_v53 = vld [vmem:[%s23557_s16 + $0xc0] sm:$0xff] }
 0x2b9   : > { %18896 = vmatmul.mubr.bf16.vlgmr.msra.gmra.mrb[0].mxu0 %v4472_v54  ;;  %18403 = vmatprep.mubr.bf16.mxu1 %v1977_v55  ;;  %v4495_v54 = vld [vmem:[%s23560_s17 + $0xc0] sm:$0xff]  ;;  %v2000_v55 = vld [vmem:[%s23557_s16 + $0xc8] sm:$0xff] }
 0x2ba   : > { %19004 = vmatpush3.bf16.msra.mxu0 %v22480_v52  ;;  %18899 = vmatprep.mubr.bf16.mxu0 %v4473_v56  ;;  %v4494_v52 = vld [vmem:[%s23560_s17 + $0xb8] sm:$0xff]  ;;  %v4496_v56 = vld [vmem:[%s23560_s17 + $0xc8] sm:$0xff] }
 0x2bb   : > { %18508 = vmatpush3.bf16.msra.mxu1 %v22481_v51  ;;  %19005 = vmatprep.subr.bf16.mxu0 %v22482_v57  ;;  %v1998_v51 = vld [vmem:[%s23557_s16 + $0xb8] sm:$0xff] }
 0x2bc   : > { %18509 = vmatprep.subr.bf16.mxu1 %v22484_v58 }
 0x2be   : > { %19006 = vmatpush3.bf16.msra.mxu0 %v22482_v57  ;;  %v2001_v57 = vld [vmem:[%s23557_s16 + $0xd0] sm:$0xff] }
 0x2bf   : > { %19007 = vmatprep.subr.bf16.mxu0 %v22483_v59  ;;  %18510 = vmatpush3.bf16.msra.mxu1 %v22484_v58  ;;  %v4497_v58 = vld [vmem:[%s23560_s17 + $0xd0] sm:$0xff] }
 0x2c0   : > { %18404 = vmatmul.mubr.bf16.gmra.mrb[4].mxu1 %v1978_v61  ;;  %18511 = vmatprep.subr.bf16.mxu1 %v22487_v60  ;;  %v4498_v61 = vld [vmem:[%s23560_s17 + $0xd8] sm:$0xff] }
 0x2c1   : > { %18900 = vmatmul.mubr.bf16.gmra.mrb[4].mxu0 %v4474_v62  ;;  %18407 = vmatprep.mubr.bf16.mxu1 %v1979_v63  ;;  %v2003_v62 = vld [vmem:[%s23557_s16 + $0xe0] sm:$0xff] }
 0x2c2   : > { %18903 = vmatprep.mubr.bf16.mxu0 %v4475_v0  ;;  %19008 = vmatpush3.bf16.msra.mxu0 %v22483_v59  ;;  %v23619_v59 = vld [vmem:[#allocation3 + $0x80] sm:$0xff]   ;;  %v5168_v63 = vld [vmem:[%s23625_s21] sm:$0xff]  ;;  %v2004_v0 = vld [vmem:[%s23557_s16 + $0xe8] sm:$0xff] }
 0x2c3   : > { %19009 = vmatprep.subr.bf16.mxu0 %v22485_v3  ;;  %18512 = vmatpush3.bf16.msra.mxu1 %v22487_v60  ;;  %v2002_v60 = vld [vmem:[%s23557_s16 + $0xd8] sm:$0xff] }
 0x2c4   : > { %18513 = vmatprep.subr.bf16.mxu1 %v22490_v4 }
 0x2c6   : > { %19010 = vmatpush3.bf16.msra.mxu0 %v22485_v3  ;;  %v5169_v3 = vld [vmem:[%s23625_s21 + $0x8] sm:$0xff] }
 0x2c7   : > { %19011 = vmatprep.subr.bf16.mxu0 %v22486_v5  ;;  %18514 = vmatpush3.bf16.msra.mxu1 %v22490_v4  ;;  %v2005_v4 = vld [vmem:[%s23557_s16 + $0xf0] sm:$0xff] }
 0x2c8   : > { %18408 = vmatmul.mubr.bf16.gmra.mrb[8].mxu1 %v1980_v6  ;;  %18515 = vmatprep.subr.bf16.mxu1 %v22493_v11  ;;  %v22494_v6 = vld [vmem:[#allocation3 + $0x188] sm:$0xff]  }
 0x2c9   : > { %18904 = vmatmul.mubr.bf16.gmra.mrb[8].mxu0 %v4476_v7  ;;  %18411 = vmatprep.mubr.bf16.mxu1 %v1981_v8  ;;  %v22496_v7 = vld [vmem:[#allocation3 + $0x190] sm:$0xff]   ;;  %v2006_v8 = vld [vmem:[%s23557_s16 + $0xf8] sm:$0xff] }
 0x2ca   : > { %18907 = vmatprep.mubr.bf16.mxu0 %v4477_v9  ;;  %19012 = vmatpush3.bf16.msra.mxu0 %v22486_v5  ;;  %v5170_v5 = vld [vmem:[%s23625_s21 + $0x10] sm:$0xff]  ;;  %v5171_v9 = vld [vmem:[%s23625_s21 + $0x18] sm:$0xff] }
 0x2cb   : > { %19013 = vmatprep.subr.bf16.mxu0 %v22488_v10  ;;  %18516 = vmatpush3.bf16.msra.mxu1 %v22493_v11  ;;  %v5172_v11 = vld [vmem:[%s23625_s21 + $0x20] sm:$0xff] }
 0x2cc   : > { %18517 = vmatprep.subr.bf16.mxu1 %v22495_v16 }
 0x2ce   : > { %19014 = vmatpush3.bf16.msra.mxu0 %v22488_v10  ;;  %v2007_v10 = vld [vmem:[%s23557_s16 + $0x100] sm:$0xff] }
 0x2cf   : > { %19015 = vmatprep.subr.bf16.mxu0 %v22489_v12  ;;  %18518 = vmatpush3.bf16.msra.mxu1 %v22495_v16  ;;  %v2009_v16 = vld [vmem:[%s23557_s16 + $0x110] sm:$0xff] }
 0x2d0   : > { %18412 = vmatmul.mubr.bf16.gmra.mrb[12].mxu1 %v1982_v13  ;;  %18519 = vmatprep.subr.bf16.mxu1 %v22497_v31  ;;  %v22500_v13 = vld [vmem:[#allocation3 + $0x1a0] sm:$0xff]  }
 0x2d1   : > { %18908 = vmatmul.mubr.bf16.gmra.mrb[12].mxu0 %v4478_v14  ;;  %18415 = vmatprep.mubr.bf16.mxu1 %v1983_v15  ;;  %v2008_v14 = vld [vmem:[%s23557_s16 + $0x108] sm:$0xff] }
 0x2d2   : > { %18911 = vmatprep.mubr.bf16.mxu0 %v4479_v17  ;;  %19016 = vmatpush3.bf16.msra.mxu0 %v22489_v12  ;;  %v22498_v12 = vld [vmem:[#allocation3 + $0x198] sm:$0xff]   ;;  %v5174_v17 = vld [vmem:[%s23625_s21 + $0x30] sm:$0xff] }
 0x2d3   : > { %19017 = vmatprep.subr.bf16.mxu0 %v22491_v2  ;;  %18520 = vmatpush3.bf16.msra.mxu1 %v22497_v31  ;;  %v5173_v15 = vld [vmem:[%s23625_s21 + $0x28] sm:$0xff]  ;;  %v2014_v31 = vld [vmem:[%s23557_s16 + $0x138] sm:$0xff] }
 0x2d4   : > { %18521 = vmatprep.subr.bf16.mxu1 %v22499_v42 }
 0x2d6   : > { %19018 = vmatpush3.bf16.msra.mxu0 %v22491_v2  ;;  %v22502_v2 = vld [vmem:[#allocation3 + $0x1a8] sm:$0xff]  }
 0x2d7   : > { %19127 = vmatprep.subr.bf16.mxu0 %v23579_v18  ;;  %18522 = vmatpush3.bf16.msra.mxu1 %v22499_v42  ;;  %v2020_v42 = vld [vmem:[%s23557_s16 + $0x168] sm:$0xff] }
 0x2d8   : > { %18416 = vmatmul.mubr.bf16.gmra.mrb[16].mxu1 %v1984_v22  ;;  %18631 = vmatprep.subr.bf16.mxu1 %v23619_v59  ;;  %v5175_v22 = vld [vmem:[%s23625_s21 + $0x38] sm:$0xff] }
 0x2d9   : > { %18912 = vmatmul.mubr.bf16.gmra.mrb[16].mxu0 %v4480_v24  ;;  %18419 = vmatprep.mubr.bf16.mxu1 %v1985_v25  ;;  %v2011_v24 = vld [vmem:[%s23557_s16 + $0x120] sm:$0xff] }
 0x2da   : > { %18915 = vmatprep.mubr.bf16.mxu0 %v4481_v26  ;;  %v5176_v25 = vld [vmem:[%s23625_s21 + $0x40] sm:$0xff]  ;;  %v2012_v26 = vld [vmem:[%s23557_s16 + $0x128] sm:$0xff] }
 0x2e0   : > { %18420 = vmatmul.mubr.bf16.gmra.mrb[20].mxu1 %v1986_v27  ;;  %v5177_v27 = vld [vmem:[%s23625_s21 + $0x48] sm:$0xff] }
 0x2e1   : > { %18916 = vmatmul.mubr.bf16.gmra.mrb[20].mxu0 %v4482_v28  ;;  %18423 = vmatprep.mubr.bf16.mxu1 %v1987_v29  ;;  %v2013_v28 = vld [vmem:[%s23557_s16 + $0x130] sm:$0xff] }
 0x2e2   : > { %18919 = vmatprep.mubr.bf16.mxu0 %v4483_v30  ;;  %v5178_v29 = vld [vmem:[%s23625_s21 + $0x50] sm:$0xff]  ;;  %v22504_v30 = vld [vmem:[#allocation3 + $0x1b0] sm:$0xff]  }
 0x2e8   : > { %18424 = vmatmul.mubr.bf16.gmra.mrb[24].mxu1 %v1988_v32  ;;  %v5179_v32 = vld [vmem:[%s23625_s21 + $0x58] sm:$0xff] }
 0x2e9   : > { %18920 = vmatmul.mubr.bf16.gmra.mrb[24].mxu0 %v4484_v34  ;;  %18427 = vmatprep.mubr.bf16.mxu1 %v1989_v35  ;;  %v2015_v34 = vld [vmem:[%s23557_s16 + $0x140] sm:$0xff] }
 0x2ea   : > { %18923 = vmatprep.mubr.bf16.mxu0 %v4485_v37  ;;  %v5180_v35 = vld [vmem:[%s23625_s21 + $0x60] sm:$0xff]  ;;  %v2016_v37 = vld [vmem:[%s23557_s16 + $0x148] sm:$0xff] }
 0x2f0   : > { %18428 = vmatmul.mubr.bf16.gmra.mrb[28].mxu1 %v1990_v38  ;;  %v5181_v38 = vld [vmem:[%s23625_s21 + $0x68] sm:$0xff] }
 0x2f1   : > { %18924 = vmatmul.mubr.bf16.gmra.mrb[28].mxu0 %v4486_v19  ;;  %18431 = vmatprep.mubr.bf16.mxu1 %v1991_v20  ;;  %v2017_v19 = vld [vmem:[%s23557_s16 + $0x150] sm:$0xff] }
 0x2f2   : > { %18927 = vmatprep.mubr.bf16.mxu0 %v4487_v21  ;;  %v5182_v20 = vld [vmem:[%s23625_s21 + $0x70] sm:$0xff]  ;;  %v2018_v21 = vld [vmem:[%s23557_s16 + $0x158] sm:$0xff] }
 0x2f8   : > { %18432 = vmatmul.mubr.bf16.gmra.mrb[32].mxu1 %v1992_v1  ;;  %v5183_v1 = vld [vmem:[%s23625_s21 + $0x78] sm:$0xff] }
 0x2f9   : > { %18928 = vmatmul.mubr.bf16.gmra.mrb[32].mxu0 %v4488_v39  ;;  %18435 = vmatprep.mubr.bf16.mxu1 %v1993_v40  ;;  %v2019_v39 = vld [vmem:[%s23557_s16 + $0x160] sm:$0xff] }
 0x2fa   : > { %18931 = vmatprep.mubr.bf16.mxu0 %v4489_v41  ;;  %v5184_v40 = vld [vmem:[%s23625_s21 + $0x80] sm:$0xff]  ;;  %v22506_v41 = vld [vmem:[#allocation3 + $0x1b8] sm:$0xff]  }
 0x300   : > { %18436 = vmatmul.mubr.bf16.gmra.mrb[36].mxu1 %v1994_v43  ;;  %v5185_v43 = vld [vmem:[%s23625_s21 + $0x88] sm:$0xff] }
 0x301   : > { %18932 = vmatmul.mubr.bf16.gmra.mrb[36].mxu0 %v4490_v44  ;;  %18439 = vmatprep.mubr.bf16.mxu1 %v1995_v45  ;;  %v2021_v44 = vld [vmem:[%s23557_s16 + $0x170] sm:$0xff] }
 0x302   : > { %18935 = vmatprep.mubr.bf16.mxu0 %v4491_v46  ;;  %v5186_v45 = vld [vmem:[%s23625_s21 + $0x90] sm:$0xff]  ;;  %v2022_v46 = vld [vmem:[%s23557_s16 + $0x178] sm:$0xff] }
 0x308   : > { %18440 = vmatmul.mubr.bf16.gmra.mrb[40].mxu1 %v1996_v47  ;;  %v5187_v47 = vld [vmem:[%s23625_s21 + $0x98] sm:$0xff] }
 0x309   : > { %18936 = vmatmul.mubr.bf16.gmra.mrb[40].mxu0 %v4492_v48  ;;  %18443 = vmatprep.mubr.bf16.mxu1 %v1997_v49  ;;  %v2023_v48 = vld [vmem:[%s23557_s16 + $0x180] sm:$0xff] }
 0x30a   : > { %18939 = vmatprep.mubr.bf16.mxu0 %v4493_v50  ;;  %v5188_v49 = vld [vmem:[%s23625_s21 + $0xa0] sm:$0xff]  ;;  %v2024_v50 = vld [vmem:[%s23557_s16 + $0x188] sm:$0xff] }
 0x310   : > { %18444 = vmatmul.mubr.bf16.gmra.mrb[44].mxu1 %v1998_v51  ;;  %v5189_v51 = vld [vmem:[%s23625_s21 + $0xa8] sm:$0xff] }
 0x311   : > { %18940 = vmatmul.mubr.bf16.gmra.mrb[44].mxu0 %v4494_v52  ;;  %18447 = vmatprep.mubr.bf16.mxu1 %v1999_v53  ;;  %v2025_v52 = vld [vmem:[%s23557_s16 + $0x190] sm:$0xff] }
 0x312   : > { %18943 = vmatprep.mubr.bf16.mxu0 %v4495_v54  ;;  %v5190_v53 = vld [vmem:[%s23625_s21 + $0xb0] sm:$0xff]  ;;  %v2026_v54 = vld [vmem:[%s23557_s16 + $0x198] sm:$0xff] }
 0x318   : > { %18448 = vmatmul.mubr.bf16.gmra.mrb[48].mxu1 %v2000_v55  ;;  %v5191_v55 = vld [vmem:[%s23625_s21 + $0xb8] sm:$0xff] }
 0x319   : > { %18944 = vmatmul.mubr.bf16.gmra.mrb[48].mxu0 %v4496_v56  ;;  %18451 = vmatprep.mubr.bf16.mxu1 %v2001_v57  ;;  %v2027_v56 = vld [vmem:[%s23557_s16 + $0x1a0] sm:$0xff] }
 0x31a   : > { %18947 = vmatprep.mubr.bf16.mxu0 %v4497_v58  ;;  %v5192_v57 = vld [vmem:[%s23625_s21 + $0xc0] sm:$0xff]  ;;  %v23678_v58 = vld [vmem:[#allocation3 + $0x1c0] sm:$0xff]  }
 0x320   : > { %18452 = vmatmul.mubr.bf16.gmra.mrb[52].mxu1 %v2002_v60  ;;  %v2028_v60 = vld [vmem:[%s23557_s16 + $0x1a8] sm:$0xff] }
 0x321   : > { %18948 = vmatmul.mubr.bf16.gmra.mrb[52].mxu0 %v4498_v61  ;;  %18455 = vmatprep.mubr.bf16.mxu1 %v2003_v62  ;;  %v5193_v61 = vld [vmem:[%s23625_s21 + $0xc8] sm:$0xff]  ;;  %v1900_v62 = vld [vmem:[%s23683_s22] sm:$0xff] }
 0x322   : > { %19019 = vmatprep.mubr.bf16.mxu0 %v5168_v63  ;;  %v5194_v63 = vld [vmem:[%s23625_s21 + $0xd0] sm:$0xff] }
 0x328   : > { %18456 = vmatmul.mubr.bf16.gmra.mrb[56].mxu1 %v2004_v0  ;;  %v1901_v0 = vld [vmem:[%s23683_s22 + $0x8] sm:$0xff] }
 0x329   : > { %19020 = vmatmul.mubr.bf16.vlgmr.msra.gmra.mrb[0].mxu0 %v5169_v3  ;;  %18459 = vmatprep.mubr.bf16.mxu1 %v2005_v4  ;;  %v5195_v3 = vld [vmem:[%s23625_s21 + $0xd8] sm:$0xff]  ;;  %v1902_v4 = vld [vmem:[%s23683_s22 + $0x10] sm:$0xff] }
 0x32a   : > { %19128 = vmatpush3.bf16.msra.mxu0 %v23579_v18  ;;  %19023 = vmatprep.mubr.bf16.mxu0 %v5170_v5  ;;  %v2010_v18 = vld [vmem:[%s23557_s16 + $0x118] sm:$0xff]  ;;  %v5196_v5 = vld [vmem:[%s23625_s21 + $0xe0] sm:$0xff]  ;;  %s23890_s16 = scalar_lea.vmem [#allocation2], %s17166_s15 }
 0x32b   : > { %19129 = vmatprep.subr.bf16.mxu0 %v22494_v6 }
 0x32e   : > { %19130 = vmatpush3.bf16.msra.mxu0 %v22494_v6  ;;  %v22503_v6 = vld [vmem:[#allocation3 + $0x88] sm:$0xff]  }
 0x32f   : > { %19131 = vmatprep.subr.bf16.mxu0 %v22496_v7 }
 0x330   : > { %18460 = vmatmul.mubr.bf16.gmra.mrb[60].mxu1 %v2006_v8  ;;  %v1903_v8 = vld [vmem:[%s23683_s22 + $0x18] sm:$0xff] }
 0x331   : > { %19024 = vmatmul.mubr.bf16.gmra.mrb[4].mxu0 %v5171_v9  ;;  %18463 = vmatprep.mubr.bf16.mxu1 %v2007_v10  ;;  %v5197_v9 = vld [vmem:[%s23625_s21 + $0xe8] sm:$0xff]  ;;  %v1904_v10 = vld [vmem:[%s23683_s22 + $0x20] sm:$0xff] }
 0x332   : > { %19027 = vmatprep.mubr.bf16.mxu0 %v5172_v11  ;;  %19132 = vmatpush3.bf16.msra.mxu0 %v22496_v7  ;;  %v22505_v7 = vld [vmem:[#allocation3 + $0x90] sm:$0xff]   ;;  %v5198_v11 = vld [vmem:[%s23625_s21 + $0xf0] sm:$0xff] }
 0x333   : > { %19133 = vmatprep.subr.bf16.mxu0 %v22498_v12 }
 0x336   : > { %19134 = vmatpush3.bf16.msra.mxu0 %v22498_v12  ;;  %v22507_v12 = vld [vmem:[#allocation3 + $0x98] sm:$0xff]  }
 0x337   : > { %19135 = vmatprep.subr.bf16.mxu0 %v22500_v13 }
 0x338   : > { %18464 = vmatmul.mubr.bf16.gmra.mrb[64].mxu1 %v2008_v14  ;;  %v5199_v14 = vld [vmem:[%s23625_s21 + $0xf8] sm:$0xff] }
 0x339   : > { %19028 = vmatmul.mubr.bf16.gmra.mrb[8].mxu0 %v5173_v15  ;;  %18467 = vmatprep.mubr.bf16.mxu1 %v2009_v16  ;;  %v1906_v15 = vld [vmem:[%s23683_s22 + $0x30] sm:$0xff]  ;;  %v5200_v16 = vld [vmem:[%s23625_s21 + $0x100] sm:$0xff] }
 0x33a   : > { %19031 = vmatprep.mubr.bf16.mxu0 %v5174_v17  ;;  %19136 = vmatpush3.bf16.msra.mxu0 %v22500_v13  ;;  %v1905_v13 = vld [vmem:[%s23683_s22 + $0x28] sm:$0xff]  ;;  %v22511_v17 = vld [vmem:[#allocation3 + $0xa8] sm:$0xff]  }
 0x33b   : > { %19137 = vmatprep.subr.bf16.mxu0 %v22502_v2 }
 0x33e   : > { %19138 = vmatpush3.bf16.msra.mxu0 %v22502_v2  ;;  %v1907_v2 = vld [vmem:[%s23683_s22 + $0x38] sm:$0xff] }
 0x33f   : > { %19139 = vmatprep.subr.bf16.mxu0 %v22504_v30 }
 0x340   : > { %18468 = vmatmul.mubr.bf16.gmra.mrb[68].mxu1 %v2010_v18  ;;  %v5201_v18 = vld [vmem:[%s23625_s21 + $0x108] sm:$0xff] }
 0x341   : > { %19032 = vmatmul.mubr.bf16.gmra.mrb[12].mxu0 %v5175_v22  ;;  %18471 = vmatprep.mubr.bf16.mxu1 %v2011_v24  ;;  %v1908_v22 = vld [vmem:[%s23683_s22 + $0x40] sm:$0xff]  ;;  %v5202_v24 = vld [vmem:[%s23625_s21 + $0x110] sm:$0xff] }
 0x342   : > { %19035 = vmatprep.mubr.bf16.mxu0 %v5176_v25  ;;  %19140 = vmatpush3.bf16.msra.mxu0 %v22504_v30  ;;  %v1909_v25 = vld [vmem:[%s23683_s22 + $0x48] sm:$0xff] }
 0x343   : > { %19141 = vmatprep.subr.bf16.mxu0 %v22506_v41  ;;  %v5205_v30 = vld [vmem:[%s23625_s21 + $0x128] sm:$0xff] }
 0x346   : > { %19142 = vmatpush3.bf16.msra.mxu0 %v22506_v41  ;;  %v5211_v41 = vld [vmem:[%s23625_s21 + $0x158] sm:$0xff] }
 0x347   : > { %19251 = vmatprep.subr.bf16.mxu0 %v23678_v58 }
 0x348   : > { %18472 = vmatmul.mubr.bf16.gmra.mrb[72].mxu1 %v2012_v26  ;;  %v5203_v26 = vld [vmem:[%s23625_s21 + $0x118] sm:$0xff] }
 0x349   : > { %19036 = vmatmul.mubr.bf16.gmra.mrb[16].mxu0 %v5177_v27  ;;  %18475 = vmatprep.mubr.bf16.mxu1 %v2013_v28  ;;  %v1910_v27 = vld [vmem:[%s23683_s22 + $0x50] sm:$0xff]  ;;  %v5204_v28 = vld [vmem:[%s23625_s21 + $0x120] sm:$0xff] }
 0x34a   : > { %19039 = vmatprep.mubr.bf16.mxu0 %v5178_v29  ;;  %v1911_v29 = vld [vmem:[%s23683_s22 + $0x58] sm:$0xff] }
 0x350   : > { %18476 = vmatmul.mubr.bf16.gmra.mrb[76].mxu1 %v2014_v31  ;;  %v1912_v31 = vld [vmem:[%s23683_s22 + $0x60] sm:$0xff] }
 0x351   : > { %19040 = vmatmul.mubr.bf16.gmra.mrb[20].mxu0 %v5179_v32  ;;  %18479 = vmatprep.mubr.bf16.mxu1 %v2015_v34  ;;  %v5206_v32 = vld [vmem:[%s23625_s21 + $0x130] sm:$0xff]  ;;  %v22513_v34 = vld [vmem:[#allocation3 + $0xb0] sm:$0xff]  }
 0x352   : > { %19043 = vmatprep.mubr.bf16.mxu0 %v5180_v35  ;;  %v1913_v35 = vld [vmem:[%s23683_s22 + $0x68] sm:$0xff] }
 0x358   : > { %18480 = vmatmul.mubr.bf16.gmra.mrb[80].mxu1 %v2016_v37  ;;  %v5207_v37 = vld [vmem:[%s23625_s21 + $0x138] sm:$0xff] }
 0x359   : > { %19044 = vmatmul.mubr.bf16.gmra.mrb[24].mxu0 %v5181_v38  ;;  %18483 = vmatprep.mubr.bf16.mxu1 %v2017_v19  ;;  %v1914_v38 = vld [vmem:[%s23683_s22 + $0x70] sm:$0xff]  ;;  %v5208_v19 = vld [vmem:[%s23625_s21 + $0x140] sm:$0xff] }
 0x35a   : > { %19047 = vmatprep.mubr.bf16.mxu0 %v5182_v20  ;;  %v1915_v20 = vld [vmem:[%s23683_s22 + $0x78] sm:$0xff] }
 0x360   : > { %18484 = vmatmul.mubr.bf16.gmra.mrb[84].mxu1 %v2018_v21  ;;  %v5209_v21 = vld [vmem:[%s23625_s21 + $0x148] sm:$0xff] }
 0x361   : > { %19048 = vmatmul.mubr.bf16.gmra.mrb[28].mxu0 %v5183_v1  ;;  %18487 = vmatprep.mubr.bf16.mxu1 %v2019_v39  ;;  %v1916_v1 = vld [vmem:[%s23683_s22 + $0x80] sm:$0xff]  ;;  %v5210_v39 = vld [vmem:[%s23625_s21 + $0x150] sm:$0xff] }
 0x362   : > { %19051 = vmatprep.mubr.bf16.mxu0 %v5184_v40  ;;  %v1917_v40 = vld [vmem:[%s23683_s22 + $0x88] sm:$0xff] }
 0x368   : > { %18488 = vmatmul.mubr.bf16.gmra.mrb[88].mxu1 %v2020_v42  ;;  %v1918_v42 = vld [vmem:[%s23683_s22 + $0x90] sm:$0xff] }
 0x369   : > { %19052 = vmatmul.mubr.bf16.gmra.mrb[32].mxu0 %v5185_v43  ;;  %18491 = vmatprep.mubr.bf16.mxu1 %v2021_v44  ;;  %v5212_v43 = vld [vmem:[%s23625_s21 + $0x160] sm:$0xff]  ;;  %v22515_v44 = vld [vmem:[#allocation3 + $0xb8] sm:$0xff]  }
 0x36a   : > { %19055 = vmatprep.mubr.bf16.mxu0 %v5186_v45  ;;  %v1919_v45 = vld [vmem:[%s23683_s22 + $0x98] sm:$0xff] }
 0x370   : > { %18492 = vmatmul.mubr.bf16.gmra.mrb[92].mxu1 %v2022_v46  ;;  %v5213_v46 = vld [vmem:[%s23625_s21 + $0x168] sm:$0xff] }
 0x371   : > { %19056 = vmatmul.mubr.bf16.gmra.mrb[36].mxu0 %v5187_v47  ;;  %18495 = vmatprep.mubr.bf16.mxu1 %v2023_v48  ;;  %v1920_v47 = vld [vmem:[%s23683_s22 + $0xa0] sm:$0xff]  ;;  %v5214_v48 = vld [vmem:[%s23625_s21 + $0x170] sm:$0xff] }
 0x372   : > { %19059 = vmatprep.mubr.bf16.mxu0 %v5188_v49  ;;  %v1921_v49 = vld [vmem:[%s23683_s22 + $0xa8] sm:$0xff] }
 0x378   : > { %18496 = vmatmul.mubr.bf16.gmra.mrb[96].mxu1 %v2024_v50  ;;  %v5215_v50 = vld [vmem:[%s23625_s21 + $0x178] sm:$0xff] }
 0x379   : > { %19060 = vmatmul.mubr.bf16.gmra.mrb[40].mxu0 %v5189_v51  ;;  %18499 = vmatprep.mubr.bf16.mxu1 %v2025_v52  ;;  %v1922_v51 = vld [vmem:[%s23683_s22 + $0xb0] sm:$0xff]  ;;  %v5216_v52 = vld [vmem:[%s23625_s21 + $0x180] sm:$0xff] }
 0x37a   : > { %19063 = vmatprep.mubr.bf16.mxu0 %v5190_v53  ;;  %v1923_v53 = vld [vmem:[%s23683_s22 + $0xb8] sm:$0xff] }
 0x380   : > { %18500 = vmatmul.mubr.bf16.gmra.mrb[100].mxu1 %v2026_v54  ;;  %v5217_v54 = vld [vmem:[%s23625_s21 + $0x188] sm:$0xff] }
 0x381   : > { %19064 = vmatmul.mubr.bf16.gmra.mrb[44].mxu0 %v5191_v55  ;;  %18503 = vmatprep.mubr.bf16.mxu1 %v2027_v56  ;;  %v1924_v55 = vld [vmem:[%s23683_s22 + $0xc0] sm:$0xff]  ;;  %v5218_v56 = vld [vmem:[%s23625_s21 + $0x190] sm:$0xff] }
 0x382   : > { %19067 = vmatprep.mubr.bf16.mxu0 %v5192_v57  ;;  %v1925_v57 = vld [vmem:[%s23683_s22 + $0xc8] sm:$0xff] }
 0x388   : > { %18504 = vmatmul.mubr.bf16.gmra.mrb[104].mxu1 %v2028_v60  ;;  %v5219_v60 = vld [vmem:[%s23625_s21 + $0x198] sm:$0xff] }
 0x389   : > { %19068 = vmatmul.mubr.bf16.gmra.mrb[48].mxu0 %v5193_v61  ;;  %18523 = vmatprep.mubr.bf16.mxu1 %v1900_v62  ;;  %v1926_v61 = vld [vmem:[%s23683_s22 + $0xd0] sm:$0xff]  ;;  %v5220_v62 = vld [vmem:[%s23625_s21 + $0x1a0] sm:$0xff] }
 0x38a   : > { %19071 = vmatprep.mubr.bf16.mxu0 %v5194_v63  ;;  %v23741_v63 = vld [vmem:[#allocation3 + $0xc0] sm:$0xff]  }
 0x390   : > { %18524 = vmatmul.mubr.bf16.vlgmr.msra.gmra.mrb[0].mxu1 %v1901_v0  ;;  %v1927_v0 = vld [vmem:[%s23683_s22 + $0xd8] sm:$0xff] }
 0x391   : > { %19072 = vmatmul.mubr.bf16.gmra.mrb[52].mxu0 %v5195_v3  ;;  %18527 = vmatprep.mubr.bf16.mxu1 %v1902_v4  ;;  %v5221_v3 = vld [vmem:[%s23625_s21 + $0x1a8] sm:$0xff]  ;;  %v1928_v4 = vld [vmem:[%s23683_s22 + $0xe0] sm:$0xff]  ;;  %s23997_s21 = scalar_lea.vmem [#allocation2], %s17130_s20 }
 0x392   : > { %19075 = vmatprep.mubr.bf16.mxu0 %v5196_v5  ;;  %18632 = vmatpush3.bf16.msra.mxu1 %v23619_v59  ;;  %v22509_v59 = vld [vmem:[#allocation3 + $0xa0] sm:$0xff]   ;;  %v5865_v5 = vld [vmem:[%s23747_s26] sm:$0xff] }
 0x393   : > { %18633 = vmatprep.subr.bf16.mxu1 %v22503_v6 }
 0x396   : > { %18634 = vmatpush3.bf16.msra.mxu1 %v22503_v6  ;;  %v1929_v6 = vld [vmem:[%s23683_s22 + $0xe8] sm:$0xff] }
 0x397   : > { %18635 = vmatprep.subr.bf16.mxu1 %v22505_v7 }
 0x398   : > { %18528 = vmatmul.mubr.bf16.gmra.mrb[4].mxu1 %v1903_v8  ;;  %v1930_v8 = vld [vmem:[%s23683_s22 + $0xf0] sm:$0xff] }
 0x399   : > { %19076 = vmatmul.mubr.bf16.gmra.mrb[56].mxu0 %v5197_v9  ;;  %18531 = vmatprep.mubr.bf16.mxu1 %v1904_v10  ;;  %v5867_v9 = vld [vmem:[%s23747_s26 + $0x10] sm:$0xff]  ;;  %v22510_v10 = vld [vmem:[#allocation3 + $0x1c8] sm:$0xff]  }
 0x39a   : > { %19079 = vmatprep.mubr.bf16.mxu0 %v5198_v11  ;;  %18636 = vmatpush3.bf16.msra.mxu1 %v22505_v7  ;;  %v5866_v7 = vld [vmem:[%s23747_s26 + $0x8] sm:$0xff]  ;;  %v22512_v11 = vld [vmem:[#allocation3 + $0x1d0] sm:$0xff]  }
 0x39b   : > { %18637 = vmatprep.subr.bf16.mxu1 %v22507_v12 }
 0x39e   : > { %18638 = vmatpush3.bf16.msra.mxu1 %v22507_v12  ;;  %v1931_v12 = vld [vmem:[%s23683_s22 + $0xf8] sm:$0xff] }
 0x39f   : > { %18639 = vmatprep.subr.bf16.mxu1 %v22509_v59 }
 0x3a0   : > { %18532 = vmatmul.mubr.bf16.gmra.mrb[8].mxu1 %v1905_v13  ;;  %v1932_v13 = vld [vmem:[%s23683_s22 + $0x100] sm:$0xff] }
 0x3a1   : > { %19080 = vmatmul.mubr.bf16.gmra.mrb[60].mxu0 %v5199_v14  ;;  %18535 = vmatprep.mubr.bf16.mxu1 %v1906_v15  ;;  %v5869_v14 = vld [vmem:[%s23747_s26 + $0x20] sm:$0xff]  ;;  %v22514_v15 = vld [vmem:[#allocation3 + $0x1d8] sm:$0xff]  }
 0x3a2   : > { %19083 = vmatprep.mubr.bf16.mxu0 %v5200_v16  ;;  %18640 = vmatpush3.bf16.msra.mxu1 %v22509_v59  ;;  %v5868_v59 = vld [vmem:[%s23747_s26 + $0x18] sm:$0xff]  ;;  %v1933_v16 = vld [vmem:[%s23683_s22 + $0x108] sm:$0xff] }
 0x3a3   : > { %18641 = vmatprep.subr.bf16.mxu1 %v22511_v17 }
 0x3a6   : > { %18642 = vmatpush3.bf16.msra.mxu1 %v22511_v17  ;;  %v5870_v17 = vld [vmem:[%s23747_s26 + $0x28] sm:$0xff] }
 0x3a7   : > { %18643 = vmatprep.subr.bf16.mxu1 %v22513_v34 }
 0x3a8   : > { %18536 = vmatmul.mubr.bf16.gmra.mrb[12].mxu1 %v1907_v2  ;;  %v1934_v2 = vld [vmem:[%s23683_s22 + $0x110] sm:$0xff] }
 0x3a9   : > { %19084 = vmatmul.mubr.bf16.gmra.mrb[64].mxu0 %v5201_v18  ;;  %18539 = vmatprep.mubr.bf16.mxu1 %v1908_v22  ;;  %v5871_v18 = vld [vmem:[%s23747_s26 + $0x30] sm:$0xff]  ;;  %v22518_v22 = vld [vmem:[#allocation3 + $0x1e8] sm:$0xff]  }
 0x3aa   : > { %19087 = vmatprep.mubr.bf16.mxu0 %v5202_v24  ;;  %18644 = vmatpush3.bf16.msra.mxu1 %v22513_v34  ;;  %v1935_v24 = vld [vmem:[%s23683_s22 + $0x118] sm:$0xff] }
 0x3ab   : > { %18645 = vmatprep.subr.bf16.mxu1 %v22515_v44  ;;  %v1939_v34 = vld [vmem:[%s23683_s22 + $0x138] sm:$0xff] }
 0x3ae   : > { %18646 = vmatpush3.bf16.msra.mxu1 %v22515_v44  ;;  %v1945_v44 = vld [vmem:[%s23683_s22 + $0x168] sm:$0xff] }
 0x3af   : > { %18755 = vmatprep.subr.bf16.mxu1 %v23741_v63 }
 0x3b0   : > { %18540 = vmatmul.mubr.bf16.gmra.mrb[16].mxu1 %v1909_v25  ;;  %v5872_v25 = vld [vmem:[%s23747_s26 + $0x38] sm:$0xff] }
 0x3b1   : > { %19088 = vmatmul.mubr.bf16.gmra.mrb[68].mxu0 %v5203_v26  ;;  %18543 = vmatprep.mubr.bf16.mxu1 %v1910_v27  ;;  %v1936_v26 = vld [vmem:[%s23683_s22 + $0x120] sm:$0xff] }
 0x3b2   : > { %19091 = vmatprep.mubr.bf16.mxu0 %v5204_v28  ;;  %v5873_v27 = vld [vmem:[%s23747_s26 + $0x40] sm:$0xff]  ;;  %v1937_v28 = vld [vmem:[%s23683_s22 + $0x128] sm:$0xff] }
 0x3b8   : > { %18544 = vmatmul.mubr.bf16.gmra.mrb[20].mxu1 %v1911_v29  ;;  %v5874_v29 = vld [vmem:[%s23747_s26 + $0x48] sm:$0xff] }
 0x3b9   : > { %19092 = vmatmul.mubr.bf16.gmra.mrb[72].mxu0 %v5205_v30  ;;  %18547 = vmatprep.mubr.bf16.mxu1 %v1912_v31  ;;  %v1938_v30 = vld [vmem:[%s23683_s22 + $0x130] sm:$0xff] }
 0x3ba   : > { %19095 = vmatprep.mubr.bf16.mxu0 %v5206_v32  ;;  %v5875_v31 = vld [vmem:[%s23747_s26 + $0x50] sm:$0xff]  ;;  %v22520_v32 = vld [vmem:[#allocation3 + $0x1f0] sm:$0xff]  }
 0x3c0   : > { %18548 = vmatmul.mubr.bf16.gmra.mrb[24].mxu1 %v1913_v35  ;;  %v5876_v35 = vld [vmem:[%s23747_s26 + $0x58] sm:$0xff] }
 0x3c1   : > { %19096 = vmatmul.mubr.bf16.gmra.mrb[76].mxu0 %v5207_v37  ;;  %18551 = vmatprep.mubr.bf16.mxu1 %v1914_v38  ;;  %v1940_v37 = vld [vmem:[%s23683_s22 + $0x140] sm:$0xff] }
 0x3c2   : > { %19099 = vmatprep.mubr.bf16.mxu0 %v5208_v19  ;;  %v5877_v38 = vld [vmem:[%s23747_s26 + $0x60] sm:$0xff]  ;;  %v1941_v19 = vld [vmem:[%s23683_s22 + $0x148] sm:$0xff] }
 0x3c8   : > { %18552 = vmatmul.mubr.bf16.gmra.mrb[28].mxu1 %v1915_v20  ;;  %v5878_v20 = vld [vmem:[%s23747_s26 + $0x68] sm:$0xff] }
 0x3c9   : > { %19100 = vmatmul.mubr.bf16.gmra.mrb[80].mxu0 %v5209_v21  ;;  %18555 = vmatprep.mubr.bf16.mxu1 %v1916_v1  ;;  %v1942_v21 = vld [vmem:[%s23683_s22 + $0x150] sm:$0xff] }
 0x3ca   : > { %19103 = vmatprep.mubr.bf16.mxu0 %v5210_v39  ;;  %v5879_v1 = vld [vmem:[%s23747_s26 + $0x70] sm:$0xff]  ;;  %v1943_v39 = vld [vmem:[%s23683_s22 + $0x158] sm:$0xff] }
 0x3d0   : > { %18556 = vmatmul.mubr.bf16.gmra.mrb[32].mxu1 %v1917_v40  ;;  %v5880_v40 = vld [vmem:[%s23747_s26 + $0x78] sm:$0xff] }
 0x3d1   : > { %19104 = vmatmul.mubr.bf16.gmra.mrb[84].mxu0 %v5211_v41  ;;  %18559 = vmatprep.mubr.bf16.mxu1 %v1918_v42  ;;  %v1944_v41 = vld [vmem:[%s23683_s22 + $0x160] sm:$0xff] }
 0x3d2   : > { %19107 = vmatprep.mubr.bf16.mxu0 %v5212_v43  ;;  %v5881_v42 = vld [vmem:[%s23747_s26 + $0x80] sm:$0xff]  ;;  %v22522_v43 = vld [vmem:[#allocation3 + $0x1f8] sm:$0xff]  }
 0x3d8   : > { %18560 = vmatmul.mubr.bf16.gmra.mrb[36].mxu1 %v1919_v45  ;;  %v5882_v45 = vld [vmem:[%s23747_s26 + $0x88] sm:$0xff] }
 0x3d9   : > { %19108 = vmatmul.mubr.bf16.gmra.mrb[88].mxu0 %v5213_v46  ;;  %18563 = vmatprep.mubr.bf16.mxu1 %v1920_v47  ;;  %v1946_v46 = vld [vmem:[%s23683_s22 + $0x170] sm:$0xff] }
 0x3da   : > { %19111 = vmatprep.mubr.bf16.mxu0 %v5214_v48  ;;  %v5883_v47 = vld [vmem:[%s23747_s26 + $0x90] sm:$0xff]  ;;  %v1947_v48 = vld [vmem:[%s23683_s22 + $0x178] sm:$0xff] }
 0x3e0   : > { %18564 = vmatmul.mubr.bf16.gmra.mrb[40].mxu1 %v1921_v49  ;;  %v5884_v49 = vld [vmem:[%s23747_s26 + $0x98] sm:$0xff] }
 0x3e1   : > { %19112 = vmatmul.mubr.bf16.gmra.mrb[92].mxu0 %v5215_v50  ;;  %18567 = vmatprep.mubr.bf16.mxu1 %v1922_v51  ;;  %v1948_v50 = vld [vmem:[%s23683_s22 + $0x180] sm:$0xff] }
 0x3e2   : > { %19115 = vmatprep.mubr.bf16.mxu0 %v5216_v52  ;;  %v5885_v51 = vld [vmem:[%s23747_s26 + $0xa0] sm:$0xff]  ;;  %v1949_v52 = vld [vmem:[%s23683_s22 + $0x188] sm:$0xff] }
 0x3e8   : > { %18568 = vmatmul.mubr.bf16.gmra.mrb[44].mxu1 %v1923_v53  ;;  %v5886_v53 = vld [vmem:[%s23747_s26 + $0xa8] sm:$0xff] }
 0x3e9   : > { %19116 = vmatmul.mubr.bf16.gmra.mrb[96].mxu0 %v5217_v54  ;;  %18571 = vmatprep.mubr.bf16.mxu1 %v1924_v55  ;;  %v1950_v54 = vld [vmem:[%s23683_s22 + $0x190] sm:$0xff] }
 0x3ea   : > { %19119 = vmatprep.mubr.bf16.mxu0 %v5218_v56  ;;  %v5887_v55 = vld [vmem:[%s23747_s26 + $0xb0] sm:$0xff]  ;;  %v1951_v56 = vld [vmem:[%s23683_s22 + $0x198] sm:$0xff] }
 0x3f0   : > { %18572 = vmatmul.mubr.bf16.gmra.mrb[48].mxu1 %v1925_v57  ;;  %v5888_v57 = vld [vmem:[%s23747_s26 + $0xb8] sm:$0xff] }
 0x3f1   : > { %19120 = vmatmul.mubr.bf16.gmra.mrb[100].mxu0 %v5219_v60  ;;  %18575 = vmatprep.mubr.bf16.mxu1 %v1926_v61  ;;  %v1952_v60 = vld [vmem:[%s23683_s22 + $0x1a0] sm:$0xff] }
 0x3f2   : > { %19123 = vmatprep.mubr.bf16.mxu0 %v5220_v62  ;;  %v5889_v61 = vld [vmem:[%s23747_s26 + $0xc0] sm:$0xff]  ;;  %v23800_v62 = vld [vmem:[#allocation3 + $0x200] sm:$0xff]  }
 0x3f8   : > { %18576 = vmatmul.mubr.bf16.gmra.mrb[52].mxu1 %v1927_v0  ;;  %v1953_v0 = vld [vmem:[%s23683_s22 + $0x1a8] sm:$0xff]  ;;  %s17175_s22 = sshll.u32 %s7255_s3, 3 }
 0x3f9   : > { %19124 = vmatmul.mubr.bf16.gmra.mrb[104].mxu0 %v5221_v3  ;;  %18579 = vmatprep.mubr.bf16.mxu1 %v1928_v4  ;;  %v5890_v3 = vld [vmem:[%s23747_s26 + $0xc8] sm:$0xff]  ;;  %v3077_v4 = vld [vmem:[%s23805_s30] sm:$0xff]  ;;  %s24119_s23 = scalar_lea.vmem [#allocation2], %s17175_s22 }
 0x3fa   : > { %19143 = vmatprep.mubr.bf16.mxu0 %v5865_v5  ;;  %v5891_v5 = vld [vmem:[%s23747_s26 + $0xd0] sm:$0xff] }
 0x400   : > { %18580 = vmatmul.mubr.bf16.gmra.mrb[56].mxu1 %v1929_v6  ;;  %v3078_v6 = vld [vmem:[%s23805_s30 + $0x8] sm:$0xff] }
 0x401   : > { %19144 = vmatmul.mubr.bf16.vlgmr.msra.gmra.mrb[0].mxu0 %v5866_v7  ;;  %18583 = vmatprep.mubr.bf16.mxu1 %v1930_v8  ;;  %v5892_v7 = vld [vmem:[%s23747_s26 + $0xd8] sm:$0xff]  ;;  %v3079_v8 = vld [vmem:[%s23805_s30 + $0x10] sm:$0xff] }
 0x402   : > { %19252 = vmatpush3.bf16.msra.mxu0 %v23678_v58  ;;  %19147 = vmatprep.mubr.bf16.mxu0 %v5867_v9  ;;  %v22516_v58 = vld [vmem:[#allocation3 + $0x1e0] sm:$0xff]   ;;  %v5893_v9 = vld [vmem:[%s23747_s26 + $0xe0] sm:$0xff] }
 0x403   : > { %19253 = vmatprep.subr.bf16.mxu0 %v22510_v10 }
 0x406   : > { %19254 = vmatpush3.bf16.msra.mxu0 %v22510_v10  ;;  %v22519_v10 = vld [vmem:[#allocation3 + $0xc8] sm:$0xff]  }
 0x407   : > { %19255 = vmatprep.subr.bf16.mxu0 %v22512_v11 }
 0x408   : > { %18584 = vmatmul.mubr.bf16.gmra.mrb[60].mxu1 %v1931_v12  ;;  %v3080_v12 = vld [vmem:[%s23805_s30 + $0x18] sm:$0xff] }
 0x409   : > { %19148 = vmatmul.mubr.bf16.gmra.mrb[4].mxu0 %v5868_v59  ;;  %18587 = vmatprep.mubr.bf16.mxu1 %v1932_v13  ;;  %v5894_v59 = vld [vmem:[%s23747_s26 + $0xe8] sm:$0xff]  ;;  %v3081_v13 = vld [vmem:[%s23805_s30 + $0x20] sm:$0xff] }
 0x40a   : > { %19151 = vmatprep.mubr.bf16.mxu0 %v5869_v14  ;;  %19256 = vmatpush3.bf16.msra.mxu0 %v22512_v11  ;;  %v22521_v11 = vld [vmem:[#allocation3 + $0xd0] sm:$0xff]   ;;  %v5895_v14 = vld [vmem:[%s23747_s26 + $0xf0] sm:$0xff] }
 0x40b   : > { %19257 = vmatprep.subr.bf16.mxu0 %v22514_v15 }
 0x40e   : > { %19258 = vmatpush3.bf16.msra.mxu0 %v22514_v15  ;;  %v22523_v15 = vld [vmem:[#allocation3 + $0xd8] sm:$0xff]  }
 0x40f   : > { %19259 = vmatprep.subr.bf16.mxu0 %v22516_v58 }
 0x410   : > { %18588 = vmatmul.mubr.bf16.gmra.mrb[64].mxu1 %v1933_v16  ;;  %v5896_v16 = vld [vmem:[%s23747_s26 + $0xf8] sm:$0xff] }
 0x411   : > { %19152 = vmatmul.mubr.bf16.gmra.mrb[8].mxu0 %v5870_v17  ;;  %18591 = vmatprep.mubr.bf16.mxu1 %v1934_v2  ;;  %v3083_v17 = vld [vmem:[%s23805_s30 + $0x30] sm:$0xff]  ;;  %v5897_v2 = vld [vmem:[%s23747_s26 + $0x100] sm:$0xff] }
 0x412   : > { %19155 = vmatprep.mubr.bf16.mxu0 %v5871_v18  ;;  %19260 = vmatpush3.bf16.msra.mxu0 %v22516_v58  ;;  %v3082_v58 = vld [vmem:[%s23805_s30 + $0x28] sm:$0xff]  ;;  %v22527_v18 = vld [vmem:[#allocation3 + $0xe8] sm:$0xff]  }
 0x413   : > { %19261 = vmatprep.subr.bf16.mxu0 %v22518_v22 }
 0x416   : > { %19262 = vmatpush3.bf16.msra.mxu0 %v22518_v22  ;;  %v3084_v22 = vld [vmem:[%s23805_s30 + $0x38] sm:$0xff] }
 0x417   : > { %19263 = vmatprep.subr.bf16.mxu0 %v22520_v32 }
 0x418   : > { %18592 = vmatmul.mubr.bf16.gmra.mrb[68].mxu1 %v1935_v24  ;;  %v5898_v24 = vld [vmem:[%s23747_s26 + $0x108] sm:$0xff] }
 0x419   : > { %19156 = vmatmul.mubr.bf16.gmra.mrb[12].mxu0 %v5872_v25  ;;  %18595 = vmatprep.mubr.bf16.mxu1 %v1936_v26  ;;  %v3085_v25 = vld [vmem:[%s23805_s30 + $0x40] sm:$0xff]  ;;  %v5899_v26 = vld [vmem:[%s23747_s26 + $0x110] sm:$0xff] }
 0x41a   : > { %19159 = vmatprep.mubr.bf16.mxu0 %v5873_v27  ;;  %19264 = vmatpush3.bf16.msra.mxu0 %v22520_v32  ;;  %v3086_v27 = vld [vmem:[%s23805_s30 + $0x48] sm:$0xff] }
 0x41b   : > { %19265 = vmatprep.subr.bf16.mxu0 %v22522_v43  ;;  %v5902_v32 = vld [vmem:[%s23747_s26 + $0x128] sm:$0xff] }
 0x41e   : > { %19266 = vmatpush3.bf16.msra.mxu0 %v22522_v43  ;;  %v5908_v43 = vld [vmem:[%s23747_s26 + $0x158] sm:$0xff] }
 0x41f   : > { %19375 = vmatprep.subr.bf16.mxu0 %v23800_v62 }
 0x420   : > { %18596 = vmatmul.mubr.bf16.gmra.mrb[72].mxu1 %v1937_v28  ;;  %v5900_v28 = vld [vmem:[%s23747_s26 + $0x118] sm:$0xff] }
 0x421   : > { %19160 = vmatmul.mubr.bf16.gmra.mrb[16].mxu0 %v5874_v29  ;;  %18599 = vmatprep.mubr.bf16.mxu1 %v1938_v30  ;;  %v3087_v29 = vld [vmem:[%s23805_s30 + $0x50] sm:$0xff]  ;;  %v5901_v30 = vld [vmem:[%s23747_s26 + $0x120] sm:$0xff] }
 0x422   : > { %19163 = vmatprep.mubr.bf16.mxu0 %v5875_v31  ;;  %v3088_v31 = vld [vmem:[%s23805_s30 + $0x58] sm:$0xff] }
 0x428   : > { %18600 = vmatmul.mubr.bf16.gmra.mrb[76].mxu1 %v1939_v34  ;;  %v3089_v34 = vld [vmem:[%s23805_s30 + $0x60] sm:$0xff] }
 0x429   : > { %19164 = vmatmul.mubr.bf16.gmra.mrb[20].mxu0 %v5876_v35  ;;  %18603 = vmatprep.mubr.bf16.mxu1 %v1940_v37  ;;  %v5903_v35 = vld [vmem:[%s23747_s26 + $0x130] sm:$0xff]  ;;  %v22529_v37 = vld [vmem:[#allocation3 + $0xf0] sm:$0xff]  }
 0x42a   : > { %19167 = vmatprep.mubr.bf16.mxu0 %v5877_v38  ;;  %v3090_v38 = vld [vmem:[%s23805_s30 + $0x68] sm:$0xff] }
 0x430   : > { %18604 = vmatmul.mubr.bf16.gmra.mrb[80].mxu1 %v1941_v19  ;;  %v5904_v19 = vld [vmem:[%s23747_s26 + $0x138] sm:$0xff] }
 0x431   : > { %19168 = vmatmul.mubr.bf16.gmra.mrb[24].mxu0 %v5878_v20  ;;  %18607 = vmatprep.mubr.bf16.mxu1 %v1942_v21  ;;  %v3091_v20 = vld [vmem:[%s23805_s30 + $0x70] sm:$0xff]  ;;  %v5905_v21 = vld [vmem:[%s23747_s26 + $0x140] sm:$0xff] }
 0x432   : > { %19171 = vmatprep.mubr.bf16.mxu0 %v5879_v1  ;;  %v3092_v1 = vld [vmem:[%s23805_s30 + $0x78] sm:$0xff] }
 0x438   : > { %18608 = vmatmul.mubr.bf16.gmra.mrb[84].mxu1 %v1943_v39  ;;  %v5906_v39 = vld [vmem:[%s23747_s26 + $0x148] sm:$0xff] }
 0x439   : > { %19172 = vmatmul.mubr.bf16.gmra.mrb[28].mxu0 %v5880_v40  ;;  %18611 = vmatprep.mubr.bf16.mxu1 %v1944_v41  ;;  %v3093_v40 = vld [vmem:[%s23805_s30 + $0x80] sm:$0xff]  ;;  %v5907_v41 = vld [vmem:[%s23747_s26 + $0x150] sm:$0xff] }
 0x43a   : > { %19175 = vmatprep.mubr.bf16.mxu0 %v5881_v42  ;;  %v3094_v42 = vld [vmem:[%s23805_s30 + $0x88] sm:$0xff] }
 0x440   : > { %18612 = vmatmul.mubr.bf16.gmra.mrb[88].mxu1 %v1945_v44  ;;  %v3095_v44 = vld [vmem:[%s23805_s30 + $0x90] sm:$0xff] }
 0x441   : > { %19176 = vmatmul.mubr.bf16.gmra.mrb[32].mxu0 %v5882_v45  ;;  %18615 = vmatprep.mubr.bf16.mxu1 %v1946_v46  ;;  %v5909_v45 = vld [vmem:[%s23747_s26 + $0x160] sm:$0xff]  ;;  %v22531_v46 = vld [vmem:[#allocation3 + $0xf8] sm:$0xff]  }
 0x442   : > { %19179 = vmatprep.mubr.bf16.mxu0 %v5883_v47  ;;  %v3096_v47 = vld [vmem:[%s23805_s30 + $0x98] sm:$0xff] }
 0x448   : > { %18616 = vmatmul.mubr.bf16.gmra.mrb[92].mxu1 %v1947_v48  ;;  %v23847_v48 = vld [vmem:[#allocation3 + $0x100] sm:$0xff]  }
 0x449   : > { %19180 = vmatmul.mubr.bf16.gmra.mrb[36].mxu0 %v5884_v49  ;;  %18619 = vmatprep.mubr.bf16.mxu1 %v1948_v50  ;;  %v5910_v49 = vld [vmem:[%s23747_s26 + $0x168] sm:$0xff]  ;;  %v3097_v50 = vld [vmem:[%s23805_s30 + $0xa0] sm:$0xff] }
 0x44a   : > { %19183 = vmatprep.mubr.bf16.mxu0 %v5885_v51  ;;  %v5911_v51 = vld [vmem:[%s23747_s26 + $0x170] sm:$0xff] }
 0x450   : > { %18620 = vmatmul.mubr.bf16.gmra.mrb[96].mxu1 %v1949_v52  ;;  %v7952_v52 = vld [vmem:[%s23854_s7] sm:$0xff] }
 0x451   : > { %19184 = vmatmul.mubr.bf16.gmra.mrb[40].mxu0 %v5886_v53  ;;  %18623 = vmatprep.mubr.bf16.mxu1 %v1950_v54  ;;  %v7954_v53 = vld [vmem:[%s23854_s7 + $0x10] sm:$0xff]  ;;  %v22778_v54 = vmov 0  }
 0x452   : > { %19187 = vmatprep.mubr.bf16.mxu0 %v5887_v55  ;;  %22462 = vset.pattern.permute.xlu0 %v22778_v54  ;;  %v7953_v55 = vld [vmem:[%s23854_s7 + $0x8] sm:$0xff] }
 0x453   : > { %8062 = vperm.xlu0 %22462, %v7952_v52   ;;  %22463 = vset.pattern.permute.xlu1 %v22778_v54  ;;  %v22533_v52 = vld [vmem:[#allocation3 + $0x228] sm:$0xff]   ;;  %v7980_v54 = vld [vmem:[%s23854_s7 + $0xe0] sm:$0xff] }
 0x454   : > { %8072 = vperm.xlu1 %22463, %v7954_v53   ;;  %v7979_v53 = vld [vmem:[%s23854_s7 + $0xd8] sm:$0xff] }
 0x457   : > { %8067 = vperm.xlu0 %22462, %v7953_v55   ;;  %v7981_v55 = vld [vmem:[%s23854_s7 + $0xe8] sm:$0xff] }
 0x458   : > { %18624 = vmatmul.mubr.bf16.gmra.mrb[100].mxu1 %v1951_v56  ;;  %v3098_v56 = vld [vmem:[%s23805_s30 + $0xa8] sm:$0xff] }
 0x459   : > { %19188 = vmatmul.mubr.bf16.gmra.mrb[44].mxu0 %v5888_v57  ;;  %18627 = vmatprep.mubr.bf16.mxu1 %v1952_v60  ;;  %v5912_v57 = vld [vmem:[%s23747_s26 + $0x178] sm:$0xff]  ;;  %v3099_v60 = vld [vmem:[%s23805_s30 + $0xb0] sm:$0xff] }
 0x45a   : > { %19191 = vmatprep.mubr.bf16.mxu0 %v5889_v61  ;;  %v5913_v61 = vld [vmem:[%s23747_s26 + $0x180] sm:$0xff] }
 0x460   : > { %18628 = vmatmul.mubr.bf16.gmra.mrb[104].mxu1 %v1953_v0  ;;  %v7955_v0 = vld [vmem:[%s23854_s7 + $0x18] sm:$0xff] }
 0x461   : > { %19192 = vmatmul.mubr.bf16.gmra.mrb[48].mxu0 %v5890_v3  ;;  %18647 = vmatprep.mubr.bf16.mxu1 %v3077_v4  ;;  %v7956_v3 = vld [vmem:[%s23854_s7 + $0x20] sm:$0xff]  ;;  %v7957_v4 = vld [vmem:[%s23854_s7 + $0x28] sm:$0xff] }
 0x462   : > { %19195 = vmatprep.mubr.bf16.mxu0 %v5891_v5  ;;  %8077 = vperm.xlu1 %22463, %v7955_v0   ;;  %v7958_v5 = vld [vmem:[%s23854_s7 + $0x30] sm:$0xff]  ;;  %v6570_v0 = vld [vmem:[%s23890_s16 + $0x40] sm:$0xff] }
 0x463   : > { %8082 = vperm.xlu0 %22462, %v7956_v3   ;;  %v7983_v3 = vld [vmem:[%s23854_s7 + $0xf8] sm:$0xff] }
 0x466   : > { %8087 = vperm.xlu1 %22463, %v7957_v4   ;;  %v7984_v4 = vld [vmem:[%s23854_s7 + $0x100] sm:$0xff] }
 0x467   : > { %8092 = vperm.xlu0 %22462, %v7958_v5   ;;  %v7985_v5 = vld [vmem:[%s23854_s7 + $0x108] sm:$0xff] }
 0x468   : > { %18648 = vmatmul.mubr.bf16.vlgmr.msra.gmra.mrb[0].mxu1 %v3078_v6  ;;  %v3100_v6 = vld [vmem:[%s23805_s30 + $0xb8] sm:$0xff] }
 0x469   : > { %19196 = vmatmul.mubr.bf16.gmra.mrb[52].mxu0 %v5892_v7  ;;  %18651 = vmatprep.mubr.bf16.mxu1 %v3079_v8  ;;  %v5914_v7 = vld [vmem:[%s23747_s26 + $0x188] sm:$0xff]  ;;  %v3101_v8 = vld [vmem:[%s23805_s30 + $0xc0] sm:$0xff] }
 0x46a   : > { %19199 = vmatprep.mubr.bf16.mxu0 %v5893_v9  ;;  %18756 = vmatpush3.bf16.msra.mxu1 %v23741_v63  ;;  %v22525_v63 = vld [vmem:[#allocation3 + $0xe0] sm:$0xff]  }
 0x46b   : > { %18757 = vmatprep.subr.bf16.mxu1 %v22519_v10  ;;  %v5915_v9 = vld [vmem:[%s23747_s26 + $0x190] sm:$0xff] }
 0x46e   : > { %18758 = vmatpush3.bf16.msra.mxu1 %v22519_v10  ;;  %v7959_v10 = vld [vmem:[%s23854_s7 + $0x38] sm:$0xff] }
 0x46f   : > { %18759 = vmatprep.subr.bf16.mxu1 %v22521_v11  ;;  %8097 = vperm.xlu1 %22463, %v7959_v10   ;;  %v6572_v10 = vld [vmem:[%s23890_s16 + $0x50] sm:$0xff] }
 0x470   : > { %18652 = vmatmul.mubr.bf16.gmra.mrb[4].mxu1 %v3080_v12  ;;  %v7961_v12 = vld [vmem:[%s23854_s7 + $0x48] sm:$0xff] }
 0x471   : > { %19200 = vmatmul.mubr.bf16.gmra.mrb[56].mxu0 %v5894_v59  ;;  %18655 = vmatprep.mubr.bf16.mxu1 %v3081_v13  ;;  %v7962_v59 = vld [vmem:[%s23854_s7 + $0x50] sm:$0xff]  ;;  %v3102_v13 = vld [vmem:[%s23805_s30 + $0xc8] sm:$0xff] }
 0x472   : > { %19203 = vmatprep.mubr.bf16.mxu0 %v5895_v14  ;;  %18760 = vmatpush3.bf16.msra.mxu1 %v22521_v11  ;;  %v7960_v11 = vld [vmem:[%s23854_s7 + $0x40] sm:$0xff]  ;;  %v5916_v14 = vld [vmem:[%s23747_s26 + $0x198] sm:$0xff] }
 0x473   : > { %18761 = vmatprep.subr.bf16.mxu1 %v22523_v15  ;;  %8102 = vperm.xlu0 %22462, %v7960_v11   ;;  %v7987_v11 = vld [vmem:[%s23854_s7 + $0x118] sm:$0xff] }
 0x474   : > { %8107 = vperm.xlu1 %22463, %v7961_v12   ;;  %v7988_v12 = vld [vmem:[%s23854_s7 + $0x120] sm:$0xff] }
 0x476   : > { %18762 = vmatpush3.bf16.msra.mxu1 %v22523_v15  ;;  %v3103_v15 = vld [vmem:[%s23805_s30 + $0xd0] sm:$0xff] }
 0x477   : > { %18763 = vmatprep.subr.bf16.mxu1 %v22525_v63  ;;  %8112 = vperm.xlu0 %22462, %v7962_v59   ;;  %v22534_v59 = vld [vmem:[#allocation3 + $0x230] sm:$0xff]  }
 0x478   : > { %18656 = vmatmul.mubr.bf16.gmra.mrb[8].mxu1 %v3082_v58  ;;  %v7963_v58 = vld [vmem:[%s23854_s7 + $0x58] sm:$0xff] }
 0x479   : > { %19204 = vmatmul.mubr.bf16.gmra.mrb[60].mxu0 %v5896_v16  ;;  %18659 = vmatprep.mubr.bf16.mxu1 %v3083_v17  ;;  %v7964_v16 = vld [vmem:[%s23854_s7 + $0x60] sm:$0xff]  ;;  %v7965_v17 = vld [vmem:[%s23854_s7 + $0x68] sm:$0xff] }
 0x47a   : > { %19207 = vmatprep.mubr.bf16.mxu0 %v5897_v2  ;;  %18764 = vmatpush3.bf16.msra.mxu1 %v22525_v63  ;;  %v5917_v63 = vld [vmem:[%s23747_s26 + $0x1a0] sm:$0xff]  ;;  %v7966_v2 = vld [vmem:[%s23854_s7 + $0x70] sm:$0xff] }
 0x47b   : > { %18765 = vmatprep.subr.bf16.mxu1 %v22527_v18  ;;  %8117 = vperm.xlu1 %22463, %v7963_v58   ;;  %v3117_v58 = vld [vmem:[%s23805_s30 + $0x140] sm:$0xff] }
 0x47c   : > { %8122 = vperm.xlu0 %22462, %v7964_v16   ;;  %v6574_v16 = vld [vmem:[%s23890_s16 + $0x60] sm:$0xff] }
 0x47e   : > { %18766 = vmatpush3.bf16.msra.mxu1 %v22527_v18  ;;  %v3104_v18 = vld [vmem:[%s23805_s30 + $0xd8] sm:$0xff] }
 0x47f   : > { %18767 = vmatprep.subr.bf16.mxu1 %v22529_v37  ;;  %8127 = vperm.xlu1 %22463, %v7965_v17   ;;  %v7991_v17 = vld [vmem:[%s23854_s7 + $0x138] sm:$0xff] }
 0x480   : > { %18660 = vmatmul.mubr.bf16.gmra.mrb[12].mxu1 %v3084_v22  ;;  %v5918_v22 = vld [vmem:[%s23747_s26 + $0x1a8] sm:$0xff]  ;;  %8132 = vperm.xlu0 %22462, %v7966_v2   ;;  %v7992_v2 = vld [vmem:[%s23854_s7 + $0x140] sm:$0xff] }
 0x481   : > { %19208 = vmatmul.mubr.bf16.gmra.mrb[64].mxu0 %v5898_v24  ;;  %18663 = vmatprep.mubr.bf16.mxu1 %v3085_v25  ;;  %v3105_v24 = vld [vmem:[%s23805_s30 + $0xe0] sm:$0xff] }
 0x482   : > { %19211 = vmatprep.mubr.bf16.mxu0 %v5899_v26  ;;  %18768 = vmatpush3.bf16.msra.mxu1 %v22529_v37  ;;  %v6562_v25 = vld [vmem:[%s23890_s16] sm:$0xff]  ;;  %v7967_v26 = vld [vmem:[%s23854_s7 + $0x78] sm:$0xff] }
 0x483   : > { %18769 = vmatprep.subr.bf16.mxu1 %v22531_v46  ;;  %8137 = vperm.xlu1 %22463, %v7967_v26   ;;  %v7971_v37 = vld [vmem:[%s23854_s7 + $0x98] sm:$0xff]  ;;  %v3119_v26 = vld [vmem:[%s23805_s30 + $0x150] sm:$0xff] }
 0x486   : > { %18770 = vmatpush3.bf16.msra.mxu1 %v22531_v46  ;;  %v3110_v46 = vld [vmem:[%s23805_s30 + $0x108] sm:$0xff] }
 0x487   : > { %20615 = vmatprep.subr.bf16.mxu1 %v23847_v48 }
 0x488   : > { %18664 = vmatmul.mubr.bf16.gmra.mrb[16].mxu1 %v3086_v27  ;;  %v7968_v27 = vld [vmem:[%s23854_s7 + $0x80] sm:$0xff] }
 0x489   : > { %19212 = vmatmul.mubr.bf16.gmra.mrb[68].mxu0 %v5900_v28  ;;  %18667 = vmatprep.mubr.bf16.mxu1 %v3087_v29  ;;  %v7969_v28 = vld [vmem:[%s23854_s7 + $0x88] sm:$0xff]  ;;  %v7970_v29 = vld [vmem:[%s23854_s7 + $0x90] sm:$0xff] }
 0x48a   : > { %19215 = vmatprep.mubr.bf16.mxu0 %v5901_v30  ;;  %8142 = vperm.xlu0 %22462, %v7968_v27   ;;  %v3106_v30 = vld [vmem:[%s23805_s30 + $0xe8] sm:$0xff]  ;;  %v6576_v27 = vld [vmem:[%s23890_s16 + $0x70] sm:$0xff] }
 0x48b   : > { %8147 = vperm.xlu1 %22463, %v7969_v28   ;;  %v7995_v28 = vld [vmem:[%s23854_s7 + $0x158] sm:$0xff] }
 0x48e   : > { %8152 = vperm.xlu0 %22462, %v7970_v29   ;;  %v7996_v29 = vld [vmem:[%s23854_s7 + $0x160] sm:$0xff] }
 0x48f   : > { %8157 = vperm.xlu1 %22463, %v7971_v37   ;;  %v6578_v37 = vld [vmem:[%s23890_s16 + $0x80] sm:$0xff] }
 0x490   : > { %18668 = vmatmul.mubr.bf16.gmra.mrb[20].mxu1 %v3088_v31  ;;  %v6563_v31 = vld [vmem:[%s23890_s16 + $0x8] sm:$0xff] }
 0x491   : > { %19216 = vmatmul.mubr.bf16.gmra.mrb[72].mxu0 %v5902_v32  ;;  %18671 = vmatprep.mubr.bf16.mxu1 %v3089_v34  ;;  %v3107_v32 = vld [vmem:[%s23805_s30 + $0xf0] sm:$0xff] }
 0x492   : > { %19219 = vmatprep.mubr.bf16.mxu0 %v5903_v35  ;;  %v6564_v34 = vld [vmem:[%s23890_s16 + $0x10] sm:$0xff]  ;;  %v22526_v35 = vld [vmem:[#allocation3 + $0x208] sm:$0xff]  }
 0x498   : > { %18672 = vmatmul.mubr.bf16.gmra.mrb[24].mxu1 %v3090_v38  ;;  %v7972_v38 = vld [vmem:[%s23854_s7 + $0xa0] sm:$0xff] }
 0x499   : > { %19220 = vmatmul.mubr.bf16.gmra.mrb[76].mxu0 %v5904_v19  ;;  %18675 = vmatprep.mubr.bf16.mxu1 %v3091_v20  ;;  %v22528_v19 = vld [vmem:[#allocation3 + $0x210] sm:$0xff]   ;;  %v7973_v20 = vld [vmem:[%s23854_s7 + $0xa8] sm:$0xff] }
 0x49a   : > { %19223 = vmatprep.mubr.bf16.mxu0 %v5905_v21  ;;  %8162 = vperm.xlu0 %22462, %v7972_v38   ;;  %v3108_v21 = vld [vmem:[%s23805_s30 + $0xf8] sm:$0xff] }
 0x49b   : > { %8167 = vperm.xlu1 %22463, %v7973_v20   ;;  %v7999_v38 = vld [vmem:[%s23854_s7 + $0x178] sm:$0xff]  ;;  %v22535_v20 = vld [vmem:[#allocation3 + $0x238] sm:$0xff]  }
 0x4a0   : > { %18676 = vmatmul.mubr.bf16.gmra.mrb[28].mxu1 %v3092_v1  ;;  %v7974_v1 = vld [vmem:[%s23854_s7 + $0xb0] sm:$0xff] }
 0x4a1   : > { %19224 = vmatmul.mubr.bf16.gmra.mrb[80].mxu0 %v5906_v39  ;;  %18679 = vmatprep.mubr.bf16.mxu1 %v3093_v40  ;;  %v6565_v39 = vld [vmem:[%s23890_s16 + $0x18] sm:$0xff]  ;;  %v3109_v40 = vld [vmem:[%s23805_s30 + $0x100] sm:$0xff] }
 0x4a2   : > { %19227 = vmatprep.mubr.bf16.mxu0 %v5907_v41  ;;  %v6566_v41 = vld [vmem:[%s23890_s16 + $0x20] sm:$0xff]  ;;  %8172 = vperm.xlu0 %22462, %v7974_v1   ;;  %v3122_v1 = vld [vmem:[%s23805_s30 + $0x168] sm:$0xff] }
 0x4a8   : > { %18680 = vmatmul.mubr.bf16.gmra.mrb[32].mxu1 %v3094_v42  ;;  %v22530_v42 = vld [vmem:[#allocation3 + $0x218] sm:$0xff]  }
 0x4a9   : > { %19228 = vmatmul.mubr.bf16.gmra.mrb[84].mxu0 %v5908_v43  ;;  %18683 = vmatprep.mubr.bf16.mxu1 %v3095_v44  ;;  %v7976_v43 = vld [vmem:[%s23854_s7 + $0xc0] sm:$0xff]  ;;  %v22532_v44 = vld [vmem:[#allocation3 + $0x220] sm:$0xff]  }
 0x4aa   : > { %19231 = vmatprep.mubr.bf16.mxu0 %v5909_v45  ;;  %8182 = vperm.xlu0 %22462, %v7976_v43   ;;  %v7977_v45 = vld [vmem:[%s23854_s7 + $0xc8] sm:$0xff]  ;;  %v8004_v43 = vld [vmem:[%s23854_s7 + $0x1a0] sm:$0xff] }
 0x4b0   : > { %18684 = vmatmul.mubr.bf16.gmra.mrb[36].mxu1 %v3096_v47  ;;  %v7978_v47 = vld [vmem:[%s23854_s7 + $0xd0] sm:$0xff] }
 0x4b1   : > { %19232 = vmatmul.mubr.bf16.gmra.mrb[88].mxu0 %v5910_v49  ;;  %18687 = vmatprep.mubr.bf16.mxu1 %v3097_v50  ;;  %v6567_v49 = vld [vmem:[%s23890_s16 + $0x28] sm:$0xff]  ;;  %v3111_v50 = vld [vmem:[%s23805_s30 + $0x110] sm:$0xff] }
 0x4b2   : > { %19235 = vmatprep.mubr.bf16.mxu0 %v5911_v51  ;;  %v6568_v51 = vld [vmem:[%s23890_s16 + $0x30] sm:$0xff]  ;;  %8192 = vperm.xlu0 %22462, %v7978_v47   ;;  %v6581_v47 = vld [vmem:[%s23890_s16 + $0x98] sm:$0xff] }
 0x4b6   : > { %8202 = vperm.xlu0 %22462, %v7980_v54   ;;  %v3126_v54 = vld [vmem:[%s23805_s30 + $0x188] sm:$0xff] }
 0x4b8   : > { %18688 = vmatmul.mubr.bf16.gmra.mrb[40].mxu1 %v3098_v56  ;;  %v3112_v56 = vld [vmem:[%s23805_s30 + $0x118] sm:$0xff] }
 0x4b9   : > { %19236 = vmatmul.mubr.bf16.gmra.mrb[92].mxu0 %v5912_v57  ;;  %18691 = vmatprep.mubr.bf16.mxu1 %v3099_v60  ;;  %v7982_v57 = vld [vmem:[%s23854_s7 + $0xf0] sm:$0xff]  ;;  %v6569_v60 = vld [vmem:[%s23890_s16 + $0x38] sm:$0xff] }
 0x4ba   : > { %19239 = vmatprep.mubr.bf16.mxu0 %v5913_v61  ;;  %v3113_v61 = vld [vmem:[%s23805_s30 + $0x120] sm:$0xff]  ;;  %8212 = vperm.xlu0 %22462, %v7982_v57   ;;  %v3127_v57 = vld [vmem:[%s23805_s30 + $0x190] sm:$0xff] }
 0x4be   : > { %8222 = vperm.xlu0 %22462, %v7984_v4   ;;  %v3128_v4 = vld [vmem:[%s23805_s30 + $0x198] sm:$0xff] }
 0x4c0   : > { %18692 = vmatmul.mubr.bf16.gmra.mrb[44].mxu1 %v3100_v6  ;;  %v3114_v6 = vld [vmem:[%s23805_s30 + $0x128] sm:$0xff] }
 0x4c1   : > { %19240 = vmatmul.mubr.bf16.gmra.mrb[96].mxu0 %v5914_v7  ;;  %18695 = vmatprep.mubr.bf16.mxu1 %v3101_v8  ;;  %v7986_v7 = vld [vmem:[%s23854_s7 + $0x110] sm:$0xff]  ;;  %v6571_v8 = vld [vmem:[%s23890_s16 + $0x48] sm:$0xff] }
 0x4c2   : > { %19243 = vmatprep.mubr.bf16.mxu0 %v5915_v9  ;;  %v3115_v9 = vld [vmem:[%s23805_s30 + $0x130] sm:$0xff]  ;;  %8232 = vperm.xlu0 %22462, %v7986_v7   ;;  %v3129_v7 = vld [vmem:[%s23805_s30 + $0x1a0] sm:$0xff] }
 0x4c6   : > { %8242 = vperm.xlu0 %22462, %v7988_v12   ;;  %v3130_v12 = vld [vmem:[%s23805_s30 + $0x1a8] sm:$0xff] }
 0x4c8   : > { %18696 = vmatmul.mubr.bf16.gmra.mrb[48].mxu1 %v3102_v13  ;;  %v7989_v13 = vld [vmem:[%s23854_s7 + $0x128] sm:$0xff] }
 0x4c9   : > { %19244 = vmatmul.mubr.bf16.gmra.mrb[100].mxu0 %v5916_v14  ;;  %18699 = vmatprep.mubr.bf16.mxu1 %v3103_v15  ;;  %v3116_v14 = vld [vmem:[%s23805_s30 + $0x138] sm:$0xff]  ;;  %v7990_v15 = vld [vmem:[%s23854_s7 + $0x130] sm:$0xff] }
 0x4ca   : > { %19247 = vmatprep.mubr.bf16.mxu0 %v5917_v63  ;;  %v6573_v63 = vld [vmem:[%s23890_s16 + $0x58] sm:$0xff]  ;;  %8252 = vperm.xlu0 %22462, %v7990_v15   ;;  %v6588_v15 = vld [vmem:[%s23890_s16 + $0xd0] sm:$0xff] }
 0x4ce   : > { %8262 = vperm.xlu0 %22462, %v7992_v2   ;;  %v8022_v2 = vld [vmem:[%s23854_s7 + $0x230] sm:$0xff] }
 0x4d0   : > { %18700 = vmatmul.mubr.bf16.gmra.mrb[52].mxu1 %v3104_v18  ;;  %v7993_v18 = vld [vmem:[%s23854_s7 + $0x148] sm:$0xff] }
 0x4d1   : > { %19248 = vmatmul.mubr.bf16.gmra.mrb[104].mxu0 %v5918_v22  ;;  %18703 = vmatprep.mubr.bf16.mxu1 %v3105_v24  ;;  %v3118_v22 = vld [vmem:[%s23805_s30 + $0x148] sm:$0xff]  ;;  %v7994_v24 = vld [vmem:[%s23854_s7 + $0x150] sm:$0xff] }
 0x4d2   : > { %19267 = vmatprep.mubr.bf16.mxu0 %v6562_v25  ;;  %v6575_v25 = vld [vmem:[%s23890_s16 + $0x68] sm:$0xff]  ;;  %8272 = vperm.xlu0 %22462, %v7994_v24   ;;  %v6590_v24 = vld [vmem:[%s23890_s16 + $0xe0] sm:$0xff] }
 0x4d6   : > { %8282 = vperm.xlu0 %22462, %v7996_v29   ;;  %v3777_v29 = vld [vmem:[%s23997_s21 + $0x18] sm:$0xff] }
 0x4d8   : > { %18704 = vmatmul.mubr.bf16.gmra.mrb[56].mxu1 %v3106_v30  ;;  %v7997_v30 = vld [vmem:[%s23854_s7 + $0x168] sm:$0xff] }
 0x4d9   : > { %19268 = vmatmul.mubr.bf16.vlgmr.msra.gmra.mrb[0].mxu0 %v6563_v31  ;;  %18707 = vmatprep.mubr.bf16.mxu1 %v3107_v32  ;;  %v3120_v31 = vld [vmem:[%s23805_s30 + $0x158] sm:$0xff]  ;;  %v7998_v32 = vld [vmem:[%s23854_s7 + $0x170] sm:$0xff] }
 0x4da   : > { %19376 = vmatpush3.bf16.msra.mxu0 %v23800_v62  ;;  %19271 = vmatprep.mubr.bf16.mxu0 %v6564_v34  ;;  %v7975_v62 = vld [vmem:[%s23854_s7 + $0xb8] sm:$0xff] }
 0x4db   : > { %19377 = vmatprep.subr.bf16.mxu0 %v22526_v35  ;;  %8177 = vperm.xlu1 %22463, %v7975_v62   ;;  %v6577_v34 = vld [vmem:[%s23890_s16 + $0x78] sm:$0xff] }
 0x4dc   : > { %8292 = vperm.xlu0 %22462, %v7998_v32   ;;  %v8003_v62 = vld [vmem:[%s23854_s7 + $0x198] sm:$0xff]  ;;  %v3778_v32 = vld [vmem:[%s23997_s21 + $0x20] sm:$0xff] }
 0x4de   : > { %19378 = vmatpush3.bf16.msra.mxu0 %v22526_v35  ;;  %v3121_v35 = vld [vmem:[%s23805_s30 + $0x160] sm:$0xff] }
 0x4df   : > { %19379 = vmatprep.subr.bf16.mxu0 %v22528_v19  ;;  %8187 = vperm.xlu1 %22463, %v7977_v45   ;;  %v3124_v45 = vld [vmem:[%s23805_s30 + $0x178] sm:$0xff] }
 0x4e0   : > { %18708 = vmatmul.mubr.bf16.gmra.mrb[60].mxu1 %v3108_v21  ;;  %v8001_v21 = vld [vmem:[%s23854_s7 + $0x188] sm:$0xff] }
 0x4e1   : > { %19272 = vmatmul.mubr.bf16.gmra.mrb[4].mxu0 %v6565_v39  ;;  %18711 = vmatprep.mubr.bf16.mxu1 %v3109_v40  ;;  %v8002_v39 = vld [vmem:[%s23854_s7 + $0x190] sm:$0xff]  ;;  %v6579_v40 = vld [vmem:[%s23890_s16 + $0x88] sm:$0xff] }
 0x4e2   : > { %19275 = vmatprep.mubr.bf16.mxu0 %v6566_v41  ;;  %19380 = vmatpush3.bf16.msra.mxu0 %v22528_v19  ;;  %v8000_v19 = vld [vmem:[%s23854_s7 + $0x180] sm:$0xff]  ;;  %v3123_v41 = vld [vmem:[%s23805_s30 + $0x170] sm:$0xff] }
 0x4e3   : > { %19381 = vmatprep.subr.bf16.mxu0 %v22530_v42  ;;  %8197 = vperm.xlu1 %22463, %v7979_v53   ;;  %v8009_v53 = vld [vmem:[%s23854_s7 + $0x1c8] sm:$0xff] }
 0x4e4   : > { %8302 = vperm.xlu0 %22462, %v8000_v19   ;;  %v8029_v19 = vld [vmem:[%s23854_s7 + $0x268] sm:$0xff] }
 0x4e6   : > { %19382 = vmatpush3.bf16.msra.mxu0 %v22530_v42  ;;  %v6580_v42 = vld [vmem:[%s23890_s16 + $0x90] sm:$0xff] }
 0x4e7   : > { %19383 = vmatprep.subr.bf16.mxu0 %v22532_v44  ;;  %8207 = vperm.xlu1 %22463, %v7981_v55   ;;  %v8010_v55 = vld [vmem:[%s23854_s7 + $0x1d0] sm:$0xff] }
 0x4e8   : > { %18712 = vmatmul.mubr.bf16.gmra.mrb[64].mxu1 %v3110_v46  ;;  %8312 = vperm.xlu0 %22462, %v8002_v39   ;;  %v8006_v46 = vld [vmem:[%s23854_s7 + $0x1b0] sm:$0xff] }
 0x4e9   : > { %19276 = vmatmul.mubr.bf16.gmra.mrb[8].mxu0 %v6567_v49  ;;  %18715 = vmatprep.mubr.bf16.mxu1 %v3111_v50  ;;  %v3125_v49 = vld [vmem:[%s23805_s30 + $0x180] sm:$0xff]  ;;  %v3780_v39 = vld [vmem:[%s23997_s21 + $0x30] sm:$0xff] }
 0x4ea   : > { %19279 = vmatprep.mubr.bf16.mxu0 %v6568_v51  ;;  %19384 = vmatpush3.bf16.msra.mxu0 %v22532_v44  ;;  %v8005_v44 = vld [vmem:[%s23854_s7 + $0x1a8] sm:$0xff]  ;;  %v6582_v50 = vld [vmem:[%s23890_s16 + $0xa0] sm:$0xff]  ;;  %v8007_v51 = vld [vmem:[%s23854_s7 + $0x1b8] sm:$0xff] }
 0x4eb   : > { %19385 = vmatprep.subr.bf16.mxu0 %v22533_v52  ;;  %8217 = vperm.xlu1 %22463, %v7983_v3   ;;  %v8013_v3 = vld [vmem:[%s23854_s7 + $0x1e8] sm:$0xff] }
 0x4ec   : > { %8322 = vperm.xlu0 %22462, %v8004_v43   ;;  %v22541_v43 = vld [vmem:[#allocation3 + $0x128] sm:$0xff]  }
 0x4ee   : > { %19386 = vmatpush3.bf16.msra.mxu0 %v22533_v52  ;;  %v8008_v52 = vld [vmem:[%s23854_s7 + $0x1c0] sm:$0xff] }
 0x4ef   : > { %8227 = vperm.xlu1 %22463, %v7985_v5   ;;  %19387 = vmatprep.subr.bf16.mxu0 %v22534_v59  ;;  %v8014_v5 = vld [vmem:[%s23854_s7 + $0x1f0] sm:$0xff] }
 0x4f0   : > { %18716 = vmatmul.mubr.bf16.gmra.mrb[68].mxu1 %v3112_v56  ;;  %8332 = vperm.xlu0 %22462, %v8006_v46   ;;  %v6583_v56 = vld [vmem:[%s23890_s16 + $0xa8] sm:$0xff]  ;;  %v8034_v46 = vld [vmem:[%s23854_s7 + $0x290] sm:$0xff] }
 0x4f1   : > { %19280 = vmatmul.mubr.bf16.gmra.mrb[12].mxu0 %v6569_v60  ;;  %18719 = vmatprep.mubr.bf16.mxu1 %v3113_v61  ;;  %v6584_v60 = vld [vmem:[%s23890_s16 + $0xb0] sm:$0xff]  ;;  %v8011_v61 = vld [vmem:[%s23854_s7 + $0x1d8] sm:$0xff] }
 0x4f2   : > { %19283 = vmatprep.mubr.bf16.mxu0 %v6570_v0  ;;  %19388 = vmatpush3.bf16.msra.mxu0 %v22534_v59  ;;  %v8012_v0 = vld [vmem:[%s23854_s7 + $0x1e0] sm:$0xff]  ;;  %v8018_v59 = vld [vmem:[%s23854_s7 + $0x210] sm:$0xff] }
 0x4f3   : > { %8237 = vperm.xlu1 %22463, %v7987_v11   ;;  %19389 = vmatprep.subr.bf16.mxu0 %v22535_v20  ;;  %v8017_v11 = vld [vmem:[%s23854_s7 + $0x208] sm:$0xff] }
 0x4f4   : > { %8342 = vperm.xlu0 %22462, %v8008_v52   ;;  %v8035_v52 = vld [vmem:[%s23854_s7 + $0x298] sm:$0xff] }
 0x4f6   : > { %19390 = vmatpush3.bf16.msra.mxu0 %v22535_v20  ;;  %v3779_v20 = vld [vmem:[%s23997_s21 + $0x28] sm:$0xff] }
 0x4f7   : > { %8247 = vperm.xlu1 %22463, %v7989_v13   ;;  %v6587_v13 = vld [vmem:[%s23890_s16 + $0xc8] sm:$0xff] }
 0x4f8   : > { %18720 = vmatmul.mubr.bf16.gmra.mrb[72].mxu1 %v3114_v6  ;;  %8352 = vperm.xlu0 %22462, %v8010_v55   ;;  %v6585_v6 = vld [vmem:[%s23890_s16 + $0xb8] sm:$0xff]  ;;  %v8037_v55 = vld [vmem:[%s23854_s7 + $0x2a8] sm:$0xff] }
 0x4f9   : > { %19284 = vmatmul.mubr.bf16.gmra.mrb[16].mxu0 %v6571_v8  ;;  %18723 = vmatprep.mubr.bf16.mxu1 %v3115_v9  ;;  %v6586_v8 = vld [vmem:[%s23890_s16 + $0xc0] sm:$0xff]  ;;  %v8015_v9 = vld [vmem:[%s23854_s7 + $0x1f8] sm:$0xff] }
 0x4fa   : > { %19287 = vmatprep.mubr.bf16.mxu0 %v6572_v10  ;;  %v8016_v10 = vld [vmem:[%s23854_s7 + $0x200] sm:$0xff] }
 0x4fb   : > { %8257 = vperm.xlu1 %22463, %v7991_v17   ;;  %v3775_v17 = vld [vmem:[%s23997_s21 + $0x8] sm:$0xff] }
 0x4fc   : > { %8362 = vperm.xlu0 %22462, %v8012_v0   ;;  %v6598_v0 = vld [vmem:[%s23890_s16 + $0x120] sm:$0xff] }
 0x4ff   : > { %8267 = vperm.xlu1 %22463, %v7993_v18   ;;  %v6589_v18 = vld [vmem:[%s23890_s16 + $0xd8] sm:$0xff] }
 0x500   : > { %18724 = vmatmul.mubr.bf16.gmra.mrb[76].mxu1 %v3116_v14  ;;  %8372 = vperm.xlu0 %22462, %v8014_v5   ;;  %v3774_v14 = vld [vmem:[%s23997_s21] sm:$0xff]  ;;  %v8041_v5 = vld [vmem:[%s23854_s7 + $0x2c8] sm:$0xff] }
 0x501   : > { %19288 = vmatmul.mubr.bf16.gmra.mrb[20].mxu0 %v6573_v63  ;;  %18727 = vmatprep.mubr.bf16.mxu1 %v3117_v58  ;;  %v8019_v63 = vld [vmem:[%s23854_s7 + $0x218] sm:$0xff]  ;;  %v8020_v58 = vld [vmem:[%s23854_s7 + $0x220] sm:$0xff] }
 0x502   : > { %19291 = vmatprep.mubr.bf16.mxu0 %v6574_v16  ;;  %v8021_v16 = vld [vmem:[%s23854_s7 + $0x228] sm:$0xff] }
 0x503   : > { %8277 = vperm.xlu1 %22463, %v7995_v28   ;;  %v8025_v28 = vld [vmem:[%s23854_s7 + $0x248] sm:$0xff] }
 0x504   : > { %8382 = vperm.xlu0 %22462, %v8016_v10   ;;  %v6600_v10 = vld [vmem:[%s23890_s16 + $0x130] sm:$0xff] }
 0x507   : > { %8287 = vperm.xlu1 %22463, %v7997_v30   ;;  %v8026_v30 = vld [vmem:[%s23854_s7 + $0x250] sm:$0xff] }
 0x508   : > { %18728 = vmatmul.mubr.bf16.gmra.mrb[80].mxu1 %v3118_v22  ;;  %8392 = vperm.xlu0 %22462, %v8018_v59   ;;  %v3776_v22 = vld [vmem:[%s23997_s21 + $0x10] sm:$0xff]  ;;  %v8045_v59 = vld [vmem:[%s23854_s7 + $0x2e8] sm:$0xff] }
 0x509   : > { %19292 = vmatmul.mubr.bf16.gmra.mrb[24].mxu0 %v6575_v25  ;;  %18731 = vmatprep.mubr.bf16.mxu1 %v3119_v26  ;;  %v8023_v25 = vld [vmem:[%s23854_s7 + $0x238] sm:$0xff]  ;;  %v8024_v26 = vld [vmem:[%s23854_s7 + $0x240] sm:$0xff] }
 0x50a   : > { %19295 = vmatprep.mubr.bf16.mxu0 %v6576_v27  ;;  %v22537_v27 = vld [vmem:[#allocation3 + $0x108] sm:$0xff]  }
 0x50b   : > { %8297 = vperm.xlu1 %22463, %v7999_v38   ;;  %v22539_v38 = vld [vmem:[#allocation3 + $0x118] sm:$0xff]  }
 0x50c   : > { %8402 = vperm.xlu0 %22462, %v8020_v58   ;;  %v6602_v58 = vld [vmem:[%s23890_s16 + $0x140] sm:$0xff] }
 0x50f   : > { %8307 = vperm.xlu1 %22463, %v8001_v21   ;;  %v8030_v21 = vld [vmem:[%s23854_s7 + $0x270] sm:$0xff] }
 0x510   : > { %18732 = vmatmul.mubr.bf16.gmra.mrb[84].mxu1 %v3120_v31  ;;  %8412 = vperm.xlu0 %22462, %v8022_v2   ;;  %v6591_v31 = vld [vmem:[%s23890_s16 + $0xe8] sm:$0xff]  ;;  %v8048_v2 = vld [vmem:[%s23854_s7 + $0x300] sm:$0xff] }
 0x511   : > { %19296 = vmatmul.mubr.bf16.gmra.mrb[28].mxu0 %v6577_v34  ;;  %18735 = vmatprep.mubr.bf16.mxu1 %v3121_v35  ;;  %v6592_v34 = vld [vmem:[%s23890_s16 + $0xf0] sm:$0xff]  ;;  %v22538_v35 = vld [vmem:[#allocation3 + $0x110] sm:$0xff]  }
 0x512   : > { %19299 = vmatprep.mubr.bf16.mxu0 %v6578_v37  ;;  %v8028_v37 = vld [vmem:[%s23854_s7 + $0x260] sm:$0xff] }
 0x513   : > { %8317 = vperm.xlu1 %22463, %v8003_v62   ;;  %v8032_v62 = vld [vmem:[%s23854_s7 + $0x280] sm:$0xff] }
 0x514   : > { %8422 = vperm.xlu0 %22462, %v8024_v26   ;;  %v6603_v26 = vld [vmem:[%s23890_s16 + $0x148] sm:$0xff] }
 0x517   : > { %8327 = vperm.xlu1 %22463, %v8005_v44   ;;  %v8033_v44 = vld [vmem:[%s23854_s7 + $0x288] sm:$0xff] }
 0x518   : > { %18736 = vmatmul.mubr.bf16.gmra.mrb[88].mxu1 %v3122_v1  ;;  %8432 = vperm.xlu0 %22462, %v8026_v30   ;;  %v6593_v1 = vld [vmem:[%s23890_s16 + $0xf8] sm:$0xff] }
 0x519   : > { %19300 = vmatmul.mubr.bf16.gmra.mrb[32].mxu0 %v6579_v40  ;;  %18739 = vmatprep.mubr.bf16.mxu1 %v3123_v41  ;;  %v6594_v40 = vld [vmem:[%s23890_s16 + $0x100] sm:$0xff]  ;;  %v22540_v41 = vld [vmem:[#allocation3 + $0x120] sm:$0xff]  }
 0x51a   : > { %19303 = vmatprep.mubr.bf16.mxu0 %v6580_v42  ;;  %v8031_v42 = vld [vmem:[%s23854_s7 + $0x278] sm:$0xff] }
 0x51b   : > { %8337 = vperm.xlu1 %22463, %v8007_v51   ;;  %v22542_v51 = vld [vmem:[#allocation3 + $0x130] sm:$0xff]  }
 0x51c   : > { %8442 = vperm.xlu0 %22462, %v8028_v37   ;;  %v8054_v37 = vld [vmem:[%s23854_s7 + $0x330] sm:$0xff] }
 0x51f   : > { %8347 = vperm.xlu1 %22463, %v8009_v53   ;;  %v8036_v53 = vld [vmem:[%s23854_s7 + $0x2a0] sm:$0xff] }
 0x520   : > { %18740 = vmatmul.mubr.bf16.gmra.mrb[92].mxu1 %v3124_v45  ;;  %8452 = vperm.xlu0 %22462, %v8030_v21   ;;  %v3781_v45 = vld [vmem:[%s23997_s21 + $0x38] sm:$0xff] }
 0x521   : > { %19304 = vmatmul.mubr.bf16.gmra.mrb[36].mxu0 %v6581_v47  ;;  %18743 = vmatprep.mubr.bf16.mxu1 %v3125_v49  ;;  %v6595_v47 = vld [vmem:[%s23890_s16 + $0x108] sm:$0xff]  ;;  %v3782_v49 = vld [vmem:[%s23997_s21 + $0x40] sm:$0xff] }
 0x522   : > { %19307 = vmatprep.mubr.bf16.mxu0 %v6582_v50  ;;  %v6596_v50 = vld [vmem:[%s23890_s16 + $0x110] sm:$0xff] }
 0x523   : > { %8357 = vperm.xlu1 %22463, %v8011_v61   ;;  %v3784_v61 = vld [vmem:[%s23997_s21 + $0x50] sm:$0xff] }
 0x524   : > { %8462 = vperm.xlu0 %22462, %v8032_v62  }
 0x527   : > { %8367 = vperm.xlu1 %22463, %v8013_v3   ;;  %v8039_v3 = vld [vmem:[%s23854_s7 + $0x2b8] sm:$0xff] }
 0x528   : > { %18744 = vmatmul.mubr.bf16.gmra.mrb[96].mxu1 %v3126_v54  ;;  %8472 = vperm.xlu0 %22462, %v8034_v46   ;;  %v22543_v54 = vld [vmem:[#allocation3 + $0x138] sm:$0xff]   ;;  %v6608_v46 = vld [vmem:[%s23890_s16 + $0x170] sm:$0xff] }
 0x529   : > { %19308 = vmatmul.mubr.bf16.gmra.mrb[40].mxu0 %v6583_v56  ;;  %18747 = vmatprep.mubr.bf16.mxu1 %v3127_v57  ;;  %v3783_v56 = vld [vmem:[%s23997_s21 + $0x48] sm:$0xff]  ;;  %v8038_v57 = vld [vmem:[%s23854_s7 + $0x2b0] sm:$0xff] }
 0x52a   : > { %19311 = vmatprep.mubr.bf16.mxu0 %v6584_v60  ;;  %v6597_v60 = vld [vmem:[%s23890_s16 + $0x118] sm:$0xff] }
 0x52b   : > { %8377 = vperm.xlu1 %22463, %v8015_v9   ;;  %v3786_v9 = vld [vmem:[%s23997_s21 + $0x60] sm:$0xff] }
 0x52c   : > { %8482 = vperm.xlu0 %22462, %v8036_v53   ;;  %v3796_v53 = vld [vmem:[%s23997_s21 + $0xb0] sm:$0xff] }
 0x52f   : > { %8387 = vperm.xlu1 %22463, %v8017_v11   ;;  %v8043_v11 = vld [vmem:[%s23854_s7 + $0x2d8] sm:$0xff] }
 0x530   : > { %18748 = vmatmul.mubr.bf16.gmra.mrb[100].mxu1 %v3128_v4  ;;  %8492 = vperm.xlu0 %22462, %v8038_v57   ;;  %v8040_v4 = vld [vmem:[%s23854_s7 + $0x2c0] sm:$0xff] }
 0x531   : > { %19312 = vmatmul.mubr.bf16.gmra.mrb[44].mxu0 %v6585_v6  ;;  %18751 = vmatprep.mubr.bf16.mxu1 %v3129_v7  ;;  %v3785_v6 = vld [vmem:[%s23997_s21 + $0x58] sm:$0xff]  ;;  %v8042_v7 = vld [vmem:[%s23854_s7 + $0x2d0] sm:$0xff]  ;;  %v3798_v57 = vld [vmem:[%s23997_s21 + $0xc0] sm:$0xff] }
 0x532   : > { %19315 = vmatprep.mubr.bf16.mxu0 %v6586_v8  ;;  %v6599_v8 = vld [vmem:[%s23890_s16 + $0x128] sm:$0xff] }
 0x533   : > { %8397 = vperm.xlu1 %22463, %v8019_v63   ;;  %v3788_v63 = vld [vmem:[%s23997_s21 + $0x70] sm:$0xff] }
 0x534   : > { %8502 = vperm.xlu0 %22462, %v8040_v4   ;;  %v6614_v4 = vld [vmem:[%s23890_s16 + $0x1a0] sm:$0xff] }
 0x537   : > { %8407 = vperm.xlu1 %22463, %v8021_v16   ;;  %v24058_v16 = vpop.permute.xlu0 %8062 }
 0x538   : > { %18752 = vmatmul.mubr.bf16.gmra.mrb[104].mxu1 %v3130_v12  ;;  %8512 = vperm.xlu0 %22462, %v8042_v7   ;;  %v8044_v12 = vld [vmem:[%s23854_s7 + $0x2e0] sm:$0xff] }
 0x539   : > { %19316 = vmatmul.mubr.bf16.gmra.mrb[48].mxu0 %v6587_v13  ;;  %18771 = vmatprep.mubr.bf16.mxu1 %v3774_v14  ;;  %v3787_v13 = vld [vmem:[%s23997_s21 + $0x68] sm:$0xff]  ;;  %v8046_v14 = vld [vmem:[%s23854_s7 + $0x2f0] sm:$0xff]  ;;  %v3802_v7 = vld [vmem:[%s23997_s21 + $0xe0] sm:$0xff] }
 0x53a   : > { %19319 = vmatprep.mubr.bf16.mxu0 %v6588_v15  ;;  %v6601_v15 = vld [vmem:[%s23890_s16 + $0x138] sm:$0xff] }
 0x53b   : > { %8417 = vperm.xlu1 %22463, %v8023_v25   ;;  %v8050_v25 = vld [vmem:[%s23854_s7 + $0x310] sm:$0xff] }
 0x53c   : > { %8522 = vperm.xlu0 %22462, %v8044_v12   ;;  %v7261_v12 = vld [vmem:[%s24119_s23 + $0x10] sm:$0xff] }
 0x53f   : > { %8427 = vperm.xlu1 %22463, %v8025_v28   ;;  %v24069_v28 = vpop.permute.xlu0 %8067 }
 0x540   : > { %18772 = vmatmul.mubr.bf16.vlgmr.msra.gmra.mrb[0].mxu1 %v3775_v17  ;;  %8532 = vperm.xlu0 %22462, %v8046_v14   ;;  %v8047_v17 = vld [vmem:[%s23854_s7 + $0x2f8] sm:$0xff]  ;;  %v3806_v14 = vld [vmem:[%s23997_s21 + $0x100] sm:$0xff] }
 0x541   : > { %19320 = vmatmul.mubr.bf16.gmra.mrb[52].mxu0 %v6589_v18  ;;  %18775 = vmatprep.mubr.bf16.mxu1 %v3776_v22  ;;  %v24062_v18 = vpop.permute.xlu1 %8072  ;;  %v8049_v22 = vld [vmem:[%s23854_s7 + $0x308] sm:$0xff] }
 0x542   : > { %19323 = vmatprep.mubr.bf16.mxu0 %v6590_v24  ;;  %20623 = vmatpush3.bf16.msra.mxu1 %v23847_v48  ;;  %v8027_v48 = vld [vmem:[%s23854_s7 + $0x258] sm:$0xff] }
 0x543   : > { %20616 = vmatprep.subr.bf16.mxu1 %v22537_v27  ;;  %8437 = vperm.xlu1 %22463, %v8027_v48   ;;  %v3789_v24 = vld [vmem:[%s23997_s21 + $0x78] sm:$0xff]  ;;  %v3791_v48 = vld [vmem:[%s23997_s21 + $0x88] sm:$0xff] }
 0x544   : > { %8542 = vperm.xlu0 %22462, %v8048_v2   ;;  %v7265_v2 = vld [vmem:[%s24119_s23 + $0x30] sm:$0xff] }
 0x545   : > { %v24072_v30 = vpop.permute.xlu1 %8077 }
 0x546   : > { %20624 = vmatpush3.bf16.msra.mxu1 %v22537_v27  ;;  %v3790_v27 = vld [vmem:[%s23997_s21 + $0x80] sm:$0xff] }
 0x547   : > { %20617 = vmatprep.subr.bf16.mxu1 %v22538_v35  ;;  %8447 = vperm.xlu1 %22463, %v8029_v19   ;;  %v3792_v19 = vld [vmem:[%s23997_s21 + $0x90] sm:$0xff] }
 0x548   : > { %18776 = vmatmul.mubr.bf16.gmra.mrb[4].mxu1 %v3777_v29  ;;  %v6604_v29 = vld [vmem:[%s23890_s16 + $0x150] sm:$0xff]  ;;  %8552 = vperm.xlu0 %22462, %v8050_v25   ;;  %v3810_v25 = vld [vmem:[%s23997_s21 + $0x120] sm:$0xff] }
 0x549   : > { %19324 = vmatmul.mubr.bf16.gmra.mrb[56].mxu0 %v6591_v31  ;;  %18779 = vmatprep.mubr.bf16.mxu1 %v3778_v32  ;;  %v8051_v31 = vld [vmem:[%s23854_s7 + $0x318] sm:$0xff]  ;;  %v8052_v32 = vld [vmem:[%s23854_s7 + $0x320] sm:$0xff]  ;;  %v24084_v21 = vpop.permute.xlu1 %8087 }
 0x54a   : > { %19327 = vmatprep.mubr.bf16.mxu0 %v6592_v34  ;;  %20625 = vmatpush3.bf16.msra.mxu1 %v22538_v35  ;;  %v24076_v34 = vpop.permute.xlu0 %8082  ;;  %v8053_v35 = vld [vmem:[%s23854_s7 + $0x328] sm:$0xff] }
 0x54b   : > { %20618 = vmatprep.subr.bf16.mxu1 %v22539_v38  ;;  %8457 = vperm.xlu1 %22463, %v8031_v42   ;;  %v3793_v42 = vld [vmem:[%s23997_s21 + $0x98] sm:$0xff] }
 0x54c   : > { %8562 = vperm.xlu0 %22462, %v8052_v32   ;;  %v7269_v32 = vld [vmem:[%s24119_s23 + $0x50] sm:$0xff] }
 0x54d   : > { %v24092_v62 = vpop.permute.xlu1 %8097 }
 0x54e   : > { %20626 = vmatpush3.bf16.msra.mxu1 %v22539_v38  ;;  %v6605_v38 = vld [vmem:[%s23890_s16 + $0x158] sm:$0xff] }
 0x54f   : > { %20619 = vmatprep.subr.bf16.mxu1 %v22540_v41  ;;  %8467 = vperm.xlu1 %22463, %v8033_v44   ;;  %v6607_v44 = vld [vmem:[%s23890_s16 + $0x168] sm:$0xff] }
 0x550   : > { %18780 = vmatmul.mubr.bf16.gmra.mrb[8].mxu1 %v3779_v20  ;;  %v6606_v20 = vld [vmem:[%s23890_s16 + $0x160] sm:$0xff]  ;;  %8572 = vperm.xlu0 %22462, %v8054_v37  }
 0x551   : > { %19328 = vmatmul.mubr.bf16.gmra.mrb[60].mxu0 %v6593_v1  ;;  %18783 = vmatprep.mubr.bf16.mxu1 %v3780_v39  ;;  %v8055_v1 = vld [vmem:[%s23854_s7 + $0x338] sm:$0xff]  ;;  %v8056_v39 = vld [vmem:[%s23854_s7 + $0x340] sm:$0xff] }
 0x552   : > { %19331 = vmatprep.mubr.bf16.mxu0 %v6594_v40  ;;  %20627 = vmatpush3.bf16.msra.mxu1 %v22540_v41  ;;  %v24088_v40 = vpop.permute.xlu0 %8092  ;;  %v8057_v41 = vld [vmem:[%s23854_s7 + $0x348] sm:$0xff]  ;;  %v3814_v37 = vld [vmem:[%s23997_s21 + $0x140] sm:$0xff] }
 0x553   : > { %20620 = vmatprep.subr.bf16.mxu1 %v22541_v43  ;;  %8477 = vperm.xlu1 %22463, %v8035_v52   ;;  %v6609_v52 = vld [vmem:[%s23890_s16 + $0x178] sm:$0xff] }
 0x554   : > { %8582 = vperm.xlu0 %22462, %v8056_v39   ;;  %v7273_v39 = vld [vmem:[%s24119_s23 + $0x70] sm:$0xff] }
 0x556   : > { %20628 = vmatpush3.bf16.msra.mxu1 %v22541_v43  ;;  %v8058_v43 = vld [vmem:[%s23854_s7 + $0x350] sm:$0xff] }
 0x557   : > { %20621 = vmatprep.subr.bf16.mxu1 %v22542_v51  ;;  %8487 = vperm.xlu1 %22463, %v8037_v55   ;;  %v3797_v55 = vld [vmem:[%s23997_s21 + $0xb8] sm:$0xff] }
 0x558   : > { %18784 = vmatmul.mubr.bf16.gmra.mrb[12].mxu1 %v3781_v45  ;;  %v3794_v45 = vld [vmem:[%s23997_s21 + $0xa0] sm:$0xff] }
 0x559   : > { %19332 = vmatmul.mubr.bf16.gmra.mrb[64].mxu0 %v6595_v47  ;;  %18787 = vmatprep.mubr.bf16.mxu1 %v3782_v49  ;;  %v24098_v47 = vpop.permute.xlu0 %8102  ;;  %v8059_v49 = vld [vmem:[%s23854_s7 + $0x358] sm:$0xff] }
 0x55a   : > { %19335 = vmatprep.mubr.bf16.mxu0 %v6596_v50  ;;  %20629 = vmatpush3.bf16.msra.mxu1 %v22542_v51  ;;  %v24101_v50 = vpop.permute.xlu1 %8107  ;;  %v3795_v51 = vld [vmem:[%s23997_s21 + $0xa8] sm:$0xff] }
 0x55b   : > { %20622 = vmatprep.subr.bf16.mxu1 %v22543_v54  ;;  %8497 = vperm.xlu1 %22463, %v8039_v3   ;;  %v3800_v3 = vld [vmem:[%s23997_s21 + $0xd0] sm:$0xff] }
 0x55c   : > { %8592 = vperm.xlu0 %22462, %v8058_v43   ;;  %v3818_v43 = vld [vmem:[%s23997_s21 + $0x160] sm:$0xff] }
 0x55e   : > { %20630 = vmatpush3.bf16.msra.mxu1 %v22543_v54  ;;  %v6610_v54 = vld [vmem:[%s23890_s16 + $0x180] sm:$0xff] }
 0x55f   : > { %8507 = vperm.xlu1 %22463, %v8041_v5   ;;  %v3801_v5 = vld [vmem:[%s23997_s21 + $0xd8] sm:$0xff] }
 0x560   : > { %18788 = vmatmul.mubr.bf16.gmra.mrb[16].mxu1 %v3783_v56  ;;  %v6611_v56 = vld [vmem:[%s23890_s16 + $0x188] sm:$0xff] }
 0x561   : > { %19336 = vmatmul.mubr.bf16.gmra.mrb[68].mxu0 %v6597_v60  ;;  %18791 = vmatprep.mubr.bf16.mxu1 %v3784_v61  ;;  %v6612_v60 = vld [vmem:[%s23890_s16 + $0x190] sm:$0xff]  ;;  %v3799_v61 = vld [vmem:[%s23997_s21 + $0xc8] sm:$0xff] }
 0x562   : > { %19339 = vmatprep.mubr.bf16.mxu0 %v6598_v0  ;;  %v6613_v0 = vld [vmem:[%s23890_s16 + $0x198] sm:$0xff] }
 0x563   : > { %8517 = vperm.xlu1 %22463, %v8043_v11   ;;  %v3804_v11 = vld [vmem:[%s23997_s21 + $0xf0] sm:$0xff] }
 0x567   : > { %8527 = vperm.xlu1 %22463, %v8045_v59   ;;  %v3805_v59 = vld [vmem:[%s23997_s21 + $0xf8] sm:$0xff] }
 0x568   : > { %18792 = vmatmul.mubr.bf16.gmra.mrb[20].mxu1 %v3785_v6  ;;  %v6615_v6 = vld [vmem:[%s23890_s16 + $0x1a8] sm:$0xff] }
 0x569   : > { %19340 = vmatmul.mubr.bf16.gmra.mrb[72].mxu0 %v6599_v8  ;;  %18795 = vmatprep.mubr.bf16.mxu1 %v3786_v9  ;;  %v7259_v8 = vld [vmem:[%s24119_s23] sm:$0xff]  ;;  %v3803_v9 = vld [vmem:[%s23997_s21 + $0xe8] sm:$0xff] }
 0x56a   : > { %19343 = vmatprep.mubr.bf16.mxu0 %v6600_v10  ;;  %v7260_v10 = vld [vmem:[%s24119_s23 + $0x8] sm:$0xff] }
 0x56b   : > { %8537 = vperm.xlu1 %22463, %v8047_v17   ;;  %v3808_v17 = vld [vmem:[%s23997_s21 + $0x110] sm:$0xff] }
 0x56f   : > { %8547 = vperm.xlu1 %22463, %v8049_v22   ;;  %v3809_v22 = vld [vmem:[%s23997_s21 + $0x118] sm:$0xff] }
 0x570   : > { %18796 = vmatmul.mubr.bf16.gmra.mrb[24].mxu1 %v3787_v13  ;;  %v7262_v13 = vld [vmem:[%s24119_s23 + $0x18] sm:$0xff] }
 0x571   : > { %19344 = vmatmul.mubr.bf16.gmra.mrb[76].mxu0 %v6601_v15  ;;  %18799 = vmatprep.mubr.bf16.mxu1 %v3788_v63  ;;  %v7263_v15 = vld [vmem:[%s24119_s23 + $0x20] sm:$0xff]  ;;  %v3807_v63 = vld [vmem:[%s23997_s21 + $0x108] sm:$0xff] }
 0x572   : > { %19347 = vmatprep.mubr.bf16.mxu0 %v6602_v58  ;;  %v7264_v58 = vld [vmem:[%s24119_s23 + $0x28] sm:$0xff] }
 0x573   : > { %8557 = vperm.xlu1 %22463, %v8051_v31   ;;  %v3812_v31 = vld [vmem:[%s23997_s21 + $0x130] sm:$0xff] }
 0x577   : > { %8567 = vperm.xlu1 %22463, %v8053_v35   ;;  %v3813_v35 = vld [vmem:[%s23997_s21 + $0x138] sm:$0xff] }
 0x578   : > { %18800 = vmatmul.mubr.bf16.gmra.mrb[28].mxu1 %v3789_v24  ;;  %v7266_v24 = vld [vmem:[%s24119_s23 + $0x38] sm:$0xff] }
 0x579   : > { %19348 = vmatmul.mubr.bf16.gmra.mrb[80].mxu0 %v6603_v26  ;;  %18803 = vmatprep.mubr.bf16.mxu1 %v3790_v27  ;;  %v7267_v26 = vld [vmem:[%s24119_s23 + $0x40] sm:$0xff]  ;;  %v3811_v27 = vld [vmem:[%s23997_s21 + $0x128] sm:$0xff] }
 0x57a   : > { %19351 = vmatprep.mubr.bf16.mxu0 %v6604_v29  ;;  %v7268_v29 = vld [vmem:[%s24119_s23 + $0x48] sm:$0xff] }
 0x57b   : > { %8577 = vperm.xlu1 %22463, %v8055_v1   ;;  %v3816_v1 = vld [vmem:[%s23997_s21 + $0x150] sm:$0xff] }
 0x57f   : > { %8587 = vperm.xlu1 %22463, %v8057_v41   ;;  %v3817_v41 = vld [vmem:[%s23997_s21 + $0x158] sm:$0xff] }
 0x580   : > { %18804 = vmatmul.mubr.bf16.gmra.mrb[32].mxu1 %v3791_v48  ;;  %v7270_v48 = vld [vmem:[%s24119_s23 + $0x58] sm:$0xff] }
 0x581   : > { %19352 = vmatmul.mubr.bf16.gmra.mrb[84].mxu0 %v6605_v38  ;;  %18807 = vmatprep.mubr.bf16.mxu1 %v3792_v19  ;;  %v7271_v38 = vld [vmem:[%s24119_s23 + $0x60] sm:$0xff]  ;;  %v3815_v19 = vld [vmem:[%s23997_s21 + $0x148] sm:$0xff] }
 0x582   : > { %19355 = vmatprep.mubr.bf16.mxu0 %v6606_v20  ;;  %v7272_v20 = vld [vmem:[%s24119_s23 + $0x68] sm:$0xff] }
 0x583   : > { %8597 = vperm.xlu1 %22463, %v8059_v49   ;;  %v3820_v49 = vld [vmem:[%s23997_s21 + $0x170] sm:$0xff] }
 0x588   : > { %18808 = vmatmul.mubr.bf16.gmra.mrb[36].mxu1 %v3793_v42  ;;  %v7274_v42 = vld [vmem:[%s24119_s23 + $0x78] sm:$0xff] }
 0x589   : > { %19356 = vmatmul.mubr.bf16.gmra.mrb[88].mxu0 %v6607_v44  ;;  %18811 = vmatprep.mubr.bf16.mxu1 %v3794_v45  ;;  %v7275_v44 = vld [vmem:[%s24119_s23 + $0x80] sm:$0xff]  ;;  %v3819_v45 = vld [vmem:[%s23997_s21 + $0x168] sm:$0xff] }
 0x58a   : > { %19359 = vmatprep.mubr.bf16.mxu0 %v6608_v46  ;;  %v7276_v46 = vld [vmem:[%s24119_s23 + $0x88] sm:$0xff] }
 0x590   : > { %18812 = vmatmul.mubr.bf16.gmra.mrb[40].mxu1 %v3795_v51  ;;  %v7277_v51 = vld [vmem:[%s24119_s23 + $0x90] sm:$0xff] }
 0x591   : > { %19360 = vmatmul.mubr.bf16.gmra.mrb[92].mxu0 %v6609_v52  ;;  %18815 = vmatprep.mubr.bf16.mxu1 %v3796_v53  ;;  %v3821_v52 = vld [vmem:[%s23997_s21 + $0x178] sm:$0xff] }
 0x592   : > { %19363 = vmatprep.mubr.bf16.mxu0 %v6610_v54  ;;  %v7278_v53 = vld [vmem:[%s24119_s23 + $0x98] sm:$0xff]  ;;  %v3822_v54 = vld [vmem:[%s23997_s21 + $0x180] sm:$0xff] }
 0x598   : > { %18816 = vmatmul.mubr.bf16.gmra.mrb[44].mxu1 %v3797_v55  ;;  %v7279_v55 = vld [vmem:[%s24119_s23 + $0xa0] sm:$0xff] }
 0x599   : > { %19364 = vmatmul.mubr.bf16.gmra.mrb[96].mxu0 %v6611_v56  ;;  %18819 = vmatprep.mubr.bf16.mxu1 %v3798_v57  ;;  %v3823_v56 = vld [vmem:[%s23997_s21 + $0x188] sm:$0xff] }
 0x59a   : > { %19367 = vmatprep.mubr.bf16.mxu0 %v6612_v60  ;;  %v7280_v57 = vld [vmem:[%s24119_s23 + $0xa8] sm:$0xff]  ;;  %v3824_v60 = vld [vmem:[%s23997_s21 + $0x190] sm:$0xff] }
 0x5a0   : > { %18820 = vmatmul.mubr.bf16.gmra.mrb[48].mxu1 %v3799_v61  ;;  %v7281_v61 = vld [vmem:[%s24119_s23 + $0xb0] sm:$0xff] }
 0x5a1   : > { %19368 = vmatmul.mubr.bf16.gmra.mrb[100].mxu0 %v6613_v0  ;;  %18823 = vmatprep.mubr.bf16.mxu1 %v3800_v3  ;;  %v3825_v0 = vld [vmem:[%s23997_s21 + $0x198] sm:$0xff] }
 0x5a2   : > { %19371 = vmatprep.mubr.bf16.mxu0 %v6614_v4  ;;  %v7282_v3 = vld [vmem:[%s24119_s23 + $0xb8] sm:$0xff]  ;;  %v3826_v4 = vld [vmem:[%s23997_s21 + $0x1a0] sm:$0xff] }
 0x5a8   : > { %18824 = vmatmul.mubr.bf16.gmra.mrb[52].mxu1 %v3801_v5  ;;  %v7283_v5 = vld [vmem:[%s24119_s23 + $0xc0] sm:$0xff] }
 0x5a9   : > { %19372 = vmatmul.mubr.bf16.gmra.mrb[104].mxu0 %v6615_v6  ;;  %18827 = vmatprep.mubr.bf16.mxu1 %v3802_v7  ;;  %v3827_v6 = vld [vmem:[%s23997_s21 + $0x1a8] sm:$0xff] }
 0x5aa   : > { %19391 = vmatprep.mubr.bf16.mxu0 %v7259_v8  ;;  %v7284_v7 = vld [vmem:[%s24119_s23 + $0xc8] sm:$0xff]  ;;  %v4499_v8 = vld [vmem:[%s23560_s17 + $0xe0] sm:$0xff] }
 0x5b0   : > { %18828 = vmatmul.mubr.bf16.gmra.mrb[56].mxu1 %v3803_v9  ;;  %v7285_v9 = vld [vmem:[%s24119_s23 + $0xd0] sm:$0xff] }
 0x5b1   : > { %19392 = vmatmul.mubr.bf16.vlgmr.msra.gmra.mrb[0].mxu0 %v7260_v10  ;;  %18831 = vmatprep.mubr.bf16.mxu1 %v3804_v11 }
 0x5b2   : > { %19395 = vmatprep.mubr.bf16.mxu0 %v7261_v12 }
 0x5b8   : > { %18832 = vmatmul.mubr.bf16.gmra.mrb[60].mxu1 %v3805_v59  ;;  %v4500_v59 = vld [vmem:[%s23560_s17 + $0xe8] sm:$0xff] }
 0x5b9   : > { %19396 = vmatmul.mubr.bf16.gmra.mrb[4].mxu0 %v7262_v13  ;;  %18835 = vmatprep.mubr.bf16.mxu1 %v3806_v14  ;;  %v7286_v14 = vld [vmem:[%s24119_s23 + $0xd8] sm:$0xff] }
 0x5ba   : > { %19399 = vmatprep.mubr.bf16.mxu0 %v7263_v15  ;;  %v4501_v15 = vld [vmem:[%s23560_s17 + $0xf0] sm:$0xff] }
 0x5c0   : > { %18836 = vmatmul.mubr.bf16.gmra.mrb[64].mxu1 %v3807_v63  ;;  %v7287_v63 = vld [vmem:[%s24119_s23 + $0xe0] sm:$0xff] }
 0x5c1   : > { %19400 = vmatmul.mubr.bf16.gmra.mrb[8].mxu0 %v7264_v58  ;;  %18839 = vmatprep.mubr.bf16.mxu1 %v3808_v17 }
 0x5c2   : > { %19403 = vmatprep.mubr.bf16.mxu0 %v7265_v2 }
 0x5c8   : > { %18840 = vmatmul.mubr.bf16.gmra.mrb[68].mxu1 %v3809_v22  ;;  %v4502_v22 = vld [vmem:[%s23560_s17 + $0xf8] sm:$0xff] }
 0x5c9   : > { %19404 = vmatmul.mubr.bf16.gmra.mrb[12].mxu0 %v7266_v24  ;;  %18843 = vmatprep.mubr.bf16.mxu1 %v3810_v25  ;;  %v24193_v24 = vpop.permute.xlu0 %8112 }
 0x5ca   : > { %19407 = vmatprep.mubr.bf16.mxu0 %v7267_v26  ;;  %v7288_v26 = vld [vmem:[%s24119_s23 + $0xe8] sm:$0xff] }
 0x5d0   : > { %18844 = vmatmul.mubr.bf16.gmra.mrb[72].mxu1 %v3811_v27  ;;  %v4503_v27 = vld [vmem:[%s23560_s17 + $0x100] sm:$0xff] }
 0x5d1   : > { %19408 = vmatmul.mubr.bf16.gmra.mrb[16].mxu0 %v7268_v29  ;;  %18847 = vmatprep.mubr.bf16.mxu1 %v3812_v31  ;;  %v24199_v29 = vpop.permute.xlu1 %8117  ;;  %v7289_v31 = vld [vmem:[%s24119_s23 + $0xf0] sm:$0xff] }
 0x5d2   : > { %19411 = vmatprep.mubr.bf16.mxu0 %v7269_v32 }
 0x5d8   : > { %18848 = vmatmul.mubr.bf16.gmra.mrb[76].mxu1 %v3813_v35  ;;  %v24204_v35 = vpop.permute.xlu0 %8122 }
 0x5d9   : > { %19412 = vmatmul.mubr.bf16.gmra.mrb[20].mxu0 %v7270_v48  ;;  %18851 = vmatprep.mubr.bf16.mxu1 %v3814_v37  ;;  %v24208_v37 = vpop.permute.xlu1 %8127 }
 0x5da   : > { %19415 = vmatprep.mubr.bf16.mxu0 %v7271_v38 }
 0x5e0   : > { %18852 = vmatmul.mubr.bf16.gmra.mrb[80].mxu1 %v3815_v19  ;;  %v4504_v19 = vld [vmem:[%s23560_s17 + $0x108] sm:$0xff] }
 0x5e1   : > { %19416 = vmatmul.mubr.bf16.gmra.mrb[24].mxu0 %v7272_v20  ;;  %18855 = vmatprep.mubr.bf16.mxu1 %v3816_v1  ;;  %v7290_v1 = vld [vmem:[%s24119_s23 + $0xf8] sm:$0xff] }
 0x5e2   : > { %19419 = vmatprep.mubr.bf16.mxu0 %v7273_v39  ;;  %v4505_v39 = vld [vmem:[%s23560_s17 + $0x110] sm:$0xff] }
 0x5e8   : > { %18856 = vmatmul.mubr.bf16.gmra.mrb[84].mxu1 %v3817_v41  ;;  %v7291_v41 = vld [vmem:[%s24119_s23 + $0x100] sm:$0xff] }
 0x5e9   : > { %19420 = vmatmul.mubr.bf16.gmra.mrb[28].mxu0 %v7274_v42  ;;  %18859 = vmatprep.mubr.bf16.mxu1 %v3818_v43  ;;  %v24218_v42 = vpop.permute.xlu0 %8132  ;;  %v24220_v43 = vpop.permute.xlu1 %8137 }
 0x5ea   : > { %19423 = vmatprep.mubr.bf16.mxu0 %v7275_v44 }
 0x5f0   : > { %18860 = vmatmul.mubr.bf16.gmra.mrb[88].mxu1 %v3819_v45 }
 0x5f1   : > { %19424 = vmatmul.mubr.bf16.gmra.mrb[32].mxu0 %v7276_v46  ;;  %18863 = vmatprep.mubr.bf16.mxu1 %v3820_v49  ;;  %v4506_v49 = vld [vmem:[%s23560_s17 + $0x118] sm:$0xff] }
 0x5f2   : > { %19427 = vmatprep.mubr.bf16.mxu0 %v7277_v51 }
 0x5f8   : > { %18864 = vmatmul.mubr.bf16.gmra.mrb[92].mxu1 %v3821_v52  ;;  %v7292_v52 = vld [vmem:[%s24119_s23 + $0x108] sm:$0xff] }
 0x5f9   : > { %19428 = vmatmul.mubr.bf16.gmra.mrb[36].mxu0 %v7278_v53  ;;  %18867 = vmatprep.mubr.bf16.mxu1 %v3822_v54  ;;  %v4507_v53 = vld [vmem:[%s23560_s17 + $0x120] sm:$0xff]  ;;  %v7293_v54 = vld [vmem:[%s24119_s23 + $0x110] sm:$0xff] }
 0x5fa   : > { %19431 = vmatprep.mubr.bf16.mxu0 %v7279_v55  ;;  %v24234_v55 = vpop.permute.xlu0 %8142 }
 0x600   : > { %18868 = vmatmul.mubr.bf16.gmra.mrb[96].mxu1 %v3823_v56  ;;  %v24236_v56 = vpop.permute.xlu1 %8147 }
 0x601   : > { %19432 = vmatmul.mubr.bf16.gmra.mrb[40].mxu0 %v7280_v57  ;;  %18871 = vmatprep.mubr.bf16.mxu1 %v3824_v60 }
 0x602   : > { %19435 = vmatprep.mubr.bf16.mxu0 %v7281_v61 }
 0x608   : > { %18872 = vmatmul.mubr.bf16.gmra.mrb[100].mxu1 %v3825_v0  ;;  %v4508_v0 = vld [vmem:[%s23560_s17 + $0x128] sm:$0xff] }
 0x609   : > { %19436 = vmatmul.mubr.bf16.gmra.mrb[44].mxu0 %v7282_v3  ;;  %18875 = vmatprep.mubr.bf16.mxu1 %v3826_v4  ;;  %v24245_v3 = vpop.permute.xlu0 %8152 }
 0x60a   : > { %19439 = vmatprep.mubr.bf16.mxu0 %v7283_v5  ;;  %v7294_v5 = vld [vmem:[%s24119_s23 + $0x118] sm:$0xff] }
 0x610   : > { %18876 = vmatmul.mubr.bf16.gmra.mrb[104].mxu1 %v3827_v6  ;;  %v4509_v6 = vld [vmem:[%s23560_s17 + $0x130] sm:$0xff] }
 0x611   : > { %19440 = vmatmul.mubr.bf16.gmra.mrb[48].mxu0 %v7284_v7  ;;  %18951 = vmatprep.mubr.bf16.mxu1 %v4499_v8  ;;  %v24251_v7 = vpop.permute.xlu1 %8157  ;;  %v7295_v8 = vld [vmem:[%s24119_s23 + $0x120] sm:$0xff] }
 0x612   : > { %19443 = vmatprep.mubr.bf16.mxu0 %v7285_v9 }
 0x613   : > { %v24174_v10 = vpop.f32.mrb[0].mxu1 }
 0x614   : > { %v24176_v11 = vpop.f32.mrb[1].mxu1 }
 0x615   : > { %v24178_v12 = vpop.f32.mrb[2].mxu1 }
 0x616   : > { %v24181_v13 = vpop.f32.mrb[3].mxu1 }
 0x618   : > { %18952 = vmatmul.mubr.bf16.vlgmr.msra.gmra.mrb[56].mxu1 %v4500_v59  ;;  %v24256_v59 = vpop.permute.xlu0 %8162 }
 0x619   : > { %19444 = vmatmul.mubr.bf16.gmra.mrb[52].mxu0 %v7286_v14  ;;  %18955 = vmatprep.mubr.bf16.mxu1 %v4501_v15  ;;  %v24260_v15 = vpop.permute.xlu1 %8167 }
 0x61a   : > { %19447 = vmatprep.mubr.bf16.mxu0 %v7287_v63 }
 0x61b   : > { %v24186_v58 = vpop.f32.mrb[4].mxu1 }
 0x61c   : > { %v24188_v17 = vpop.f32.mrb[5].mxu1 }
 0x61d   : > { %v24190_v2 = vpop.f32.mrb[6].mxu1 }
 0x61e   : > { %v24195_v25 = vpop.f32.mrb[7].mxu1 }
 0x620   : > { %18956 = vmatmul.mubr.bf16.gmra.mrb[60].mxu1 %v4502_v22  ;;  %v4510_v22 = vld [vmem:[%s23560_s17 + $0x138] sm:$0xff] }
 0x621   : > { %19448 = vmatmul.mubr.bf16.gmra.mrb[56].mxu0 %v7288_v26  ;;  %18959 = vmatprep.mubr.bf16.mxu1 %v4503_v27  ;;  %v7296_v27 = vld [vmem:[%s24119_s23 + $0x128] sm:$0xff] }
 0x622   : > { %19451 = vmatprep.mubr.bf16.mxu0 %v7289_v31  ;;  %v4511_v31 = vld [vmem:[%s23560_s17 + $0x140] sm:$0xff] }
 0x623   : > { %v24202_v32 = vpop.f32.mrb[8].mxu1 }
 0x624   : > { %v24206_v48 = vpop.f32.mrb[9].mxu1 }
 0x625   : > { %v24210_v38 = vpop.f32.mrb[10].mxu1 }
 0x626   : > { %v24213_v20 = vpop.f32.mrb[11].mxu1 }
 0x628   : > { %18960 = vmatmul.mubr.bf16.gmra.mrb[64].mxu1 %v4504_v19  ;;  %v7297_v19 = vld [vmem:[%s24119_s23 + $0x130] sm:$0xff] }
 0x629   : > { %19452 = vmatmul.mubr.bf16.gmra.mrb[60].mxu0 %v7290_v1  ;;  %18963 = vmatprep.mubr.bf16.mxu1 %v4505_v39  ;;  %v24270_v1 = vpop.permute.xlu0 %8172  ;;  %v24272_v39 = vpop.permute.xlu1 %8177 }
 0x62a   : > { %19455 = vmatprep.mubr.bf16.mxu0 %v7291_v41 }
 0x62b   : > { %v24222_v44 = vpop.f32.mrb[12].mxu1 }
 0x62c   : > { %v24224_v45 = vpop.f32.mrb[13].mxu1 }
 0x62d   : > { %v24226_v46 = vpop.f32.mrb[14].mxu1 }
 0x62e   : > { %v24229_v51 = vpop.f32.mrb[15].mxu1 }
 0x630   : > { %18964 = vmatmul.mubr.bf16.gmra.mrb[68].mxu1 %v4506_v49 }
 0x631   : > { %19456 = vmatmul.mubr.bf16.gmra.mrb[64].mxu0 %v7292_v52  ;;  %18967 = vmatprep.mubr.bf16.mxu1 %v4507_v53  ;;  %v4512_v53 = vld [vmem:[%s23560_s17 + $0x148] sm:$0xff] }
 0x632   : > { %19459 = vmatprep.mubr.bf16.mxu0 %v7293_v54 }
 0x633   : > { %v24238_v57 = vpop.f32.mrb[16].mxu1 }
 0x634   : > { %v24240_v60 = vpop.f32.mrb[17].mxu1 }
 0x635   : > { %v24242_v61 = vpop.f32.mrb[18].mxu1 }
 0x636   : > { %v24247_v4 = vpop.f32.mrb[19].mxu1 }
 0x638   : > { %18968 = vmatmul.mubr.bf16.gmra.mrb[72].mxu1 %v4508_v0  ;;  %v7298_v0 = vld [vmem:[%s24119_s23 + $0x138] sm:$0xff] }
 0x639   : > { %19460 = vmatmul.mubr.bf16.gmra.mrb[68].mxu0 %v7294_v5  ;;  %18971 = vmatprep.mubr.bf16.mxu1 %v4509_v6  ;;  %v4513_v5 = vld [vmem:[%s23560_s17 + $0x150] sm:$0xff]  ;;  %v7299_v6 = vld [vmem:[%s24119_s23 + $0x140] sm:$0xff] }
 0x63a   : > { %19463 = vmatprep.mubr.bf16.mxu0 %v7295_v8  ;;  %v24286_v8 = vpop.permute.xlu0 %8182 }
 0x63b   : > { %v24254_v9 = vpop.f32.mrb[20].mxu1  ;;  %26416 = vst [vmem:[#allocation17_spill] sm:$0xff] %v24286_v8 }
 0x63c   : > { %v24258_v14 = vpop.f32.mrb[21].mxu1 }
 0x63d   : > { %v24262_v63 = vpop.f32.mrb[22].mxu1 }
 0x63e   : > { %v24265_v26 = vpop.f32.mrb[23].mxu1  ;;  %v24297_v33 = vpop.permute.xlu0 %8192 }
 0x640   : > { %18972 = vmatmul.mubr.bf16.gmra.mrb[76].mxu1 %v4510_v22  ;;  %v24288_v22 = vpop.permute.xlu1 %8187 }
 0x641   : > { %19464 = vmatmul.mubr.bf16.gmra.mrb[72].mxu0 %v7296_v27  ;;  %18975 = vmatprep.mubr.bf16.mxu1 %v4511_v31  ;;  %26417 = vst [vmem:[#allocation18_spill] sm:$0xff] %v24288_v22  ;;  %v4516_v22 = vld [vmem:[%s23560_s17 + $0x168] sm:$0xff] }
 0x642   : > { %19467 = vmatprep.mubr.bf16.mxu0 %v7297_v19 }
 0x643   : > { %v24274_v41 = vpop.f32.mrb[24].mxu1 }
 0x644   : > { %v24276_v49 = vpop.f32.mrb[25].mxu1 }
 0x645   : > { %v24278_v52 = vpop.f32.mrb[26].mxu1 }
 0x646   : > { %26414 = vst [vmem:[#allocation15_spill] sm:$0xff] %v24278_v52  ;;  %v24281_v54 = vpop.f32.mrb[27].mxu1  ;;  %v7311_v52 = vld [vmem:[%s24119_s23 + $0x1a0] sm:$0xff] }
 0x647   : > { %26415 = vst [vmem:[#allocation16_spill] sm:$0xff] %v24281_v54  ;;  %v7300_v54 = vld [vmem:[%s24119_s23 + $0x148] sm:$0xff] }
 0x648   : > { %18976 = vmatmul.mubr.bf16.gmra.mrb[80].mxu1 %v4512_v53  ;;  %v4515_v53 = vld [vmem:[%s23560_s17 + $0x160] sm:$0xff] }
 0x649   : > { %19468 = vmatmul.mubr.bf16.gmra.mrb[76].mxu0 %v7298_v0  ;;  %18979 = vmatprep.mubr.bf16.mxu1 %v4513_v5  ;;  %v24303_v0 = vpop.permute.xlu1 %8197  ;;  %v7301_v5 = vld [vmem:[%s24119_s23 + $0x150] sm:$0xff] }
 0x64a   : > { %19471 = vmatprep.mubr.bf16.mxu0 %v7299_v6  ;;  %26422 = vst [vmem:[#allocation23_spill] sm:$0xff] %v24303_v0  ;;  %v7304_v0 = vld [vmem:[%s24119_s23 + $0x168] sm:$0xff] }
 0x64b   : > { %v24290_v27 = vpop.f32.mrb[28].mxu1 }
 0x64c   : > { %26418 = vst [vmem:[#allocation19_spill] sm:$0xff] %v24290_v27  ;;  %v24292_v31 = vpop.f32.mrb[29].mxu1 }
 0x64d   : > { %26419 = vst [vmem:[#allocation20_spill] sm:$0xff] %v24292_v31  ;;  %v24294_v19 = vpop.f32.mrb[30].mxu1  ;;  %v24312_v27 = vpop.permute.xlu1 %8207 }
 0x64e   : > { %26420 = vst [vmem:[#allocation21_spill] sm:$0xff] %v24294_v19  ;;  %v24299_v36 = vpop.f32.mrb[31].mxu1  ;;  %v24308_v19 = vpop.permute.xlu0 %8202  ;;  %26426 = vst [vmem:[#allocation27_spill] sm:$0xff] %v24312_v27 }
 0x64f   : > { %26421 = vst [vmem:[#allocation22_spill] sm:$0xff] %v24299_v36  ;;  %26424 = vst [vmem:[#allocation25_spill] sm:$0xff] %v24308_v19 }
 0x650   : > { %18980 = vmatmul.mubr.bf16.gmra.mrb[84].mxu1 %v4514_v23  ;;  %v7302_v23 = vld [vmem:[%s24119_s23 + $0x158] sm:$0xff] }
 0x651   : > { %19472 = vmatmul.mubr.bf16.gmra.mrb[80].mxu0 %v7300_v54  ;;  %18983 = vmatprep.mubr.bf16.mxu1 %v4515_v53  ;;  %v4517_v54 = vld [vmem:[%s23560_s17 + $0x170] sm:$0xff]  ;;  %v7303_v53 = vld [vmem:[%s24119_s23 + $0x160] sm:$0xff] }
 0x652   : > { %19475 = vmatprep.mubr.bf16.mxu0 %v7301_v5  ;;  %v24322_v5 = vpop.permute.xlu0 %8212 }
 0x653   : > { %v24306_v6 = vpop.f32.mrb[32].mxu1  ;;  %26429 = vst [vmem:[#allocation30_spill] sm:$0xff] %v24322_v5 }
 0x654   : > { %26423 = vst [vmem:[#allocation24_spill] sm:$0xff] %v24306_v6  ;;  %v24310_v31 = vpop.f32.mrb[33].mxu1 }
 0x655   : > { %26425 = vst [vmem:[#allocation26_spill] sm:$0xff] %v24310_v31  ;;  %v24314_v36 = vpop.f32.mrb[34].mxu1  ;;  %v24324_v31 = vpop.permute.xlu1 %8217 }
 0x656   : > { %26427 = vst [vmem:[#allocation28_spill] sm:$0xff] %v24314_v36  ;;  %v24317_v8 = vpop.f32.mrb[35].mxu1  ;;  %26430 = vst [vmem:[#allocation31_spill] sm:$0xff] %v24324_v31 }
 0x657   : > { %26428 = vst [vmem:[#allocation29_spill] sm:$0xff] %v24317_v8  ;;  %v4518_v8 = vld [vmem:[%s23560_s17 + $0x178] sm:$0xff] }
 0x658   : > { %18984 = vmatmul.mubr.bf16.gmra.mrb[88].mxu1 %v4516_v22  ;;  %v4519_v22 = vld [vmem:[%s23560_s17 + $0x180] sm:$0xff] }
 0x659   : > { %19476 = vmatmul.mubr.bf16.gmra.mrb[84].mxu0 %v7302_v23  ;;  %18987 = vmatprep.mubr.bf16.mxu1 %v4517_v54  ;;  %v7305_v23 = vld [vmem:[%s24119_s23 + $0x170] sm:$0xff]  ;;  %v24338_v54 = vpop.permute.xlu0 %8222 }
 0x65a   : > { %19479 = vmatprep.mubr.bf16.mxu0 %v7303_v53  ;;  %26435 = vst [vmem:[#allocation36_spill] sm:$0xff] %v24338_v54  ;;  %v24340_v53 = vpop.permute.xlu1 %8227  ;;  %v7306_v54 = vld [vmem:[%s24119_s23 + $0x178] sm:$0xff] }
 0x65b   : > { %v24326_v6 = vpop.f32.mrb[36].mxu1  ;;  %26436 = vst [vmem:[#allocation37_spill] sm:$0xff] %v24340_v53  ;;  %v4522_v53 = vld [vmem:[%s23560_s17 + $0x198] sm:$0xff] }
 0x65c   : > { %26431 = vst [vmem:[#allocation32_spill] sm:$0xff] %v24326_v6  ;;  %v24328_v36 = vpop.f32.mrb[37].mxu1 }
 0x65d   : > { %26432 = vst [vmem:[#allocation33_spill] sm:$0xff] %v24328_v36  ;;  %v24330_v27 = vpop.f32.mrb[38].mxu1  ;;  %v24349_v31 = vpop.permute.xlu0 %8232 }
 0x65e   : > { %26433 = vst [vmem:[#allocation34_spill] sm:$0xff] %v24330_v27  ;;  %v24333_v19 = vpop.f32.mrb[39].mxu1  ;;  %26440 = vst [vmem:[#allocation41_spill] sm:$0xff] %v24349_v31 }
 0x65f   : > { %26434 = vst [vmem:[#allocation35_spill] sm:$0xff] %v24333_v19  ;;  %v4520_v19 = vld [vmem:[%s23560_s17 + $0x188] sm:$0xff] }
 0x660   : > { %18988 = vmatmul.mubr.bf16.gmra.mrb[92].mxu1 %v4518_v8  ;;  %v4521_v8 = vld [vmem:[%s23560_s17 + $0x190] sm:$0xff] }
 0x661   : > { %19480 = vmatmul.mubr.bf16.gmra.mrb[88].mxu0 %v7304_v0  ;;  %18991 = vmatprep.mubr.bf16.mxu1 %v4519_v22  ;;  %v24355_v0 = vpop.permute.xlu1 %8237  ;;  %v7307_v22 = vld [vmem:[%s24119_s23 + $0x180] sm:$0xff] }
 0x662   : > { %19483 = vmatprep.mubr.bf16.mxu0 %v7305_v23  ;;  %26442 = vst [vmem:[#allocation43_spill] sm:$0xff] %v24355_v0  ;;  %v7310_v0 = vld [vmem:[%s24119_s23 + $0x198] sm:$0xff] }
 0x663   : > { %v24342_v36 = vpop.f32.mrb[40].mxu1 }
 0x664   : > { %26437 = vst [vmem:[#allocation38_spill] sm:$0xff] %v24342_v36  ;;  %v24344_v27 = vpop.f32.mrb[41].mxu1 }
 0x665   : > { %26438 = vst [vmem:[#allocation39_spill] sm:$0xff] %v24344_v27  ;;  %v24346_v6 = vpop.f32.mrb[42].mxu1  ;;  %v24364_v36 = vpop.permute.xlu1 %8247 }
 0x666   : > { %26439 = vst [vmem:[#allocation40_spill] sm:$0xff] %v24346_v6  ;;  %v24351_v5 = vpop.f32.mrb[43].mxu1  ;;  %v24360_v6 = vpop.permute.xlu0 %8242  ;;  %26446 = vst [vmem:[#allocation47_spill] sm:$0xff] %v24364_v36 }
 0x667   : > { %26441 = vst [vmem:[#allocation42_spill] sm:$0xff] %v24351_v5  ;;  %26444 = vst [vmem:[#allocation45_spill] sm:$0xff] %v24360_v6 }
 0x668   : > { %18992 = vmatmul.mubr.bf16.gmra.mrb[96].mxu1 %v4520_v19  ;;  %v7308_v19 = vld [vmem:[%s24119_s23 + $0x188] sm:$0xff] }
 0x669   : > { %19484 = vmatmul.mubr.bf16.gmra.mrb[92].mxu0 %v7306_v54  ;;  %18995 = vmatprep.mubr.bf16.mxu1 %v4521_v8  ;;  %v4523_v54 = vld [vmem:[%s23560_s17 + $0x1a0] sm:$0xff]  ;;  %v7309_v8 = vld [vmem:[%s24119_s23 + $0x190] sm:$0xff] }
 0x66a   : > { %19487 = vmatprep.mubr.bf16.mxu0 %v7307_v22  ;;  %v24374_v22 = vpop.permute.xlu0 %8252 }
 0x66b   : > { %v24358_v23 = vpop.f32.mrb[44].mxu1  ;;  %26449 = vst [vmem:[#allocation50_spill] sm:$0xff] %v24374_v22 }
 0x66c   : > { %26443 = vst [vmem:[#allocation44_spill] sm:$0xff] %v24358_v23  ;;  %v24362_v27 = vpop.f32.mrb[45].mxu1 }
 0x66d   : > { %26445 = vst [vmem:[#allocation46_spill] sm:$0xff] %v24362_v27  ;;  %v24366_v5 = vpop.f32.mrb[46].mxu1  ;;  %v24376_v27 = vpop.permute.xlu1 %8257 }
 0x66e   : > { %26447 = vst [vmem:[#allocation48_spill] sm:$0xff] %v24366_v5  ;;  %v24369_v31 = vpop.f32.mrb[47].mxu1  ;;  %26450 = vst [vmem:[#allocation51_spill] sm:$0xff] %v24376_v27 }
 0x66f   : > { %26448 = vst [vmem:[#allocation49_spill] sm:$0xff] %v24369_v31  ;;  %v4524_v31 = vld [vmem:[%s23560_s17 + $0x1a8] sm:$0xff]  ;;  %s24417_s17 = scalar_lea.vmem [#allocation8], %s23553_s12 }
 0x670   : > { %18996 = vmatmul.mubr.bf16.gmra.mrb[100].mxu1 %v4522_v53  ;;  %v24389_v53 = vpop.permute.xlu0 %8262 }
 0x671   : > { %19488 = vmatmul.mubr.bf16.gmra.mrb[96].mxu0 %v7308_v19  ;;  %18999 = vmatprep.mubr.bf16.mxu1 %v4523_v54  ;;  %26455 = vst [vmem:[#allocation56_spill] sm:$0xff] %v24389_v53  ;;  %v24391_v19 = vpop.permute.xlu1 %8267 }
 0x672   : > { %19491 = vmatprep.mubr.bf16.mxu0 %v7309_v8  ;;  %26456 = vst [vmem:[#allocation57_spill] sm:$0xff] %v24391_v19 }
 0x673   : > { %v24378_v23 = vpop.f32.mrb[48].mxu1 }
 0x674   : > { %26451 = vst [vmem:[#allocation52_spill] sm:$0xff] %v24378_v23  ;;  %v24380_v36 = vpop.f32.mrb[49].mxu1  ;;  %v24399_v23 = vpop.permute.xlu0 %8272 }
 0x675   : > { %26452 = vst [vmem:[#allocation53_spill] sm:$0xff] %v24380_v36  ;;  %v24382_v5 = vpop.f32.mrb[50].mxu1  ;;  %26460 = vst [vmem:[#allocation61_spill] sm:$0xff] %v24399_v23  ;;  %v24404_v27 = vpop.permute.xlu1 %8277 }
 0x676   : > { %26453 = vst [vmem:[#allocation54_spill] sm:$0xff] %v24382_v5  ;;  %v24385_v6 = vpop.f32.mrb[51].mxu1 }
 0x677   : > { %26454 = vst [vmem:[#allocation55_spill] sm:$0xff] %v24385_v6  ;;  %v7312_v6 = vld [vmem:[%s24119_s23 + $0x1a8] sm:$0xff] }
 0x678   : > { %19000 = vmatmul.mubr.bf16.gmra.mrb[104].mxu1 %v4524_v31  ;;  %v24406_v31 = vpop.permute.xlu0 %8282 }
 0x679   : > { %19492 = vmatmul.mubr.bf16.gmra.mrb[100].mxu0 %v7310_v0  ;;  %26462 = vst [vmem:[#allocation63_spill] sm:$0xff] %v24406_v31  ;;  %v24408_v0 = vpop.permute.xlu1 %8287 }
 0x67a   : > { %19495 = vmatprep.mubr.bf16.mxu0 %v7311_v52  ;;  %26463 = vst [vmem:[#allocation64_spill] sm:$0xff] %v24408_v0 }
 0x67b   : > { %v24393_v54 = vpop.f32.mrb[52].mxu1 }
 0x67c   : > { %26457 = vst [vmem:[#allocation58_spill] sm:$0xff] %v24393_v54  ;;  %v24395_v8 = vpop.f32.mrb[53].mxu1 }
 0x67d   : > { %26458 = vst [vmem:[#allocation59_spill] sm:$0xff] %v24395_v8  ;;  %v24397_v36 = vpop.f32.mrb[54].mxu1 }
 0x67e   : > { %26459 = vst [vmem:[#allocation60_spill] sm:$0xff] %v24397_v36  ;;  %v24401_v5 = vpop.f32.mrb[55].mxu1 }
 0x67f   : > { %26461 = vst [vmem:[#allocation62_spill] sm:$0xff] %v24401_v5 }
 0x681   : > { %19496 = vmatmul.mubr.bf16.gmra.mrb[104].mxu0 %v7312_v6 }
 0x684   : > { %v19393_v19 = vpop.f32.mrb[0].mxu0 }
 0x685   : > { %v20631_v52 = vadd.f32 %v19393_v19, %v24174_v10  ;;  %v7412_v54 = vpop.f32.mrb[1].mxu0 }
 0x686   : > { %v20632_v8 = vadd.f32 %v7412_v54, %v24176_v11  ;;  %v19394_v36 = vpop.f32.mrb[2].mxu0  ;;  %v24421_v11 = vpop.permute.xlu0 %8292 }
 0x687   : > { %v8602_v53 = vmul.f32 %v20631_v52, %v24062_v18  ;;  %v20633_v5 = vadd.f32 %v19394_v36, %v24178_v12  ;;  %v7415_v23 = vpop.f32.mrb[3].mxu0  ;;  %v24425_v36 = vpop.permute.xlu1 %8297 }
 0x688   : > { %v8600_v22 = vmul.f32 %v20632_v8, %v24058_v16  ;;  %v20634_v6 = vadd.f32 %v7415_v23, %v24181_v13  ;;  %26464 = vst [vmem:[#allocation65_spill] sm:$0xff] %v24425_v36 }
 0x689   : > { %8711 = vst [vmem:[%s24417_s17 + $0x10] sm:$0xff] %v8602_v53  ;;  %v8603_v10 = vmul.f32 %v20633_v5, %v24072_v30  ;;  %v8933_v8 = vmul.f32 %v8602_v53, %v8602_v53 }
 0x68a   : > { %8709 = vst [vmem:[%s24417_s17] sm:$0xff] %v8600_v22  ;;  %v8601_v18 = vmul.f32 %v20634_v6, %v24069_v28  ;;  %v8931_v16 = vmul.f32 %v8600_v22, %v8600_v22 }
 0x68b   : > { %8712 = vst [vmem:[%s24417_s17 + $0x18] sm:$0xff] %v8603_v10  ;;  %v8934_v28 = vmul.f32 %v8603_v10, %v8603_v10 }
 0x68c   : > { %8710 = vst [vmem:[%s24417_s17 + $0x8] sm:$0xff] %v8601_v18  ;;  %v8817_v12 = vadd.f32 %v8601_v18, %v8600_v22  ;;  %v8932_v13 = vmul.f32 %v8601_v18, %v8601_v18  ;;  %v19397_v23 = vpop.f32.mrb[4].mxu0  ;;  %v24433_v18 = vpop.permute.xlu0 %8302 }
 0x68d   : > { %v20635_v19 = vadd.f32 %v19397_v23, %v24186_v58  ;;  %v7428_v54 = vpop.f32.mrb[5].mxu0 }
 0x68e   : > { %v8818_v52 = vadd.f32 %v8817_v12, %v8602_v53  ;;  %v9039_v30 = vadd.f32 %v8932_v13, %v8931_v16  ;;  %v20636_v5 = vadd.f32 %v7428_v54, %v24188_v17  ;;  %v19398_v0 = vpop.f32.mrb[6].mxu0  ;;  %v24437_v16 = vpop.permute.xlu1 %8307 }
 0x68f   : > { %v8606_v6 = vmul.f32 %v20635_v19, %v24088_v40  ;;  %v20637_v36 = vadd.f32 %v19398_v0, %v24190_v2  ;;  %v7431_v22 = vpop.f32.mrb[7].mxu0 }
 0x690   : > { %v8819_v58 = vadd.f32 %v8818_v52, %v8603_v10  ;;  %v9040_v23 = vadd.f32 %v9039_v30, %v8933_v8  ;;  %v8604_v31 = vmul.f32 %v20636_v5, %v24076_v34  ;;  %v20638_v53 = vadd.f32 %v7431_v22, %v24195_v25  ;;  %v24446_v8 = vpop.permute.xlu0 %8312 }
 0x691   : > { %8715 = vst [vmem:[%s24417_s17 + $0x30] sm:$0xff] %v8606_v6  ;;  %v8607_v17 = vmul.f32 %v20637_v36, %v24092_v62  ;;  %v8937_v52 = vmul.f32 %v8606_v6, %v8606_v6 }
 0x692   : > { %v9041_v12 = vadd.f32 %v9040_v23, %v8934_v28  ;;  %8713 = vst [vmem:[%s24417_s17 + $0x20] sm:$0xff] %v8604_v31  ;;  %v8820_v40 = vadd.f32 %v8819_v58, %v8604_v31  ;;  %v8935_v13 = vmul.f32 %v8604_v31, %v8604_v31  ;;  %v8605_v2 = vmul.f32 %v20638_v53, %v24084_v21  ;;  %v24449_v21 = vpop.permute.xlu1 %8317 }
 0x693   : > { %8716 = vst [vmem:[%s24417_s17 + $0x38] sm:$0xff] %v8607_v17  ;;  %v8938_v5 = vmul.f32 %v8607_v17, %v8607_v17 }
 0x694   : > { %v9042_v0 = vadd.f32 %v9041_v12, %v8935_v13  ;;  %8714 = vst [vmem:[%s24417_s17 + $0x28] sm:$0xff] %v8605_v2  ;;  %v8821_v10 = vadd.f32 %v8820_v40, %v8605_v2  ;;  %v8936_v19 = vmul.f32 %v8605_v2, %v8605_v2  ;;  %v19401_v54 = vpop.f32.mrb[8].mxu0 }
 0x695   : > { %v20639_v34 = vadd.f32 %v19401_v54, %v24202_v32  ;;  %v7444_v25 = vpop.f32.mrb[9].mxu0 }
 0x696   : > { %v8822_v62 = vadd.f32 %v8821_v10, %v8606_v6  ;;  %v9043_v36 = vadd.f32 %v9042_v0, %v8936_v19  ;;  %v20640_v31 = vadd.f32 %v7444_v25, %v24206_v48  ;;  %v19402_v30 = vpop.f32.mrb[10].mxu0 }
 0x697   : > { %v8610_v28 = vmul.f32 %v20639_v34, %v24193_v24  ;;  %v20641_v22 = vadd.f32 %v19402_v30, %v24210_v38  ;;  %v7447_v32 = vpop.f32.mrb[11].mxu0  ;;  %v24460_v24 = vpop.permute.xlu0 %8322 }
 0x698   : > { %v8823_v58 = vadd.f32 %v8822_v62, %v8607_v17  ;;  %v9044_v23 = vadd.f32 %v9043_v36, %v8937_v52  ;;  %v8608_v53 = vmul.f32 %v20640_v31, %v24098_v47  ;;  %v20642_v6 = vadd.f32 %v7447_v32, %v24213_v20  ;;  %v24463_v47 = vpop.permute.xlu1 %8327 }
 0x699   : > { %8719 = vst [vmem:[%s24417_s17 + $0x50] sm:$0xff] %v8610_v28  ;;  %v8611_v48 = vmul.f32 %v20641_v22, %v24199_v29  ;;  %v8941_v19 = vmul.f32 %v8610_v28, %v8610_v28 }
 0x69a   : > { %v9045_v12 = vadd.f32 %v9044_v23, %v8938_v5  ;;  %8717 = vst [vmem:[%s24417_s17 + $0x40] sm:$0xff] %v8608_v53  ;;  %v8824_v40 = vadd.f32 %v8823_v58, %v8608_v53  ;;  %v8939_v13 = vmul.f32 %v8608_v53, %v8608_v53  ;;  %v8609_v2 = vmul.f32 %v20642_v6, %v24101_v50 }
 0x69b   : > { %8720 = vst [vmem:[%s24417_s17 + $0x58] sm:$0xff] %v8611_v48  ;;  %v8942_v52 = vmul.f32 %v8611_v48, %v8611_v48  ;;  %v24473_v32 = vpop.permute.xlu0 %8332 }
 0x69c   : > { %v9046_v38 = vadd.f32 %v9045_v12, %v8939_v13  ;;  %8718 = vst [vmem:[%s24417_s17 + $0x48] sm:$0xff] %v8609_v2  ;;  %v8825_v17 = vadd.f32 %v8824_v40, %v8609_v2  ;;  %v8940_v0 = vmul.f32 %v8609_v2, %v8609_v2  ;;  %v19405_v10 = vpop.f32.mrb[12].mxu0 }
 0x69d   : > { %v20643_v20 = vadd.f32 %v19405_v10, %v24222_v44  ;;  %v7460_v29 = vpop.f32.mrb[13].mxu0 }
 0x69e   : > { %v8826_v54 = vadd.f32 %v8825_v17, %v8610_v28  ;;  %v9047_v34 = vadd.f32 %v9046_v38, %v8940_v0  ;;  %v20644_v50 = vadd.f32 %v7460_v29, %v24224_v45  ;;  %v19406_v25 = vpop.f32.mrb[14].mxu0 }
 0x69f   : > { %v8614_v62 = vmul.f32 %v20643_v20, %v24218_v42  ;;  %v20645_v36 = vadd.f32 %v19406_v25, %v24226_v46  ;;  %v7463_v31 = vpop.f32.mrb[15].mxu0  ;;  %v24477_v46 = vpop.permute.xlu1 %8337 }
 0x6a0   : > { %v8827_v30 = vadd.f32 %v8826_v54, %v8611_v48  ;;  %v9048_v5 = vadd.f32 %v9047_v34, %v8941_v19  ;;  %v8612_v44 = vmul.f32 %v20644_v50, %v24204_v35  ;;  %v20646_v22 = vadd.f32 %v7463_v31, %v24229_v51  ;;  %v24485_v20 = vpop.permute.xlu0 %8342 }
 0x6a1   : > { %8723 = vst [vmem:[%s24417_s17 + $0x70] sm:$0xff] %v8614_v62  ;;  %v8615_v28 = vmul.f32 %v20645_v36, %v24220_v43  ;;  %v8945_v43 = vmul.f32 %v8614_v62, %v8614_v62 }
 0x6a2   : > { %v9049_v45 = vadd.f32 %v9048_v5, %v8942_v52  ;;  %8721 = vst [vmem:[%s24417_s17 + $0x60] sm:$0xff] %v8612_v44  ;;  %v8828_v58 = vadd.f32 %v8827_v30, %v8612_v44  ;;  %v8943_v42 = vmul.f32 %v8612_v44, %v8612_v44  ;;  %v8613_v23 = vmul.f32 %v20646_v22, %v24208_v37 }
 0x6a3   : > { %8724 = vst [vmem:[%s24417_s17 + $0x78] sm:$0xff] %v8615_v28  ;;  %v8946_v37 = vmul.f32 %v8615_v28, %v8615_v28  ;;  %v24489_v34 = vpop.permute.xlu1 %8347 }
 0x6a4   : > { %v9050_v53 = vadd.f32 %v9049_v45, %v8943_v42  ;;  %8722 = vst [vmem:[%s24417_s17 + $0x68] sm:$0xff] %v8613_v23  ;;  %v8829_v6 = vadd.f32 %v8828_v58, %v8613_v23  ;;  %v8944_v35 = vmul.f32 %v8613_v23, %v8613_v23  ;;  %v19409_v48 = vpop.f32.mrb[16].mxu0  ;;  %v24498_v30 = vpop.permute.xlu0 %8352 }
 0x6a5   : > { %v20647_v51 = vadd.f32 %v19409_v48, %v24238_v57  ;;  %v7476_v12 = vpop.f32.mrb[17].mxu0 }
 0x6a6   : > { %v8830_v40 = vadd.f32 %v8829_v6, %v8614_v62  ;;  %v9051_v13 = vadd.f32 %v9050_v53, %v8944_v35  ;;  %v20648_v2 = vadd.f32 %v7476_v12, %v24240_v60  ;;  %v19410_v38 = vpop.f32.mrb[18].mxu0 }
 0x6a7   : > { %v8618_v17 = vmul.f32 %v20647_v51, %v24245_v3  ;;  %v20649_v0 = vadd.f32 %v19410_v38, %v24242_v61  ;;  %v7479_v10 = vpop.f32.mrb[19].mxu0 }
 0x6a8   : > { %v8831_v57 = vadd.f32 %v8830_v40, %v8615_v28  ;;  %v9052_v29 = vadd.f32 %v9051_v13, %v8945_v43  ;;  %v8616_v19 = vmul.f32 %v20648_v2, %v24234_v55  ;;  %v20650_v54 = vadd.f32 %v7479_v10, %v24247_v4 }
 0x6a9   : > { %8727 = vst [vmem:[%s24417_s17 + $0x90] sm:$0xff] %v8618_v17  ;;  %v8619_v60 = vmul.f32 %v20649_v0, %v24251_v7  ;;  %v8949_v5 = vmul.f32 %v8618_v17, %v8618_v17 }
 0x6aa   : > { %v9053_v50 = vadd.f32 %v9052_v29, %v8946_v37  ;;  %8725 = vst [vmem:[%s24417_s17 + $0x80] sm:$0xff] %v8616_v19  ;;  %v8832_v3 = vadd.f32 %v8831_v57, %v8616_v19  ;;  %v8947_v25 = vmul.f32 %v8616_v19, %v8616_v19  ;;  %v8617_v61 = vmul.f32 %v20650_v54, %v24236_v56  ;;  %v24501_v56 = vpop.permute.xlu1 %8357  ;;  %v26465_v29 = vld [vmem:[#allocation15_spill] sm:$0xff] }
 0x6ab   : > { %8728 = vst [vmem:[%s24417_s17 + $0x98] sm:$0xff] %v8619_v60  ;;  %v8950_v45 = vmul.f32 %v8619_v60, %v8619_v60 }
 0x6ac   : > { %v9054_v52 = vadd.f32 %v9053_v50, %v8947_v25  ;;  %8726 = vst [vmem:[%s24417_s17 + $0x88] sm:$0xff] %v8617_v61  ;;  %v8833_v62 = vadd.f32 %v8832_v3, %v8617_v61  ;;  %v8948_v36 = vmul.f32 %v8617_v61, %v8617_v61  ;;  %v19413_v31 = vpop.f32.mrb[20].mxu0  ;;  %v26466_v3 = vld [vmem:[#allocation17_spill] sm:$0xff]  ;;  %v26467_v25 = vld [vmem:[#allocation16_spill] sm:$0xff] }
 0x6ad   : > { %v20651_v55 = vadd.f32 %v19413_v31, %v24254_v9  ;;  %v7492_v4 = vpop.f32.mrb[21].mxu0 }
 0x6ae   : > { %v8834_v7 = vadd.f32 %v8833_v62, %v8618_v17  ;;  %v9055_v44 = vadd.f32 %v9054_v52, %v8948_v36  ;;  %v20652_v22 = vadd.f32 %v7492_v4, %v24258_v14  ;;  %v19414_v28 = vpop.f32.mrb[22].mxu0  ;;  %v26468_v52 = vld [vmem:[#allocation23_spill] sm:$0xff] }
 0x6af   : > { %v8622_v58 = vmul.f32 %v20651_v55, %v24270_v1  ;;  %v20653_v42 = vadd.f32 %v19414_v28, %v24262_v63  ;;  %v7495_v9 = vpop.f32.mrb[23].mxu0  ;;  %v24512_v1 = vpop.permute.xlu0 %8362  ;;  %v26469_v55 = vld [vmem:[#allocation18_spill] sm:$0xff] }
 0x6b0   : > { %v8835_v23 = vadd.f32 %v8834_v7, %v8619_v60  ;;  %v9056_v53 = vadd.f32 %v9055_v44, %v8949_v5  ;;  %v8620_v6 = vmul.f32 %v20652_v22, %v24256_v59  ;;  %v20654_v35 = vadd.f32 %v7495_v9, %v24265_v26  ;;  %v24515_v59 = vpop.permute.xlu1 %8367 }
 0x6b1   : > { %8731 = vst [vmem:[%s24417_s17 + $0xb0] sm:$0xff] %v8622_v58  ;;  %v8623_v14 = vmul.f32 %v20653_v42, %v24272_v39  ;;  %v8953_v38 = vmul.f32 %v8622_v58, %v8622_v58 }
 0x6b2   : > { %v9057_v48 = vadd.f32 %v9056_v53, %v8950_v45  ;;  %8729 = vst [vmem:[%s24417_s17 + $0xa0] sm:$0xff] %v8620_v6  ;;  %v8836_v51 = vadd.f32 %v8835_v23, %v8620_v6  ;;  %v8951_v12 = vmul.f32 %v8620_v6, %v8620_v6  ;;  %v8621_v43 = vmul.f32 %v20654_v35, %v24260_v15  ;;  %v26470_v45 = vld [vmem:[#allocation19_spill] sm:$0xff]  ;;  %v26471_v6 = vld [vmem:[#allocation20_spill] sm:$0xff] }
 0x6b3   : > { %8732 = vst [vmem:[%s24417_s17 + $0xb8] sm:$0xff] %v8623_v14  ;;  %v8954_v10 = vmul.f32 %v8623_v14, %v8623_v14  ;;  %v24525_v36 = vpop.permute.xlu0 %8372 }
 0x6b4   : > { %v9058_v63 = vadd.f32 %v9057_v48, %v8951_v12  ;;  %8730 = vst [vmem:[%s24417_s17 + $0xa8] sm:$0xff] %v8621_v43  ;;  %v8837_v40 = vadd.f32 %v8836_v51, %v8621_v43  ;;  %v8952_v13 = vmul.f32 %v8621_v43, %v8621_v43  ;;  %v19417_v2 = vpop.f32.mrb[24].mxu0  ;;  %v24529_v5 = vpop.permute.xlu1 %8377  ;;  %v26472_v51 = vld [vmem:[#allocation30_spill] sm:$0xff]  ;;  %v26473_v43 = vld [vmem:[#allocation21_spill] sm:$0xff] }
 0x6b5   : > { %v20655_v26 = vadd.f32 %v19417_v2, %v24274_v41  ;;  %v7508_v39 = vpop.f32.mrb[25].mxu0 }
 0x6b6   : > { %v8838_v37 = vadd.f32 %v8837_v40, %v8622_v58  ;;  %v9059_v17 = vadd.f32 %v9058_v63, %v8952_v13  ;;  %v20656_v15 = vadd.f32 %v7508_v39, %v24276_v49  ;;  %v19418_v0 = vpop.f32.mrb[26].mxu0  ;;  %v26474_v39 = vld [vmem:[#allocation25_spill] sm:$0xff] }
 0x6b7   : > { %v8626_v57 = vmul.f32 %v20655_v26, %v24297_v33  ;;  %v20657_v19 = vadd.f32 %v19418_v0, %v26465_v29  ;;  %v7511_v54 = vpop.f32.mrb[27].mxu0  ;;  %v24537_v13 = vpop.permute.xlu0 %8382  ;;  %v26476_v0 = vld [vmem:[#allocation31_spill] sm:$0xff] }
 0x6b8   : > { %v8839_v60 = vadd.f32 %v8838_v37, %v8623_v14  ;;  %v9060_v50 = vadd.f32 %v9059_v17, %v8953_v38  ;;  %v8624_v41 = vmul.f32 %v20656_v15, %v26466_v3  ;;  %v20658_v61 = vadd.f32 %v7511_v54, %v26467_v25  ;;  %v26475_v37 = vld [vmem:[#allocation22_spill] sm:$0xff]  ;;  %v24541_v15 = vpop.permute.xlu1 %8387  ;;  %v26477_v54 = vld [vmem:[#allocation27_spill] sm:$0xff] }
 0x6b9   : > { %8735 = vst [vmem:[%s24417_s17 + $0xd0] sm:$0xff] %v8626_v57  ;;  %v8627_v62 = vmul.f32 %v20657_v19, %v26468_v52  ;;  %v8957_v9 = vmul.f32 %v8626_v57, %v8626_v57 }
 0x6ba   : > { %v9061_v49 = vadd.f32 %v9060_v50, %v8954_v10  ;;  %8733 = vst [vmem:[%s24417_s17 + $0xc0] sm:$0xff] %v8624_v41  ;;  %v8840_v31 = vadd.f32 %v8839_v60, %v8624_v41  ;;  %v8955_v33 = vmul.f32 %v8624_v41, %v8624_v41  ;;  %v8625_v4 = vmul.f32 %v20658_v61, %v26469_v55  ;;  %v26478_v61 = vld [vmem:[#allocation24_spill] sm:$0xff] }
 0x6bb   : > { %8736 = vst [vmem:[%s24417_s17 + $0xd8] sm:$0xff] %v8627_v62  ;;  %v8958_v48 = vmul.f32 %v8627_v62, %v8627_v62 }
 0x6bc   : > { %v9062_v7 = vadd.f32 %v9061_v49, %v8955_v33  ;;  %8734 = vst [vmem:[%s24417_s17 + $0xc8] sm:$0xff] %v8625_v4  ;;  %v8841_v44 = vadd.f32 %v8840_v31, %v8625_v4  ;;  %v8956_v22 = vmul.f32 %v8625_v4, %v8625_v4  ;;  %v19421_v28 = vpop.f32.mrb[28].mxu0  ;;  %v24550_v49 = vpop.permute.xlu0 %8392  ;;  %v26479_v4 = vld [vmem:[#allocation26_spill] sm:$0xff] }
 0x6bd   : > { %v20659_v58 = vadd.f32 %v19421_v28, %v26470_v45  ;;  %v7524_v42 = vpop.f32.mrb[29].mxu0  ;;  %v26480_v45 = vld [vmem:[#allocation41_spill] sm:$0xff] }
 0x6be   : > { %v8842_v23 = vadd.f32 %v8841_v44, %v8626_v57  ;;  %v9063_v53 = vadd.f32 %v9062_v7, %v8956_v22  ;;  %v20660_v35 = vadd.f32 %v7524_v42, %v26471_v6  ;;  %v19422_v14 = vpop.f32.mrb[30].mxu0  ;;  %v24553_v22 = vpop.permute.xlu1 %8397  ;;  %v26481_v42 = vld [vmem:[#allocation28_spill] sm:$0xff] }
 0x6bf   : > { %v8630_v12 = vmul.f32 %v20659_v58, %v26472_v51  ;;  %v20661_v63 = vadd.f32 %v19422_v14, %v26473_v43  ;;  %v7527_v40 = vpop.f32.mrb[31].mxu0 }
 0x6c0   : > { %v8843_v2 = vadd.f32 %v8842_v23, %v8627_v62  ;;  %v9064_v26 = vadd.f32 %v9063_v53, %v8957_v9  ;;  %v8628_v38 = vmul.f32 %v20660_v35, %v26474_v39  ;;  %v20662_v17 = vadd.f32 %v7527_v40, %v26475_v37  ;;  %v26482_v35 = vld [vmem:[#allocation36_spill] sm:$0xff] }
 0x6c1   : > { %8739 = vst [vmem:[%s24417_s17 + $0xf0] sm:$0xff] %v8630_v12  ;;  %v8631_v10 = vmul.f32 %v20661_v63, %v26476_v0  ;;  %v8961_v31 = vmul.f32 %v8630_v12, %v8630_v12 }
 0x6c2   : > { %v9065_v57 = vadd.f32 %v9064_v26, %v8958_v48  ;;  %8737 = vst [vmem:[%s24417_s17 + $0xe0] sm:$0xff] %v8628_v38  ;;  %v8844_v29 = vadd.f32 %v8843_v2, %v8628_v38  ;;  %v8959_v19 = vmul.f32 %v8628_v38, %v8628_v38  ;;  %v8629_v60 = vmul.f32 %v20662_v17, %v26477_v54  ;;  %v26483_v48 = vld [vmem:[#allocation29_spill] sm:$0xff]  ;;  %v24564_v38 = vpop.permute.xlu0 %8402 }
 0x6c3   : > { %8740 = vst [vmem:[%s24417_s17 + $0xf8] sm:$0xff] %v8631_v10  ;;  %v8962_v28 = vmul.f32 %v8631_v10, %v8631_v10  ;;  %v26485_v26 = vld [vmem:[#allocation37_spill] sm:$0xff] }
 0x6c4   : > { %v9066_v50 = vadd.f32 %v9065_v57, %v8959_v19  ;;  %8738 = vst [vmem:[%s24417_s17 + $0xe8] sm:$0xff] %v8629_v60  ;;  %v8845_v3 = vadd.f32 %v8844_v29, %v8629_v60  ;;  %v8960_v41 = vmul.f32 %v8629_v60, %v8629_v60  ;;  %v19425_v25 = vpop.f32.mrb[32].mxu0  ;;  %v24567_v57 = vpop.permute.xlu1 %8407  ;;  %v26486_v29 = vld [vmem:[#allocation32_spill] sm:$0xff] }
 0x6c5   : > { %v20663_v52 = vadd.f32 %v19425_v25, %v26478_v61  ;;  %v7540_v62 = vpop.f32.mrb[33].mxu0 }
 0x6c6   : > { %v8846_v33 = vadd.f32 %v8845_v3, %v8630_v12  ;;  %v9067_v55 = vadd.f32 %v9066_v50, %v8960_v41  ;;  %v20664_v7 = vadd.f32 %v7540_v62, %v26479_v4  ;;  %v19426_v44 = vpop.f32.mrb[34].mxu0  ;;  %v26484_v12 = vld [vmem:[#allocation43_spill] sm:$0xff]  ;;  %v26487_v41 = vld [vmem:[#allocation33_spill] sm:$0xff]  ;;  %v26488_v62 = vld [vmem:[#allocation50_spill] sm:$0xff] }
 0x6c7   : > { %v8634_v58 = vmul.f32 %v20663_v52, %v26480_v45  ;;  %v20665_v9 = vadd.f32 %v19426_v44, %v26481_v42  ;;  %v7543_v23 = vpop.f32.mrb[35].mxu0  ;;  %v26491_v42 = vld [vmem:[#allocation35_spill] sm:$0xff] }
 0x6c8   : > { %v8847_v53 = vadd.f32 %v8846_v33, %v8631_v10  ;;  %v9068_v6 = vadd.f32 %v9067_v55, %v8961_v31  ;;  %v8632_v14 = vmul.f32 %v20664_v7, %v26482_v35  ;;  %v20666_v51 = vadd.f32 %v7543_v23, %v26483_v48  ;;  %v26489_v33 = vld [vmem:[#allocation34_spill] sm:$0xff]  ;;  %v26493_v48 = vld [vmem:[#allocation47_spill] sm:$0xff] }
 0x6c9   : > { %8743 = vst [vmem:[%s24417_s17 + $0x110] sm:$0xff] %v8634_v58  ;;  %v8635_v43 = vmul.f32 %v20665_v9, %v26484_v12  ;;  %v8965_v60 = vmul.f32 %v8634_v58, %v8634_v58  ;;  %v24581_v12 = vpop.permute.xlu1 %8417 }
 0x6ca   : > { %v9069_v63 = vadd.f32 %v9068_v6, %v8962_v28  ;;  %8741 = vst [vmem:[%s24417_s17 + $0x100] sm:$0xff] %v8632_v14  ;;  %v8848_v40 = vadd.f32 %v8847_v53, %v8632_v14  ;;  %v8963_v2 = vmul.f32 %v8632_v14, %v8632_v14  ;;  %v8633_v39 = vmul.f32 %v20666_v51, %v26485_v26  ;;  %v26490_v28 = vld [vmem:[#allocation45_spill] sm:$0xff]  ;;  %v24577_v53 = vpop.permute.xlu0 %8412  ;;  %v26494_v26 = vld [vmem:[#allocation38_spill] sm:$0xff] }
 0x6cb   : > { %8744 = vst [vmem:[%s24417_s17 + $0x118] sm:$0xff] %v8635_v43  ;;  %v8966_v52 = vmul.f32 %v8635_v43, %v8635_v43 }
 0x6cc   : > { %v9070_v37 = vadd.f32 %v9069_v63, %v8963_v2  ;;  %8742 = vst [vmem:[%s24417_s17 + $0x108] sm:$0xff] %v8633_v39  ;;  %v8849_v17 = vadd.f32 %v8848_v40, %v8633_v39  ;;  %v8964_v0 = vmul.f32 %v8633_v39, %v8633_v39  ;;  %v19429_v10 = vpop.f32.mrb[36].mxu0 }
 0x6cd   : > { %v20667_v19 = vadd.f32 %v19429_v10, %v26486_v29  ;;  %v7556_v54 = vpop.f32.mrb[37].mxu0  ;;  %v26495_v29 = vld [vmem:[#allocation39_spill] sm:$0xff] }
 0x6ce   : > { %v8850_v50 = vadd.f32 %v8849_v17, %v8634_v58  ;;  %v9071_v3 = vadd.f32 %v9070_v37, %v8964_v0  ;;  %v20668_v25 = vadd.f32 %v7556_v54, %v26487_v41  ;;  %v19430_v61 = vpop.f32.mrb[38].mxu0  ;;  %v26492_v58 = vld [vmem:[#allocation51_spill] sm:$0xff]  ;;  %v26497_v41 = vld [vmem:[#allocation40_spill] sm:$0xff] }
 0x6cf   : > { %v8638_v31 = vmul.f32 %v20667_v19, %v26488_v62  ;;  %v20669_v55 = vadd.f32 %v19430_v61, %v26489_v33  ;;  %v7559_v4 = vpop.f32.mrb[39].mxu0 }
 0x6d0   : > { %v8851_v7 = vadd.f32 %v8850_v50, %v8635_v43  ;;  %v9072_v44 = vadd.f32 %v9071_v3, %v8965_v60  ;;  %v8636_v45 = vmul.f32 %v20668_v25, %v26490_v28  ;;  %v20670_v9 = vadd.f32 %v7559_v4, %v26491_v42  ;;  %v26496_v50 = vld [vmem:[#allocation61_spill] sm:$0xff] }
 0x6d1   : > { %8747 = vst [vmem:[%s24417_s17 + $0x130] sm:$0xff] %v8638_v31  ;;  %v8639_v23 = vmul.f32 %v20669_v55, %v26492_v58  ;;  %v8969_v17 = vmul.f32 %v8638_v31, %v8638_v31  ;;  %v26498_v55 = vld [vmem:[#allocation56_spill] sm:$0xff]  ;;  %v26500_v58 = vld [vmem:[#allocation57_spill] sm:$0xff] }
 0x6d2   : > { %v9073_v6 = vadd.f32 %v9072_v44, %v8966_v52  ;;  %8745 = vst [vmem:[%s24417_s17 + $0x120] sm:$0xff] %v8636_v45  ;;  %v8852_v35 = vadd.f32 %v8851_v7, %v8636_v45  ;;  %v8967_v14 = vmul.f32 %v8636_v45, %v8636_v45  ;;  %v8637_v51 = vmul.f32 %v20670_v9, %v26493_v48  ;;  %v24589_v52 = vpop.permute.xlu0 %8422  ;;  %v24593_v44 = vpop.permute.xlu1 %8427 }
 0x6d3   : > { %8748 = vst [vmem:[%s24417_s17 + $0x138] sm:$0xff] %v8639_v23  ;;  %v8970_v60 = vmul.f32 %v8639_v23, %v8639_v23 }
 0x6d4   : > { %v9074_v43 = vadd.f32 %v9073_v6, %v8967_v14  ;;  %8746 = vst [vmem:[%s24417_s17 + $0x128] sm:$0xff] %v8637_v51  ;;  %v8853_v63 = vadd.f32 %v8852_v35, %v8637_v51  ;;  %v8968_v40 = vmul.f32 %v8637_v51, %v8637_v51  ;;  %v19433_v2 = vpop.f32.mrb[40].mxu0  ;;  %v26501_v51 = vld [vmem:[#allocation44_spill] sm:$0xff] }
 0x6d5   : > { %v20671_v39 = vadd.f32 %v19433_v2, %v26494_v26  ;;  %v7572_v37 = vpop.f32.mrb[41].mxu0 }
 0x6d6   : > { %v8854_v0 = vadd.f32 %v8853_v63, %v8638_v31  ;;  %v9075_v10 = vadd.f32 %v9074_v43, %v8968_v40  ;;  %v20672_v19 = vadd.f32 %v7572_v37, %v26495_v29  ;;  %v19434_v54 = vpop.f32.mrb[42].mxu0  ;;  %v26499_v31 = vld [vmem:[#allocation42_spill] sm:$0xff]  ;;  %v24602_v40 = vpop.permute.xlu0 %8432 }
 0x6d7   : > { %v8642_v3 = vmul.f32 %v20671_v39, %v26496_v50  ;;  %v20673_v25 = vadd.f32 %v19434_v54, %v26497_v41  ;;  %v7575_v61 = vpop.f32.mrb[43].mxu0  ;;  %v26502_v39 = vld [vmem:[#allocation46_spill] sm:$0xff] }
 0x6d8   : > { %v8855_v62 = vadd.f32 %v8854_v0, %v8639_v23  ;;  %v9076_v33 = vadd.f32 %v9075_v10, %v8969_v17  ;;  %v8640_v4 = vmul.f32 %v20672_v19, %v26498_v55  ;;  %v20674_v7 = vadd.f32 %v7575_v61, %v26499_v31  ;;  %v24605_v0 = vpop.permute.xlu1 %8437  ;;  %v26503_v19 = vld [vmem:[#allocation48_spill] sm:$0xff] }
 0x6d9   : > { %8751 = vst [vmem:[%s24417_s17 + $0x150] sm:$0xff] %v8642_v3  ;;  %v8643_v28 = vmul.f32 %v20673_v25, %v24404_v27  ;;  %v8973_v2 = vmul.f32 %v8642_v3, %v8642_v3  ;;  %v26504_v25 = vld [vmem:[#allocation63_spill] sm:$0xff] }
 0x6da   : > { %v9077_v45 = vadd.f32 %v9076_v33, %v8970_v60  ;;  %8749 = vst [vmem:[%s24417_s17 + $0x140] sm:$0xff] %v8640_v4  ;;  %v8856_v42 = vadd.f32 %v8855_v62, %v8640_v4  ;;  %v8971_v9 = vmul.f32 %v8640_v4, %v8640_v4  ;;  %v8641_v6 = vmul.f32 %v20674_v7, %v26500_v58  ;;  %v26506_v33 = vld [vmem:[#allocation65_spill] sm:$0xff] }
 0x6db   : > { %8752 = vst [vmem:[%s24417_s17 + $0x158] sm:$0xff] %v8643_v28  ;;  %v8974_v10 = vmul.f32 %v8643_v28, %v8643_v28 }
 0x6dc   : > { %v9078_v35 = vadd.f32 %v9077_v45, %v8971_v9  ;;  %8750 = vst [vmem:[%s24417_s17 + $0x148] sm:$0xff] %v8641_v6  ;;  %v8857_v23 = vadd.f32 %v8856_v42, %v8641_v6  ;;  %v8972_v14 = vmul.f32 %v8641_v6, %v8641_v6  ;;  %v19437_v48 = vpop.f32.mrb[44].mxu0  ;;  %v26507_v45 = vld [vmem:[#allocation64_spill] sm:$0xff] }
 0x6dd   : > { %v20675_v43 = vadd.f32 %v19437_v48, %v26501_v51  ;;  %v7588_v63 = vpop.f32.mrb[45].mxu0 }
 0x6de   : > { %v8858_v27 = vadd.f32 %v8857_v23, %v8642_v3  ;;  %v9079_v26 = vadd.f32 %v9078_v35, %v8972_v14  ;;  %v20676_v37 = vadd.f32 %v7588_v63, %v26502_v39  ;;  %v19438_v17 = vpop.f32.mrb[46].mxu0  ;;  %v26505_v3 = vld [vmem:[#allocation49_spill] sm:$0xff]  ;;  %v24619_v35 = vpop.permute.xlu1 %8447  ;;  %v26508_v23 = vld [vmem:[#allocation52_spill] sm:$0xff] }
 0x6df   : > { %v8646_v29 = vmul.f32 %v20675_v43, %v24421_v11  ;;  %v20677_v54 = vadd.f32 %v19438_v17, %v26503_v19  ;;  %v7591_v60 = vpop.f32.mrb[47].mxu0  ;;  %v24616_v11 = vpop.permute.xlu0 %8442  ;;  %v26510_v17 = vld [vmem:[#allocation54_spill] sm:$0xff] }
 0x6e0   : > { %v8859_v50 = vadd.f32 %v8858_v27, %v8643_v28  ;;  %v9080_v41 = vadd.f32 %v9079_v26, %v8973_v2  ;;  %v8644_v61 = vmul.f32 %v20676_v37, %v26504_v25  ;;  %v20678_v62 = vadd.f32 %v7591_v60, %v26505_v3  ;;  %v26509_v2 = vld [vmem:[#allocation53_spill] sm:$0xff] }
 0x6e1   : > { %8755 = vst [vmem:[%s24417_s17 + $0x170] sm:$0xff] %v8646_v29  ;;  %v8647_v55 = vmul.f32 %v20677_v54, %v26506_v33  ;;  %v8977_v51 = vmul.f32 %v8646_v29, %v8646_v29 }
 0x6e2   : > { %v9081_v4 = vadd.f32 %v9080_v41, %v8974_v10  ;;  %8753 = vst [vmem:[%s24417_s17 + $0x160] sm:$0xff] %v8644_v61  ;;  %v8860_v31 = vadd.f32 %v8859_v50, %v8644_v61  ;;  %v8975_v7 = vmul.f32 %v8644_v61, %v8644_v61  ;;  %v8645_v42 = vmul.f32 %v20678_v62, %v26507_v45  ;;  %v26511_v41 = vld [vmem:[#allocation55_spill] sm:$0xff] }
 0x6e3   : > { %8756 = vst [vmem:[%s24417_s17 + $0x178] sm:$0xff] %v8647_v55  ;;  %v8978_v39 = vmul.f32 %v8647_v55, %v8647_v55  ;;  %v24629_v61 = vpop.permute.xlu0 %8452 }
 0x6e4   : > { %v9082_v9 = vadd.f32 %v9081_v4, %v8975_v7  ;;  %8754 = vst [vmem:[%s24417_s17 + $0x168] sm:$0xff] %v8645_v42  ;;  %v8861_v28 = vadd.f32 %v8860_v31, %v8645_v42  ;;  %v8976_v58 = vmul.f32 %v8645_v42, %v8645_v42  ;;  %v19441_v6 = vpop.f32.mrb[48].mxu0  ;;  %v24633_v4 = vpop.permute.xlu1 %8457 }
 0x6e5   : > { %v20679_v14 = vadd.f32 %v19441_v6, %v26508_v23  ;;  %v7604_v48 = vpop.f32.mrb[49].mxu0 }
 0x6e6   : > { %v8862_v43 = vadd.f32 %v8861_v28, %v8646_v29  ;;  %v9083_v63 = vadd.f32 %v9082_v9, %v8976_v58  ;;  %v20680_v27 = vadd.f32 %v7604_v48, %v26509_v2  ;;  %v19442_v26 = vpop.f32.mrb[50].mxu0  ;;  %v26512_v9 = vld [vmem:[#allocation58_spill] sm:$0xff] }
 0x6e7   : > { %v8650_v37 = vmul.f32 %v20679_v14, %v24446_v8  ;;  %v20681_v10 = vadd.f32 %v19442_v26, %v26510_v17  ;;  %v7607_v19 = vpop.f32.mrb[51].mxu0 }
 0x6e8   : > { %v9084_v54 = vadd.f32 %v9083_v63, %v8977_v51  ;;  %v8648_v60 = vmul.f32 %v20680_v27, %v24433_v18  ;;  %v8863_v50 = vadd.f32 %v8862_v43, %v8647_v55  ;;  %v20682_v25 = vadd.f32 %v7607_v19, %v26511_v41  ;;  %v26514_v27 = vld [vmem:[#allocation60_spill] sm:$0xff] }
 0x6e9   : > { %8759 = vst [vmem:[%s24417_s17 + $0x190] sm:$0xff] %v8650_v37  ;;  %v8651_v29 = vmul.f32 %v20681_v10, %v24449_v21  ;;  %v8981_v6 = vmul.f32 %v8650_v37, %v8650_v37 }
 0x6ea   : > { %8757 = vst [vmem:[%s24417_s17 + $0x180] sm:$0xff] %v8648_v60  ;;  %v8864_v3 = vadd.f32 %v8863_v50, %v8648_v60  ;;  %v8979_v62 = vmul.f32 %v8648_v60, %v8648_v60  ;;  %v9085_v8 = vadd.f32 %v9084_v54, %v8978_v39  ;;  %v8649_v33 = vmul.f32 %v20682_v25, %v24437_v16  ;;  %v26513_v16 = vld [vmem:[#allocation59_spill] sm:$0xff]  ;;  %v26515_v54 = vld [vmem:[#allocation62_spill] sm:$0xff]  ;;  %v24645_v50 = vpop.permute.xlu0 %8462 }
 0x6eb   : > { %8760 = vst [vmem:[%s24417_s17 + $0x198] sm:$0xff] %v8651_v29  ;;  %v18953_v31 = vpop.f32.mrb[56].mxu1  ;;  %v8982_v63 = vmul.f32 %v8651_v29, %v8651_v29 }
 0x6ec   : > { %v9086_v7 = vadd.f32 %v9085_v8, %v8979_v62  ;;  %8758 = vst [vmem:[%s24417_s17 + $0x188] sm:$0xff] %v8649_v33  ;;  %v8865_v18 = vadd.f32 %v8864_v3, %v8649_v33  ;;  %v8980_v55 = vmul.f32 %v8649_v33, %v8649_v33  ;;  %v19445_v45 = vpop.f32.mrb[52].mxu0  ;;  %v4848_v42 = vpop.f32.mrb[57].mxu1 }
 0x6ed   : > { %v20683_v21 = vadd.f32 %v19445_v45, %v26512_v9  ;;  %v7620_v28 = vpop.f32.mrb[53].mxu0  ;;  %v18954_v58 = vpop.f32.mrb[58].mxu1 }
 0x6ee   : > { %v8866_v23 = vadd.f32 %v8865_v18, %v8650_v37  ;;  %v9087_v14 = vadd.f32 %v9086_v7, %v8980_v55  ;;  %v20684_v48 = vadd.f32 %v7620_v28, %v26513_v16  ;;  %v19446_v51 = vpop.f32.mrb[54].mxu0  ;;  %v4851_v43 = vpop.f32.mrb[59].mxu1 }
 0x6ef   : > { %v8654_v2 = vmul.f32 %v20683_v21, %v24473_v32  ;;  %v20685_v26 = vadd.f32 %v19446_v51, %v26514_v27  ;;  %v7623_v39 = vpop.f32.mrb[55].mxu0  ;;  %v24649_v62 = vpop.permute.xlu1 %8467 }
 0x6f0   : > { %v9088_v17 = vadd.f32 %v9087_v14, %v8981_v6  ;;  %v8652_v10 = vmul.f32 %v20684_v48, %v24460_v24  ;;  %v8867_v19 = vadd.f32 %v8866_v23, %v8651_v29  ;;  %v20686_v37 = vadd.f32 %v7623_v39, %v26515_v54  ;;  %v24657_v39 = vpop.permute.xlu0 %8472 }
 0x6f1   : > { %8763 = vst [vmem:[%s24417_s17 + $0x1b0] sm:$0xff] %v8654_v2  ;;  %v8655_v60 = vmul.f32 %v20685_v26, %v24477_v46  ;;  %v8985_v9 = vmul.f32 %v8654_v2, %v8654_v2 }
 0x6f2   : > { %8761 = vst [vmem:[%s24417_s17 + $0x1a0] sm:$0xff] %v8652_v10  ;;  %v8868_v41 = vadd.f32 %v8867_v19, %v8652_v10  ;;  %v8983_v25 = vmul.f32 %v8652_v10, %v8652_v10  ;;  %v9089_v32 = vadd.f32 %v9088_v17, %v8982_v63  ;;  %v8653_v3 = vmul.f32 %v20686_v37, %v24463_v47 }
 0x6f3   : > { %8764 = vst [vmem:[%s24417_s17 + $0x1b8] sm:$0xff] %v8655_v60  ;;  %v18957_v8 = vpop.f32.mrb[60].mxu1  ;;  %v8986_v14 = vmul.f32 %v8655_v60, %v8655_v60  ;;  %v24661_v19 = vpop.permute.xlu1 %8477 }
 0x6f4   : > { %v9090_v33 = vadd.f32 %v9089_v32, %v8983_v25  ;;  %8762 = vst [vmem:[%s24417_s17 + $0x1a8] sm:$0xff] %v8653_v3  ;;  %v8869_v24 = vadd.f32 %v8868_v41, %v8653_v3  ;;  %v8984_v29 = vmul.f32 %v8653_v3, %v8653_v3  ;;  %v19449_v7 = vpop.f32.mrb[56].mxu0  ;;  %v4864_v18 = vpop.f32.mrb[61].mxu1 }
 0x6f5   : > { %v20687_v55 = vadd.f32 %v19449_v7, %v18953_v31  ;;  %v7636_v46 = vpop.f32.mrb[57].mxu0  ;;  %v18958_v45 = vpop.f32.mrb[62].mxu1 }
 0x6f6   : > { %v8870_v21 = vadd.f32 %v8869_v24, %v8654_v2  ;;  %v9091_v28 = vadd.f32 %v9090_v33, %v8984_v29  ;;  %v20688_v6 = vadd.f32 %v7636_v46, %v4848_v42  ;;  %v19450_v47 = vpop.f32.mrb[58].mxu0  ;;  %v4867_v23 = vpop.f32.mrb[63].mxu1 }
 0x6f7   : > { %v8658_v16 = vmul.f32 %v20687_v55, %v24498_v30  ;;  %v20689_v48 = vadd.f32 %v19450_v47, %v18954_v58  ;;  %v7639_v51 = vpop.f32.mrb[59].mxu0 }
 0x6f8   : > { %v9092_v63 = vadd.f32 %v9091_v28, %v8985_v9  ;;  %v8656_v31 = vmul.f32 %v20688_v6, %v24485_v20  ;;  %v8871_v27 = vadd.f32 %v8870_v21, %v8655_v60  ;;  %v20690_v26 = vadd.f32 %v7639_v51, %v4851_v43  ;;  %v24673_v51 = vpop.permute.xlu1 %8487 }
 0x6f9   : > { %8767 = vst [vmem:[%s24417_s17 + $0x1d0] sm:$0xff] %v8658_v16  ;;  %v8659_v2 = vmul.f32 %v20689_v48, %v24501_v56  ;;  %v8989_v32 = vmul.f32 %v8658_v16, %v8658_v16 }
 0x6fa   : > { %8765 = vst [vmem:[%s24417_s17 + $0x1c0] sm:$0xff] %v8656_v31  ;;  %v8872_v42 = vadd.f32 %v8871_v27, %v8656_v31  ;;  %v8987_v17 = vmul.f32 %v8656_v31, %v8656_v31  ;;  %v9093_v10 = vadd.f32 %v9092_v63, %v8986_v14  ;;  %v8657_v30 = vmul.f32 %v20690_v26, %v24489_v34  ;;  %v24669_v14 = vpop.permute.xlu0 %8482 }
 0x6fb   : > { %8768 = vst [vmem:[%s24417_s17 + $0x1d8] sm:$0xff] %v8659_v2  ;;  %v18961_v58 = vpop.f32.mrb[64].mxu1  ;;  %v8990_v7 = vmul.f32 %v8659_v2, %v8659_v2 }
 0x6fc   : > { %v9094_v54 = vadd.f32 %v9093_v10, %v8987_v17  ;;  %8766 = vst [vmem:[%s24417_s17 + $0x1c8] sm:$0xff] %v8657_v30  ;;  %v8873_v20 = vadd.f32 %v8872_v42, %v8657_v30  ;;  %v8988_v37 = vmul.f32 %v8657_v30, %v8657_v30  ;;  %v19453_v43 = vpop.f32.mrb[60].mxu0  ;;  %v4880_v60 = vpop.f32.mrb[65].mxu1 }
 0x6fd   : > { %v20691_v41 = vadd.f32 %v19453_v43, %v18957_v8  ;;  %v7652_v56 = vpop.f32.mrb[61].mxu0  ;;  %v18962_v25 = vpop.f32.mrb[66].mxu1 }
 0x6fe   : > { %v8874_v3 = vadd.f32 %v8873_v20, %v8658_v16  ;;  %v9095_v33 = vadd.f32 %v9094_v54, %v8988_v37  ;;  %v20692_v24 = vadd.f32 %v7652_v56, %v4864_v18  ;;  %v19454_v34 = vpop.f32.mrb[62].mxu0  ;;  %v4883_v29 = vpop.f32.mrb[67].mxu1 }
 0x6ff   : > { %v8662_v55 = vmul.f32 %v20691_v41, %v24525_v36  ;;  %v20693_v46 = vadd.f32 %v19454_v34, %v18958_v45  ;;  %v7655_v9 = vpop.f32.mrb[63].mxu0 }
 0x700   : > { %v9096_v21 = vadd.f32 %v9095_v33, %v8989_v32  ;;  %v8660_v8 = vmul.f32 %v20692_v24, %v24512_v1  ;;  %v8875_v28 = vadd.f32 %v8874_v3, %v8659_v2  ;;  %v20694_v6 = vadd.f32 %v7655_v9, %v4867_v23  ;;  %v24681_v24 = vpop.permute.xlu0 %8492 }
 0x701   : > { %8771 = vst [vmem:[%s24417_s17 + $0x1f0] sm:$0xff] %v8662_v55  ;;  %v8663_v47 = vmul.f32 %v20693_v46, %v24529_v5  ;;  %v8993_v42 = vmul.f32 %v8662_v55, %v8662_v55 }
 0x702   : > { %8769 = vst [vmem:[%s24417_s17 + $0x1e0] sm:$0xff] %v8660_v8  ;;  %v8876_v18 = vadd.f32 %v8875_v28, %v8660_v8  ;;  %v8991_v16 = vmul.f32 %v8660_v8, %v8660_v8  ;;  %v9097_v48 = vadd.f32 %v9096_v21, %v8990_v7  ;;  %v8661_v36 = vmul.f32 %v20694_v6, %v24515_v59 }
 0x703   : > { %8772 = vst [vmem:[%s24417_s17 + $0x1f8] sm:$0xff] %v8663_v47  ;;  %v18965_v45 = vpop.f32.mrb[68].mxu1  ;;  %v8994_v20 = vmul.f32 %v8663_v47, %v8663_v47 }
 0x704   : > { %v9098_v63 = vadd.f32 %v9097_v48, %v8991_v16  ;;  %8770 = vst [vmem:[%s24417_s17 + $0x1e8] sm:$0xff] %v8661_v36  ;;  %v8877_v1 = vadd.f32 %v8876_v18, %v8661_v36  ;;  %v8992_v31 = vmul.f32 %v8661_v36, %v8661_v36  ;;  %v19457_v23 = vpop.f32.mrb[64].mxu0  ;;  %v4896_v27 = vpop.f32.mrb[69].mxu1 }
 0x705   : > { %v20695_v26 = vadd.f32 %v19457_v23, %v18961_v58  ;;  %v7668_v5 = vpop.f32.mrb[65].mxu0  ;;  %v18966_v2 = vpop.f32.mrb[70].mxu1 }
 0x706   : > { %v8878_v17 = vadd.f32 %v8877_v1, %v8662_v55  ;;  %v9099_v10 = vadd.f32 %v9098_v63, %v8992_v31  ;;  %v20696_v30 = vadd.f32 %v7668_v5, %v4880_v60  ;;  %v19458_v59 = vpop.f32.mrb[66].mxu0  ;;  %v4899_v54 = vpop.f32.mrb[71].mxu1 }
 0x707   : > { %v8666_v37 = vmul.f32 %v20695_v26, %v24550_v49  ;;  %v20697_v43 = vadd.f32 %v19458_v59, %v18962_v25  ;;  %v7671_v41 = vpop.f32.mrb[67].mxu0  ;;  %v24685_v55 = vpop.permute.xlu1 %8497 }
 0x708   : > { %v9100_v56 = vadd.f32 %v9099_v10, %v8993_v42  ;;  %v8664_v58 = vmul.f32 %v20696_v30, %v24537_v13  ;;  %v8879_v32 = vadd.f32 %v8878_v17, %v8663_v47  ;;  %v20698_v3 = vadd.f32 %v7671_v41, %v4883_v29  ;;  %v24693_v17 = vpop.permute.xlu0 %8502 }
 0x709   : > { %8775 = vst [vmem:[%s24417_s17 + $0x210] sm:$0xff] %v8666_v37  ;;  %v8667_v33 = vmul.f32 %v20697_v43, %v24553_v22  ;;  %v8997_v6 = vmul.f32 %v8666_v37, %v8666_v37 }
 0x70a   : > { %8773 = vst [vmem:[%s24417_s17 + $0x200] sm:$0xff] %v8664_v58  ;;  %v8880_v60 = vadd.f32 %v8879_v32, %v8664_v58  ;;  %v8995_v34 = vmul.f32 %v8664_v58, %v8664_v58  ;;  %v9101_v7 = vadd.f32 %v9100_v56, %v8994_v20  ;;  %v8665_v49 = vmul.f32 %v20698_v3, %v24541_v15 }
 0x70b   : > { %8776 = vst [vmem:[%s24417_s17 + $0x218] sm:$0xff] %v8667_v33  ;;  %v18969_v25 = vpop.f32.mrb[72].mxu1  ;;  %v8998_v36 = vmul.f32 %v8667_v33, %v8667_v33  ;;  %v24697_v59 = vpop.permute.xlu1 %8507 }
 0x70c   : > { %v9102_v46 = vadd.f32 %v9101_v7, %v8995_v34  ;;  %8774 = vst [vmem:[%s24417_s17 + $0x208] sm:$0xff] %v8665_v49  ;;  %v8881_v13 = vadd.f32 %v8880_v60, %v8665_v49  ;;  %v8996_v9 = vmul.f32 %v8665_v49, %v8665_v49  ;;  %v19461_v29 = vpop.f32.mrb[68].mxu0  ;;  %v4912_v21 = vpop.f32.mrb[73].mxu1 }
 0x70d   : > { %v20699_v8 = vadd.f32 %v19461_v29, %v18965_v45  ;;  %v7684_v22 = vpop.f32.mrb[69].mxu0  ;;  %v18970_v28 = vpop.f32.mrb[74].mxu1 }
 0x70e   : > { %v8882_v47 = vadd.f32 %v8881_v13, %v8666_v37  ;;  %v9103_v18 = vadd.f32 %v9102_v46, %v8996_v9  ;;  %v20700_v16 = vadd.f32 %v7684_v22, %v4896_v27  ;;  %v19462_v15 = vpop.f32.mrb[70].mxu0  ;;  %v4915_v48 = vpop.f32.mrb[75].mxu1 }
 0x70f   : > { %v8670_v63 = vmul.f32 %v20699_v8, %v24577_v53  ;;  %v20701_v1 = vadd.f32 %v19462_v15, %v18966_v2  ;;  %v7687_v31 = vpop.f32.mrb[71].mxu0  ;;  %v24705_v22 = vpop.permute.xlu0 %8512 }
 0x710   : > { %v9104_v23 = vadd.f32 %v9103_v18, %v8997_v6  ;;  %v8668_v45 = vmul.f32 %v20700_v16, %v24564_v38  ;;  %v8883_v26 = vadd.f32 %v8882_v47, %v8667_v33  ;;  %v20702_v5 = vadd.f32 %v7687_v31, %v4899_v54  ;;  %v24709_v18 = vpop.permute.xlu1 %8517 }
 0x711   : > { %8779 = vst [vmem:[%s24417_s17 + $0x230] sm:$0xff] %v8670_v63  ;;  %v8671_v42 = vmul.f32 %v20701_v1, %v24581_v12  ;;  %v9001_v58 = vmul.f32 %v8670_v63, %v8670_v63 }
 0x712   : > { %8777 = vst [vmem:[%s24417_s17 + $0x220] sm:$0xff] %v8668_v45  ;;  %v8884_v27 = vadd.f32 %v8883_v26, %v8668_v45  ;;  %v8999_v10 = vmul.f32 %v8668_v45, %v8668_v45  ;;  %v9105_v30 = vadd.f32 %v9104_v23, %v8998_v36  ;;  %v8669_v53 = vmul.f32 %v20702_v5, %v24567_v57 }
 0x713   : > { %8780 = vst [vmem:[%s24417_s17 + $0x238] sm:$0xff] %v8671_v42  ;;  %v18973_v2 = vpop.f32.mrb[76].mxu1  ;;  %v9002_v34 = vmul.f32 %v8671_v42, %v8671_v42 }
 0x714   : > { %v9106_v20 = vadd.f32 %v9105_v30, %v8999_v10  ;;  %8778 = vst [vmem:[%s24417_s17 + $0x228] sm:$0xff] %v8669_v53  ;;  %v8885_v38 = vadd.f32 %v8884_v27, %v8669_v53  ;;  %v9000_v37 = vmul.f32 %v8669_v53, %v8669_v53  ;;  %v19465_v54 = vpop.f32.mrb[72].mxu0  ;;  %v4928_v43 = vpop.f32.mrb[77].mxu1 }
 0x715   : > { %v20703_v41 = vadd.f32 %v19465_v54, %v18969_v25  ;;  %v7700_v12 = vpop.f32.mrb[73].mxu0  ;;  %v18974_v56 = vpop.f32.mrb[78].mxu1 }
 0x716   : > { %v8886_v32 = vadd.f32 %v8885_v38, %v8670_v63  ;;  %v9107_v3 = vadd.f32 %v9106_v20, %v9000_v37  ;;  %v20704_v33 = vadd.f32 %v7700_v12, %v4912_v21  ;;  %v19466_v57 = vpop.f32.mrb[74].mxu0  ;;  %v4931_v60 = vpop.f32.mrb[79].mxu1 }
 0x717   : > { %v8674_v7 = vmul.f32 %v20703_v41, %v24602_v40  ;;  %v20705_v49 = vadd.f32 %v19466_v57, %v18970_v28  ;;  %v7703_v46 = vpop.f32.mrb[75].mxu0  ;;  %v24717_v54 = vpop.permute.xlu0 %8522 }
 0x718   : > { %v9108_v13 = vadd.f32 %v9107_v3, %v9001_v58  ;;  %v8672_v25 = vmul.f32 %v20704_v33, %v24589_v52  ;;  %v8887_v9 = vadd.f32 %v8886_v32, %v8671_v42  ;;  %v20706_v29 = vadd.f32 %v7703_v46, %v4915_v48  ;;  %v24721_v58 = vpop.permute.xlu1 %8527 }
 0x719   : > { %8783 = vst [vmem:[%s24417_s17 + $0x250] sm:$0xff] %v8674_v7  ;;  %v8675_v8 = vmul.f32 %v20705_v49, %v24605_v0  ;;  %v9005_v31 = vmul.f32 %v8674_v7, %v8674_v7 }
 0x71a   : > { %8781 = vst [vmem:[%s24417_s17 + $0x240] sm:$0xff] %v8672_v25  ;;  %v8888_v21 = vadd.f32 %v8887_v9, %v8672_v25  ;;  %v9003_v6 = vmul.f32 %v8672_v25, %v8672_v25  ;;  %v9109_v47 = vadd.f32 %v9108_v13, %v9002_v34  ;;  %v8673_v40 = vmul.f32 %v20706_v29, %v24593_v44 }
 0x71b   : > { %8784 = vst [vmem:[%s24417_s17 + $0x258] sm:$0xff] %v8675_v8  ;;  %v18977_v28 = vpop.f32.mrb[80].mxu1  ;;  %v9006_v42 = vmul.f32 %v8675_v8, %v8675_v8 }
 0x71c   : > { %v9110_v16 = vadd.f32 %v9109_v47, %v9003_v6  ;;  %8782 = vst [vmem:[%s24417_s17 + $0x248] sm:$0xff] %v8673_v40  ;;  %v8889_v52 = vadd.f32 %v8888_v21, %v8673_v40  ;;  %v9004_v15 = vmul.f32 %v8673_v40, %v8673_v40  ;;  %v19469_v48 = vpop.f32.mrb[76].mxu0  ;;  %v4944_v36 = vpop.f32.mrb[81].mxu1 }
 0x71d   : > { %v20707_v63 = vadd.f32 %v19469_v48, %v18973_v2  ;;  %v7716_v0 = vpop.f32.mrb[77].mxu0  ;;  %v18978_v1 = vpop.f32.mrb[82].mxu1 }
 0x71e   : > { %v8890_v23 = vadd.f32 %v8889_v52, %v8674_v7  ;;  %v9111_v45 = vadd.f32 %v9110_v16, %v9004_v15  ;;  %v20708_v26 = vadd.f32 %v7716_v0, %v4928_v43  ;;  %v19470_v44 = vpop.f32.mrb[78].mxu0  ;;  %v4947_v5 = vpop.f32.mrb[83].mxu1 }
 0x71f   : > { %v8678_v27 = vmul.f32 %v20707_v63, %v24629_v61  ;;  %v20709_v10 = vadd.f32 %v19470_v44, %v18974_v56  ;;  %v7719_v30 = vpop.f32.mrb[79].mxu0  ;;  %v24729_v52 = vpop.permute.xlu0 %8532 }
 0x720   : > { %v9112_v53 = vadd.f32 %v9111_v45, %v9005_v31  ;;  %v8676_v2 = vmul.f32 %v20708_v26, %v24616_v11  ;;  %v8891_v20 = vadd.f32 %v8890_v23, %v8675_v8  ;;  %v20710_v38 = vadd.f32 %v7719_v30, %v4931_v60  ;;  %v24733_v63 = vpop.permute.xlu1 %8537 }
 0x721   : > { %8787 = vst [vmem:[%s24417_s17 + $0x270] sm:$0xff] %v8678_v27  ;;  %v8679_v37 = vmul.f32 %v20709_v10, %v24633_v4  ;;  %v9009_v7 = vmul.f32 %v8678_v27, %v8678_v27 }
 0x722   : > { %8785 = vst [vmem:[%s24417_s17 + $0x260] sm:$0xff] %v8676_v2  ;;  %v8892_v43 = vadd.f32 %v8891_v20, %v8676_v2  ;;  %v9007_v41 = vmul.f32 %v8676_v2, %v8676_v2  ;;  %v9113_v12 = vadd.f32 %v9112_v53, %v9006_v42  ;;  %v8677_v61 = vmul.f32 %v20710_v38, %v24619_v35 }
 0x723   : > { %8788 = vst [vmem:[%s24417_s17 + $0x278] sm:$0xff] %v8679_v37  ;;  %v18981_v56 = vpop.f32.mrb[84].mxu1  ;;  %v9010_v9 = vmul.f32 %v8679_v37, %v8679_v37 }
 0x724   : > { %v9114_v32 = vadd.f32 %v9113_v12, %v9007_v41  ;;  %8786 = vst [vmem:[%s24417_s17 + $0x268] sm:$0xff] %v8677_v61  ;;  %v8893_v11 = vadd.f32 %v8892_v43, %v8677_v61  ;;  %v9008_v3 = vmul.f32 %v8677_v61, %v8677_v61  ;;  %v19473_v33 = vpop.f32.mrb[80].mxu0  ;;  %v4960_v57 = vpop.f32.mrb[85].mxu1 }
 0x725   : > { %v20711_v60 = vadd.f32 %v19473_v33, %v18977_v28  ;;  %v7732_v4 = vpop.f32.mrb[81].mxu0  ;;  %v18982_v34 = vpop.f32.mrb[86].mxu1 }
 0x726   : > { %v8894_v49 = vadd.f32 %v8893_v11, %v8678_v27  ;;  %v9115_v46 = vadd.f32 %v9114_v32, %v9008_v3  ;;  %v20712_v13 = vadd.f32 %v7732_v4, %v4944_v36  ;;  %v19474_v35 = vpop.f32.mrb[82].mxu0  ;;  %v4963_v25 = vpop.f32.mrb[87].mxu1 }
 0x727   : > { %v8682_v29 = vmul.f32 %v20711_v60, %v24657_v39  ;;  %v20713_v8 = vadd.f32 %v19474_v35, %v18978_v1  ;;  %v7735_v21 = vpop.f32.mrb[83].mxu0  ;;  %v24745_v33 = vpop.permute.xlu1 %8547 }
 0x728   : > { %v9116_v6 = vadd.f32 %v9115_v46, %v9009_v7  ;;  %v8680_v47 = vmul.f32 %v20712_v13, %v24645_v50  ;;  %v8895_v40 = vadd.f32 %v8894_v49, %v8679_v37  ;;  %v20714_v28 = vadd.f32 %v7735_v21, %v4947_v5 }
 0x729   : > { %8791 = vst [vmem:[%s24417_s17 + $0x290] sm:$0xff] %v8682_v29  ;;  %v8683_v16 = vmul.f32 %v20713_v8, %v24661_v19  ;;  %v9013_v5 = vmul.f32 %v8682_v29, %v8682_v29 }
 0x72a   : > { %8789 = vst [vmem:[%s24417_s17 + $0x280] sm:$0xff] %v8680_v47  ;;  %v8896_v15 = vadd.f32 %v8895_v40, %v8680_v47  ;;  %v9011_v48 = vmul.f32 %v8680_v47, %v8680_v47  ;;  %v9117_v36 = vadd.f32 %v9116_v6, %v9010_v9  ;;  %v8681_v39 = vmul.f32 %v20714_v28, %v24649_v62 }
 0x72b   : > { %8792 = vst [vmem:[%s24417_s17 + $0x298] sm:$0xff] %v8683_v16  ;;  %v18985_v0 = vpop.f32.mrb[88].mxu1  ;;  %v9014_v53 = vmul.f32 %v8683_v16, %v8683_v16 }
 0x72c   : > { %v9118_v1 = vadd.f32 %v9117_v36, %v9011_v48  ;;  %8790 = vst [vmem:[%s24417_s17 + $0x288] sm:$0xff] %v8681_v39  ;;  %v8897_v50 = vadd.f32 %v8896_v15, %v8681_v39  ;;  %v9012_v31 = vmul.f32 %v8681_v39, %v8681_v39  ;;  %v19477_v23 = vpop.f32.mrb[84].mxu0  ;;  %v4976_v45 = vpop.f32.mrb[89].mxu1 }
 0x72d   : > { %v20715_v26 = vadd.f32 %v19477_v23, %v18981_v56  ;;  %v7748_v19 = vpop.f32.mrb[85].mxu0  ;;  %v18986_v44 = vpop.f32.mrb[90].mxu1 }
 0x72e   : > { %v8898_v42 = vadd.f32 %v8897_v50, %v8682_v29  ;;  %v9119_v27 = vadd.f32 %v9118_v1, %v9012_v31  ;;  %v20716_v10 = vadd.f32 %v7748_v19, %v4960_v57  ;;  %v19478_v62 = vpop.f32.mrb[86].mxu0  ;;  %v4979_v30 = vpop.f32.mrb[91].mxu1 }
 0x72f   : > { %v8686_v2 = vmul.f32 %v20715_v26, %v24681_v24  ;;  %v20717_v20 = vadd.f32 %v19478_v62, %v18982_v34  ;;  %v7751_v38 = vpop.f32.mrb[87].mxu0  ;;  %v24741_v56 = vpop.permute.xlu0 %8542 }
 0x730   : > { %v9120_v37 = vadd.f32 %v9119_v27, %v9013_v5  ;;  %v8684_v43 = vmul.f32 %v20716_v10, %v24669_v14  ;;  %v8899_v41 = vadd.f32 %v8898_v42, %v8683_v16  ;;  %v20718_v12 = vadd.f32 %v7751_v38, %v4963_v25 }
 0x731   : > { %8795 = vst [vmem:[%s24417_s17 + $0x2b0] sm:$0xff] %v8686_v2  ;;  %v8687_v61 = vmul.f32 %v20717_v20, %v24685_v55  ;;  %v9017_v13 = vmul.f32 %v8686_v2, %v8686_v2 }
 0x732   : > { %8793 = vst [vmem:[%s24417_s17 + $0x2a0] sm:$0xff] %v8684_v43  ;;  %v8900_v32 = vadd.f32 %v8899_v41, %v8684_v43  ;;  %v9015_v11 = vmul.f32 %v8684_v43, %v8684_v43  ;;  %v9121_v3 = vadd.f32 %v9120_v37, %v9014_v53  ;;  %v8685_v24 = vmul.f32 %v20718_v12, %v24673_v51 }
 0x733   : > { %8796 = vst [vmem:[%s24417_s17 + $0x2b8] sm:$0xff] %v8687_v61  ;;  %v18989_v57 = vpop.f32.mrb[92].mxu1  ;;  %v9018_v8 = vmul.f32 %v8687_v61, %v8687_v61  ;;  %v8553_v36 = vpop.permute.xlu0 %8552 }
 0x734   : > { %v9122_v60 = vadd.f32 %v9121_v3, %v9015_v11  ;;  %8794 = vst [vmem:[%s24417_s17 + $0x2a8] sm:$0xff] %v8685_v24  ;;  %v8901_v14 = vadd.f32 %v8900_v32, %v8685_v24  ;;  %v9016_v4 = vmul.f32 %v8685_v24, %v8685_v24  ;;  %v19481_v34 = vpop.f32.mrb[88].mxu0  ;;  %v4992_v7 = vpop.f32.mrb[93].mxu1 }
 0x735   : > { %v20719_v49 = vadd.f32 %v19481_v34, %v18985_v0  ;;  %v7764_v55 = vpop.f32.mrb[89].mxu0  ;;  %v18990_v46 = vpop.f32.mrb[94].mxu1 }
 0x736   : > { %v8902_v35 = vadd.f32 %v8901_v14, %v8686_v2  ;;  %v9123_v25 = vadd.f32 %v9122_v60, %v9016_v4  ;;  %v20720_v9 = vadd.f32 %v7764_v55, %v4976_v45  ;;  %v19482_v51 = vpop.f32.mrb[90].mxu0  ;;  %v4995_v29 = vpop.f32.mrb[95].mxu1 }
 0x737   : > { %v8690_v21 = vmul.f32 %v20719_v49, %v24705_v22  ;;  %v20721_v6 = vadd.f32 %v19482_v51, %v18986_v44  ;;  %v7767_v47 = vpop.f32.mrb[91].mxu0  ;;  %v8558_v22 = vpop.permute.xlu1 %8557 }
 0x738   : > { %v9124_v40 = vadd.f32 %v9123_v25, %v9017_v13  ;;  %v8688_v28 = vmul.f32 %v20720_v9, %v24693_v17  ;;  %v8903_v16 = vadd.f32 %v8902_v35, %v8687_v61  ;;  %v20722_v15 = vadd.f32 %v7767_v47, %v4979_v30  ;;  %v24761_v32 = vpop.permute.xlu0 %8562 }
 0x739   : > { %8799 = vst [vmem:[%s24417_s17 + $0x2d0] sm:$0xff] %v8690_v21  ;;  %v8691_v48 = vmul.f32 %v20721_v6, %v24709_v18  ;;  %v9021_v42 = vmul.f32 %v8690_v21, %v8690_v21 }
 0x73a   : > { %8797 = vst [vmem:[%s24417_s17 + $0x2c0] sm:$0xff] %v8688_v28  ;;  %v8904_v39 = vadd.f32 %v8903_v16, %v8688_v28  ;;  %v9019_v0 = vmul.f32 %v8688_v28, %v8688_v28  ;;  %v9125_v1 = vadd.f32 %v9124_v40, %v9018_v8  ;;  %v8689_v50 = vmul.f32 %v20722_v15, %v24697_v59 }
 0x73b   : > { %8800 = vst [vmem:[%s24417_s17 + $0x2d8] sm:$0xff] %v8691_v48  ;;  %v18993_v31 = vpop.f32.mrb[96].mxu1  ;;  %v9022_v53 = vmul.f32 %v8691_v48, %v8691_v48 }
 0x73c   : > { %v9126_v23 = vadd.f32 %v9125_v1, %v9019_v0  ;;  %8798 = vst [vmem:[%s24417_s17 + $0x2c8] sm:$0xff] %v8689_v50  ;;  %v8905_v45 = vadd.f32 %v8904_v39, %v8689_v50  ;;  %v9020_v26 = vmul.f32 %v8689_v50, %v8689_v50  ;;  %v19485_v17 = vpop.f32.mrb[92].mxu0  ;;  %v5008_v19 = vpop.f32.mrb[97].mxu1 }
 0x73d   : > { %v20723_v44 = vadd.f32 %v19485_v17, %v18989_v57  ;;  %v7780_v5 = vpop.f32.mrb[93].mxu0  ;;  %v18994_v18 = vpop.f32.mrb[98].mxu1 }
 0x73e   : > { %v8906_v27 = vadd.f32 %v8905_v45, %v8690_v21  ;;  %v9127_v10 = vadd.f32 %v9126_v23, %v9020_v26  ;;  %v20724_v62 = vadd.f32 %v7780_v5, %v4992_v7  ;;  %v19486_v30 = vpop.f32.mrb[94].mxu0  ;;  %v5011_v59 = vpop.f32.mrb[99].mxu1 }
 0x73f   : > { %v8694_v2 = vmul.f32 %v20723_v44, %v24729_v52  ;;  %v20725_v20 = vadd.f32 %v19486_v30, %v18990_v46  ;;  %v7783_v38 = vpop.f32.mrb[95].mxu0  ;;  %v24765_v57 = vpop.permute.xlu1 %8567 }
 0x740   : > { %v9128_v37 = vadd.f32 %v9127_v10, %v9021_v42  ;;  %v8692_v43 = vmul.f32 %v20724_v62, %v24717_v54  ;;  %v8907_v41 = vadd.f32 %v8906_v27, %v8691_v48  ;;  %v20726_v12 = vadd.f32 %v7783_v38, %v4995_v29  ;;  %v8573_v15 = vpop.permute.xlu0 %8572 }
 0x741   : > { %8803 = vst [vmem:[%s24417_s17 + $0x2f0] sm:$0xff] %v8694_v2  ;;  %v8695_v61 = vmul.f32 %v20725_v20, %v24733_v63  ;;  %v9025_v46 = vmul.f32 %v8694_v2, %v8694_v2 }
 0x742   : > { %8801 = vst [vmem:[%s24417_s17 + $0x2e0] sm:$0xff] %v8692_v43  ;;  %v8908_v11 = vadd.f32 %v8907_v41, %v8692_v43  ;;  %v9023_v3 = vmul.f32 %v8692_v43, %v8692_v43  ;;  %v9129_v24 = vadd.f32 %v9128_v37, %v9022_v53  ;;  %v8693_v52 = vmul.f32 %v20726_v12, %v24721_v58 }
 0x743   : > { %8804 = vst [vmem:[%s24417_s17 + $0x2f8] sm:$0xff] %v8695_v61  ;;  %v18997_v60 = vpop.f32.mrb[100].mxu1  ;;  %v9026_v51 = vmul.f32 %v8695_v61, %v8695_v61  ;;  %v8578_v50 = vpop.permute.xlu1 %8577 }
 0x744   : > { %v9130_v14 = vadd.f32 %v9129_v24, %v9023_v3  ;;  %8802 = vst [vmem:[%s24417_s17 + $0x2e8] sm:$0xff] %v8693_v52  ;;  %v8909_v54 = vadd.f32 %v8908_v11, %v8693_v52  ;;  %v9024_v4 = vmul.f32 %v8693_v52, %v8693_v52  ;;  %v19489_v34 = vpop.f32.mrb[96].mxu0  ;;  %v5024_v7 = vpop.f32.mrb[101].mxu1 }
 0x745   : > { %v20727_v49 = vadd.f32 %v19489_v34, %v18993_v31  ;;  %v7796_v63 = vpop.f32.mrb[97].mxu0  ;;  %v18998_v55 = vpop.f32.mrb[102].mxu1 }
 0x746   : > { %v8910_v13 = vadd.f32 %v8909_v54, %v8694_v2  ;;  %v9131_v35 = vadd.f32 %v9130_v14, %v9024_v4  ;;  %v20728_v25 = vadd.f32 %v7796_v63, %v5008_v19  ;;  %v19490_v58 = vpop.f32.mrb[98].mxu0  ;;  %v5027_v9 = vpop.f32.mrb[103].mxu1 }
 0x747   : > { %v8698_v29 = vmul.f32 %v20727_v49, %v8553_v36  ;;  %v20729_v8 = vadd.f32 %v19490_v58, %v18994_v18  ;;  %v7799_v21 = vpop.f32.mrb[99].mxu0  ;;  %v8583_v53 = vpop.permute.xlu0 %8582 }
 0x748   : > { %v9132_v6 = vadd.f32 %v9131_v35, %v9025_v46  ;;  %v8696_v47 = vmul.f32 %v20728_v25, %v24741_v56  ;;  %v8911_v40 = vadd.f32 %v8910_v13, %v8695_v61  ;;  %v20730_v28 = vadd.f32 %v7799_v21, %v5011_v59  ;;  %v8588_v41 = vpop.permute.xlu1 %8587 }
 0x749   : > { %8807 = vst [vmem:[%s24417_s17 + $0x310] sm:$0xff] %v8698_v29  ;;  %v8699_v16 = vmul.f32 %v20729_v8, %v8558_v22  ;;  %v9029_v22 = vmul.f32 %v8698_v29, %v8698_v29 }
 0x74a   : > { %8805 = vst [vmem:[%s24417_s17 + $0x300] sm:$0xff] %v8696_v47  ;;  %v8912_v48 = vadd.f32 %v8911_v40, %v8696_v47  ;;  %v9027_v39 = vmul.f32 %v8696_v47, %v8696_v47  ;;  %v9133_v0 = vadd.f32 %v9132_v6, %v9026_v51  ;;  %v8697_v1 = vmul.f32 %v20730_v28, %v24745_v33 }
 0x74b   : > { %8808 = vst [vmem:[%s24417_s17 + $0x318] sm:$0xff] %v8699_v16  ;;  %v19001_v36 = vpop.f32.mrb[104].mxu1  ;;  %v9030_v10 = vmul.f32 %v8699_v16, %v8699_v16 }
 0x74c   : > { %v9134_v31 = vadd.f32 %v9133_v0, %v9027_v39  ;;  %8806 = vst [vmem:[%s24417_s17 + $0x308] sm:$0xff] %v8697_v1  ;;  %v8913_v23 = vadd.f32 %v8912_v48, %v8697_v1  ;;  %v9028_v45 = vmul.f32 %v8697_v1, %v8697_v1  ;;  %v19493_v26 = vpop.f32.mrb[100].mxu0  ;;  %v5040_v56 = vpop.f32.mrb[105].mxu1 }
 0x74d   : > { %v20731_v17 = vadd.f32 %v19493_v26, %v18997_v60  ;;  %v7812_v19 = vpop.f32.mrb[101].mxu0  ;;  %v19002_v44 = vpop.f32.mrb[106].mxu1 }
 0x74e   : > { %v8914_v5 = vadd.f32 %v8913_v23, %v8698_v29  ;;  %v9135_v18 = vadd.f32 %v9134_v31, %v9028_v45  ;;  %v20732_v42 = vadd.f32 %v7812_v19, %v5024_v7  ;;  %v19494_v27 = vpop.f32.mrb[102].mxu0  ;;  %v5043_v33 = vpop.f32.mrb[107].mxu1 }
 0x74f   : > { %v8702_v62 = vmul.f32 %v20731_v17, %v8573_v15  ;;  %v20733_v30 = vadd.f32 %v19494_v27, %v18998_v55  ;;  %v7815_v59 = vpop.f32.mrb[103].mxu0  ;;  %v8598_v25 = vpop.permute.xlu1 %8597  ;;  %v26516_v27 = vld [vmem:[#allocation14_spill] sm:$0xff] }
 0x750   : > { %v9136_v2 = vadd.f32 %v9135_v18, %v9029_v22  ;;  %v8700_v20 = vmul.f32 %v20732_v42, %v24761_v32  ;;  %v8915_v38 = vadd.f32 %v8914_v5, %v8699_v16  ;;  %v20734_v37 = vadd.f32 %v7815_v59, %v5027_v9  ;;  %v8593_v32 = vpop.permute.xlu0 %8592 }
 0x751   : > { %8811 = vst [vmem:[%s24417_s17 + $0x330] sm:$0xff] %v8702_v62  ;;  %v8703_v43 = vmul.f32 %v20733_v30, %v8578_v50  ;;  %v9033_v34 = vmul.f32 %v8702_v62, %v8702_v62 }
 0x752   : > { %8809 = vst [vmem:[%s24417_s17 + $0x320] sm:$0xff] %v8700_v20  ;;  %v8916_v12 = vadd.f32 %v8915_v38, %v8700_v20  ;;  %v9031_v61 = vmul.f32 %v8700_v20, %v8700_v20  ;;  %v9137_v11 = vadd.f32 %v9136_v2, %v9030_v10  ;;  %v8701_v3 = vmul.f32 %v20734_v37, %v24765_v57  ;;  %v9157_v37 = vld [vmem:[%s26402_s5] sm:$0x1] (%p1889_p4) }
 0x753   : > { %8812 = vst [vmem:[%s24417_s17 + $0x338] sm:$0xff] %v8703_v43  ;;  %v9034_v46 = vmul.f32 %v8703_v43, %v8703_v43 }
 0x754   : > { %v9138_v24 = vadd.f32 %v9137_v11, %v9031_v61  ;;  %8810 = vst [vmem:[%s24417_s17 + $0x328] sm:$0xff] %v8701_v3  ;;  %v8917_v52 = vadd.f32 %v8916_v12, %v8701_v3  ;;  %v9032_v60 = vmul.f32 %v8701_v3, %v8701_v3  ;;  %v19497_v14 = vpop.f32.mrb[104].mxu0  ;;  %v24802_v12 = vld [vmem:[%s26403_s6] sm:$0x1] (%p1889_p4) }
 0x755   : > { %v20735_v54 = vadd.f32 %v19497_v14, %v19001_v36  ;;  %v7828_v4 = vpop.f32.mrb[105].mxu0 }
 0x756   : > { %v8918_v7 = vadd.f32 %v8917_v52, %v8702_v62  ;;  %v9139_v49 = vadd.f32 %v9138_v24, %v9032_v60  ;;  %v20736_v63 = vadd.f32 %v7828_v4, %v5040_v56  ;;  %v19498_v55 = vpop.f32.mrb[106].mxu0  ;;  %v26517_v62 = vld [vmem:[#allocation13_spill] sm:$0xff] }
 0x757   : > { %v8706_v13 = vmul.f32 %v20735_v54, %v8593_v32  ;;  %v20737_v57 = vadd.f32 %v19498_v55, %v19002_v44  ;;  %v7831_v35 = vpop.f32.mrb[107].mxu0 }
 0x758   : > { %v9140_v58 = vadd.f32 %v9139_v49, %v9033_v34  ;;  %v8704_v9 = vmul.f32 %v20736_v63, %v8583_v53  ;;  %v8919_v51 = vadd.f32 %v8918_v7, %v8703_v43  ;;  %v20738_v29 = vadd.f32 %v7831_v35, %v5043_v33 }
 0x759   : > { %8815 = vst [vmem:[%s24417_s17 + $0x350] sm:$0xff] %v8706_v13  ;;  %v8707_v8 = vmul.f32 %v20737_v57, %v8598_v25  ;;  %v9037_v48 = vmul.f32 %v8706_v13, %v8706_v13 }
 0x75a   : > { %8813 = vst [vmem:[%s24417_s17 + $0x340] sm:$0xff] %v8704_v9  ;;  %v8920_v21 = vadd.f32 %v8919_v51, %v8704_v9  ;;  %v9035_v6 = vmul.f32 %v8704_v9, %v8704_v9  ;;  %v9141_v47 = vadd.f32 %v9140_v58, %v9034_v46  ;;  %v8705_v40 = vmul.f32 %v20738_v29, %v8588_v41 }
 0x75b   : > { %8816 = vst [vmem:[%s24417_s17 + $0x358] sm:$0xff] %v8707_v8  ;;  %v9038_v1 = vmul.f32 %v8707_v8, %v8707_v8 }
 0x75c   : > { %v9142_v28 = vadd.f32 %v9141_v47, %v9035_v6  ;;  %8814 = vst [vmem:[%s24417_s17 + $0x348] sm:$0xff] %v8705_v40  ;;  %v8921_v16 = vadd.f32 %v8920_v21, %v8705_v40  ;;  %v9036_v15 = vmul.f32 %v8705_v40, %v8705_v40 }
 0x75e   : > { %v8922_v39 = vadd.f32 %v8921_v16, %v8706_v13  ;;  %v9143_v0 = vadd.f32 %v9142_v28, %v9036_v15 }
 0x760   : > { %v8923_v50 = vadd.f32 %v8922_v39, %v8707_v8  ;;  %v9144_v36 = vadd.f32 %v9143_v0, %v9037_v48 }
 0x762   : > { %v8924_v31 = vrot.slane %v8923_v50, 4  ;;  %v9145_v23 = vadd.f32 %v9144_v36, %v9038_v1 }
 0x764   : > { %v8925_v45 = vadd.f32 %v8924_v31, %v8923_v50  ;;  %v9146_v26 = vrot.slane %v9145_v23, 4 }
 0x766   : > { %v8926_v56 = vrot.slane %v8925_v45, 2  ;;  %v9147_v17 = vadd.f32 %v9146_v26, %v9145_v23 }
 0x768   : > { %v8927_v19 = vadd.f32 %v8926_v56, %v8925_v45  ;;  %v9148_v44 = vrot.slane %v9147_v17, 2 }
 0x76a   : > { %v8928_v22 = vrot.slane %v8927_v19, 1  ;;  %v9149_v5 = vadd.f32 %v9148_v44, %v9147_v17 }
 0x76c   : > { %v8929_v18 = vadd.f32 %v8928_v22, %v8927_v19  ;;  %v9150_v42 = vrot.slane %v9149_v5, 1  ;;  %1891 = sbr.rel (!%p1889_p4) target bundleno = 663 (0x297), region = 166 }
 0x76e   : > { %v8930_v10 = vadd.f32 %v26516_v27, %v8929_v18   ;;  %v9151_v33 = vadd.f32 %v9150_v42, %v9149_v5 }
 0x770   : > { %v9152_v30 = vadd.f32 %v26517_v62, %v9151_v33   ;;  %v26519_v36 = vmov %v8930_v10  ;;  %v9153_v59 = vmul.f32 (%p1889_p4), 0.001953125, %v8930_v10 }
 0x772   : > { %v26518_v33 = vmov %v9152_v30  ;;  %v9154_v53 = vmul.f32 (%p1889_p4), 0.001953125, %v9152_v30  ;;  %v9155_v2 = vmul.f32 (%p1889_p4), %v9153_v59, %v9153_v59 }
 0x774   :  { %v9156_v20 = vsub.f32 %v9154_v53, %v9155_v2 }
 0x776   :  { %v9158_v38 = vadd.f32 1e-05, %v9156_v20 }
 0x778   :  { %22544 = vrsqrt.f32 %v9158_v38 }
 0x782   :  { %v22545_v43 = vpop.eup %22544 }
 0x783   :  { %v24797_v41 = vmul.f32 %v22545_v43, %v9157_v37 }
 0x785   :  { %v24805_v61 = vmul.f32 %v24797_v41, %v9153_v59 }
 0x787   :  { %v9163_v11 = vsub.f32 %v24802_v12, %v24805_v61 }
 0x788 LB: > { %v22779_v3 = vmov 0   ;;  %s24815_s5 = smul.u32 864, %s22766_s11  ;;  %s9169_s11 = sadd.s32 1, %s22766_s11   ;;  %s22766_s11 = sphi %s24809_s11, %s9169_s11  }
 0x789   : > { %22547 = vset.pattern.permute.xlu1 %v22779_v3  ;;  %22546 = vset.pattern.permute.xlu0 %v22779_v3  ;;  %p9166_p5 = scmp.ge.s32.totalorder %s9169_s11, 6  }
 0x78a   : > { %s24821_s28 = scalar_lea.vmem %s26398_s1, %s24815_s5  ;;  %s24889_s29 = scalar_lea.vmem [#allocation8], %s24815_s5 }
 0x78b   : > { %v9283_v24 = vld [vmem:[%s24821_s28 + $0x10] sm:$0xff]  ;;  %v9281_v52 = vld [vmem:[%s24821_s28] sm:$0xff]  ;;  %v9284_v60 = vld [vmem:[%s24821_s28 + $0x18] sm:$0xff]  ;;  %s10427_s30 = sadd.s32 304, %s24815_s5  ;;  %s25336_s15 = smov (%p9166_p5), 0  }
 0x78c   : > { %9737 = vperm.xlu1 %22547, %v9283_v24   ;;  %9727 = vperm.xlu0 %22546, %v9281_v52   ;;  %v9282_v14 = vld [vmem:[%s24821_s28 + $0x8] sm:$0xff]  ;;  %v9285_v4 = vld [vmem:[%s24821_s28 + $0x20] sm:$0xff]  ;;  %v9288_v32 = vld [vmem:[%s24821_s28 + $0x38] sm:$0xff]  ;;  %s24922_s4 = sshra.s32 %s10427_s30, 4 }
 0x78d   : > { %v9286_v54 = vld [vmem:[%s24821_s28 + $0x28] sm:$0xff]  ;;  %v9287_v34 = vld [vmem:[%s24821_s28 + $0x30] sm:$0xff]  ;;  %v9289_v49 = vld [vmem:[%s24821_s28 + $0x40] sm:$0xff]  ;;  %s17184_s10 = sshll.u32 %s24922_s4, 3 }
 0x78e   : > { %v9290_v7 = vld [vmem:[%s24821_s28 + $0x48] sm:$0xff]  ;;  %v9292_v63 = vld [vmem:[%s24821_s28 + $0x58] sm:$0xff]  ;;  %v9291_v55 = vld [vmem:[%s24821_s28 + $0x50] sm:$0xff]  ;;  %s24943_s7 = scalar_lea.vmem [#allocation2], %s17184_s10 }
 0x78f   : > { %v9294_v46 = vld [vmem:[%s24821_s28 + $0x68] sm:$0xff]  ;;  %v9293_v13 = vld [vmem:[%s24821_s28 + $0x60] sm:$0xff]  ;;  %v9296_v57 = vld [vmem:[%s24821_s28 + $0x78] sm:$0xff] }
 0x790   : > { %9742 = vperm.xlu1 %22547, %v9284_v60   ;;  %9732 = vperm.xlu0 %22546, %v9282_v14   ;;  %v9295_v35 = vld [vmem:[%s24821_s28 + $0x70] sm:$0xff]  ;;  %v9298_v25 = vld [vmem:[%s24821_s28 + $0x88] sm:$0xff]  ;;  %v9297_v58 = vld [vmem:[%s24821_s28 + $0x80] sm:$0xff] }
 0x791   : > { %v9300_v9 = vld [vmem:[%s24821_s28 + $0x98] sm:$0xff]  ;;  %v9299_v51 = vld [vmem:[%s24821_s28 + $0x90] sm:$0xff]  ;;  %v9302_v29 = vld [vmem:[%s24821_s28 + $0xa8] sm:$0xff] }
 0x792   : > { %v9301_v8 = vld [vmem:[%s24821_s28 + $0xa0] sm:$0xff]  ;;  %v9304_v21 = vld [vmem:[%s24821_s28 + $0xb8] sm:$0xff]  ;;  %v9303_v6 = vld [vmem:[%s24821_s28 + $0xb0] sm:$0xff] }
 0x793   : > { %v9306_v47 = vld [vmem:[%s24821_s28 + $0xc8] sm:$0xff]  ;;  %v9305_v40 = vld [vmem:[%s24821_s28 + $0xc0] sm:$0xff]  ;;  %v9308_v28 = vld [vmem:[%s24821_s28 + $0xd8] sm:$0xff] }
 0x794   : > { %9752 = vperm.xlu1 %22547, %v9286_v54   ;;  %9747 = vperm.xlu0 %22546, %v9285_v4   ;;  %v9307_v16 = vld [vmem:[%s24821_s28 + $0xd0] sm:$0xff]  ;;  %v9310_v15 = vld [vmem:[%s24821_s28 + $0xe8] sm:$0xff]  ;;  %v9309_v48 = vld [vmem:[%s24821_s28 + $0xe0] sm:$0xff] }
 0x795   : > { %v9312_v39 = vld [vmem:[%s24821_s28 + $0xf8] sm:$0xff]  ;;  %v9311_v0 = vld [vmem:[%s24821_s28 + $0xf0] sm:$0xff]  ;;  %v9314_v1 = vld [vmem:[%s24821_s28 + $0x108] sm:$0xff] }
 0x796   : > { %v9313_v50 = vld [vmem:[%s24821_s28 + $0x100] sm:$0xff]  ;;  %v9316_v36 = vld [vmem:[%s24821_s28 + $0x118] sm:$0xff]  ;;  %v9315_v31 = vld [vmem:[%s24821_s28 + $0x110] sm:$0xff] }
 0x797   : > { %v9318_v23 = vld [vmem:[%s24821_s28 + $0x128] sm:$0xff]  ;;  %v9317_v45 = vld [vmem:[%s24821_s28 + $0x120] sm:$0xff]  ;;  %v9320_v26 = vld [vmem:[%s24821_s28 + $0x138] sm:$0xff] }
 0x798   : > { %9762 = vperm.xlu1 %22547, %v9288_v32   ;;  %9757 = vperm.xlu0 %22546, %v9287_v34   ;;  %v9319_v56 = vld [vmem:[%s24821_s28 + $0x130] sm:$0xff]  ;;  %v9322_v17 = vld [vmem:[%s24821_s28 + $0x148] sm:$0xff]  ;;  %v9321_v19 = vld [vmem:[%s24821_s28 + $0x140] sm:$0xff] }
 0x799   : > { %v9324_v44 = vld [vmem:[%s24821_s28 + $0x158] sm:$0xff]  ;;  %v9323_v22 = vld [vmem:[%s24821_s28 + $0x150] sm:$0xff]  ;;  %v9326_v5 = vld [vmem:[%s24821_s28 + $0x168] sm:$0xff] }
 0x79a   : > { %v9325_v18 = vld [vmem:[%s24821_s28 + $0x160] sm:$0xff]  ;;  %v9328_v42 = vld [vmem:[%s24821_s28 + $0x178] sm:$0xff]  ;;  %v9327_v27 = vld [vmem:[%s24821_s28 + $0x170] sm:$0xff] }
 0x79b   : > { %v9330_v10 = vld [vmem:[%s24821_s28 + $0x188] sm:$0xff]  ;;  %v9329_v33 = vld [vmem:[%s24821_s28 + $0x180] sm:$0xff]  ;;  %v9332_v62 = vld [vmem:[%s24821_s28 + $0x198] sm:$0xff] }
 0x79c   : > { %9772 = vperm.xlu1 %22547, %v9290_v7   ;;  %9767 = vperm.xlu0 %22546, %v9289_v49   ;;  %v9331_v30 = vld [vmem:[%s24821_s28 + $0x190] sm:$0xff]  ;;  %v9334_v59 = vld [vmem:[%s24821_s28 + $0x1a8] sm:$0xff]  ;;  %v9333_v53 = vld [vmem:[%s24821_s28 + $0x1a0] sm:$0xff] }
 0x79d   : > { %v9336_v2 = vld [vmem:[%s24821_s28 + $0x1b8] sm:$0xff]  ;;  %v9335_v20 = vld [vmem:[%s24821_s28 + $0x1b0] sm:$0xff]  ;;  %v9338_v38 = vld [vmem:[%s24821_s28 + $0x1c8] sm:$0xff] }
 0x79e   : > { %v9337_v37 = vld [vmem:[%s24821_s28 + $0x1c0] sm:$0xff]  ;;  %v9340_v43 = vld [vmem:[%s24821_s28 + $0x1d8] sm:$0xff]  ;;  %v9339_v3 = vld [vmem:[%s24821_s28 + $0x1d0] sm:$0xff] }
 0x79f   : > { %v26520_v24 = vld [vmem:[#allocation12_spill] sm:$0xff]  ;;  %v9342_v60 = vld [vmem:[%s24821_s28 + $0x1e8] sm:$0xff]  ;;  %v9172_v54 = vld [vmem:[%s24889_s29] sm:$0xff] }
 0x7a0   : > { %9782 = vperm.xlu1 %22547, %v9292_v63   ;;  %9777 = vperm.xlu0 %22546, %v9291_v55   ;;  %v24885_v52 = vrot.slane %v24797_v41, %v26520_v24  ;;  %v9174_v14 = vld [vmem:[%s24889_s29 + $0x10] sm:$0xff]  ;;  %v9341_v4 = vld [vmem:[%s24821_s28 + $0x1e0] sm:$0xff]  ;;  %v9175_v32 = vld [vmem:[%s24889_s29 + $0x18] sm:$0xff]  ;;  %v24900_v7 = vrot.slane %v9163_v11, %v26520_v24 }
 0x7a1   : > { %v9173_v34 = vld [vmem:[%s24889_s29 + $0x8] sm:$0xff] }
 0x7a2   : > { %v9397_v49 = vmul.f32 %v24885_v52, %v9174_v14  ;;  %v9395_v63 = vmul.f32 %v24885_v52, %v9172_v54  ;;  %v9398_v55 = vmul.f32 %v24885_v52, %v9175_v32 }
 0x7a4   : > { %9792 = vperm.xlu1 %22547, %v9294_v46   ;;  %9787 = vperm.xlu0 %22546, %v9293_v13   ;;  %v9396_v46 = vmul.f32 %v24885_v52, %v9173_v34  ;;  %v9177_v13 = vld [vmem:[%s24889_s29 + $0x28] sm:$0xff] }
 0x7a8   : > { %9802 = vperm.xlu1 %22547, %v9296_v57   ;;  %9797 = vperm.xlu0 %22546, %v9295_v35   ;;  %v9344_v57 = vld [vmem:[%s24821_s28 + $0x1f8] sm:$0xff]  ;;  %v9343_v35 = vld [vmem:[%s24821_s28 + $0x1f0] sm:$0xff] }
 0x7ac   : > { %9812 = vperm.xlu1 %22547, %v9298_v25   ;;  %9807 = vperm.xlu0 %22546, %v9297_v58   ;;  %v9176_v25 = vld [vmem:[%s24889_s29 + $0x20] sm:$0xff]  ;;  %v9511_v58 = vadd.f32 %v24900_v7, %v9397_v49 }
 0x7b0   : > { %9822 = vperm.xlu1 %22547, %v9300_v9   ;;  %9817 = vperm.xlu0 %22546, %v9299_v51   ;;  %v9509_v9 = vadd.f32 %v24900_v7, %v9395_v63  ;;  %v9400_v51 = vmul.f32 %v24885_v52, %v9177_v13  ;;  %v9184_v13 = vld [vmem:[%s24889_s29 + $0x60] sm:$0xff] }
 0x7b4   : > { %9832 = vperm.xlu1 %22547, %v9302_v29   ;;  %9827 = vperm.xlu0 %22546, %v9301_v8   ;;  %v9179_v29 = vld [vmem:[%s24889_s29 + $0x38] sm:$0xff]  ;;  %v9512_v8 = vadd.f32 %v24900_v7, %v9398_v55 }
 0x7b8   : > { %9842 = vperm.xlu1 %22547, %v9304_v21   ;;  %9837 = vperm.xlu0 %22546, %v9303_v6   ;;  %v9510_v21 = vadd.f32 %v24900_v7, %v9396_v46  ;;  %v9399_v6 = vmul.f32 %v24885_v52, %v9176_v25  ;;  %v9185_v46 = vld [vmem:[%s24889_s29 + $0x68] sm:$0xff] }
 0x7bc   : > { %9852 = vperm.xlu1 %22547, %v9306_v47   ;;  %9847 = vperm.xlu0 %22546, %v9305_v40   ;;  %v9178_v47 = vld [vmem:[%s24889_s29 + $0x30] sm:$0xff]  ;;  %v9346_v40 = vld [vmem:[%s24821_s28 + $0x208] sm:$0xff] }
 0x7c0   : > { %9862 = vperm.xlu1 %22547, %v9308_v28   ;;  %9857 = vperm.xlu0 %22546, %v9307_v16   ;;  %v9345_v28 = vld [vmem:[%s24821_s28 + $0x200] sm:$0xff]  ;;  %v9402_v16 = vmul.f32 %v24885_v52, %v9179_v29 }
 0x7c4   : > { %9872 = vperm.xlu1 %22547, %v9310_v15   ;;  %9867 = vperm.xlu0 %22546, %v9309_v48   ;;  %v9619_v48 = vmax.f32 %v9511_v58, 0.0 }
 0x7c8   : > { %9882 = vperm.xlu1 %22547, %v9312_v39   ;;  %9877 = vperm.xlu0 %22546, %v9311_v0   ;;  %v9514_v0 = vadd.f32 %v24900_v7, %v9400_v51 }
 0x7cc   : > { %9892 = vperm.xlu1 %22547, %v9314_v1   ;;  %9887 = vperm.xlu0 %22546, %v9313_v50   ;;  %v9401_v1 = vmul.f32 %v24885_v52, %v9178_v47  ;;  %v9181_v50 = vld [vmem:[%s24889_s29 + $0x48] sm:$0xff] }
 0x7d0   : > { %9902 = vperm.xlu1 %22547, %v9316_v36   ;;  %9897 = vperm.xlu0 %22546, %v9315_v31   ;;  %v9617_v36 = vmax.f32 %v9509_v9, 0.0  ;;  %v9620_v31 = vmax.f32 %v9512_v8, 0.0  ;;  %v9408_v8 = vmul.f32 %v24885_v52, %v9185_v46 }
 0x7d4   : > { %9912 = vperm.xlu1 %22547, %v9318_v23   ;;  %9907 = vperm.xlu0 %22546, %v9317_v45   ;;  %v9618_v23 = vmax.f32 %v9510_v21, 0.0  ;;  %v9513_v45 = vadd.f32 %v24900_v7, %v9399_v6  ;;  %v9407_v21 = vmul.f32 %v24885_v52, %v9184_v13 }
 0x7d8   : > { %9922 = vperm.xlu1 %22547, %v9320_v26   ;;  %9917 = vperm.xlu0 %22546, %v9319_v56   ;;  %v9180_v26 = vld [vmem:[%s24889_s29 + $0x40] sm:$0xff]  ;;  %v9348_v56 = vld [vmem:[%s24821_s28 + $0x218] sm:$0xff] }
 0x7dc   : > { %9932 = vperm.xlu1 %22547, %v9322_v17   ;;  %9927 = vperm.xlu0 %22546, %v9321_v19   ;;  %v9347_v17 = vld [vmem:[%s24821_s28 + $0x210] sm:$0xff]  ;;  %v9516_v19 = vadd.f32 %v24900_v7, %v9402_v16  ;;  %v9187_v16 = vld [vmem:[%s24889_s29 + $0x78] sm:$0xff] }
 0x7de   : > { %v9624_v14 = vmax.f32 %v9516_v19, 0.0 }
 0x7e0   : > { %9942 = vperm.xlu1 %22547, %v9324_v44   ;;  %9937 = vperm.xlu0 %22546, %v9323_v22   ;;  %v9404_v44 = vmul.f32 %v24885_v52, %v9181_v50 }
 0x7e2   : > { %v9518_v54 = vadd.f32 %v24900_v7, %v9404_v44  ;;  %v9189_v44 = vld [vmem:[%s24889_s29 + $0x88] sm:$0xff] }
 0x7e4   : > { %9952 = vperm.xlu1 %22547, %v9326_v5   ;;  %9947 = vperm.xlu0 %22546, %v9325_v18   ;;  %v9626_v51 = vmax.f32 %v9518_v54, 0.0 }
 0x7e8   : > { %9962 = vperm.xlu1 %22547, %v9328_v42   ;;  %9957 = vperm.xlu0 %22546, %v9327_v27   ;;  %v9622_v42 = vmax.f32 %v9514_v0, 0.0  ;;  %v9515_v27 = vadd.f32 %v24900_v7, %v9401_v1 }
 0x7ea   : > { %v9623_v63 = vmax.f32 %v9515_v27, 0.0 }
 0x7ec   : > { %9972 = vperm.xlu1 %22547, %v9330_v10   ;;  %9967 = vperm.xlu0 %22546, %v9329_v33   ;;  %v9403_v10 = vmul.f32 %v24885_v52, %v9180_v26 }
 0x7f0   : > { %9982 = vperm.xlu1 %22547, %v9332_v62   ;;  %9977 = vperm.xlu0 %22546, %v9331_v30  }
 0x7f4   : > { %9992 = vperm.xlu1 %22547, %v9334_v59   ;;  %9987 = vperm.xlu0 %22546, %v9333_v53   ;;  %v9621_v59 = vmax.f32 %v9513_v45, 0.0  ;;  %v9183_v53 = vld [vmem:[%s24889_s29 + $0x58] sm:$0xff]  ;;  %v9410_v45 = vmul.f32 %v24885_v52, %v9187_v16 }
 0x7f5   : > { %v9406_v32 = vmul.f32 %v24885_v52, %v9183_v53 }
 0x7f7   : > { %v9520_v29 = vadd.f32 %v24900_v7, %v9406_v32 }
 0x7f8   : > { %10002 = vperm.xlu1 %22547, %v9336_v2   ;;  %9997 = vperm.xlu0 %22546, %v9335_v20   ;;  %v9350_v2 = vld [vmem:[%s24821_s28 + $0x228] sm:$0xff]  ;;  %v9349_v20 = vld [vmem:[%s24821_s28 + $0x220] sm:$0xff] }
 0x7fc   : > { %10012 = vperm.xlu1 %22547, %v9338_v38   ;;  %10007 = vperm.xlu0 %22546, %v9337_v37   ;;  %v9182_v38 = vld [vmem:[%s24889_s29 + $0x50] sm:$0xff] }
 0x7fd   : > { %v9405_v55 = vmul.f32 %v24885_v52, %v9182_v38 }
 0x800   : > { %10022 = vperm.xlu1 %22547, %v9340_v43   ;;  %10017 = vperm.xlu0 %22546, %v9339_v3  }
 0x804   : > { %10032 = vperm.xlu1 %22547, %v9342_v60   ;;  %10027 = vperm.xlu0 %22546, %v9341_v4   ;;  %v9517_v4 = vadd.f32 %v24900_v7, %v9403_v10 }
 0x808   : > { %10042 = vperm.xlu1 %22547, %v9344_v57   ;;  %10037 = vperm.xlu0 %22546, %v9343_v35   ;;  %v9352_v57 = vld [vmem:[%s24821_s28 + $0x238] sm:$0xff]  ;;  %v9351_v35 = vld [vmem:[%s24821_s28 + $0x230] sm:$0xff] }
 0x80b   : > { %v9738_v15 = vpop.permute.xlu1 %9737  ;;  %v9728_v39 = vpop.permute.xlu0 %9727 }
 0x80c   : > { %10052 = vperm.xlu1 %22547, %v9346_v40   ;;  %10047 = vperm.xlu0 %22546, %v9345_v28   ;;  %v10267_v22 = vmul.f32 %v9738_v15, %v9619_v48  ;;  %v10265_v33 = vmul.f32 %v9728_v39, %v9617_v36  ;;  %v9625_v40 = vmax.f32 %v9517_v4, 0.0  ;;  %v9519_v28 = vadd.f32 %v24900_v7, %v9405_v55  ;;  %v9354_v15 = vld [vmem:[%s24821_s28 + $0x248] sm:$0xff]  ;;  %v9353_v48 = vld [vmem:[%s24821_s28 + $0x240] sm:$0xff]  ;;  %v9186_v39 = vld [vmem:[%s24889_s29 + $0x70] sm:$0xff] }
 0x80d   : > { %v9628_v36 = vmax.f32 %v9520_v29, 0.0  ;;  %v9409_v19 = vmul.f32 %v24885_v52, %v9186_v39  ;;  %v9195_v39 = vld [vmem:[%s24889_s29 + $0xb8] sm:$0xff] }
 0x80f   : > { %v9743_v5 = vpop.permute.xlu1 %9742  ;;  %v9733_v18 = vpop.permute.xlu0 %9732  ;;  %v9523_v38 = vadd.f32 %v24900_v7, %v9409_v19 }
 0x810   : > { %v10268_v62 = vmul.f32 %v9743_v5, %v9620_v31  ;;  %v10266_v30 = vmul.f32 %v9733_v18, %v9618_v23  ;;  %10062 = vperm.xlu1 %22547, %v9348_v56   ;;  %10057 = vperm.xlu0 %22546, %v9347_v17   ;;  %v9522_v31 = vadd.f32 %v24900_v7, %v9408_v8  ;;  %v9627_v17 = vmax.f32 %v9519_v28, 0.0  ;;  %v9356_v5 = vld [vmem:[%s24821_s28 + $0x258] sm:$0xff]  ;;  %v9355_v18 = vld [vmem:[%s24821_s28 + $0x250] sm:$0xff] }
 0x811   : > { %v9521_v23 = vadd.f32 %v24900_v7, %v9407_v21  ;;  %v9631_v13 = vmax.f32 %v9523_v38, 0.0 }
 0x812   : > { %v10374_v37 = vpack.c.bf16 %v10268_v62, %v10267_v22  ;;  %v10373_v43 = vpack.c.bf16 %v10266_v30, %v10265_v33  ;;  %v9188_v22 = vld [vmem:[%s24889_s29 + $0x80] sm:$0xff]  ;;  %v9630_v33 = vmax.f32 %v9522_v31, 0.0  ;;  %v9524_v62 = vadd.f32 %v24900_v7, %v9410_v45 }
 0x813   : > { %v9753_v3 = vpop.permute.xlu1 %9752  ;;  %v9748_v60 = vpop.permute.xlu0 %9747  ;;  %v9412_v30 = vmul.f32 %v24885_v52, %v9189_v44 }
 0x814   : > { %10433 = vst [vmem:[%s24943_s7 + $0x8] sm:$0xff] %v10374_v37  ;;  %10432 = vst [vmem:[%s24943_s7] sm:$0xff] %v10373_v43  ;;  %v10270_v34 = vmul.f32 %v9753_v3, %v9622_v42  ;;  %v10269_v49 = vmul.f32 %v9748_v60, %v9621_v59  ;;  %10072 = vperm.xlu1 %22547, %v9350_v2   ;;  %10067 = vperm.xlu0 %22546, %v9349_v20   ;;  %v9629_v20 = vmax.f32 %v9521_v23, 0.0  ;;  %v9191_v37 = vld [vmem:[%s24889_s29 + $0x98] sm:$0xff]  ;;  %v9358_v43 = vld [vmem:[%s24821_s28 + $0x268] sm:$0xff] }
 0x815   : > { %v9411_v59 = vmul.f32 %v24885_v52, %v9188_v22  ;;  %v9357_v3 = vld [vmem:[%s24821_s28 + $0x260] sm:$0xff]  ;;  %v9190_v60 = vld [vmem:[%s24889_s29 + $0x90] sm:$0xff]  ;;  %v9632_v32 = vmax.f32 %v9524_v62, 0.0 }
 0x816   : > { %v10375_v25 = vpack.c.bf16 %v10270_v34, %v10269_v49  ;;  %v9526_v34 = vadd.f32 %v24900_v7, %v9412_v30 }
 0x817   : > { %v9763_v58 = vpop.permute.xlu1 %9762  ;;  %v9758_v9 = vpop.permute.xlu0 %9757  ;;  %v9525_v49 = vadd.f32 %v24900_v7, %v9411_v59 }
 0x818   : > { %10434 = vst [vmem:[%s24943_s7 + $0x10] sm:$0xff] %v10375_v25  ;;  %v10272_v6 = vmul.f32 %v9763_v58, %v9624_v14  ;;  %v10271_v47 = vmul.f32 %v9758_v9, %v9623_v63  ;;  %10082 = vperm.xlu1 %22547, %v9352_v57   ;;  %10077 = vperm.xlu0 %22546, %v9351_v35   ;;  %v9193_v35 = vld [vmem:[%s24889_s29 + $0xa8] sm:$0xff]  ;;  %v9192_v25 = vld [vmem:[%s24889_s29 + $0xa0] sm:$0xff]  ;;  %v9360_v58 = vld [vmem:[%s24821_s28 + $0x278] sm:$0xff]  ;;  %v9634_v21 = vmax.f32 %v9526_v34, 0.0 }
 0x819   : > { %v9414_v63 = vmul.f32 %v24885_v52, %v9191_v37  ;;  %v9413_v57 = vmul.f32 %v24885_v52, %v9190_v60  ;;  %v9359_v9 = vld [vmem:[%s24821_s28 + $0x270] sm:$0xff]  ;;  %v9199_v60 = vld [vmem:[%s24889_s29 + $0xd8] sm:$0xff] }
 0x81a   : > { %v10376_v0 = vpack.c.bf16 %v10272_v6, %v10271_v47  ;;  %v9416_v47 = vmul.f32 %v24885_v52, %v9193_v35 }
 0x81b   : > { %v9773_v1 = vpop.permute.xlu1 %9772  ;;  %v9768_v50 = vpop.permute.xlu0 %9767  ;;  %v9528_v6 = vadd.f32 %v24900_v7, %v9414_v63 }
 0x81c   : > { %10435 = vst [vmem:[%s24943_s7 + $0x18] sm:$0xff] %v10376_v0  ;;  %v10274_v26 = vmul.f32 %v9773_v1, %v9626_v51  ;;  %v10273_v56 = vmul.f32 %v9768_v50, %v9625_v40  ;;  %10092 = vperm.xlu1 %22547, %v9354_v15   ;;  %10087 = vperm.xlu0 %22546, %v9353_v48   ;;  %v9633_v15 = vmax.f32 %v9525_v49, 0.0  ;;  %v9362_v0 = vld [vmem:[%s24821_s28 + $0x288] sm:$0xff]  ;;  %v9361_v1 = vld [vmem:[%s24821_s28 + $0x280] sm:$0xff]  ;;  %v9194_v50 = vld [vmem:[%s24889_s29 + $0xb0] sm:$0xff] }
 0x81d   : > { %v9415_v40 = vmul.f32 %v24885_v52, %v9192_v25  ;;  %v9527_v48 = vadd.f32 %v24900_v7, %v9413_v57  ;;  %v9636_v45 = vmax.f32 %v9528_v6, 0.0 }
 0x81e   : > { %v10377_v42 = vpack.c.bf16 %v10274_v26, %v10273_v56  ;;  %v9530_v26 = vadd.f32 %v24900_v7, %v9416_v47 }
 0x81f   : > { %v9783_v27 = vpop.permute.xlu1 %9782  ;;  %v9778_v10 = vpop.permute.xlu0 %9777  ;;  %v9529_v56 = vadd.f32 %v24900_v7, %v9415_v40  ;;  %v9635_v22 = vmax.f32 %v9527_v48, 0.0 }
 0x820   : > { %10436 = vst [vmem:[%s24943_s7 + $0x20] sm:$0xff] %v10377_v42  ;;  %v10276_v53 = vmul.f32 %v9783_v27, %v9628_v36  ;;  %v10275_v2 = vmul.f32 %v9778_v10, %v9627_v17  ;;  %10102 = vperm.xlu1 %22547, %v9356_v5   ;;  %10097 = vperm.xlu0 %22546, %v9355_v18   ;;  %v9197_v18 = vld [vmem:[%s24889_s29 + $0xc8] sm:$0xff]  ;;  %v9196_v42 = vld [vmem:[%s24889_s29 + $0xc0] sm:$0xff]  ;;  %v9364_v27 = vld [vmem:[%s24821_s28 + $0x298] sm:$0xff]  ;;  %v9638_v59 = vmax.f32 %v9530_v26, 0.0 }
 0x821   : > { %v9418_v17 = vmul.f32 %v24885_v52, %v9195_v39  ;;  %v9417_v5 = vmul.f32 %v24885_v52, %v9194_v50  ;;  %v9363_v10 = vld [vmem:[%s24821_s28 + $0x290] sm:$0xff]  ;;  %v9203_v50 = vld [vmem:[%s24889_s29 + $0xf8] sm:$0xff] }
 0x822   : > { %v10378_v14 = vpack.c.bf16 %v10276_v53, %v10275_v2  ;;  %v9420_v2 = vmul.f32 %v24885_v52, %v9197_v18 }
 0x823   : > { %v9793_v54 = vpop.permute.xlu1 %9792  ;;  %v9788_v4 = vpop.permute.xlu0 %9787  ;;  %v9532_v53 = vadd.f32 %v24900_v7, %v9418_v17 }
 0x824   : > { %10437 = vst [vmem:[%s24943_s7 + $0x28] sm:$0xff] %v10378_v14  ;;  %v10278_v55 = vmul.f32 %v9793_v54, %v9630_v33  ;;  %v10277_v46 = vmul.f32 %v9788_v4, %v9629_v20  ;;  %10112 = vperm.xlu1 %22547, %v9358_v43   ;;  %10107 = vperm.xlu0 %22546, %v9357_v3   ;;  %v9637_v43 = vmax.f32 %v9529_v56, 0.0  ;;  %v9366_v14 = vld [vmem:[%s24821_s28 + $0x2a8] sm:$0xff]  ;;  %v9365_v54 = vld [vmem:[%s24821_s28 + $0x2a0] sm:$0xff]  ;;  %v9198_v4 = vld [vmem:[%s24889_s29 + $0xd0] sm:$0xff] }
 0x825   : > { %v9419_v20 = vmul.f32 %v24885_v52, %v9196_v42  ;;  %v9531_v3 = vadd.f32 %v24900_v7, %v9417_v5  ;;  %v9640_v63 = vmax.f32 %v9532_v53, 0.0 }
 0x826   : > { %v10379_v51 = vpack.c.bf16 %v10278_v55, %v10277_v46  ;;  %v9534_v55 = vadd.f32 %v24900_v7, %v9420_v2 }
 0x827   : > { %v9803_v29 = vpop.permute.xlu1 %9802  ;;  %v9798_v8 = vpop.permute.xlu0 %9797  ;;  %v9533_v46 = vadd.f32 %v24900_v7, %v9419_v20  ;;  %v9639_v25 = vmax.f32 %v9531_v3, 0.0 }
 0x828   : > { %10438 = vst [vmem:[%s24943_s7 + $0x30] sm:$0xff] %v10379_v51  ;;  %v10280_v28 = vmul.f32 %v9803_v29, %v9632_v32  ;;  %v10279_v16 = vmul.f32 %v9798_v8, %v9631_v13  ;;  %10122 = vperm.xlu1 %22547, %v9360_v58   ;;  %10117 = vperm.xlu0 %22546, %v9359_v9   ;;  %v9201_v9 = vld [vmem:[%s24889_s29 + $0xe8] sm:$0xff]  ;;  %v9200_v51 = vld [vmem:[%s24889_s29 + $0xe0] sm:$0xff]  ;;  %v9368_v29 = vld [vmem:[%s24821_s28 + $0x2b8] sm:$0xff]  ;;  %v9642_v40 = vmax.f32 %v9534_v55, 0.0 }
 0x829   : > { %v9422_v13 = vmul.f32 %v24885_v52, %v9199_v60  ;;  %v9421_v58 = vmul.f32 %v24885_v52, %v9198_v4  ;;  %v9367_v8 = vld [vmem:[%s24821_s28 + $0x2b0] sm:$0xff]  ;;  %v9207_v4 = vld [vmem:[%s24889_s29 + $0x118] sm:$0xff] }
 0x82a   : > { %v10380_v36 = vpack.c.bf16 %v10280_v28, %v10279_v16  ;;  %v9424_v16 = vmul.f32 %v24885_v52, %v9201_v9 }
 0x82b   : > { %v9813_v31 = vpop.permute.xlu1 %9812  ;;  %v9808_v23 = vpop.permute.xlu0 %9807  ;;  %v9536_v28 = vadd.f32 %v24900_v7, %v9422_v13 }
 0x82c   : > { %10439 = vst [vmem:[%s24943_s7 + $0x38] sm:$0xff] %v10380_v36  ;;  %v10282_v19 = vmul.f32 %v9813_v31, %v9634_v21  ;;  %v10281_v44 = vmul.f32 %v9808_v23, %v9633_v15  ;;  %10132 = vperm.xlu1 %22547, %v9362_v0   ;;  %10127 = vperm.xlu0 %22546, %v9361_v1   ;;  %v9641_v0 = vmax.f32 %v9533_v46, 0.0  ;;  %v9370_v36 = vld [vmem:[%s24821_s28 + $0x2c8] sm:$0xff]  ;;  %v9369_v31 = vld [vmem:[%s24821_s28 + $0x2c0] sm:$0xff]  ;;  %v9202_v23 = vld [vmem:[%s24889_s29 + $0xf0] sm:$0xff] }
 0x82d   : > { %v9423_v15 = vmul.f32 %v24885_v52, %v9200_v51  ;;  %v9535_v1 = vadd.f32 %v24900_v7, %v9421_v58  ;;  %v9644_v17 = vmax.f32 %v9536_v28, 0.0 }
 0x82e   : > { %v10381_v33 = vpack.c.bf16 %v10282_v19, %v10281_v44  ;;  %v9538_v19 = vadd.f32 %v24900_v7, %v9424_v16 }
 0x82f   : > { %v9823_v62 = vpop.permute.xlu1 %9822  ;;  %v9818_v30 = vpop.permute.xlu0 %9817  ;;  %v9537_v44 = vadd.f32 %v24900_v7, %v9423_v15  ;;  %v9643_v42 = vmax.f32 %v9535_v1, 0.0 }
 0x830   : > { %10440 = vst [vmem:[%s24943_s7 + $0x40] sm:$0xff] %v10381_v33  ;;  %v10284_v38 = vmul.f32 %v9823_v62, %v9636_v45  ;;  %v10283_v37 = vmul.f32 %v9818_v30, %v9635_v22  ;;  %10142 = vperm.xlu1 %22547, %v9364_v27   ;;  %10137 = vperm.xlu0 %22546, %v9363_v10   ;;  %v9205_v10 = vld [vmem:[%s24889_s29 + $0x108] sm:$0xff]  ;;  %v9204_v33 = vld [vmem:[%s24889_s29 + $0x100] sm:$0xff]  ;;  %v9372_v62 = vld [vmem:[%s24821_s28 + $0x2d8] sm:$0xff]  ;;  %v9646_v20 = vmax.f32 %v9538_v19, 0.0 }
 0x831   : > { %v9426_v22 = vmul.f32 %v24885_v52, %v9203_v50  ;;  %v9425_v27 = vmul.f32 %v24885_v52, %v9202_v23  ;;  %v9371_v30 = vld [vmem:[%s24821_s28 + $0x2d0] sm:$0xff]  ;;  %v9211_v23 = vld [vmem:[%s24889_s29 + $0x138] sm:$0xff] }
 0x832   : > { %v10382_v32 = vpack.c.bf16 %v10284_v38, %v10283_v37  ;;  %v9428_v37 = vmul.f32 %v24885_v52, %v9205_v10 }
 0x833   : > { %v9833_v34 = vpop.permute.xlu1 %9832  ;;  %v9828_v49 = vpop.permute.xlu0 %9827  ;;  %v9540_v38 = vadd.f32 %v24900_v7, %v9426_v22 }
 0x834   : > { %10441 = vst [vmem:[%s24943_s7 + $0x48] sm:$0xff] %v10382_v32  ;;  %v10286_v57 = vmul.f32 %v9833_v34, %v9638_v59  ;;  %v10285_v35 = vmul.f32 %v9828_v49, %v9637_v43  ;;  %10152 = vperm.xlu1 %22547, %v9366_v14   ;;  %10147 = vperm.xlu0 %22546, %v9365_v54   ;;  %v9645_v14 = vmax.f32 %v9537_v44, 0.0  ;;  %v9374_v32 = vld [vmem:[%s24821_s28 + $0x2e8] sm:$0xff]  ;;  %v9373_v34 = vld [vmem:[%s24821_s28 + $0x2e0] sm:$0xff]  ;;  %v9206_v49 = vld [vmem:[%s24889_s29 + $0x110] sm:$0xff] }
 0x835   : > { %v9427_v43 = vmul.f32 %v24885_v52, %v9204_v33  ;;  %v9539_v54 = vadd.f32 %v24900_v7, %v9425_v27  ;;  %v9648_v13 = vmax.f32 %v9540_v38, 0.0 }
 0x836   : > { %v10383_v21 = vpack.c.bf16 %v10286_v57, %v10285_v35  ;;  %v9542_v57 = vadd.f32 %v24900_v7, %v9428_v37 }
 0x837   : > { %v9843_v6 = vpop.permute.xlu1 %9842  ;;  %v9838_v47 = vpop.permute.xlu0 %9837  ;;  %v9541_v35 = vadd.f32 %v24900_v7, %v9427_v43  ;;  %v9647_v51 = vmax.f32 %v9539_v54, 0.0 }
 0x838   : > { %10442 = vst [vmem:[%s24943_s7 + $0x50] sm:$0xff] %v10383_v21  ;;  %v10288_v48 = vmul.f32 %v9843_v6, %v9640_v63  ;;  %v10287_v39 = vmul.f32 %v9838_v47, %v9639_v25  ;;  %10162 = vperm.xlu1 %22547, %v9368_v29   ;;  %10157 = vperm.xlu0 %22546, %v9367_v8   ;;  %v9209_v8 = vld [vmem:[%s24889_s29 + $0x128] sm:$0xff]  ;;  %v9208_v21 = vld [vmem:[%s24889_s29 + $0x120] sm:$0xff]  ;;  %v9376_v6 = vld [vmem:[%s24821_s28 + $0x2f8] sm:$0xff]  ;;  %v9650_v15 = vmax.f32 %v9542_v57, 0.0 }
 0x839   : > { %v9430_v25 = vmul.f32 %v24885_v52, %v9207_v4  ;;  %v9429_v29 = vmul.f32 %v24885_v52, %v9206_v49  ;;  %v9375_v47 = vld [vmem:[%s24821_s28 + $0x2f0] sm:$0xff]  ;;  %v9215_v49 = vld [vmem:[%s24889_s29 + $0x158] sm:$0xff] }
 0x83a   : > { %v10384_v45 = vpack.c.bf16 %v10288_v48, %v10287_v39  ;;  %v9432_v39 = vmul.f32 %v24885_v52, %v9209_v8 }
 0x83b   : > { %v9853_v26 = vpop.permute.xlu1 %9852  ;;  %v9848_v56 = vpop.permute.xlu0 %9847  ;;  %v9544_v48 = vadd.f32 %v24900_v7, %v9430_v25 }
 0x83c   : > { %10443 = vst [vmem:[%s24943_s7 + $0x58] sm:$0xff] %v10384_v45  ;;  %v10290_v5 = vmul.f32 %v9853_v26, %v9642_v40  ;;  %v10289_v18 = vmul.f32 %v9848_v56, %v9641_v0  ;;  %10172 = vperm.xlu1 %22547, %v9370_v36   ;;  %10167 = vperm.xlu0 %22546, %v9369_v31   ;;  %v9649_v36 = vmax.f32 %v9541_v35, 0.0  ;;  %v9378_v45 = vld [vmem:[%s24821_s28 + $0x308] sm:$0xff]  ;;  %v9377_v26 = vld [vmem:[%s24821_s28 + $0x300] sm:$0xff]  ;;  %v9210_v56 = vld [vmem:[%s24889_s29 + $0x130] sm:$0xff] }
 0x83d   : > { %v9431_v0 = vmul.f32 %v24885_v52, %v9208_v21  ;;  %v9543_v31 = vadd.f32 %v24900_v7, %v9429_v29  ;;  %v9652_v22 = vmax.f32 %v9544_v48, 0.0 }
 0x83e   : > { %v10385_v59 = vpack.c.bf16 %v10290_v5, %v10289_v18  ;;  %v9546_v5 = vadd.f32 %v24900_v7, %v9432_v39 }
 0x83f   : > { %v9863_v53 = vpop.permute.xlu1 %9862  ;;  %v9858_v2 = vpop.permute.xlu0 %9857  ;;  %v9545_v18 = vadd.f32 %v24900_v7, %v9431_v0  ;;  %v9651_v33 = vmax.f32 %v9543_v31, 0.0 }
 0x840   : > { %10444 = vst [vmem:[%s24943_s7 + $0x60] sm:$0xff] %v10385_v59  ;;  %v10292_v3 = vmul.f32 %v9863_v53, %v9644_v17  ;;  %v10291_v60 = vmul.f32 %v9858_v2, %v9643_v42  ;;  %10182 = vperm.xlu1 %22547, %v9372_v62   ;;  %10177 = vperm.xlu0 %22546, %v9371_v30   ;;  %v9213_v30 = vld [vmem:[%s24889_s29 + $0x148] sm:$0xff]  ;;  %v9212_v59 = vld [vmem:[%s24889_s29 + $0x140] sm:$0xff]  ;;  %v9380_v53 = vld [vmem:[%s24821_s28 + $0x318] sm:$0xff]  ;;  %v9654_v43 = vmax.f32 %v9546_v5, 0.0 }
 0x841   : > { %v9434_v42 = vmul.f32 %v24885_v52, %v9211_v23  ;;  %v9433_v62 = vmul.f32 %v24885_v52, %v9210_v56  ;;  %v9379_v2 = vld [vmem:[%s24821_s28 + $0x310] sm:$0xff]  ;;  %v9219_v56 = vld [vmem:[%s24889_s29 + $0x178] sm:$0xff] }
 0x842   : > { %v10386_v63 = vpack.c.bf16 %v10292_v3, %v10291_v60  ;;  %v9436_v60 = vmul.f32 %v24885_v52, %v9213_v30 }
 0x843   : > { %v9873_v55 = vpop.permute.xlu1 %9872  ;;  %v9868_v46 = vpop.permute.xlu0 %9867  ;;  %v9548_v3 = vadd.f32 %v24900_v7, %v9434_v42 }
 0x844   : > { %10445 = vst [vmem:[%s24943_s7 + $0x68] sm:$0xff] %v10386_v63  ;;  %v10294_v58 = vmul.f32 %v9873_v55, %v9646_v20  ;;  %v10293_v9 = vmul.f32 %v9868_v46, %v9645_v14  ;;  %10192 = vperm.xlu1 %22547, %v9374_v32   ;;  %10187 = vperm.xlu0 %22546, %v9373_v34   ;;  %v9653_v32 = vmax.f32 %v9545_v18, 0.0  ;;  %v9382_v63 = vld [vmem:[%s24821_s28 + $0x328] sm:$0xff]  ;;  %v9381_v55 = vld [vmem:[%s24821_s28 + $0x320] sm:$0xff]  ;;  %v9214_v46 = vld [vmem:[%s24889_s29 + $0x150] sm:$0xff] }
 0x845   : > { %v9435_v14 = vmul.f32 %v24885_v52, %v9212_v59  ;;  %v9547_v34 = vadd.f32 %v24900_v7, %v9433_v62  ;;  %v9656_v25 = vmax.f32 %v9548_v3, 0.0 }
 0x846   : > { %v10387_v40 = vpack.c.bf16 %v10294_v58, %v10293_v9  ;;  %v9550_v58 = vadd.f32 %v24900_v7, %v9436_v60 }
 0x847   : > { %v9883_v28 = vpop.permute.xlu1 %9882  ;;  %v9878_v16 = vpop.permute.xlu0 %9877  ;;  %v9549_v9 = vadd.f32 %v24900_v7, %v9435_v14  ;;  %v9655_v21 = vmax.f32 %v9547_v34, 0.0 }
 0x848   : > { %10446 = vst [vmem:[%s24943_s7 + $0x70] sm:$0xff] %v10387_v40  ;;  %v10296_v1 = vmul.f32 %v9883_v28, %v9648_v13  ;;  %v10295_v50 = vmul.f32 %v9878_v16, %v9647_v51  ;;  %10202 = vperm.xlu1 %22547, %v9376_v6   ;;  %10197 = vperm.xlu0 %22546, %v9375_v47   ;;  %v9217_v47 = vld [vmem:[%s24889_s29 + $0x168] sm:$0xff]  ;;  %v9216_v40 = vld [vmem:[%s24889_s29 + $0x160] sm:$0xff]  ;;  %v9384_v28 = vld [vmem:[%s24821_s28 + $0x338] sm:$0xff]  ;;  %v9658_v0 = vmax.f32 %v9550_v58, 0.0 }
 0x849   : > { %v9438_v51 = vmul.f32 %v24885_v52, %v9215_v49  ;;  %v9437_v6 = vmul.f32 %v24885_v52, %v9214_v46  ;;  %v9383_v16 = vld [vmem:[%s24821_s28 + $0x330] sm:$0xff]  ;;  %v9223_v46 = vld [vmem:[%s24889_s29 + $0x198] sm:$0xff] }
 0x84a   : > { %v10388_v17 = vpack.c.bf16 %v10296_v1, %v10295_v50  ;;  %v9440_v50 = vmul.f32 %v24885_v52, %v9217_v47 }
 0x84b   : > { %v9893_v19 = vpop.permute.xlu1 %9892  ;;  %v9888_v44 = vpop.permute.xlu0 %9887  ;;  %v9552_v1 = vadd.f32 %v24900_v7, %v9438_v51  ;;  %v9446_v51 = vmul.f32 %v24885_v52, %v9223_v46 }
 0x84c   : > { %10447 = vst [vmem:[%s24943_s7 + $0x78] sm:$0xff] %v10388_v17  ;;  %v10298_v27 = vmul.f32 %v9893_v19, %v9650_v15  ;;  %v10297_v10 = vmul.f32 %v9888_v44, %v9649_v36  ;;  %10212 = vperm.xlu1 %22547, %v9378_v45   ;;  %10207 = vperm.xlu0 %22546, %v9377_v26   ;;  %v9657_v45 = vmax.f32 %v9549_v9, 0.0  ;;  %v9386_v17 = vld [vmem:[%s24821_s28 + $0x348] sm:$0xff]  ;;  %v9385_v19 = vld [vmem:[%s24821_s28 + $0x340] sm:$0xff]  ;;  %v9218_v44 = vld [vmem:[%s24889_s29 + $0x170] sm:$0xff] }
 0x84d   : > { %v9439_v36 = vmul.f32 %v24885_v52, %v9216_v40  ;;  %v9551_v26 = vadd.f32 %v24900_v7, %v9437_v6  ;;  %v9660_v42 = vmax.f32 %v9552_v1, 0.0  ;;  %v9225_v40 = vld [vmem:[%s24889_s29 + $0x1a8] sm:$0xff]  ;;  %v9560_v1 = vadd.f32 %v24900_v7, %v9446_v51 }
 0x84e   : > { %v10389_v20 = vpack.c.bf16 %v10298_v27, %v10297_v10  ;;  %v9554_v27 = vadd.f32 %v24900_v7, %v9440_v50 }
 0x84f   : > { %v9903_v38 = vpop.permute.xlu1 %9902  ;;  %v9898_v37 = vpop.permute.xlu0 %9897  ;;  %v9553_v10 = vadd.f32 %v24900_v7, %v9439_v36  ;;  %v9659_v59 = vmax.f32 %v9551_v26, 0.0  ;;  %v9227_v26 = vld [vmem:[%s24889_s29 + $0x1b8] sm:$0xff] }
 0x850   : > { %10448 = vst [vmem:[%s24943_s7 + $0x80] sm:$0xff] %v10389_v20  ;;  %v10300_v54 = vmul.f32 %v9903_v38, %v9652_v22  ;;  %v10299_v4 = vmul.f32 %v9898_v37, %v9651_v33  ;;  %10222 = vperm.xlu1 %22547, %v9380_v53   ;;  %10217 = vperm.xlu0 %22546, %v9379_v2   ;;  %v9221_v2 = vld [vmem:[%s24889_s29 + $0x188] sm:$0xff]  ;;  %v9220_v20 = vld [vmem:[%s24889_s29 + $0x180] sm:$0xff]  ;;  %v9388_v38 = vld [vmem:[%s24821_s28 + $0x358] sm:$0xff]  ;;  %v9662_v14 = vmax.f32 %v9554_v27, 0.0 }
 0x851   : > { %v9442_v33 = vmul.f32 %v24885_v52, %v9219_v56  ;;  %v9441_v53 = vmul.f32 %v24885_v52, %v9218_v44  ;;  %v9387_v37 = vld [vmem:[%s24821_s28 + $0x350] sm:$0xff] }
 0x852   : > { %v10390_v13 = vpack.c.bf16 %v10300_v54, %v10299_v4  ;;  %v9444_v4 = vmul.f32 %v24885_v52, %v9221_v2  ;;  %v9226_v56 = vld [vmem:[%s24889_s29 + $0x1b0] sm:$0xff] }
 0x853   : > { %v9913_v57 = vpop.permute.xlu1 %9912  ;;  %v9908_v35 = vpop.permute.xlu0 %9907  ;;  %v9556_v54 = vadd.f32 %v24900_v7, %v9442_v33 }
 0x854   : > { %10449 = vst [vmem:[%s24943_s7 + $0x88] sm:$0xff] %v10390_v13  ;;  %v10302_v29 = vmul.f32 %v9913_v57, %v9654_v43  ;;  %v10301_v8 = vmul.f32 %v9908_v35, %v9653_v32  ;;  %10232 = vperm.xlu1 %22547, %v9382_v63   ;;  %10227 = vperm.xlu0 %22546, %v9381_v55   ;;  %v9661_v63 = vmax.f32 %v9553_v10, 0.0  ;;  %v9222_v13 = vld [vmem:[%s24889_s29 + $0x190] sm:$0xff] }
 0x855   : > { %v9443_v32 = vmul.f32 %v24885_v52, %v9220_v20  ;;  %v9555_v55 = vadd.f32 %v24900_v7, %v9441_v53  ;;  %v9558_v58 = vadd.f32 %v24900_v7, %v9444_v4  ;;  %v9664_v6 = vmax.f32 %v9556_v54, 0.0 }
 0x856   : > { %v10391_v15 = vpack.c.bf16 %v10302_v29, %v10301_v8  ;;  %v9445_v29 = vmul.f32 %v24885_v52, %v9222_v13 }
 0x857   : > { %v9923_v48 = vpop.permute.xlu1 %9922  ;;  %v9918_v39 = vpop.permute.xlu0 %9917  ;;  %v9557_v9 = vadd.f32 %v24900_v7, %v9443_v32  ;;  %v9663_v47 = vmax.f32 %v9555_v55, 0.0  ;;  %v9231_v32 = vld [vmem:[%s24889_s29 + $0x1d8] sm:$0xff] }
 0x858   : > { %10450 = vst [vmem:[%s24943_s7 + $0x90] sm:$0xff] %v10391_v15  ;;  %v10304_v31 = vmul.f32 %v9923_v48, %v9656_v25  ;;  %v10303_v23 = vmul.f32 %v9918_v39, %v9655_v21  ;;  %10242 = vperm.xlu1 %22547, %v9384_v28   ;;  %10237 = vperm.xlu0 %22546, %v9383_v16   ;;  %v9224_v28 = vld [vmem:[%s24889_s29 + $0x1a0] sm:$0xff]  ;;  %v9666_v39 = vmax.f32 %v9558_v58, 0.0 }
 0x859   : > { %v9559_v50 = vadd.f32 %v24900_v7, %v9445_v29  ;;  %v9233_v29 = vld [vmem:[%s24889_s29 + $0x1e8] sm:$0xff] }
 0x85a   : > { %v10392_v22 = vpack.c.bf16 %v10304_v31, %v10303_v23  ;;  %v9448_v23 = vmul.f32 %v24885_v52, %v9225_v40 }
 0x85b   : > { %v9933_v5 = vpop.permute.xlu1 %9932  ;;  %v9928_v18 = vpop.permute.xlu0 %9927 }
 0x85c   : > { %10451 = vst [vmem:[%s24943_s7 + $0x98] sm:$0xff] %v10392_v22  ;;  %v10306_v62 = vmul.f32 %v9933_v5, %v9658_v0  ;;  %v10305_v30 = vmul.f32 %v9928_v18, %v9657_v45  ;;  %10252 = vperm.xlu1 %22547, %v9386_v17   ;;  %10247 = vperm.xlu0 %22546, %v9385_v19   ;;  %v9665_v0 = vmax.f32 %v9557_v9, 0.0  ;;  %v9668_v22 = vmax.f32 %v9560_v1, 0.0 }
 0x85d   : > { %v9447_v45 = vmul.f32 %v24885_v52, %v9224_v28  ;;  %v9667_v5 = vmax.f32 %v9559_v50, 0.0  ;;  %v9450_v18 = vmul.f32 %v24885_v52, %v9227_v26  ;;  %v9562_v33 = vadd.f32 %v24900_v7, %v9448_v23  ;;  %v9235_v50 = vld [vmem:[%s24889_s29 + $0x1f8] sm:$0xff] }
 0x85e   : > { %v10393_v43 = vpack.c.bf16 %v10306_v62, %v10305_v30  ;;  %v9229_v30 = vld [vmem:[%s24889_s29 + $0x1c8] sm:$0xff]  ;;  %v9454_v9 = vmul.f32 %v24885_v52, %v9231_v32 }
 0x85f   : > { %v9943_v3 = vpop.permute.xlu1 %9942  ;;  %v9938_v60 = vpop.permute.xlu0 %9937  ;;  %v9561_v62 = vadd.f32 %v24900_v7, %v9447_v45  ;;  %v9670_v54 = vmax.f32 %v9562_v33, 0.0 }
 0x860   : > { %10452 = vst [vmem:[%s24943_s7 + $0xa0] sm:$0xff] %v10393_v43  ;;  %v10308_v34 = vmul.f32 %v9943_v3, %v9660_v42  ;;  %v10307_v49 = vmul.f32 %v9938_v60, %v9659_v59  ;;  %10262 = vperm.xlu1 %22547, %v9388_v38   ;;  %10257 = vperm.xlu0 %22546, %v9387_v37   ;;  %v9228_v59 = vld [vmem:[%s24889_s29 + $0x1c0] sm:$0xff] }
 0x861   : > { %v9449_v42 = vmul.f32 %v24885_v52, %v9226_v56  ;;  %v9564_v38 = vadd.f32 %v24900_v7, %v9450_v18  ;;  %v9452_v43 = vmul.f32 %v24885_v52, %v9229_v30  ;;  %v9451_v3 = vmul.f32 %v24885_v52, %v9228_v59 }
 0x862   : > { %v10394_v57 = vpack.c.bf16 %v10308_v34, %v10307_v49  ;;  %v9669_v4 = vmax.f32 %v9561_v62, 0.0  ;;  %v9230_v34 = vld [vmem:[%s24889_s29 + $0x1d0] sm:$0xff] }
 0x863   : > { %v9953_v35 = vpop.permute.xlu1 %9952  ;;  %v9948_v25 = vpop.permute.xlu0 %9947  ;;  %v9563_v37 = vadd.f32 %v24900_v7, %v9449_v42  ;;  %v9672_v46 = vmax.f32 %v9564_v38, 0.0  ;;  %v9453_v51 = vmul.f32 %v24885_v52, %v9230_v34  ;;  %v9237_v42 = vld [vmem:[%s24889_s29 + $0x208] sm:$0xff] }
 0x864   : > { %10453 = vst [vmem:[%s24943_s7 + $0xa8] sm:$0xff] %v10394_v57  ;;  %v10310_v8 = vmul.f32 %v9953_v35, %v9662_v14  ;;  %v10309_v21 = vmul.f32 %v9948_v25, %v9661_v63  ;;  %v9566_v57 = vadd.f32 %v24900_v7, %v9452_v43  ;;  %v9565_v35 = vadd.f32 %v24900_v7, %v9451_v3  ;;  %v9239_v3 = vld [vmem:[%s24889_s29 + $0x218] sm:$0xff] }
 0x865   : > { %v9671_v13 = vmax.f32 %v9563_v37, 0.0  ;;  %v9567_v1 = vadd.f32 %v24900_v7, %v9453_v51  ;;  %v9460_v37 = vmul.f32 %v24885_v52, %v9237_v42 }
 0x866   : > { %v10395_v16 = vpack.c.bf16 %v10310_v8, %v10309_v21  ;;  %v9232_v8 = vld [vmem:[%s24889_s29 + $0x1e0] sm:$0xff]  ;;  %v9674_v40 = vmax.f32 %v9566_v57, 0.0  ;;  %v9673_v28 = vmax.f32 %v9565_v35, 0.0  ;;  %v9241_v35 = vld [vmem:[%s24889_s29 + $0x228] sm:$0xff] }
 0x867   : > { %v9963_v15 = vpop.permute.xlu1 %9962  ;;  %v9958_v48 = vpop.permute.xlu0 %9957  ;;  %v9675_v18 = vmax.f32 %v9567_v1, 0.0 }
 0x868   : > { %10454 = vst [vmem:[%s24943_s7 + $0xb0] sm:$0xff] %v10395_v16  ;;  %v10312_v36 = vmul.f32 %v9963_v15, %v9664_v6  ;;  %v10311_v31 = vmul.f32 %v9958_v48, %v9663_v47  ;;  %v9456_v16 = vmul.f32 %v24885_v52, %v9233_v29  ;;  %v9455_v15 = vmul.f32 %v24885_v52, %v9232_v8 }
 0x86a   : > { %v10396_v17 = vpack.c.bf16 %v10312_v36, %v10311_v31  ;;  %v9234_v36 = vld [vmem:[%s24889_s29 + $0x1f0] sm:$0xff]  ;;  %v9570_v26 = vadd.f32 %v24900_v7, %v9456_v16  ;;  %v9569_v56 = vadd.f32 %v24900_v7, %v9455_v15  ;;  %v9243_v15 = vld [vmem:[%s24889_s29 + $0x238] sm:$0xff] }
 0x86b   : > { %v9973_v19 = vpop.permute.xlu1 %9972  ;;  %v9968_v44 = vpop.permute.xlu0 %9967 }
 0x86c   : > { %10455 = vst [vmem:[%s24943_s7 + $0xb8] sm:$0xff] %v10396_v17  ;;  %v10314_v27 = vmul.f32 %v9973_v19, %v9666_v39  ;;  %v10313_v10 = vmul.f32 %v9968_v44, %v9665_v0  ;;  %v9568_v0 = vadd.f32 %v24900_v7, %v9454_v9  ;;  %v9458_v17 = vmul.f32 %v24885_v52, %v9235_v50 }
 0x86d   : > { %v9457_v19 = vmul.f32 %v24885_v52, %v9234_v36  ;;  %v9678_v30 = vmax.f32 %v9570_v26, 0.0  ;;  %v9677_v59 = vmax.f32 %v9569_v56, 0.0  ;;  %v9466_v56 = vmul.f32 %v24885_v52, %v9243_v15 }
 0x86e   : > { %v10397_v53 = vpack.c.bf16 %v10314_v27, %v10313_v10  ;;  %v9236_v27 = vld [vmem:[%s24889_s29 + $0x200] sm:$0xff] }
 0x86f   : > { %v9983_v2 = vpop.permute.xlu1 %9982  ;;  %v9978_v20 = vpop.permute.xlu0 %9977  ;;  %v9459_v43 = vmul.f32 %v24885_v52, %v9236_v27 }
 0x870   : > { %10456 = vst [vmem:[%s24943_s7 + $0xc0] sm:$0xff] %v10397_v53  ;;  %v10316_v60 = vmul.f32 %v9983_v2, %v9668_v22  ;;  %v10315_v14 = vmul.f32 %v9978_v20, %v9667_v5  ;;  %v9676_v5 = vmax.f32 %v9568_v0, 0.0  ;;  %v9572_v53 = vadd.f32 %v24900_v7, %v9458_v17 }
 0x871   : > { %v9571_v2 = vadd.f32 %v24900_v7, %v9457_v19  ;;  %v9573_v57 = vadd.f32 %v24900_v7, %v9459_v43  ;;  %v9245_v19 = vld [vmem:[%s24889_s29 + $0x248] sm:$0xff] }
 0x872   : > { %v10398_v49 = vpack.c.bf16 %v10316_v60, %v10315_v14  ;;  %v9238_v60 = vld [vmem:[%s24889_s29 + $0x210] sm:$0xff]  ;;  %v9680_v32 = vmax.f32 %v9572_v53, 0.0 }
 0x873   : > { %v9993_v63 = vpop.permute.xlu1 %9992  ;;  %v9988_v55 = vpop.permute.xlu0 %9987  ;;  %v9679_v34 = vmax.f32 %v9571_v2, 0.0  ;;  %v9681_v16 = vmax.f32 %v9573_v57, 0.0  ;;  %v9247_v2 = vld [vmem:[%s24889_s29 + $0x258] sm:$0xff] }
 0x874   : > { %10457 = vst [vmem:[%s24943_s7 + $0xc8] sm:$0xff] %v10398_v49  ;;  %v10318_v25 = vmul.f32 %v9993_v63, %v9670_v54  ;;  %v10317_v58 = vmul.f32 %v9988_v55, %v9669_v4  ;;  %v9462_v49 = vmul.f32 %v24885_v52, %v9239_v3  ;;  %v9461_v63 = vmul.f32 %v24885_v52, %v9238_v60 }
 0x876   : > { %v10399_v21 = vpack.c.bf16 %v10318_v25, %v10317_v58  ;;  %v9240_v25 = vld [vmem:[%s24889_s29 + $0x220] sm:$0xff]  ;;  %v9576_v29 = vadd.f32 %v24900_v7, %v9462_v49  ;;  %v9575_v8 = vadd.f32 %v24900_v7, %v9461_v63  ;;  %v9249_v63 = vld [vmem:[%s24889_s29 + $0x268] sm:$0xff] }
 0x877   : > { %v10003_v6 = vpop.permute.xlu1 %10002  ;;  %v9998_v47 = vpop.permute.xlu0 %9997 }
 0x878   : > { %10458 = vst [vmem:[%s24943_s7 + $0xd0] sm:$0xff] %v10399_v21  ;;  %v10320_v48 = vmul.f32 %v10003_v6, %v9672_v46  ;;  %v10319_v39 = vmul.f32 %v9998_v47, %v9671_v13  ;;  %v9574_v13 = vadd.f32 %v24900_v7, %v9460_v37  ;;  %v9464_v21 = vmul.f32 %v24885_v52, %v9241_v35 }
 0x879   : > { %v9463_v6 = vmul.f32 %v24885_v52, %v9240_v25  ;;  %v9684_v50 = vmax.f32 %v9576_v29, 0.0  ;;  %v9683_v36 = vmax.f32 %v9575_v8, 0.0  ;;  %v9472_v8 = vmul.f32 %v24885_v52, %v9249_v63 }
 0x87a   : > { %v10400_v31 = vpack.c.bf16 %v10320_v48, %v10319_v39  ;;  %v9242_v48 = vld [vmem:[%s24889_s29 + $0x230] sm:$0xff] }
 0x87b   : > { %v10013_v23 = vpop.permute.xlu1 %10012  ;;  %v10008_v45 = vpop.permute.xlu0 %10007  ;;  %v9465_v17 = vmul.f32 %v24885_v52, %v9242_v48 }
 0x87c   : > { %10459 = vst [vmem:[%s24943_s7 + $0xd8] sm:$0xff] %v10400_v31  ;;  %v10322_v44 = vmul.f32 %v10013_v23, %v9674_v40  ;;  %v10321_v22 = vmul.f32 %v10008_v45, %v9673_v28  ;;  %v9682_v28 = vmax.f32 %v9574_v13, 0.0  ;;  %v9578_v31 = vadd.f32 %v24900_v7, %v9464_v21 }
 0x87d   : > { %v9577_v23 = vadd.f32 %v24900_v7, %v9463_v6  ;;  %v9579_v53 = vadd.f32 %v24900_v7, %v9465_v17  ;;  %v9251_v6 = vld [vmem:[%s24889_s29 + $0x278] sm:$0xff] }
 0x87e   : > { %v10401_v10 = vpack.c.bf16 %v10322_v44, %v10321_v22  ;;  %v9244_v44 = vld [vmem:[%s24889_s29 + $0x240] sm:$0xff]  ;;  %v9686_v42 = vmax.f32 %v9578_v31, 0.0 }
 0x87f   : > { %v10023_v33 = vpop.permute.xlu1 %10022  ;;  %v10018_v62 = vpop.permute.xlu0 %10017  ;;  %v9685_v27 = vmax.f32 %v9577_v23, 0.0  ;;  %v9687_v49 = vmax.f32 %v9579_v53, 0.0  ;;  %v9253_v23 = vld [vmem:[%s24889_s29 + $0x288] sm:$0xff] }
 0x880   : > { %10460 = vst [vmem:[%s24943_s7 + $0xe0] sm:$0xff] %v10401_v10  ;;  %v10324_v20 = vmul.f32 %v10023_v33, %v9676_v5  ;;  %v10323_v38 = vmul.f32 %v10018_v62, %v9675_v18  ;;  %v9468_v10 = vmul.f32 %v24885_v52, %v9245_v19  ;;  %v9467_v33 = vmul.f32 %v24885_v52, %v9244_v44 }
 0x882   : > { %v10402_v14 = vpack.c.bf16 %v10324_v20, %v10323_v38  ;;  %v9246_v20 = vld [vmem:[%s24889_s29 + $0x250] sm:$0xff]  ;;  %v9582_v3 = vadd.f32 %v24900_v7, %v9468_v10  ;;  %v9581_v60 = vadd.f32 %v24900_v7, %v9467_v33  ;;  %v9255_v33 = vld [vmem:[%s24889_s29 + $0x298] sm:$0xff] }
 0x883   : > { %v10033_v54 = vpop.permute.xlu1 %10032  ;;  %v10028_v4 = vpop.permute.xlu0 %10027 }
 0x884   : > { %10461 = vst [vmem:[%s24943_s7 + $0xe8] sm:$0xff] %v10402_v14  ;;  %v10326_v55 = vmul.f32 %v10033_v54, %v9678_v30  ;;  %v10325_v46 = vmul.f32 %v10028_v4, %v9677_v59  ;;  %v9580_v59 = vadd.f32 %v24900_v7, %v9466_v56  ;;  %v9470_v14 = vmul.f32 %v24885_v52, %v9247_v2 }
 0x885   : > { %v9469_v54 = vmul.f32 %v24885_v52, %v9246_v20  ;;  %v9690_v35 = vmax.f32 %v9582_v3, 0.0  ;;  %v9689_v25 = vmax.f32 %v9581_v60, 0.0  ;;  %v9478_v60 = vmul.f32 %v24885_v52, %v9255_v33 }
 0x886   : > { %v10403_v58 = vpack.c.bf16 %v10326_v55, %v10325_v46  ;;  %v9248_v55 = vld [vmem:[%s24889_s29 + $0x260] sm:$0xff] }
 0x887   : > { %v10043_v9 = vpop.permute.xlu1 %10042  ;;  %v10038_v51 = vpop.permute.xlu0 %10037  ;;  %v9471_v21 = vmul.f32 %v24885_v52, %v9248_v55 }
 0x888   : > { %10462 = vst [vmem:[%s24943_s7 + $0xf0] sm:$0xff] %v10403_v58  ;;  %v10328_v47 = vmul.f32 %v10043_v9, %v9680_v32  ;;  %v10327_v40 = vmul.f32 %v10038_v51, %v9679_v34  ;;  %v9688_v34 = vmax.f32 %v9580_v59, 0.0  ;;  %v9584_v58 = vadd.f32 %v24900_v7, %v9470_v14 }
 0x889   : > { %v9583_v9 = vadd.f32 %v24900_v7, %v9469_v54  ;;  %v9585_v31 = vadd.f32 %v24900_v7, %v9471_v21  ;;  %v9257_v54 = vld [vmem:[%s24889_s29 + $0x2a8] sm:$0xff] }
 0x88a   : > { %v10404_v39 = vpack.c.bf16 %v10328_v47, %v10327_v40  ;;  %v9250_v47 = vld [vmem:[%s24889_s29 + $0x270] sm:$0xff]  ;;  %v9692_v15 = vmax.f32 %v9584_v58, 0.0 }
 0x88b   : > { %v10053_v0 = vpop.permute.xlu1 %10052  ;;  %v10048_v1 = vpop.permute.xlu0 %10047  ;;  %v9691_v48 = vmax.f32 %v9583_v9, 0.0  ;;  %v9693_v10 = vmax.f32 %v9585_v31, 0.0  ;;  %v9259_v9 = vld [vmem:[%s24889_s29 + $0x2b8] sm:$0xff] }
 0x88c   : > { %10463 = vst [vmem:[%s24943_s7 + $0xf8] sm:$0xff] %v10404_v39  ;;  %v10330_v45 = vmul.f32 %v10053_v0, %v9682_v28  ;;  %v10329_v26 = vmul.f32 %v10048_v1, %v9681_v16  ;;  %v9474_v39 = vmul.f32 %v24885_v52, %v9251_v6  ;;  %v9473_v0 = vmul.f32 %v24885_v52, %v9250_v47 }
 0x88e   : > { %v10405_v22 = vpack.c.bf16 %v10330_v45, %v10329_v26  ;;  %v9252_v45 = vld [vmem:[%s24889_s29 + $0x280] sm:$0xff]  ;;  %v9588_v19 = vadd.f32 %v24900_v7, %v9474_v39  ;;  %v9587_v44 = vadd.f32 %v24900_v7, %v9473_v0  ;;  %v9261_v0 = vld [vmem:[%s24889_s29 + $0x2c8] sm:$0xff] }
 0x88f   : > { %v10063_v5 = vpop.permute.xlu1 %10062  ;;  %v10058_v18 = vpop.permute.xlu0 %10057 }
 0x890   : > { %10464 = vst [vmem:[%s24943_s7 + $0x100] sm:$0xff] %v10405_v22  ;;  %v10332_v62 = vmul.f32 %v10063_v5, %v9684_v50  ;;  %v10331_v30 = vmul.f32 %v10058_v18, %v9683_v36  ;;  %v9586_v36 = vadd.f32 %v24900_v7, %v9472_v8  ;;  %v9476_v22 = vmul.f32 %v24885_v52, %v9253_v23 }
 0x891   : > { %v9475_v5 = vmul.f32 %v24885_v52, %v9252_v45  ;;  %v9696_v2 = vmax.f32 %v9588_v19, 0.0  ;;  %v9695_v20 = vmax.f32 %v9587_v44, 0.0  ;;  %v9484_v44 = vmul.f32 %v24885_v52, %v9261_v0 }
 0x892   : > { %v10406_v38 = vpack.c.bf16 %v10332_v62, %v10331_v30  ;;  %v9254_v62 = vld [vmem:[%s24889_s29 + $0x290] sm:$0xff] }
 0x893   : > { %v10073_v37 = vpop.permute.xlu1 %10072  ;;  %v10068_v43 = vpop.permute.xlu0 %10067  ;;  %v9477_v14 = vmul.f32 %v24885_v52, %v9254_v62 }
 0x894   : > { %10465 = vst [vmem:[%s24943_s7 + $0x108] sm:$0xff] %v10406_v38  ;;  %v10334_v4 = vmul.f32 %v10073_v37, %v9686_v42  ;;  %v10333_v32 = vmul.f32 %v10068_v43, %v9685_v27  ;;  %v9694_v27 = vmax.f32 %v9586_v36, 0.0  ;;  %v9590_v38 = vadd.f32 %v24900_v7, %v9476_v22 }
 0x895   : > { %v9589_v37 = vadd.f32 %v24900_v7, %v9475_v5  ;;  %v9591_v58 = vadd.f32 %v24900_v7, %v9477_v14  ;;  %v9263_v5 = vld [vmem:[%s24889_s29 + $0x2d8] sm:$0xff] }
 0x896   : > { %v10407_v46 = vpack.c.bf16 %v10334_v4, %v10333_v32  ;;  %v9256_v4 = vld [vmem:[%s24889_s29 + $0x2a0] sm:$0xff]  ;;  %v9698_v63 = vmax.f32 %v9590_v38, 0.0 }
 0x897   : > { %v10083_v13 = vpop.permute.xlu1 %10082  ;;  %v10078_v57 = vpop.permute.xlu0 %10077  ;;  %v9697_v55 = vmax.f32 %v9589_v37, 0.0  ;;  %v9699_v39 = vmax.f32 %v9591_v58, 0.0  ;;  %v9265_v37 = vld [vmem:[%s24889_s29 + $0x2e8] sm:$0xff] }
 0x898   : > { %10466 = vst [vmem:[%s24943_s7 + $0x110] sm:$0xff] %v10407_v46  ;;  %v10336_v51 = vmul.f32 %v10083_v13, %v9688_v34  ;;  %v10335_v29 = vmul.f32 %v10078_v57, %v9687_v49  ;;  %v9480_v46 = vmul.f32 %v24885_v52, %v9257_v54  ;;  %v9479_v13 = vmul.f32 %v24885_v52, %v9256_v4 }
 0x89a   : > { %v10408_v40 = vpack.c.bf16 %v10336_v51, %v10335_v29  ;;  %v9258_v51 = vld [vmem:[%s24889_s29 + $0x2b0] sm:$0xff]  ;;  %v9594_v6 = vadd.f32 %v24900_v7, %v9480_v46  ;;  %v9593_v47 = vadd.f32 %v24900_v7, %v9479_v13  ;;  %v9267_v13 = vld [vmem:[%s24889_s29 + $0x2f8] sm:$0xff] }
 0x89b   : > { %v10093_v28 = vpop.permute.xlu1 %10092  ;;  %v10088_v16 = vpop.permute.xlu0 %10087 }
 0x89c   : > { %10467 = vst [vmem:[%s24943_s7 + $0x118] sm:$0xff] %v10408_v40  ;;  %v10338_v1 = vmul.f32 %v10093_v28, %v9690_v35  ;;  %v10337_v50 = vmul.f32 %v10088_v16, %v9689_v25  ;;  %v9592_v25 = vadd.f32 %v24900_v7, %v9478_v60  ;;  %v9482_v40 = vmul.f32 %v24885_v52, %v9259_v9 }
 0x89d   : > { %v9481_v28 = vmul.f32 %v24885_v52, %v9258_v51  ;;  %v9702_v23 = vmax.f32 %v9594_v6, 0.0  ;;  %v9701_v45 = vmax.f32 %v9593_v47, 0.0  ;;  %v9490_v47 = vmul.f32 %v24885_v52, %v9267_v13 }
 0x89e   : > { %v10409_v26 = vpack.c.bf16 %v10338_v1, %v10337_v50  ;;  %v9260_v1 = vld [vmem:[%s24889_s29 + $0x2c0] sm:$0xff] }
 0x89f   : > { %v10103_v56 = vpop.permute.xlu1 %10102  ;;  %v10098_v17 = vpop.permute.xlu0 %10097  ;;  %v9483_v22 = vmul.f32 %v24885_v52, %v9260_v1 }
 0x8a0   : > { %10468 = vst [vmem:[%s24943_s7 + $0x120] sm:$0xff] %v10409_v26  ;;  %v10340_v18 = vmul.f32 %v10103_v56, %v9692_v15  ;;  %v10339_v42 = vmul.f32 %v10098_v17, %v9691_v48  ;;  %v9700_v48 = vmax.f32 %v9592_v25, 0.0  ;;  %v9596_v26 = vadd.f32 %v24900_v7, %v9482_v40 }
 0x8a1   : > { %v9595_v56 = vadd.f32 %v24900_v7, %v9481_v28  ;;  %v9597_v38 = vadd.f32 %v24900_v7, %v9483_v22  ;;  %v9269_v28 = vld [vmem:[%s24889_s29 + $0x308] sm:$0xff] }
 0x8a2   : > { %v10410_v30 = vpack.c.bf16 %v10340_v18, %v10339_v42  ;;  %v9262_v18 = vld [vmem:[%s24889_s29 + $0x2d0] sm:$0xff]  ;;  %v9704_v33 = vmax.f32 %v9596_v26, 0.0 }
 0x8a3   : > { %v10113_v59 = vpop.permute.xlu1 %10112  ;;  %v10108_v53 = vpop.permute.xlu0 %10107  ;;  %v9703_v62 = vmax.f32 %v9595_v56, 0.0  ;;  %v9705_v46 = vmax.f32 %v9597_v38, 0.0  ;;  %v9271_v56 = vld [vmem:[%s24889_s29 + $0x318] sm:$0xff] }
 0x8a4   : > { %10469 = vst [vmem:[%s24943_s7 + $0x128] sm:$0xff] %v10410_v30  ;;  %v10342_v43 = vmul.f32 %v10113_v59, %v9694_v27  ;;  %v10341_v3 = vmul.f32 %v10108_v53, %v9693_v10  ;;  %v9486_v30 = vmul.f32 %v24885_v52, %v9263_v5  ;;  %v9485_v59 = vmul.f32 %v24885_v52, %v9262_v18 }
 0x8a6   : > { %v10411_v32 = vpack.c.bf16 %v10342_v43, %v10341_v3  ;;  %v9264_v43 = vld [vmem:[%s24889_s29 + $0x2e0] sm:$0xff]  ;;  %v9600_v54 = vadd.f32 %v24900_v7, %v9486_v30  ;;  %v9599_v4 = vadd.f32 %v24900_v7, %v9485_v59  ;;  %v9273_v59 = vld [vmem:[%s24889_s29 + $0x328] sm:$0xff] }
 0x8a7   : > { %v10123_v34 = vpop.permute.xlu1 %10122  ;;  %v10118_v49 = vpop.permute.xlu0 %10117 }
 0x8a8   : > { %10470 = vst [vmem:[%s24943_s7 + $0x130] sm:$0xff] %v10411_v32  ;;  %v10344_v57 = vmul.f32 %v10123_v34, %v9696_v2  ;;  %v10343_v35 = vmul.f32 %v10118_v49, %v9695_v20  ;;  %v9598_v20 = vadd.f32 %v24900_v7, %v9484_v44  ;;  %v9488_v32 = vmul.f32 %v24885_v52, %v9265_v37 }
 0x8a9   : > { %v9487_v34 = vmul.f32 %v24885_v52, %v9264_v43  ;;  %v9708_v9 = vmax.f32 %v9600_v54, 0.0  ;;  %v9707_v51 = vmax.f32 %v9599_v4, 0.0  ;;  %v9496_v4 = vmul.f32 %v24885_v52, %v9273_v59 }
 0x8aa   : > { %v10412_v29 = vpack.c.bf16 %v10344_v57, %v10343_v35  ;;  %v9266_v57 = vld [vmem:[%s24889_s29 + $0x2f0] sm:$0xff] }
 0x8ab   : > { %v10133_v8 = vpop.permute.xlu1 %10132  ;;  %v10128_v21 = vpop.permute.xlu0 %10127  ;;  %v9489_v40 = vmul.f32 %v24885_v52, %v9266_v57 }
 0x8ac   : > { %10471 = vst [vmem:[%s24943_s7 + $0x138] sm:$0xff] %v10412_v29  ;;  %v10346_v16 = vmul.f32 %v10133_v8, %v9698_v63  ;;  %v10345_v15 = vmul.f32 %v10128_v21, %v9697_v55  ;;  %v9706_v55 = vmax.f32 %v9598_v20, 0.0  ;;  %v9602_v29 = vadd.f32 %v24900_v7, %v9488_v32 }
 0x8ad   : > { %v9601_v8 = vadd.f32 %v24900_v7, %v9487_v34  ;;  %v9603_v26 = vadd.f32 %v24900_v7, %v9489_v40  ;;  %v9275_v34 = vld [vmem:[%s24889_s29 + $0x338] sm:$0xff] }
 0x8ae   : > { %v10413_v50 = vpack.c.bf16 %v10346_v16, %v10345_v15  ;;  %v9268_v16 = vld [vmem:[%s24889_s29 + $0x300] sm:$0xff]  ;;  %v9710_v0 = vmax.f32 %v9602_v29, 0.0 }
 0x8af   : > { %v10143_v36 = vpop.permute.xlu1 %10142  ;;  %v10138_v31 = vpop.permute.xlu0 %10137  ;;  %v9709_v1 = vmax.f32 %v9601_v8, 0.0  ;;  %v9711_v30 = vmax.f32 %v9603_v26, 0.0  ;;  %v9277_v8 = vld [vmem:[%s24889_s29 + $0x348] sm:$0xff] }
 0x8b0   : > { %10472 = vst [vmem:[%s24943_s7 + $0x140] sm:$0xff] %v10413_v50  ;;  %v10348_v17 = vmul.f32 %v10143_v36, %v9700_v48  ;;  %v10347_v19 = vmul.f32 %v10138_v31, %v9699_v39  ;;  %v9492_v50 = vmul.f32 %v24885_v52, %v9269_v28  ;;  %v9491_v36 = vmul.f32 %v24885_v52, %v9268_v16 }
 0x8b2   : > { %v10414_v42 = vpack.c.bf16 %v10348_v17, %v10347_v19  ;;  %v9270_v17 = vld [vmem:[%s24889_s29 + $0x310] sm:$0xff]  ;;  %v9606_v5 = vadd.f32 %v24900_v7, %v9492_v50  ;;  %v9605_v18 = vadd.f32 %v24900_v7, %v9491_v36  ;;  %v9279_v36 = vld [vmem:[%s24889_s29 + $0x358] sm:$0xff] }
 0x8b3   : > { %v10153_v27 = vpop.permute.xlu1 %10152  ;;  %v10148_v10 = vpop.permute.xlu0 %10147 }
 0x8b4   : > { %10473 = vst [vmem:[%s24943_s7 + $0x148] sm:$0xff] %v10414_v42  ;;  %v10350_v53 = vmul.f32 %v10153_v27, %v9702_v23  ;;  %v10349_v2 = vmul.f32 %v10148_v10, %v9701_v45  ;;  %v9604_v45 = vadd.f32 %v24900_v7, %v9490_v47  ;;  %v9494_v42 = vmul.f32 %v24885_v52, %v9271_v56 }
 0x8b5   : > { %v9493_v27 = vmul.f32 %v24885_v52, %v9270_v17  ;;  %v9714_v37 = vmax.f32 %v9606_v5, 0.0  ;;  %v9713_v43 = vmax.f32 %v9605_v18, 0.0  ;;  %v9502_v18 = vmul.f32 %v24885_v52, %v9279_v36 }
 0x8b6   : > { %v10415_v3 = vpack.c.bf16 %v10350_v53, %v10349_v2  ;;  %v9272_v53 = vld [vmem:[%s24889_s29 + $0x320] sm:$0xff] }
 0x8b7   : > { %v10163_v60 = vpop.permute.xlu1 %10162  ;;  %v10158_v14 = vpop.permute.xlu0 %10157  ;;  %v9495_v32 = vmul.f32 %v24885_v52, %v9272_v53 }
 0x8b8   : > { %10474 = vst [vmem:[%s24943_s7 + $0x150] sm:$0xff] %v10415_v3  ;;  %v10352_v49 = vmul.f32 %v10163_v60, %v9704_v33  ;;  %v10351_v63 = vmul.f32 %v10158_v14, %v9703_v62  ;;  %v9712_v62 = vmax.f32 %v9604_v45, 0.0  ;;  %v9608_v3 = vadd.f32 %v24900_v7, %v9494_v42 }
 0x8b9   : > { %v9607_v60 = vadd.f32 %v24900_v7, %v9493_v27  ;;  %v9609_v29 = vadd.f32 %v24900_v7, %v9495_v32 }
 0x8ba   : > { %v10416_v35 = vpack.c.bf16 %v10352_v49, %v10351_v63  ;;  %v9274_v49 = vld [vmem:[%s24889_s29 + $0x330] sm:$0xff]  ;;  %v9716_v13 = vmax.f32 %v9608_v3, 0.0 }
 0x8bb   : > { %v10173_v25 = vpop.permute.xlu1 %10172  ;;  %v10168_v58 = vpop.permute.xlu0 %10167  ;;  %v9715_v57 = vmax.f32 %v9607_v60, 0.0  ;;  %v9717_v50 = vmax.f32 %v9609_v29, 0.0 }
 0x8bc   : > { %10475 = vst [vmem:[%s24943_s7 + $0x158] sm:$0xff] %v10416_v35  ;;  %v10354_v21 = vmul.f32 %v10173_v25, %v9706_v55  ;;  %v10353_v6 = vmul.f32 %v10168_v58, %v9705_v46  ;;  %v9498_v35 = vmul.f32 %v24885_v52, %v9275_v34  ;;  %v9497_v25 = vmul.f32 %v24885_v52, %v9274_v49 }
 0x8be   : > { %v10417_v15 = vpack.c.bf16 %v10354_v21, %v10353_v6  ;;  %v9276_v21 = vld [vmem:[%s24889_s29 + $0x340] sm:$0xff]  ;;  %v9612_v28 = vadd.f32 %v24900_v7, %v9498_v35  ;;  %v9611_v16 = vadd.f32 %v24900_v7, %v9497_v25 }
 0x8bf   : > { %v10183_v48 = vpop.permute.xlu1 %10182  ;;  %v10178_v39 = vpop.permute.xlu0 %10177 }
 0x8c0   : > { %10476 = vst [vmem:[%s24943_s7 + $0x160] sm:$0xff] %v10417_v15  ;;  %v10356_v31 = vmul.f32 %v10183_v48, %v9708_v9  ;;  %v10355_v23 = vmul.f32 %v10178_v39, %v9707_v51  ;;  %v9610_v51 = vadd.f32 %v24900_v7, %v9496_v4  ;;  %v9500_v15 = vmul.f32 %v24885_v52, %v9277_v8 }
 0x8c1   : > { %v9499_v48 = vmul.f32 %v24885_v52, %v9276_v21  ;;  %v9720_v56 = vmax.f32 %v9612_v28, 0.0  ;;  %v9719_v17 = vmax.f32 %v9611_v16, 0.0 }
 0x8c2   : > { %v10418_v19 = vpack.c.bf16 %v10356_v31, %v10355_v23  ;;  %v9278_v31 = vld [vmem:[%s24889_s29 + $0x350] sm:$0xff] }
 0x8c3   : > { %v10193_v44 = vpop.permute.xlu1 %10192  ;;  %v10188_v22 = vpop.permute.xlu0 %10187  ;;  %v9501_v42 = vmul.f32 %v24885_v52, %v9278_v31 }
 0x8c4   : > { %10477 = vst [vmem:[%s24943_s7 + $0x168] sm:$0xff] %v10418_v19  ;;  %v10358_v10 = vmul.f32 %v10193_v44, %v9710_v0  ;;  %v10357_v33 = vmul.f32 %v10188_v22, %v9709_v1  ;;  %v9718_v1 = vmax.f32 %v9610_v51, 0.0  ;;  %v9614_v19 = vadd.f32 %v24900_v7, %v9500_v15 }
 0x8c5   : > { %v9613_v44 = vadd.f32 %v24900_v7, %v9499_v48 }
 0x8c6   : > { %v10419_v2 = vpack.c.bf16 %v10358_v10, %v10357_v33 }
 0x8c7   : > { %v10203_v20 = vpop.permute.xlu1 %10202  ;;  %v10198_v38 = vpop.permute.xlu0 %10197 }
 0x8c8   : > { %10478 = vst [vmem:[%s24943_s7 + $0x170] sm:$0xff] %v10419_v2  ;;  %v10360_v14 = vmul.f32 %v10203_v20, %v9712_v62  ;;  %v10359_v54 = vmul.f32 %v10198_v38, %v9711_v30  ;;  %v9722_v62 = vmax.f32 %v9614_v19, 0.0  ;;  %v9721_v30 = vmax.f32 %v9613_v44, 0.0 }
 0x8c9   : > { %v9616_v2 = vadd.f32 %v24900_v7, %v9502_v18  ;;  %v9615_v20 = vadd.f32 %v24900_v7, %v9501_v42  ;;  %v25334_v7 = vld [vmem:[%s26405_s8] ss:$0 sm:$0xff] (%p9166_p5) }
 0x8ca   : > { %v10420_v63 = vpack.c.bf16 %v10360_v14, %v10359_v54 }
 0x8cb   : > { %v10213_v55 = vpop.permute.xlu1 %10212  ;;  %v10208_v46 = vpop.permute.xlu0 %10207  ;;  %v9724_v60 = vmax.f32 %v9616_v2, 0.0  ;;  %v9723_v14 = vmax.f32 %v9615_v20, 0.0 }
 0x8cc   : > { %10479 = vst [vmem:[%s24943_s7 + $0x178] sm:$0xff] %v10420_v63  ;;  %v10362_v58 = vmul.f32 %v10213_v55, %v9714_v37  ;;  %v10361_v9 = vmul.f32 %v10208_v46, %v9713_v43 }
 0x8ce   : > { %v10421_v6 = vpack.c.bf16 %v10362_v58, %v10361_v9 }
 0x8cf   : > { %v10223_v47 = vpop.permute.xlu1 %10222  ;;  %v10218_v40 = vpop.permute.xlu0 %10217 }
 0x8d0   : > { %10480 = vst [vmem:[%s24943_s7 + $0x180] sm:$0xff] %v10421_v6  ;;  %v10364_v39 = vmul.f32 %v10223_v47, %v9716_v13  ;;  %v10363_v0 = vmul.f32 %v10218_v40, %v9715_v57 }
 0x8d2   : > { %v10422_v23 = vpack.c.bf16 %v10364_v39, %v10363_v0 }
 0x8d3   : > { %v10233_v45 = vpop.permute.xlu1 %10232  ;;  %v10228_v26 = vpop.permute.xlu0 %10227 }
 0x8d4   : > { %10481 = vst [vmem:[%s24943_s7 + $0x188] sm:$0xff] %v10422_v23  ;;  %v10366_v22 = vmul.f32 %v10233_v45, %v9718_v1  ;;  %v10365_v5 = vmul.f32 %v10228_v26, %v9717_v50 }
 0x8d6   : > { %v10423_v27 = vpack.c.bf16 %v10366_v22, %v10365_v5 }
 0x8d7   : > { %v10243_v10 = vpop.permute.xlu1 %10242  ;;  %v10238_v33 = vpop.permute.xlu0 %10237 }
 0x8d8   : > { %10482 = vst [vmem:[%s24943_s7 + $0x190] sm:$0xff] %v10423_v27  ;;  %v10368_v59 = vmul.f32 %v10243_v10, %v9720_v56  ;;  %v10367_v53 = vmul.f32 %v10238_v33, %v9719_v17 }
 0x8da   : > { %v10424_v38 = vpack.c.bf16 %v10368_v59, %v10367_v53 }
 0x8db   : > { %v10253_v37 = vpop.permute.xlu1 %10252  ;;  %v10248_v43 = vpop.permute.xlu0 %10247 }
 0x8dc   : > { %10483 = vst [vmem:[%s24943_s7 + $0x198] sm:$0xff] %v10424_v38  ;;  %v10370_v3 = vmul.f32 %v10253_v37, %v9722_v62  ;;  %v10369_v52 = vmul.f32 %v10248_v43, %v9721_v30 }
 0x8de   : > { %v10425_v54 = vpack.c.bf16 %v10370_v3, %v10369_v52  ;;  %9168 = sbr.rel (!%p9166_p5) target bundleno = 1928 (0x788), region = 177 }
 0x8df   : > { %v10263_v4 = vpop.permute.xlu1 %10262  ;;  %v10258_v32 = vpop.permute.xlu0 %10257 }
 0x8e0   : > { %10484 = vst [vmem:[%s24943_s7 + $0x1a0] sm:$0xff] %v10425_v54  ;;  %v10372_v34 = vmul.f32 %v10263_v4, %v9724_v60  ;;  %v10371_v49 = vmul.f32 %v10258_v32, %v9723_v14 }
 0x8e2   : > { %v10426_v63 = vpack.c.bf16 %v10372_v34, %v10371_v49 }
 0x8e4   : > { %10485 = vst [vmem:[%s24943_s7 + $0x1a8] sm:$0xff] %v10426_v63 }
 0x8e5 LB: > { %v22548_v55 = vld [vmem:[#allocation6 + $0x40] sm:$0xff]   ;;  %v22550_v13 = vld [vmem:[#allocation6 + $0x48] sm:$0xff]   ;;  %s25342_s16 = smul.u32 864, %s22770_s15  ;;  %v22552_v12 = vld [vmem:[#allocation6 + $0x50] sm:$0xff]   ;;  %s10492_s15 = sadd.s32 1, %s22770_s15   ;;  %s22770_s15 = sphi %s25336_s15, %s10492_s15  }
 0x8e6   : > { %v22549_v46 = vld [vmem:[#allocation6 + $0x100] sm:$0xff]   ;;  %19499 = vmatprep.subr.bf16.mxu1 %v22548_v55  ;;  %v22551_v41 = vld [vmem:[#allocation6 + $0x108] sm:$0xff]   ;;  %v22553_v61 = vld [vmem:[#allocation6 + $0x110] sm:$0xff]   ;;  %p10489_p6 = scmp.ge.s32.totalorder %s10492_s15, 6  }
 0x8e7   : > { %19995 = vmatprep.subr.bf16.mxu0 %v22549_v46  ;;  %19500 = vmatpush3.bf16.msra.mxu1 %v22548_v55  ;;  %s10568_s1 = sadd.s32 16, %s25342_s16  ;;  %v22554_v11 = vld [vmem:[#allocation6 + $0x58] sm:$0xff]   ;;  %s13064_s19 = sadd.s32 304, %s25342_s16  ;;  %v22556_v57 = vld [vmem:[#allocation6 + $0x60] sm:$0xff]   ;;  %v22558_v25 = vld [vmem:[#allocation6 + $0x68] sm:$0xff]  }
 0x8e8   : > { %19996 = vmatpush3.bf16.msra.mxu0 %v22549_v46  ;;  %19501 = vmatprep.subr.bf16.mxu1 %v22550_v13  ;;  %s10569_s8 = sshra.s32 %s10568_s1, 4  ;;  %v22555_v24 = vld [vmem:[#allocation6 + $0x118] sm:$0xff]   ;;  %s13065_s20 = sshra.s32 %s13064_s19, 4  ;;  %v22557_v35 = vld [vmem:[#allocation6 + $0x120] sm:$0xff]   ;;  %v22559_v51 = vld [vmem:[#allocation6 + $0x128] sm:$0xff]  }
 0x8e9   : > { %19997 = vmatprep.subr.bf16.mxu0 %v22551_v41  ;;  %s17186_s18 = sshll.u32 %s10569_s8, 3  ;;  %s17221_s21 = sshll.u32 %s13065_s20, 3  ;;  %v22560_v29 = vld [vmem:[#allocation6 + $0x70] sm:$0xff]   ;;  %v22562_v21 = vld [vmem:[#allocation6 + $0x78] sm:$0xff]   ;;  %v22565_v47 = vld [vmem:[#allocation6] sm:$0xff]  }
 0x8ea   : > { %s25346_s2 = scalar_lea.vmem [#allocation2], %s17186_s18  ;;  %s25349_s3 = scalar_lea.vmem [#allocation2], %s17221_s21  ;;  %v22561_v8 = vld [vmem:[#allocation6 + $0x130] sm:$0xff]   ;;  %v22563_v6 = vld [vmem:[#allocation6 + $0x138] sm:$0xff]   ;;  %v22564_v40 = vld [vmem:[#allocation6 + $0x140] sm:$0xff]  }
 0x8eb   : > { %19502 = vmatpush3.bf16.msra.mxu1 %v22550_v13  ;;  %v10573_v58 = vld [vmem:[%s25346_s2] sm:$0xff]  ;;  %v10574_v28 = vld [vmem:[%s25346_s2 + $0x8] sm:$0xff]  ;;  %v10575_v15 = vld [vmem:[%s25346_s2 + $0x10] sm:$0xff]  ;;  %s13761_s22 = sadd.s32 320, %s25342_s16  ;;  %s10494_s24 = sshra.s32 %s25342_s16, 4 }
 0x8ec   : > { %19998 = vmatpush3.bf16.msra.mxu0 %v22551_v41  ;;  %19503 = vmatprep.subr.bf16.mxu1 %v22552_v12  ;;  %v13069_v9 = vld [vmem:[%s25349_s3] sm:$0xff]  ;;  %v13070_v16 = vld [vmem:[%s25349_s3 + $0x8] sm:$0xff]  ;;  %v13071_v48 = vld [vmem:[%s25349_s3 + $0x10] sm:$0xff]  ;;  %s13762_s23 = sshra.s32 %s13761_s22, 4  ;;  %s17185_s25 = sshll.u32 %s10494_s24, 3 }
 0x8ed   : > { %19999 = vmatprep.subr.bf16.mxu0 %v22553_v61  ;;  %19515 = vmatprep.mubr.bf16.mxu1 %v10573_v58  ;;  %v22566_v39 = vld [vmem:[#allocation6 + $0x148] sm:$0xff]   ;;  %v22567_v1 = vld [vmem:[#allocation6 + $0x150] sm:$0xff]   ;;  %v22569_v26 = vld [vmem:[#allocation6 + $0x158] sm:$0xff]   ;;  %s17230_s17 = sshll.u32 %s13762_s23, 3  ;;  %s25472_s26 = scalar_lea.vmem [#allocation2], %s17185_s25 }
 0x8ee   : > { %20011 = vmatprep.mubr.bf16.mxu0 %v13069_v9  ;;  %v22568_v0 = vld [vmem:[#allocation6 + $0x8] sm:$0xff]   ;;  %v22571_v50 = vld [vmem:[#allocation6 + $0x10] sm:$0xff]   ;;  %v22574_v56 = vld [vmem:[#allocation6 + $0x18] sm:$0xff]   ;;  %s25414_s12 = scalar_lea.vmem [#allocation2], %s17230_s17  ;;  %s14458_s11 = sadd.s32 576, %s25342_s16 }
 0x8ef   : > { %19504 = vmatpush3.bf16.msra.mxu1 %v22552_v12  ;;  %v10576_v36 = vld [vmem:[%s25346_s2 + $0x18] sm:$0xff]  ;;  %v10577_v23 = vld [vmem:[%s25346_s2 + $0x20] sm:$0xff]  ;;  %v22570_v17 = vld [vmem:[#allocation6 + $0x160] sm:$0xff]   ;;  %s14459_s5 = sshra.s32 %s14458_s11, 4  ;;  %s11670_s28 = sadd.s32 32, %s25342_s16 }
 0x8f0   : > { %20000 = vmatpush3.bf16.msra.mxu0 %v22553_v61  ;;  %19505 = vmatprep.subr.bf16.mxu1 %v22554_v11  ;;  %v13072_v31 = vld [vmem:[%s25349_s3 + $0x18] sm:$0xff]  ;;  %v13073_v45 = vld [vmem:[%s25349_s3 + $0x20] sm:$0xff]  ;;  %v10578_v19 = vld [vmem:[%s25346_s2 + $0x28] sm:$0xff]  ;;  %s17239_s6 = sshll.u32 %s14459_s5, 3  ;;  %s11671_s29 = sshra.s32 %s11670_s28, 4 }
 0x8f1   : > { %20001 = vmatprep.subr.bf16.mxu0 %v22555_v24  ;;  %v13074_v44 = vld [vmem:[%s25349_s3 + $0x28] sm:$0xff]  ;;  %v10579_v22 = vld [vmem:[%s25346_s2 + $0x30] sm:$0xff]  ;;  %v22572_v18 = vld [vmem:[#allocation6 + $0x168] sm:$0xff]   ;;  %s25536_s27 = scalar_lea.vmem [#allocation2], %s17239_s6  ;;  %s17203_s30 = sshll.u32 %s11671_s29, 3 }
 0x8f2   : > { %v13075_v5 = vld [vmem:[%s25349_s3 + $0x30] sm:$0xff]  ;;  %v22573_v27 = vld [vmem:[#allocation6 + $0x170] sm:$0xff]   ;;  %v10580_v10 = vld [vmem:[%s25346_s2 + $0x38] sm:$0xff]  ;;  %s25594_s4 = scalar_lea.vmem [#allocation2], %s17203_s30  ;;  %s15155_s10 = sadd.s32 592, %s25342_s16 }
 0x8f3   : > { %19506 = vmatpush3.bf16.msra.mxu1 %v22554_v11  ;;  %v22577_v42 = vld [vmem:[#allocation6 + $0x20] sm:$0xff]   ;;  %v13076_v33 = vld [vmem:[%s25349_s3 + $0x38] sm:$0xff]  ;;  %v10581_v62 = vld [vmem:[%s25346_s2 + $0x40] sm:$0xff]  ;;  %s15156_s7 = sshra.s32 %s15155_s10, 4  ;;  %s12367_s1 = sadd.s32 288, %s25342_s16 }
 0x8f4   : > { %20002 = vmatpush3.bf16.msra.mxu0 %v22555_v24  ;;  %19507 = vmatprep.subr.bf16.mxu1 %v22556_v57  ;;  %v22579_v30 = vld [vmem:[#allocation6 + $0x28] sm:$0xff]   ;;  %v13077_v59 = vld [vmem:[%s25349_s3 + $0x40] sm:$0xff]  ;;  %v22575_v53 = vld [vmem:[#allocation6 + $0x178] sm:$0xff]   ;;  %s17248_s13 = sshll.u32 %s15156_s7, 3  ;;  %s12368_s8 = sshra.s32 %s12367_s1, 4 }
 0x8f5   : > { %20003 = vmatprep.subr.bf16.mxu0 %v22557_v35  ;;  %v25368_v2 = vld [vmem:[#allocation6 + $0x180] sm:$0xff]   ;;  %v10582_v20 = vld [vmem:[%s25346_s2 + $0x48] sm:$0xff]  ;;  %v10584_v3 = vld [vmem:[%s25346_s2 + $0x58] sm:$0xff]  ;;  %s25658_s14 = scalar_lea.vmem [#allocation2], %s17248_s13  ;;  %s17212_s18 = sshll.u32 %s12368_s8, 3 }
 0x8f6   : > { %v13078_v38 = vld [vmem:[%s25349_s3 + $0x48] sm:$0xff]  ;;  %v10583_v37 = vld [vmem:[%s25346_s2 + $0x50] sm:$0xff]  ;;  %v13080_v52 = vld [vmem:[%s25349_s3 + $0x58] sm:$0xff]  ;;  %s25713_s19 = scalar_lea.vmem [#allocation2], %s17212_s18  ;;  %s15852_s20 = sadd.s32 608, %s25342_s16 }
 0x8f7   : > { %19508 = vmatpush3.bf16.msra.mxu1 %v22556_v57  ;;  %v13079_v43 = vld [vmem:[%s25349_s3 + $0x50] sm:$0xff]  ;;  %v10585_v60 = vld [vmem:[%s25346_s2 + $0x60] sm:$0xff]  ;;  %v10586_v4 = vld [vmem:[%s25346_s2 + $0x68] sm:$0xff]  ;;  %s15853_s21 = sshra.s32 %s15852_s20, 4 }
 0x8f8   : > { %20004 = vmatpush3.bf16.msra.mxu0 %v22557_v35  ;;  %19509 = vmatprep.subr.bf16.mxu1 %v22558_v25  ;;  %v13081_v14 = vld [vmem:[%s25349_s3 + $0x60] sm:$0xff]  ;;  %v13082_v32 = vld [vmem:[%s25349_s3 + $0x68] sm:$0xff]  ;;  %v10587_v34 = vld [vmem:[%s25346_s2 + $0x70] sm:$0xff] }
 0x8f9   : > { %20005 = vmatprep.subr.bf16.mxu0 %v22559_v51  ;;  %v22581_v54 = vld [vmem:[#allocation6 + $0x30] sm:$0xff]   ;;  %v13083_v49 = vld [vmem:[%s25349_s3 + $0x70] sm:$0xff]  ;;  %v10588_v63 = vld [vmem:[%s25346_s2 + $0x78] sm:$0xff] }
 0x8fa   : > { %v13084_v55 = vld [vmem:[%s25349_s3 + $0x78] sm:$0xff]  ;;  %v10589_v46 = vld [vmem:[%s25346_s2 + $0x80] sm:$0xff]  ;;  %v10590_v41 = vld [vmem:[%s25346_s2 + $0x88] sm:$0xff] }
 0x8fb   : > { %19510 = vmatpush3.bf16.msra.mxu1 %v22558_v25  ;;  %v13085_v13 = vld [vmem:[%s25349_s3 + $0x80] sm:$0xff]  ;;  %v13086_v12 = vld [vmem:[%s25349_s3 + $0x88] sm:$0xff]  ;;  %v10591_v61 = vld [vmem:[%s25346_s2 + $0x90] sm:$0xff] }
 0x8fc   : > { %20006 = vmatpush3.bf16.msra.mxu0 %v22559_v51  ;;  %19511 = vmatprep.subr.bf16.mxu1 %v22560_v29  ;;  %v13087_v11 = vld [vmem:[%s25349_s3 + $0x90] sm:$0xff]  ;;  %v22583_v24 = vld [vmem:[#allocation6 + $0x38] sm:$0xff]   ;;  %v10592_v57 = vld [vmem:[%s25346_s2 + $0x98] sm:$0xff] }
 0x8fd   : > { %20007 = vmatprep.subr.bf16.mxu0 %v22561_v8  ;;  %v13088_v35 = vld [vmem:[%s25349_s3 + $0x98] sm:$0xff]  ;;  %v10593_v25 = vld [vmem:[%s25346_s2 + $0xa0] sm:$0xff]  ;;  %v10594_v9 = vld [vmem:[%s25346_s2 + $0xa8] sm:$0xff] }
 0x8fe   : > { %v13089_v58 = vld [vmem:[%s25349_s3 + $0xa0] sm:$0xff]  ;;  %v13090_v51 = vld [vmem:[%s25349_s3 + $0xa8] sm:$0xff] }
 0x8ff   : > { %19512 = vmatpush3.bf16.msra.mxu1 %v22560_v29  ;;  %v10595_v29 = vld [vmem:[%s25346_s2 + $0xb0] sm:$0xff] }
 0x900   : > { %20008 = vmatpush3.bf16.msra.mxu0 %v22561_v8  ;;  %19513 = vmatprep.subr.bf16.mxu1 %v22562_v21  ;;  %v13091_v8 = vld [vmem:[%s25349_s3 + $0xb0] sm:$0xff] }
 0x901   : > { %20009 = vmatprep.subr.bf16.mxu0 %v22563_v6 }
 0x903   : > { %19514 = vmatpush3.bf16.msra.mxu1 %v22562_v21  ;;  %v10596_v21 = vld [vmem:[%s25346_s2 + $0xb8] sm:$0xff] }
 0x904   : > { %20010 = vmatpush3.bf16.msra.mxu0 %v22563_v6  ;;  %19623 = vmatprep.subr.bf16.mxu1 %v22565_v47  ;;  %v13092_v6 = vld [vmem:[%s25349_s3 + $0xb8] sm:$0xff] }
 0x905   : > { %20119 = vmatprep.subr.bf16.mxu0 %v22564_v40 }
 0x906   : > { %19516 = vmatmul.mubr.bf16.vlgmr.msra.gmra.mrb[0].mxu1 %v10574_v28  ;;  %v10598_v28 = vld [vmem:[%s25346_s2 + $0xc8] sm:$0xff] }
 0x907   : > { %20012 = vmatmul.mubr.bf16.vlgmr.msra.gmra.mrb[0].mxu0 %v13070_v16  ;;  %19519 = vmatprep.mubr.bf16.mxu1 %v10575_v15  ;;  %v13094_v16 = vld [vmem:[%s25349_s3 + $0xc8] sm:$0xff]  ;;  %v10599_v15 = vld [vmem:[%s25346_s2 + $0xd0] sm:$0xff] }
 0x908   : > { %20120 = vmatpush3.bf16.msra.mxu0 %v22564_v40  ;;  %20015 = vmatprep.mubr.bf16.mxu0 %v13071_v48  ;;  %v13093_v40 = vld [vmem:[%s25349_s3 + $0xc0] sm:$0xff]  ;;  %v13095_v48 = vld [vmem:[%s25349_s3 + $0xd0] sm:$0xff] }
 0x909   : > { %19624 = vmatpush3.bf16.msra.mxu1 %v22565_v47  ;;  %20121 = vmatprep.subr.bf16.mxu0 %v22566_v39  ;;  %v10597_v47 = vld [vmem:[%s25346_s2 + $0xc0] sm:$0xff] }
 0x90a   : > { %19625 = vmatprep.subr.bf16.mxu1 %v22568_v0 }
 0x90c   : > { %20122 = vmatpush3.bf16.msra.mxu0 %v22566_v39  ;;  %v25408_v39 = vld [vmem:[#allocation6 + $0x80] sm:$0xff]  }
 0x90d   : > { %20123 = vmatprep.subr.bf16.mxu0 %v22567_v1  ;;  %19626 = vmatpush3.bf16.msra.mxu1 %v22568_v0  ;;  %v10600_v0 = vld [vmem:[%s25346_s2 + $0xd8] sm:$0xff] }
 0x90e   : > { %19520 = vmatmul.mubr.bf16.gmra.mrb[4].mxu1 %v10576_v36  ;;  %19627 = vmatprep.subr.bf16.mxu1 %v22571_v50  ;;  %v13766_v36 = vld [vmem:[%s25414_s12] sm:$0xff] }
 0x90f   : > { %20016 = vmatmul.mubr.bf16.gmra.mrb[4].mxu0 %v13072_v31  ;;  %19523 = vmatprep.mubr.bf16.mxu1 %v10577_v23  ;;  %v10602_v31 = vld [vmem:[%s25346_s2 + $0xe8] sm:$0xff] }
 0x910   : > { %20019 = vmatprep.mubr.bf16.mxu0 %v13073_v45  ;;  %20124 = vmatpush3.bf16.msra.mxu0 %v22567_v1  ;;  %v13096_v1 = vld [vmem:[%s25349_s3 + $0xd8] sm:$0xff]  ;;  %v13767_v23 = vld [vmem:[%s25414_s12 + $0x8] sm:$0xff]  ;;  %v10603_v45 = vld [vmem:[%s25346_s2 + $0xf0] sm:$0xff] }
 0x911   : > { %20125 = vmatprep.subr.bf16.mxu0 %v22569_v26  ;;  %19628 = vmatpush3.bf16.msra.mxu1 %v22571_v50  ;;  %v10601_v50 = vld [vmem:[%s25346_s2 + $0xe0] sm:$0xff] }
 0x912   : > { %19629 = vmatprep.subr.bf16.mxu1 %v22574_v56 }
 0x914   : > { %20126 = vmatpush3.bf16.msra.mxu0 %v22569_v26  ;;  %v13768_v26 = vld [vmem:[%s25414_s12 + $0x10] sm:$0xff] }
 0x915   : > { %20127 = vmatprep.subr.bf16.mxu0 %v22570_v17  ;;  %19630 = vmatpush3.bf16.msra.mxu1 %v22574_v56  ;;  %v22578_v56 = vld [vmem:[#allocation6 + $0x188] sm:$0xff]  }
 0x916   : > { %19524 = vmatmul.mubr.bf16.gmra.mrb[8].mxu1 %v10578_v19  ;;  %19631 = vmatprep.subr.bf16.mxu1 %v22577_v42  ;;  %v10604_v19 = vld [vmem:[%s25346_s2 + $0xf8] sm:$0xff] }
 0x917   : > { %20020 = vmatmul.mubr.bf16.gmra.mrb[8].mxu0 %v13074_v44  ;;  %19527 = vmatprep.mubr.bf16.mxu1 %v10579_v22  ;;  %v13769_v44 = vld [vmem:[%s25414_s12 + $0x18] sm:$0xff]  ;;  %v10605_v22 = vld [vmem:[%s25346_s2 + $0x100] sm:$0xff] }
 0x918   : > { %20023 = vmatprep.mubr.bf16.mxu0 %v13075_v5  ;;  %20128 = vmatpush3.bf16.msra.mxu0 %v22570_v17  ;;  %v22580_v17 = vld [vmem:[#allocation6 + $0x190] sm:$0xff]  }
 0x919   : > { %20129 = vmatprep.subr.bf16.mxu0 %v22572_v18  ;;  %19632 = vmatpush3.bf16.msra.mxu1 %v22577_v42  ;;  %v13770_v5 = vld [vmem:[%s25414_s12 + $0x20] sm:$0xff]  ;;  %v22584_v42 = vld [vmem:[#allocation6 + $0x1a0] sm:$0xff]  }
 0x91a   : > { %19633 = vmatprep.subr.bf16.mxu1 %v22579_v30 }
 0x91c   : > { %20130 = vmatpush3.bf16.msra.mxu0 %v22572_v18  ;;  %v22582_v18 = vld [vmem:[#allocation6 + $0x198] sm:$0xff]  }
 0x91d   : > { %20131 = vmatprep.subr.bf16.mxu0 %v22573_v27  ;;  %19634 = vmatpush3.bf16.msra.mxu1 %v22579_v30  ;;  %v22586_v30 = vld [vmem:[#allocation6 + $0x1a8] sm:$0xff]  }
 0x91e   : > { %19528 = vmatmul.mubr.bf16.gmra.mrb[12].mxu1 %v10580_v10  ;;  %19635 = vmatprep.subr.bf16.mxu1 %v22581_v54  ;;  %v13771_v10 = vld [vmem:[%s25414_s12 + $0x28] sm:$0xff] }
 0x91f   : > { %20024 = vmatmul.mubr.bf16.gmra.mrb[12].mxu0 %v13076_v33  ;;  %19531 = vmatprep.mubr.bf16.mxu1 %v10581_v62  ;;  %v10607_v33 = vld [vmem:[%s25346_s2 + $0x110] sm:$0xff] }
 0x920   : > { %20027 = vmatprep.mubr.bf16.mxu0 %v13077_v59  ;;  %20132 = vmatpush3.bf16.msra.mxu0 %v22573_v27  ;;  %v10606_v27 = vld [vmem:[%s25346_s2 + $0x108] sm:$0xff]  ;;  %v13772_v62 = vld [vmem:[%s25414_s12 + $0x30] sm:$0xff]  ;;  %v10608_v59 = vld [vmem:[%s25346_s2 + $0x118] sm:$0xff] }
 0x921   : > { %20133 = vmatprep.subr.bf16.mxu0 %v22575_v53  ;;  %19636 = vmatpush3.bf16.msra.mxu1 %v22581_v54  ;;  %v10613_v54 = vld [vmem:[%s25346_s2 + $0x140] sm:$0xff] }
 0x922   : > { %19637 = vmatprep.subr.bf16.mxu1 %v22583_v24 }
 0x924   : > { %20134 = vmatpush3.bf16.msra.mxu0 %v22575_v53  ;;  %v13773_v53 = vld [vmem:[%s25414_s12 + $0x38] sm:$0xff] }
 0x925   : > { %20243 = vmatprep.subr.bf16.mxu0 %v25368_v2  ;;  %19638 = vmatpush3.bf16.msra.mxu1 %v22583_v24  ;;  %v10619_v24 = vld [vmem:[%s25346_s2 + $0x170] sm:$0xff] }
 0x926   : > { %19532 = vmatmul.mubr.bf16.gmra.mrb[16].mxu1 %v10582_v20  ;;  %19747 = vmatprep.subr.bf16.mxu1 %v25408_v39  ;;  %v13774_v20 = vld [vmem:[%s25414_s12 + $0x40] sm:$0xff] }
 0x927   : > { %20028 = vmatmul.mubr.bf16.gmra.mrb[16].mxu0 %v13078_v38  ;;  %19535 = vmatprep.mubr.bf16.mxu1 %v10583_v37  ;;  %v10610_v38 = vld [vmem:[%s25346_s2 + $0x128] sm:$0xff] }
 0x928   : > { %20031 = vmatprep.mubr.bf16.mxu0 %v13079_v43  ;;  %v13775_v37 = vld [vmem:[%s25414_s12 + $0x48] sm:$0xff]  ;;  %v10611_v43 = vld [vmem:[%s25346_s2 + $0x130] sm:$0xff] }
 0x92e   : > { %19536 = vmatmul.mubr.bf16.gmra.mrb[20].mxu1 %v10584_v3  ;;  %v13776_v3 = vld [vmem:[%s25414_s12 + $0x50] sm:$0xff] }
 0x92f   : > { %20032 = vmatmul.mubr.bf16.gmra.mrb[20].mxu0 %v13080_v52  ;;  %19539 = vmatprep.mubr.bf16.mxu1 %v10585_v60  ;;  %v22588_v52 = vld [vmem:[#allocation6 + $0x1b0] sm:$0xff]   ;;  %v10612_v60 = vld [vmem:[%s25346_s2 + $0x138] sm:$0xff] }
 0x930   : > { %20035 = vmatprep.mubr.bf16.mxu0 %v13081_v14  ;;  %v13777_v14 = vld [vmem:[%s25414_s12 + $0x58] sm:$0xff] }
 0x936   : > { %19540 = vmatmul.mubr.bf16.gmra.mrb[24].mxu1 %v10586_v4  ;;  %v13778_v4 = vld [vmem:[%s25414_s12 + $0x60] sm:$0xff] }
 0x937   : > { %20036 = vmatmul.mubr.bf16.gmra.mrb[24].mxu0 %v13082_v32  ;;  %19543 = vmatprep.mubr.bf16.mxu1 %v10587_v34  ;;  %v10614_v32 = vld [vmem:[%s25346_s2 + $0x148] sm:$0xff] }
 0x938   : > { %20039 = vmatprep.mubr.bf16.mxu0 %v13083_v49  ;;  %v13779_v34 = vld [vmem:[%s25414_s12 + $0x68] sm:$0xff]  ;;  %v10615_v49 = vld [vmem:[%s25346_s2 + $0x150] sm:$0xff] }
 0x93e   : > { %19544 = vmatmul.mubr.bf16.gmra.mrb[28].mxu1 %v10588_v63  ;;  %v13780_v63 = vld [vmem:[%s25414_s12 + $0x70] sm:$0xff] }
 0x93f   : > { %20040 = vmatmul.mubr.bf16.gmra.mrb[28].mxu0 %v13084_v55  ;;  %19547 = vmatprep.mubr.bf16.mxu1 %v10589_v46  ;;  %v10616_v55 = vld [vmem:[%s25346_s2 + $0x158] sm:$0xff] }
 0x940   : > { %20043 = vmatprep.mubr.bf16.mxu0 %v13085_v13  ;;  %v13781_v46 = vld [vmem:[%s25414_s12 + $0x78] sm:$0xff]  ;;  %v10617_v13 = vld [vmem:[%s25346_s2 + $0x160] sm:$0xff] }
 0x946   : > { %19548 = vmatmul.mubr.bf16.gmra.mrb[32].mxu1 %v10590_v41  ;;  %v13782_v41 = vld [vmem:[%s25414_s12 + $0x80] sm:$0xff] }
 0x947   : > { %20044 = vmatmul.mubr.bf16.gmra.mrb[32].mxu0 %v13086_v12  ;;  %19551 = vmatprep.mubr.bf16.mxu1 %v10591_v61  ;;  %v22590_v12 = vld [vmem:[#allocation6 + $0x1b8] sm:$0xff]  }
 0x948   : > { %20047 = vmatprep.mubr.bf16.mxu0 %v13087_v11  ;;  %v10618_v61 = vld [vmem:[%s25346_s2 + $0x168] sm:$0xff] }
 0x949   : > { %v13783_v11 = vld [vmem:[%s25414_s12 + $0x88] sm:$0xff] }
 0x94e   : > { %19552 = vmatmul.mubr.bf16.gmra.mrb[36].mxu1 %v10592_v57  ;;  %v13784_v57 = vld [vmem:[%s25414_s12 + $0x90] sm:$0xff] }
 0x94f   : > { %20048 = vmatmul.mubr.bf16.gmra.mrb[36].mxu0 %v13088_v35  ;;  %19555 = vmatprep.mubr.bf16.mxu1 %v10593_v25  ;;  %v10620_v35 = vld [vmem:[%s25346_s2 + $0x178] sm:$0xff] }
 0x950   : > { %20051 = vmatprep.mubr.bf16.mxu0 %v13089_v58  ;;  %v13785_v25 = vld [vmem:[%s25414_s12 + $0x98] sm:$0xff]  ;;  %v10621_v58 = vld [vmem:[%s25346_s2 + $0x180] sm:$0xff] }
 0x956   : > { %19556 = vmatmul.mubr.bf16.gmra.mrb[40].mxu1 %v10594_v9  ;;  %v13786_v9 = vld [vmem:[%s25414_s12 + $0xa0] sm:$0xff] }
 0x957   : > { %20052 = vmatmul.mubr.bf16.gmra.mrb[40].mxu0 %v13090_v51  ;;  %19559 = vmatprep.mubr.bf16.mxu1 %v10595_v29  ;;  %v10622_v51 = vld [vmem:[%s25346_s2 + $0x188] sm:$0xff] }
 0x958   : > { %20055 = vmatprep.mubr.bf16.mxu0 %v13091_v8  ;;  %v13787_v29 = vld [vmem:[%s25414_s12 + $0xa8] sm:$0xff]  ;;  %v10623_v8 = vld [vmem:[%s25346_s2 + $0x190] sm:$0xff] }
 0x95e   : > { %19560 = vmatmul.mubr.bf16.gmra.mrb[44].mxu1 %v10596_v21  ;;  %v13788_v21 = vld [vmem:[%s25414_s12 + $0xb0] sm:$0xff] }
 0x95f   : > { %20056 = vmatmul.mubr.bf16.gmra.mrb[44].mxu0 %v13092_v6  ;;  %19563 = vmatprep.mubr.bf16.mxu1 %v10597_v47  ;;  %v10624_v6 = vld [vmem:[%s25346_s2 + $0x198] sm:$0xff] }
 0x960   : > { %20059 = vmatprep.mubr.bf16.mxu0 %v13093_v40  ;;  %v13789_v47 = vld [vmem:[%s25414_s12 + $0xb8] sm:$0xff]  ;;  %v10625_v40 = vld [vmem:[%s25346_s2 + $0x1a0] sm:$0xff] }
 0x966   : > { %19564 = vmatmul.mubr.bf16.gmra.mrb[48].mxu1 %v10598_v28  ;;  %v13790_v28 = vld [vmem:[%s25414_s12 + $0xc0] sm:$0xff] }
 0x967   : > { %20060 = vmatmul.mubr.bf16.gmra.mrb[48].mxu0 %v13094_v16  ;;  %19567 = vmatprep.mubr.bf16.mxu1 %v10599_v15  ;;  %v25467_v16 = vld [vmem:[#allocation6 + $0x1c0] sm:$0xff]   ;;  %v10626_v15 = vld [vmem:[%s25346_s2 + $0x1a8] sm:$0xff] }
 0x968   : > { %20063 = vmatprep.mubr.bf16.mxu0 %v13095_v48  ;;  %v13791_v48 = vld [vmem:[%s25414_s12 + $0xc8] sm:$0xff] }
 0x96e   : > { %19568 = vmatmul.mubr.bf16.gmra.mrb[52].mxu1 %v10600_v0  ;;  %v10498_v0 = vld [vmem:[%s25472_s26] sm:$0xff] }
 0x96f   : > { %20064 = vmatmul.mubr.bf16.gmra.mrb[52].mxu0 %v13096_v1  ;;  %19571 = vmatprep.mubr.bf16.mxu1 %v10601_v50  ;;  %v13792_v1 = vld [vmem:[%s25414_s12 + $0xd0] sm:$0xff]  ;;  %v10499_v50 = vld [vmem:[%s25472_s26 + $0x8] sm:$0xff] }
 0x970   : > { %20135 = vmatprep.mubr.bf16.mxu0 %v13766_v36  ;;  %v13793_v36 = vld [vmem:[%s25414_s12 + $0xd8] sm:$0xff] }
 0x976   : > { %19572 = vmatmul.mubr.bf16.gmra.mrb[56].mxu1 %v10602_v31  ;;  %v10500_v31 = vld [vmem:[%s25472_s26 + $0x10] sm:$0xff] }
 0x977   : > { %20136 = vmatmul.mubr.bf16.vlgmr.msra.gmra.mrb[0].mxu0 %v13767_v23  ;;  %19575 = vmatprep.mubr.bf16.mxu1 %v10603_v45  ;;  %v13794_v23 = vld [vmem:[%s25414_s12 + $0xe0] sm:$0xff]  ;;  %v22587_v45 = vld [vmem:[#allocation6 + $0x88] sm:$0xff]  }
 0x978   : > { %20244 = vmatpush3.bf16.msra.mxu0 %v25368_v2  ;;  %20139 = vmatprep.mubr.bf16.mxu0 %v13768_v26  ;;  %v10609_v2 = vld [vmem:[%s25346_s2 + $0x120] sm:$0xff]  ;;  %s17257_s2 = sshll.u32 %s15853_s21, 3 }
 0x979   : > { %20245 = vmatprep.subr.bf16.mxu0 %v22578_v56  ;;  %v22589_v26 = vld [vmem:[#allocation6 + $0x90] sm:$0xff]   ;;  %s25774_s22 = scalar_lea.vmem [#allocation2], %s17257_s2 }
 0x97c   : > { %20246 = vmatpush3.bf16.msra.mxu0 %v22578_v56  ;;  %v10501_v56 = vld [vmem:[%s25472_s26 + $0x18] sm:$0xff] }
 0x97d   : > { %20247 = vmatprep.subr.bf16.mxu0 %v22580_v17 }
 0x97e   : > { %19576 = vmatmul.mubr.bf16.gmra.mrb[60].mxu1 %v10604_v19  ;;  %v10502_v19 = vld [vmem:[%s25472_s26 + $0x20] sm:$0xff] }
 0x97f   : > { %20140 = vmatmul.mubr.bf16.gmra.mrb[4].mxu0 %v13769_v44  ;;  %19579 = vmatprep.mubr.bf16.mxu1 %v10605_v22  ;;  %v13796_v44 = vld [vmem:[%s25414_s12 + $0xf0] sm:$0xff]  ;;  %v22591_v22 = vld [vmem:[#allocation6 + $0x98] sm:$0xff]  }
 0x980   : > { %20143 = vmatprep.mubr.bf16.mxu0 %v13770_v5  ;;  %20248 = vmatpush3.bf16.msra.mxu0 %v22580_v17  ;;  %v13795_v17 = vld [vmem:[%s25414_s12 + $0xe8] sm:$0xff] }
 0x981   : > { %20249 = vmatprep.subr.bf16.mxu0 %v22582_v18  ;;  %v10503_v5 = vld [vmem:[%s25472_s26 + $0x28] sm:$0xff] }
 0x984   : > { %20250 = vmatpush3.bf16.msra.mxu0 %v22582_v18  ;;  %v13797_v18 = vld [vmem:[%s25414_s12 + $0xf8] sm:$0xff] }
 0x985   : > { %20251 = vmatprep.subr.bf16.mxu0 %v22584_v42 }
 0x986   : > { %19580 = vmatmul.mubr.bf16.gmra.mrb[64].mxu1 %v10606_v27  ;;  %v13798_v27 = vld [vmem:[%s25414_s12 + $0x100] sm:$0xff] }
 0x987   : > { %20144 = vmatmul.mubr.bf16.gmra.mrb[8].mxu0 %v13771_v10  ;;  %19583 = vmatprep.mubr.bf16.mxu1 %v10607_v33  ;;  %v22595_v10 = vld [vmem:[#allocation6 + $0xa8] sm:$0xff]  }
 0x988   : > { %20147 = vmatprep.mubr.bf16.mxu0 %v13772_v62  ;;  %20252 = vmatpush3.bf16.msra.mxu0 %v22584_v42  ;;  %v10504_v42 = vld [vmem:[%s25472_s26 + $0x30] sm:$0xff]  ;;  %v10505_v33 = vld [vmem:[%s25472_s26 + $0x38] sm:$0xff]  ;;  %v13799_v62 = vld [vmem:[%s25414_s12 + $0x108] sm:$0xff] }
 0x989   : > { %20253 = vmatprep.subr.bf16.mxu0 %v22586_v30 }
 0x98c   : > { %20254 = vmatpush3.bf16.msra.mxu0 %v22586_v30  ;;  %v10506_v30 = vld [vmem:[%s25472_s26 + $0x40] sm:$0xff] }
 0x98d   : > { %20255 = vmatprep.subr.bf16.mxu0 %v22588_v52 }
 0x98e   : > { %19584 = vmatmul.mubr.bf16.gmra.mrb[68].mxu1 %v10608_v59  ;;  %v13800_v59 = vld [vmem:[%s25414_s12 + $0x110] sm:$0xff] }
 0x98f   : > { %20148 = vmatmul.mubr.bf16.gmra.mrb[12].mxu0 %v13773_v53  ;;  %19587 = vmatprep.mubr.bf16.mxu1 %v10609_v2  ;;  %v10507_v53 = vld [vmem:[%s25472_s26 + $0x48] sm:$0xff]  ;;  %v13801_v2 = vld [vmem:[%s25414_s12 + $0x118] sm:$0xff] }
 0x990   : > { %20151 = vmatprep.mubr.bf16.mxu0 %v13774_v20  ;;  %20256 = vmatpush3.bf16.msra.mxu0 %v22588_v52  ;;  %v10508_v20 = vld [vmem:[%s25472_s26 + $0x50] sm:$0xff] }
 0x991   : > { %20257 = vmatprep.subr.bf16.mxu0 %v22590_v12  ;;  %v13804_v52 = vld [vmem:[%s25414_s12 + $0x130] sm:$0xff] }
 0x994   : > { %20258 = vmatpush3.bf16.msra.mxu0 %v22590_v12  ;;  %v13810_v12 = vld [vmem:[%s25414_s12 + $0x160] sm:$0xff] }
 0x995   : > { %20367 = vmatprep.subr.bf16.mxu0 %v25467_v16 }
 0x996   : > { %19588 = vmatmul.mubr.bf16.gmra.mrb[72].mxu1 %v10610_v38  ;;  %v13802_v38 = vld [vmem:[%s25414_s12 + $0x120] sm:$0xff] }
 0x997   : > { %20152 = vmatmul.mubr.bf16.gmra.mrb[16].mxu0 %v13775_v37  ;;  %19591 = vmatprep.mubr.bf16.mxu1 %v10611_v43  ;;  %v10509_v37 = vld [vmem:[%s25472_s26 + $0x58] sm:$0xff]  ;;  %v13803_v43 = vld [vmem:[%s25414_s12 + $0x128] sm:$0xff] }
 0x998   : > { %20155 = vmatprep.mubr.bf16.mxu0 %v13776_v3  ;;  %v10510_v3 = vld [vmem:[%s25472_s26 + $0x60] sm:$0xff] }
 0x99e   : > { %19592 = vmatmul.mubr.bf16.gmra.mrb[76].mxu1 %v10612_v60  ;;  %v22597_v60 = vld [vmem:[#allocation6 + $0xb0] sm:$0xff]  }
 0x99f   : > { %20156 = vmatmul.mubr.bf16.gmra.mrb[20].mxu0 %v13777_v14  ;;  %19595 = vmatprep.mubr.bf16.mxu1 %v10613_v54  ;;  %v10511_v14 = vld [vmem:[%s25472_s26 + $0x68] sm:$0xff]  ;;  %v13805_v54 = vld [vmem:[%s25414_s12 + $0x138] sm:$0xff] }
 0x9a0   : > { %20159 = vmatprep.mubr.bf16.mxu0 %v13778_v4  ;;  %v10512_v4 = vld [vmem:[%s25472_s26 + $0x70] sm:$0xff] }
 0x9a6   : > { %19596 = vmatmul.mubr.bf16.gmra.mrb[80].mxu1 %v10614_v32  ;;  %v13806_v32 = vld [vmem:[%s25414_s12 + $0x140] sm:$0xff] }
 0x9a7   : > { %20160 = vmatmul.mubr.bf16.gmra.mrb[24].mxu0 %v13779_v34  ;;  %19599 = vmatprep.mubr.bf16.mxu1 %v10615_v49  ;;  %v10513_v34 = vld [vmem:[%s25472_s26 + $0x78] sm:$0xff]  ;;  %v13807_v49 = vld [vmem:[%s25414_s12 + $0x148] sm:$0xff] }
 0x9a8   : > { %20163 = vmatprep.mubr.bf16.mxu0 %v13780_v63  ;;  %v10514_v63 = vld [vmem:[%s25472_s26 + $0x80] sm:$0xff] }
 0x9ae   : > { %19600 = vmatmul.mubr.bf16.gmra.mrb[84].mxu1 %v10616_v55  ;;  %v13808_v55 = vld [vmem:[%s25414_s12 + $0x150] sm:$0xff] }
 0x9af   : > { %20164 = vmatmul.mubr.bf16.gmra.mrb[28].mxu0 %v13781_v46  ;;  %19603 = vmatprep.mubr.bf16.mxu1 %v10617_v13  ;;  %v10515_v46 = vld [vmem:[%s25472_s26 + $0x88] sm:$0xff]  ;;  %v13809_v13 = vld [vmem:[%s25414_s12 + $0x158] sm:$0xff] }
 0x9b0   : > { %20167 = vmatprep.mubr.bf16.mxu0 %v13782_v41  ;;  %v10516_v41 = vld [vmem:[%s25472_s26 + $0x90] sm:$0xff] }
 0x9b6   : > { %19604 = vmatmul.mubr.bf16.gmra.mrb[88].mxu1 %v10618_v61  ;;  %v22599_v61 = vld [vmem:[#allocation6 + $0xb8] sm:$0xff]  }
 0x9b7   : > { %20168 = vmatmul.mubr.bf16.gmra.mrb[32].mxu0 %v13783_v11  ;;  %19607 = vmatprep.mubr.bf16.mxu1 %v10619_v24  ;;  %v10517_v11 = vld [vmem:[%s25472_s26 + $0x98] sm:$0xff]  ;;  %v13811_v24 = vld [vmem:[%s25414_s12 + $0x168] sm:$0xff] }
 0x9b8   : > { %20171 = vmatprep.mubr.bf16.mxu0 %v13784_v57  ;;  %v10518_v57 = vld [vmem:[%s25472_s26 + $0xa0] sm:$0xff] }
 0x9be   : > { %19608 = vmatmul.mubr.bf16.gmra.mrb[92].mxu1 %v10620_v35  ;;  %v13812_v35 = vld [vmem:[%s25414_s12 + $0x170] sm:$0xff] }
 0x9bf   : > { %20172 = vmatmul.mubr.bf16.gmra.mrb[36].mxu0 %v13785_v25  ;;  %19611 = vmatprep.mubr.bf16.mxu1 %v10621_v58  ;;  %v10519_v25 = vld [vmem:[%s25472_s26 + $0xa8] sm:$0xff]  ;;  %v13813_v58 = vld [vmem:[%s25414_s12 + $0x178] sm:$0xff] }
 0x9c0   : > { %20175 = vmatprep.mubr.bf16.mxu0 %v13786_v9  ;;  %v10520_v9 = vld [vmem:[%s25472_s26 + $0xb0] sm:$0xff] }
 0x9c6   : > { %19612 = vmatmul.mubr.bf16.gmra.mrb[96].mxu1 %v10622_v51  ;;  %v13814_v51 = vld [vmem:[%s25414_s12 + $0x180] sm:$0xff] }
 0x9c7   : > { %20176 = vmatmul.mubr.bf16.gmra.mrb[40].mxu0 %v13787_v29  ;;  %19615 = vmatprep.mubr.bf16.mxu1 %v10623_v8  ;;  %v10521_v29 = vld [vmem:[%s25472_s26 + $0xb8] sm:$0xff]  ;;  %v13815_v8 = vld [vmem:[%s25414_s12 + $0x188] sm:$0xff] }
 0x9c8   : > { %20179 = vmatprep.mubr.bf16.mxu0 %v13788_v21  ;;  %v10522_v21 = vld [vmem:[%s25472_s26 + $0xc0] sm:$0xff] }
 0x9ce   : > { %19616 = vmatmul.mubr.bf16.gmra.mrb[100].mxu1 %v10624_v6  ;;  %v13816_v6 = vld [vmem:[%s25414_s12 + $0x190] sm:$0xff] }
 0x9cf   : > { %20180 = vmatmul.mubr.bf16.gmra.mrb[44].mxu0 %v13789_v47  ;;  %19619 = vmatprep.mubr.bf16.mxu1 %v10625_v40  ;;  %v10523_v47 = vld [vmem:[%s25472_s26 + $0xc8] sm:$0xff]  ;;  %v13817_v40 = vld [vmem:[%s25414_s12 + $0x198] sm:$0xff] }
 0x9d0   : > { %20183 = vmatprep.mubr.bf16.mxu0 %v13790_v28  ;;  %v10524_v28 = vld [vmem:[%s25472_s26 + $0xd0] sm:$0xff] }
 0x9d6   : > { %19620 = vmatmul.mubr.bf16.gmra.mrb[104].mxu1 %v10626_v15  ;;  %v13818_v15 = vld [vmem:[%s25414_s12 + $0x1a0] sm:$0xff] }
 0x9d7   : > { %20184 = vmatmul.mubr.bf16.gmra.mrb[48].mxu0 %v13791_v48  ;;  %19639 = vmatprep.mubr.bf16.mxu1 %v10498_v0  ;;  %v25530_v48 = vld [vmem:[#allocation6 + $0xc0] sm:$0xff]   ;;  %v10525_v0 = vld [vmem:[%s25472_s26 + $0xd8] sm:$0xff] }
 0x9d8   : > { %20187 = vmatprep.mubr.bf16.mxu0 %v13792_v1  ;;  %v13819_v1 = vld [vmem:[%s25414_s12 + $0x1a8] sm:$0xff]  ;;  %s26012_s12 = scalar_lea.vmem [#allocation8], %s25342_s16 }
 0x9de   : > { %19640 = vmatmul.mubr.bf16.vlgmr.msra.gmra.mrb[0].mxu1 %v10499_v50  ;;  %v10526_v50 = vld [vmem:[%s25472_s26 + $0xe0] sm:$0xff] }
 0x9df   : > { %20188 = vmatmul.mubr.bf16.gmra.mrb[52].mxu0 %v13793_v36  ;;  %19643 = vmatprep.mubr.bf16.mxu1 %v10500_v31  ;;  %v14463_v36 = vld [vmem:[%s25536_s27] sm:$0xff]  ;;  %v10527_v31 = vld [vmem:[%s25472_s26 + $0xe8] sm:$0xff] }
 0x9e0   : > { %20191 = vmatprep.mubr.bf16.mxu0 %v13794_v23  ;;  %19748 = vmatpush3.bf16.msra.mxu1 %v25408_v39  ;;  %v22593_v39 = vld [vmem:[#allocation6 + $0xa0] sm:$0xff]   ;;  %v14464_v23 = vld [vmem:[%s25536_s27 + $0x8] sm:$0xff] }
 0x9e1   : > { %19749 = vmatprep.subr.bf16.mxu1 %v22587_v45 }
 0x9e4   : > { %19750 = vmatpush3.bf16.msra.mxu1 %v22587_v45  ;;  %v10528_v45 = vld [vmem:[%s25472_s26 + $0xf0] sm:$0xff] }
 0x9e5   : > { %19751 = vmatprep.subr.bf16.mxu1 %v22589_v26 }
 0x9e6   : > { %19644 = vmatmul.mubr.bf16.gmra.mrb[4].mxu1 %v10501_v56  ;;  %v22594_v56 = vld [vmem:[#allocation6 + $0x1c8] sm:$0xff]  }
 0x9e7   : > { %20192 = vmatmul.mubr.bf16.gmra.mrb[56].mxu0 %v13795_v17  ;;  %19647 = vmatprep.mubr.bf16.mxu1 %v10502_v19  ;;  %v22596_v17 = vld [vmem:[#allocation6 + $0x1d0] sm:$0xff]   ;;  %v10529_v19 = vld [vmem:[%s25472_s26 + $0xf8] sm:$0xff] }
 0x9e8   : > { %20195 = vmatprep.mubr.bf16.mxu0 %v13796_v44  ;;  %19752 = vmatpush3.bf16.msra.mxu1 %v22589_v26  ;;  %v14465_v26 = vld [vmem:[%s25536_s27 + $0x10] sm:$0xff]  ;;  %v14466_v44 = vld [vmem:[%s25536_s27 + $0x18] sm:$0xff] }
 0x9e9   : > { %19753 = vmatprep.subr.bf16.mxu1 %v22591_v22 }
 0x9ec   : > { %19754 = vmatpush3.bf16.msra.mxu1 %v22591_v22  ;;  %v10530_v22 = vld [vmem:[%s25472_s26 + $0x100] sm:$0xff] }
 0x9ed   : > { %19755 = vmatprep.subr.bf16.mxu1 %v22593_v39 }
 0x9ee   : > { %19648 = vmatmul.mubr.bf16.gmra.mrb[8].mxu1 %v10503_v5  ;;  %v22598_v5 = vld [vmem:[#allocation6 + $0x1d8] sm:$0xff]  }
 0x9ef   : > { %20196 = vmatmul.mubr.bf16.gmra.mrb[60].mxu0 %v13797_v18  ;;  %19651 = vmatprep.mubr.bf16.mxu1 %v10504_v42  ;;  %v10531_v18 = vld [vmem:[%s25472_s26 + $0x108] sm:$0xff] }
 0x9f0   : > { %20199 = vmatprep.mubr.bf16.mxu0 %v13798_v27  ;;  %19756 = vmatpush3.bf16.msra.mxu1 %v22593_v39  ;;  %v14467_v39 = vld [vmem:[%s25536_s27 + $0x20] sm:$0xff]  ;;  %v14468_v42 = vld [vmem:[%s25536_s27 + $0x28] sm:$0xff]  ;;  %v10532_v27 = vld [vmem:[%s25472_s26 + $0x110] sm:$0xff] }
 0x9f1   : > { %19757 = vmatprep.subr.bf16.mxu1 %v22595_v10 }
 0x9f4   : > { %19758 = vmatpush3.bf16.msra.mxu1 %v22595_v10  ;;  %v14469_v10 = vld [vmem:[%s25536_s27 + $0x30] sm:$0xff] }
 0x9f5   : > { %19759 = vmatprep.subr.bf16.mxu1 %v22597_v60 }
 0x9f6   : > { %19652 = vmatmul.mubr.bf16.gmra.mrb[12].mxu1 %v10505_v33  ;;  %v22602_v33 = vld [vmem:[#allocation6 + $0x1e8] sm:$0xff]  }
 0x9f7   : > { %20200 = vmatmul.mubr.bf16.gmra.mrb[64].mxu0 %v13799_v62  ;;  %19655 = vmatprep.mubr.bf16.mxu1 %v10506_v30  ;;  %v10533_v62 = vld [vmem:[%s25472_s26 + $0x118] sm:$0xff] }
 0x9f8   : > { %20203 = vmatprep.mubr.bf16.mxu0 %v13800_v59  ;;  %19760 = vmatpush3.bf16.msra.mxu1 %v22597_v60  ;;  %v14470_v30 = vld [vmem:[%s25536_s27 + $0x38] sm:$0xff]  ;;  %v10534_v59 = vld [vmem:[%s25472_s26 + $0x120] sm:$0xff] }
 0x9f9   : > { %19761 = vmatprep.subr.bf16.mxu1 %v22599_v61  ;;  %v10538_v60 = vld [vmem:[%s25472_s26 + $0x140] sm:$0xff] }
 0x9fc   : > { %19762 = vmatpush3.bf16.msra.mxu1 %v22599_v61  ;;  %v10544_v61 = vld [vmem:[%s25472_s26 + $0x170] sm:$0xff] }
 0x9fd   : > { %19871 = vmatprep.subr.bf16.mxu1 %v25530_v48 }
 0x9fe   : > { %19656 = vmatmul.mubr.bf16.gmra.mrb[16].mxu1 %v10507_v53  ;;  %v14471_v53 = vld [vmem:[%s25536_s27 + $0x40] sm:$0xff] }
 0x9ff   : > { %20204 = vmatmul.mubr.bf16.gmra.mrb[68].mxu0 %v13801_v2  ;;  %19659 = vmatprep.mubr.bf16.mxu1 %v10508_v20  ;;  %v10535_v2 = vld [vmem:[%s25472_s26 + $0x128] sm:$0xff] }
 0xa00   : > { %20207 = vmatprep.mubr.bf16.mxu0 %v13802_v38  ;;  %v14472_v20 = vld [vmem:[%s25536_s27 + $0x48] sm:$0xff]  ;;  %v10536_v38 = vld [vmem:[%s25472_s26 + $0x130] sm:$0xff] }
 0xa06   : > { %19660 = vmatmul.mubr.bf16.gmra.mrb[20].mxu1 %v10509_v37  ;;  %v14473_v37 = vld [vmem:[%s25536_s27 + $0x50] sm:$0xff] }
 0xa07   : > { %20208 = vmatmul.mubr.bf16.gmra.mrb[72].mxu0 %v13803_v43  ;;  %19663 = vmatprep.mubr.bf16.mxu1 %v10510_v3  ;;  %v22604_v43 = vld [vmem:[#allocation6 + $0x1f0] sm:$0xff]   ;;  %v10537_v3 = vld [vmem:[%s25472_s26 + $0x138] sm:$0xff] }
 0xa08   : > { %20211 = vmatprep.mubr.bf16.mxu0 %v13804_v52  ;;  %v14474_v52 = vld [vmem:[%s25536_s27 + $0x58] sm:$0xff] }
 0xa0e   : > { %19664 = vmatmul.mubr.bf16.gmra.mrb[24].mxu1 %v10511_v14  ;;  %v14475_v14 = vld [vmem:[%s25536_s27 + $0x60] sm:$0xff] }
 0xa0f   : > { %20212 = vmatmul.mubr.bf16.gmra.mrb[76].mxu0 %v13805_v54  ;;  %19667 = vmatprep.mubr.bf16.mxu1 %v10512_v4  ;;  %v10539_v54 = vld [vmem:[%s25472_s26 + $0x148] sm:$0xff] }
 0xa10   : > { %20215 = vmatprep.mubr.bf16.mxu0 %v13806_v32  ;;  %v14476_v4 = vld [vmem:[%s25536_s27 + $0x68] sm:$0xff]  ;;  %v10540_v32 = vld [vmem:[%s25472_s26 + $0x150] sm:$0xff] }
 0xa16   : > { %19668 = vmatmul.mubr.bf16.gmra.mrb[28].mxu1 %v10513_v34  ;;  %v14477_v34 = vld [vmem:[%s25536_s27 + $0x70] sm:$0xff] }
 0xa17   : > { %20216 = vmatmul.mubr.bf16.gmra.mrb[80].mxu0 %v13807_v49  ;;  %19671 = vmatprep.mubr.bf16.mxu1 %v10514_v63  ;;  %v10541_v49 = vld [vmem:[%s25472_s26 + $0x158] sm:$0xff] }
 0xa18   : > { %20219 = vmatprep.mubr.bf16.mxu0 %v13808_v55  ;;  %v14478_v63 = vld [vmem:[%s25536_s27 + $0x78] sm:$0xff]  ;;  %v10542_v55 = vld [vmem:[%s25472_s26 + $0x160] sm:$0xff] }
 0xa1e   : > { %19672 = vmatmul.mubr.bf16.gmra.mrb[32].mxu1 %v10515_v46  ;;  %v14479_v46 = vld [vmem:[%s25536_s27 + $0x80] sm:$0xff] }
 0xa1f   : > { %20220 = vmatmul.mubr.bf16.gmra.mrb[84].mxu0 %v13809_v13  ;;  %19675 = vmatprep.mubr.bf16.mxu1 %v10516_v41  ;;  %v22606_v13 = vld [vmem:[#allocation6 + $0x1f8] sm:$0xff]  }
 0xa20   : > { %20223 = vmatprep.mubr.bf16.mxu0 %v13810_v12  ;;  %v10543_v41 = vld [vmem:[%s25472_s26 + $0x168] sm:$0xff] }
 0xa21   : > { %v14480_v12 = vld [vmem:[%s25536_s27 + $0x88] sm:$0xff] }
 0xa26   : > { %19676 = vmatmul.mubr.bf16.gmra.mrb[36].mxu1 %v10517_v11  ;;  %v14481_v11 = vld [vmem:[%s25536_s27 + $0x90] sm:$0xff] }
 0xa27   : > { %20224 = vmatmul.mubr.bf16.gmra.mrb[88].mxu0 %v13811_v24  ;;  %19679 = vmatprep.mubr.bf16.mxu1 %v10518_v57  ;;  %v10545_v24 = vld [vmem:[%s25472_s26 + $0x178] sm:$0xff] }
 0xa28   : > { %20227 = vmatprep.mubr.bf16.mxu0 %v13812_v35  ;;  %v14482_v57 = vld [vmem:[%s25536_s27 + $0x98] sm:$0xff]  ;;  %v10546_v35 = vld [vmem:[%s25472_s26 + $0x180] sm:$0xff] }
 0xa2e   : > { %19680 = vmatmul.mubr.bf16.gmra.mrb[40].mxu1 %v10519_v25  ;;  %v14483_v25 = vld [vmem:[%s25536_s27 + $0xa0] sm:$0xff] }
 0xa2f   : > { %20228 = vmatmul.mubr.bf16.gmra.mrb[92].mxu0 %v13813_v58  ;;  %19683 = vmatprep.mubr.bf16.mxu1 %v10520_v9  ;;  %v10547_v58 = vld [vmem:[%s25472_s26 + $0x188] sm:$0xff] }
 0xa30   : > { %20231 = vmatprep.mubr.bf16.mxu0 %v13814_v51  ;;  %v14484_v9 = vld [vmem:[%s25536_s27 + $0xa8] sm:$0xff]  ;;  %v10548_v51 = vld [vmem:[%s25472_s26 + $0x190] sm:$0xff] }
 0xa36   : > { %19684 = vmatmul.mubr.bf16.gmra.mrb[44].mxu1 %v10521_v29  ;;  %v14485_v29 = vld [vmem:[%s25536_s27 + $0xb0] sm:$0xff] }
 0xa37   : > { %20232 = vmatmul.mubr.bf16.gmra.mrb[96].mxu0 %v13815_v8  ;;  %19687 = vmatprep.mubr.bf16.mxu1 %v10522_v21  ;;  %v10549_v8 = vld [vmem:[%s25472_s26 + $0x198] sm:$0xff] }
 0xa38   : > { %20235 = vmatprep.mubr.bf16.mxu0 %v13816_v6  ;;  %v14486_v21 = vld [vmem:[%s25536_s27 + $0xb8] sm:$0xff]  ;;  %v10550_v6 = vld [vmem:[%s25472_s26 + $0x1a0] sm:$0xff] }
 0xa3e   : > { %19688 = vmatmul.mubr.bf16.gmra.mrb[48].mxu1 %v10523_v47  ;;  %v14487_v47 = vld [vmem:[%s25536_s27 + $0xc0] sm:$0xff] }
 0xa3f   : > { %20236 = vmatmul.mubr.bf16.gmra.mrb[100].mxu0 %v13817_v40  ;;  %19691 = vmatprep.mubr.bf16.mxu1 %v10524_v28  ;;  %v25589_v40 = vld [vmem:[#allocation6 + $0x200] sm:$0xff]   ;;  %v10551_v28 = vld [vmem:[%s25472_s26 + $0x1a8] sm:$0xff] }
 0xa40   : > { %20239 = vmatprep.mubr.bf16.mxu0 %v13818_v15  ;;  %v14488_v15 = vld [vmem:[%s25536_s27 + $0xc8] sm:$0xff] }
 0xa46   : > { %19692 = vmatmul.mubr.bf16.gmra.mrb[52].mxu1 %v10525_v0  ;;  %v11675_v0 = vld [vmem:[%s25594_s4] sm:$0xff] }
 0xa47   : > { %20240 = vmatmul.mubr.bf16.gmra.mrb[104].mxu0 %v13819_v1  ;;  %19695 = vmatprep.mubr.bf16.mxu1 %v10526_v50  ;;  %v14489_v1 = vld [vmem:[%s25536_s27 + $0xd0] sm:$0xff]  ;;  %v11676_v50 = vld [vmem:[%s25594_s4 + $0x8] sm:$0xff] }
 0xa48   : > { %20259 = vmatprep.mubr.bf16.mxu0 %v14463_v36  ;;  %v14490_v36 = vld [vmem:[%s25536_s27 + $0xd8] sm:$0xff] }
 0xa4e   : > { %19696 = vmatmul.mubr.bf16.gmra.mrb[56].mxu1 %v10527_v31  ;;  %v11677_v31 = vld [vmem:[%s25594_s4 + $0x10] sm:$0xff] }
 0xa4f   : > { %20260 = vmatmul.mubr.bf16.vlgmr.msra.gmra.mrb[0].mxu0 %v14464_v23  ;;  %19699 = vmatprep.mubr.bf16.mxu1 %v10528_v45  ;;  %v14491_v23 = vld [vmem:[%s25536_s27 + $0xe0] sm:$0xff]  ;;  %v22603_v45 = vld [vmem:[#allocation6 + $0xc8] sm:$0xff]  }
 0xa50   : > { %20368 = vmatpush3.bf16.msra.mxu0 %v25467_v16  ;;  %20263 = vmatprep.mubr.bf16.mxu0 %v14465_v26  ;;  %v22600_v16 = vld [vmem:[#allocation6 + $0x1e0] sm:$0xff]   ;;  %v22605_v26 = vld [vmem:[#allocation6 + $0xd0] sm:$0xff]  }
 0xa51   : > { %20369 = vmatprep.subr.bf16.mxu0 %v22594_v56 }
 0xa54   : > { %20370 = vmatpush3.bf16.msra.mxu0 %v22594_v56  ;;  %v11678_v56 = vld [vmem:[%s25594_s4 + $0x18] sm:$0xff] }
 0xa55   : > { %20371 = vmatprep.subr.bf16.mxu0 %v22596_v17 }
 0xa56   : > { %19700 = vmatmul.mubr.bf16.gmra.mrb[60].mxu1 %v10529_v19  ;;  %v11679_v19 = vld [vmem:[%s25594_s4 + $0x20] sm:$0xff] }
 0xa57   : > { %20264 = vmatmul.mubr.bf16.gmra.mrb[4].mxu0 %v14466_v44  ;;  %19703 = vmatprep.mubr.bf16.mxu1 %v10530_v22  ;;  %v14493_v44 = vld [vmem:[%s25536_s27 + $0xf0] sm:$0xff]  ;;  %v22607_v22 = vld [vmem:[#allocation6 + $0xd8] sm:$0xff]  }
 0xa58   : > { %20267 = vmatprep.mubr.bf16.mxu0 %v14467_v39  ;;  %20372 = vmatpush3.bf16.msra.mxu0 %v22596_v17  ;;  %v14492_v17 = vld [vmem:[%s25536_s27 + $0xe8] sm:$0xff] }
 0xa59   : > { %20373 = vmatprep.subr.bf16.mxu0 %v22598_v5  ;;  %v11680_v39 = vld [vmem:[%s25594_s4 + $0x28] sm:$0xff] }
 0xa5c   : > { %20374 = vmatpush3.bf16.msra.mxu0 %v22598_v5  ;;  %v14494_v5 = vld [vmem:[%s25536_s27 + $0xf8] sm:$0xff] }
 0xa5d   : > { %20375 = vmatprep.subr.bf16.mxu0 %v22600_v16 }
 0xa5e   : > { %19704 = vmatmul.mubr.bf16.gmra.mrb[64].mxu1 %v10531_v18  ;;  %v14495_v18 = vld [vmem:[%s25536_s27 + $0x100] sm:$0xff] }
 0xa5f   : > { %20268 = vmatmul.mubr.bf16.gmra.mrb[8].mxu0 %v14468_v42  ;;  %19707 = vmatprep.mubr.bf16.mxu1 %v10532_v27  ;;  %v22611_v42 = vld [vmem:[#allocation6 + $0xe8] sm:$0xff]  }
 0xa60   : > { %20271 = vmatprep.mubr.bf16.mxu0 %v14469_v10  ;;  %20376 = vmatpush3.bf16.msra.mxu0 %v22600_v16  ;;  %v11681_v16 = vld [vmem:[%s25594_s4 + $0x30] sm:$0xff]  ;;  %v11682_v27 = vld [vmem:[%s25594_s4 + $0x38] sm:$0xff]  ;;  %v14496_v10 = vld [vmem:[%s25536_s27 + $0x108] sm:$0xff] }
 0xa61   : > { %20377 = vmatprep.subr.bf16.mxu0 %v22602_v33 }
 0xa64   : > { %20378 = vmatpush3.bf16.msra.mxu0 %v22602_v33  ;;  %v11683_v33 = vld [vmem:[%s25594_s4 + $0x40] sm:$0xff] }
 0xa65   : > { %20379 = vmatprep.subr.bf16.mxu0 %v22604_v43 }
 0xa66   : > { %19708 = vmatmul.mubr.bf16.gmra.mrb[68].mxu1 %v10533_v62  ;;  %v14497_v62 = vld [vmem:[%s25536_s27 + $0x110] sm:$0xff] }
 0xa67   : > { %20272 = vmatmul.mubr.bf16.gmra.mrb[12].mxu0 %v14470_v30  ;;  %19711 = vmatprep.mubr.bf16.mxu1 %v10534_v59  ;;  %v11684_v30 = vld [vmem:[%s25594_s4 + $0x48] sm:$0xff]  ;;  %v14498_v59 = vld [vmem:[%s25536_s27 + $0x118] sm:$0xff] }
 0xa68   : > { %20275 = vmatprep.mubr.bf16.mxu0 %v14471_v53  ;;  %20380 = vmatpush3.bf16.msra.mxu0 %v22604_v43  ;;  %v11685_v53 = vld [vmem:[%s25594_s4 + $0x50] sm:$0xff] }
 0xa69   : > { %20381 = vmatprep.subr.bf16.mxu0 %v22606_v13  ;;  %v14501_v43 = vld [vmem:[%s25536_s27 + $0x130] sm:$0xff] }
 0xa6c   : > { %20382 = vmatpush3.bf16.msra.mxu0 %v22606_v13  ;;  %v14507_v13 = vld [vmem:[%s25536_s27 + $0x160] sm:$0xff] }
 0xa6d   : > { %20491 = vmatprep.subr.bf16.mxu0 %v25589_v40 }
 0xa6e   : > { %19712 = vmatmul.mubr.bf16.gmra.mrb[72].mxu1 %v10535_v2  ;;  %v14499_v2 = vld [vmem:[%s25536_s27 + $0x120] sm:$0xff] }
 0xa6f   : > { %20276 = vmatmul.mubr.bf16.gmra.mrb[16].mxu0 %v14472_v20  ;;  %19715 = vmatprep.mubr.bf16.mxu1 %v10536_v38  ;;  %v11686_v20 = vld [vmem:[%s25594_s4 + $0x58] sm:$0xff]  ;;  %v14500_v38 = vld [vmem:[%s25536_s27 + $0x128] sm:$0xff] }
 0xa70   : > { %20279 = vmatprep.mubr.bf16.mxu0 %v14473_v37  ;;  %v11687_v37 = vld [vmem:[%s25594_s4 + $0x60] sm:$0xff] }
 0xa76   : > { %19716 = vmatmul.mubr.bf16.gmra.mrb[76].mxu1 %v10537_v3  ;;  %v22613_v3 = vld [vmem:[#allocation6 + $0xf0] sm:$0xff]  }
 0xa77   : > { %20280 = vmatmul.mubr.bf16.gmra.mrb[20].mxu0 %v14474_v52  ;;  %19719 = vmatprep.mubr.bf16.mxu1 %v10538_v60  ;;  %v11688_v52 = vld [vmem:[%s25594_s4 + $0x68] sm:$0xff]  ;;  %v14502_v60 = vld [vmem:[%s25536_s27 + $0x138] sm:$0xff] }
 0xa78   : > { %20283 = vmatprep.mubr.bf16.mxu0 %v14475_v14  ;;  %v11689_v14 = vld [vmem:[%s25594_s4 + $0x70] sm:$0xff] }
 0xa7e   : > { %19720 = vmatmul.mubr.bf16.gmra.mrb[80].mxu1 %v10539_v54  ;;  %v14503_v54 = vld [vmem:[%s25536_s27 + $0x140] sm:$0xff] }
 0xa7f   : > { %20284 = vmatmul.mubr.bf16.gmra.mrb[24].mxu0 %v14476_v4  ;;  %19723 = vmatprep.mubr.bf16.mxu1 %v10540_v32  ;;  %v11690_v4 = vld [vmem:[%s25594_s4 + $0x78] sm:$0xff]  ;;  %v14504_v32 = vld [vmem:[%s25536_s27 + $0x148] sm:$0xff] }
 0xa80   : > { %20287 = vmatprep.mubr.bf16.mxu0 %v14477_v34  ;;  %v11691_v34 = vld [vmem:[%s25594_s4 + $0x80] sm:$0xff] }
 0xa86   : > { %19724 = vmatmul.mubr.bf16.gmra.mrb[84].mxu1 %v10541_v49  ;;  %v14505_v49 = vld [vmem:[%s25536_s27 + $0x150] sm:$0xff] }
 0xa87   : > { %20288 = vmatmul.mubr.bf16.gmra.mrb[28].mxu0 %v14478_v63  ;;  %19727 = vmatprep.mubr.bf16.mxu1 %v10542_v55  ;;  %v11692_v63 = vld [vmem:[%s25594_s4 + $0x88] sm:$0xff]  ;;  %v14506_v55 = vld [vmem:[%s25536_s27 + $0x158] sm:$0xff] }
 0xa88   : > { %20291 = vmatprep.mubr.bf16.mxu0 %v14479_v46  ;;  %v11693_v46 = vld [vmem:[%s25594_s4 + $0x90] sm:$0xff] }
 0xa8e   : > { %19728 = vmatmul.mubr.bf16.gmra.mrb[88].mxu1 %v10543_v41  ;;  %v22615_v41 = vld [vmem:[#allocation6 + $0xf8] sm:$0xff]  }
 0xa8f   : > { %20292 = vmatmul.mubr.bf16.gmra.mrb[32].mxu0 %v14480_v12  ;;  %19731 = vmatprep.mubr.bf16.mxu1 %v10544_v61  ;;  %v11694_v12 = vld [vmem:[%s25594_s4 + $0x98] sm:$0xff]  ;;  %v25636_v61 = vld [vmem:[#allocation6 + $0x100] sm:$0xff]  }
 0xa90   : > { %20295 = vmatprep.mubr.bf16.mxu0 %v14481_v11  ;;  %v14508_v11 = vld [vmem:[%s25536_s27 + $0x168] sm:$0xff] }
 0xa96   : > { %19732 = vmatmul.mubr.bf16.gmra.mrb[92].mxu1 %v10545_v24  ;;  %v11695_v24 = vld [vmem:[%s25594_s4 + $0xa0] sm:$0xff] }
 0xa97   : > { %20296 = vmatmul.mubr.bf16.gmra.mrb[36].mxu0 %v14482_v57  ;;  %19735 = vmatprep.mubr.bf16.mxu1 %v10546_v35  ;;  %v14509_v57 = vld [vmem:[%s25536_s27 + $0x170] sm:$0xff]  ;;  %v11696_v35 = vld [vmem:[%s25594_s4 + $0xa8] sm:$0xff] }
 0xa98   : > { %20299 = vmatprep.mubr.bf16.mxu0 %v14483_v25  ;;  %v14510_v25 = vld [vmem:[%s25536_s27 + $0x178] sm:$0xff] }
 0xa9e   : > { %19736 = vmatmul.mubr.bf16.gmra.mrb[96].mxu1 %v10547_v58  ;;  %v11697_v58 = vld [vmem:[%s25594_s4 + $0xb0] sm:$0xff] }
 0xa9f   : > { %20300 = vmatmul.mubr.bf16.gmra.mrb[40].mxu0 %v14484_v9  ;;  %19739 = vmatprep.mubr.bf16.mxu1 %v10548_v51  ;;  %v14511_v9 = vld [vmem:[%s25536_s27 + $0x180] sm:$0xff]  ;;  %v11698_v51 = vld [vmem:[%s25594_s4 + $0xb8] sm:$0xff] }
 0xaa0   : > { %20303 = vmatprep.mubr.bf16.mxu0 %v14485_v29  ;;  %v14512_v29 = vld [vmem:[%s25536_s27 + $0x188] sm:$0xff] }
 0xaa6   : > { %19740 = vmatmul.mubr.bf16.gmra.mrb[100].mxu1 %v10549_v8  ;;  %v11699_v8 = vld [vmem:[%s25594_s4 + $0xc0] sm:$0xff] }
 0xaa7   : > { %20304 = vmatmul.mubr.bf16.gmra.mrb[44].mxu0 %v14486_v21  ;;  %19743 = vmatprep.mubr.bf16.mxu1 %v10550_v6  ;;  %v14513_v21 = vld [vmem:[%s25536_s27 + $0x190] sm:$0xff]  ;;  %v11700_v6 = vld [vmem:[%s25594_s4 + $0xc8] sm:$0xff] }
 0xaa8   : > { %20307 = vmatprep.mubr.bf16.mxu0 %v14487_v47  ;;  %v14514_v47 = vld [vmem:[%s25536_s27 + $0x198] sm:$0xff] }
 0xaae   : > { %19744 = vmatmul.mubr.bf16.gmra.mrb[104].mxu1 %v10551_v28  ;;  %v11701_v28 = vld [vmem:[%s25594_s4 + $0xd0] sm:$0xff] }
 0xaaf   : > { %20308 = vmatmul.mubr.bf16.gmra.mrb[48].mxu0 %v14488_v15  ;;  %19763 = vmatprep.mubr.bf16.mxu1 %v11675_v0  ;;  %v14515_v15 = vld [vmem:[%s25536_s27 + $0x1a0] sm:$0xff]  ;;  %v11702_v0 = vld [vmem:[%s25594_s4 + $0xd8] sm:$0xff] }
 0xab0   : > { %20311 = vmatprep.mubr.bf16.mxu0 %v14489_v1  ;;  %v14516_v1 = vld [vmem:[%s25536_s27 + $0x1a8] sm:$0xff] }
 0xab6   : > { %19764 = vmatmul.mubr.bf16.vlgmr.msra.gmra.mrb[0].mxu1 %v11676_v50  ;;  %v11703_v50 = vld [vmem:[%s25594_s4 + $0xe0] sm:$0xff] }
 0xab7   : > { %20312 = vmatmul.mubr.bf16.gmra.mrb[52].mxu0 %v14490_v36  ;;  %19767 = vmatprep.mubr.bf16.mxu1 %v11677_v31  ;;  %v15160_v36 = vld [vmem:[%s25658_s14] sm:$0xff]  ;;  %v11704_v31 = vld [vmem:[%s25594_s4 + $0xe8] sm:$0xff] }
 0xab8   : > { %20315 = vmatprep.mubr.bf16.mxu0 %v14491_v23  ;;  %19872 = vmatpush3.bf16.msra.mxu1 %v25530_v48  ;;  %v22609_v48 = vld [vmem:[#allocation6 + $0xe0] sm:$0xff]   ;;  %v15161_v23 = vld [vmem:[%s25658_s14 + $0x8] sm:$0xff] }
 0xab9   : > { %19873 = vmatprep.subr.bf16.mxu1 %v22603_v45 }
 0xabc   : > { %19874 = vmatpush3.bf16.msra.mxu1 %v22603_v45  ;;  %v11705_v45 = vld [vmem:[%s25594_s4 + $0xf0] sm:$0xff] }
 0xabd   : > { %19875 = vmatprep.subr.bf16.mxu1 %v22605_v26 }
 0xabe   : > { %19768 = vmatmul.mubr.bf16.gmra.mrb[4].mxu1 %v11678_v56  ;;  %v22610_v56 = vld [vmem:[#allocation6 + $0x208] sm:$0xff]  }
 0xabf   : > { %20316 = vmatmul.mubr.bf16.gmra.mrb[56].mxu0 %v14492_v17  ;;  %19771 = vmatprep.mubr.bf16.mxu1 %v11679_v19  ;;  %v22612_v17 = vld [vmem:[#allocation6 + $0x210] sm:$0xff]   ;;  %v11706_v19 = vld [vmem:[%s25594_s4 + $0xf8] sm:$0xff] }
 0xac0   : > { %20319 = vmatprep.mubr.bf16.mxu0 %v14493_v44  ;;  %19876 = vmatpush3.bf16.msra.mxu1 %v22605_v26  ;;  %v15162_v26 = vld [vmem:[%s25658_s14 + $0x10] sm:$0xff]  ;;  %v15163_v44 = vld [vmem:[%s25658_s14 + $0x18] sm:$0xff] }
 0xac1   : > { %19877 = vmatprep.subr.bf16.mxu1 %v22607_v22 }
 0xac4   : > { %19878 = vmatpush3.bf16.msra.mxu1 %v22607_v22  ;;  %v11707_v22 = vld [vmem:[%s25594_s4 + $0x100] sm:$0xff] }
 0xac5   : > { %19879 = vmatprep.subr.bf16.mxu1 %v22609_v48 }
 0xac6   : > { %19772 = vmatmul.mubr.bf16.gmra.mrb[8].mxu1 %v11680_v39  ;;  %v22614_v39 = vld [vmem:[#allocation6 + $0x218] sm:$0xff]  }
 0xac7   : > { %20320 = vmatmul.mubr.bf16.gmra.mrb[60].mxu0 %v14494_v5  ;;  %19775 = vmatprep.mubr.bf16.mxu1 %v11681_v16  ;;  %v11708_v5 = vld [vmem:[%s25594_s4 + $0x108] sm:$0xff] }
 0xac8   : > { %20323 = vmatprep.mubr.bf16.mxu0 %v14495_v18  ;;  %19880 = vmatpush3.bf16.msra.mxu1 %v22609_v48  ;;  %v15164_v48 = vld [vmem:[%s25658_s14 + $0x20] sm:$0xff]  ;;  %v15165_v16 = vld [vmem:[%s25658_s14 + $0x28] sm:$0xff]  ;;  %v11709_v18 = vld [vmem:[%s25594_s4 + $0x110] sm:$0xff] }
 0xac9   : > { %19881 = vmatprep.subr.bf16.mxu1 %v22611_v42 }
 0xacc   : > { %19882 = vmatpush3.bf16.msra.mxu1 %v22611_v42  ;;  %v15166_v42 = vld [vmem:[%s25658_s14 + $0x30] sm:$0xff] }
 0xacd   : > { %19883 = vmatprep.subr.bf16.mxu1 %v22613_v3 }
 0xace   : > { %19776 = vmatmul.mubr.bf16.gmra.mrb[12].mxu1 %v11682_v27  ;;  %v22617_v27 = vld [vmem:[#allocation6 + $0x228] sm:$0xff]  }
 0xacf   : > { %20324 = vmatmul.mubr.bf16.gmra.mrb[64].mxu0 %v14496_v10  ;;  %19779 = vmatprep.mubr.bf16.mxu1 %v11683_v33  ;;  %v11710_v10 = vld [vmem:[%s25594_s4 + $0x118] sm:$0xff] }
 0xad0   : > { %20327 = vmatprep.mubr.bf16.mxu0 %v14497_v62  ;;  %19884 = vmatpush3.bf16.msra.mxu1 %v22613_v3  ;;  %v15167_v33 = vld [vmem:[%s25658_s14 + $0x38] sm:$0xff]  ;;  %v11711_v62 = vld [vmem:[%s25594_s4 + $0x120] sm:$0xff] }
 0xad1   : > { %19885 = vmatprep.subr.bf16.mxu1 %v22615_v41  ;;  %v11715_v3 = vld [vmem:[%s25594_s4 + $0x140] sm:$0xff] }
 0xad4   : > { %19886 = vmatpush3.bf16.msra.mxu1 %v22615_v41  ;;  %v11721_v41 = vld [vmem:[%s25594_s4 + $0x170] sm:$0xff] }
 0xad5   : > { %21495 = vmatprep.subr.bf16.mxu1 %v25636_v61 }
 0xad6   : > { %19780 = vmatmul.mubr.bf16.gmra.mrb[16].mxu1 %v11684_v30  ;;  %v15168_v30 = vld [vmem:[%s25658_s14 + $0x40] sm:$0xff] }
 0xad7   : > { %20328 = vmatmul.mubr.bf16.gmra.mrb[68].mxu0 %v14498_v59  ;;  %19783 = vmatprep.mubr.bf16.mxu1 %v11685_v53  ;;  %v11712_v59 = vld [vmem:[%s25594_s4 + $0x128] sm:$0xff] }
 0xad8   : > { %20331 = vmatprep.mubr.bf16.mxu0 %v14499_v2  ;;  %v15169_v53 = vld [vmem:[%s25658_s14 + $0x48] sm:$0xff]  ;;  %v11713_v2 = vld [vmem:[%s25594_s4 + $0x130] sm:$0xff] }
 0xade   : > { %19784 = vmatmul.mubr.bf16.gmra.mrb[20].mxu1 %v11686_v20  ;;  %v15170_v20 = vld [vmem:[%s25658_s14 + $0x50] sm:$0xff] }
 0xadf   : > { %20332 = vmatmul.mubr.bf16.gmra.mrb[72].mxu0 %v14500_v38  ;;  %19787 = vmatprep.mubr.bf16.mxu1 %v11687_v37  ;;  %v22618_v38 = vld [vmem:[#allocation6 + $0x230] sm:$0xff]   ;;  %v11714_v37 = vld [vmem:[%s25594_s4 + $0x138] sm:$0xff] }
 0xae0   : > { %20335 = vmatprep.mubr.bf16.mxu0 %v14501_v43  ;;  %v15171_v43 = vld [vmem:[%s25658_s14 + $0x58] sm:$0xff] }
 0xae6   : > { %19788 = vmatmul.mubr.bf16.gmra.mrb[24].mxu1 %v11688_v52  ;;  %v15172_v52 = vld [vmem:[%s25658_s14 + $0x60] sm:$0xff] }
 0xae7   : > { %20336 = vmatmul.mubr.bf16.gmra.mrb[76].mxu0 %v14502_v60  ;;  %19791 = vmatprep.mubr.bf16.mxu1 %v11689_v14  ;;  %v11716_v60 = vld [vmem:[%s25594_s4 + $0x148] sm:$0xff] }
 0xae8   : > { %20339 = vmatprep.mubr.bf16.mxu0 %v14503_v54  ;;  %v15173_v14 = vld [vmem:[%s25658_s14 + $0x68] sm:$0xff]  ;;  %v11717_v54 = vld [vmem:[%s25594_s4 + $0x150] sm:$0xff] }
 0xaee   : > { %19792 = vmatmul.mubr.bf16.gmra.mrb[28].mxu1 %v11690_v4  ;;  %v15174_v4 = vld [vmem:[%s25658_s14 + $0x70] sm:$0xff] }
 0xaef   : > { %20340 = vmatmul.mubr.bf16.gmra.mrb[80].mxu0 %v14504_v32  ;;  %19795 = vmatprep.mubr.bf16.mxu1 %v11691_v34  ;;  %v11718_v32 = vld [vmem:[%s25594_s4 + $0x158] sm:$0xff] }
 0xaf0   : > { %20343 = vmatprep.mubr.bf16.mxu0 %v14505_v49  ;;  %v15175_v34 = vld [vmem:[%s25658_s14 + $0x78] sm:$0xff]  ;;  %v11719_v49 = vld [vmem:[%s25594_s4 + $0x160] sm:$0xff] }
 0xaf6   : > { %19796 = vmatmul.mubr.bf16.gmra.mrb[32].mxu1 %v11692_v63  ;;  %v15176_v63 = vld [vmem:[%s25658_s14 + $0x80] sm:$0xff] }
 0xaf7   : > { %20344 = vmatmul.mubr.bf16.gmra.mrb[84].mxu0 %v14506_v55  ;;  %19799 = vmatprep.mubr.bf16.mxu1 %v11693_v46  ;;  %v22619_v55 = vld [vmem:[#allocation6 + $0x238] sm:$0xff]  }
 0xaf8   : > { %20347 = vmatprep.mubr.bf16.mxu0 %v14507_v13  ;;  %v11720_v46 = vld [vmem:[%s25594_s4 + $0x168] sm:$0xff] }
 0xaf9   : > { %v15177_v13 = vld [vmem:[%s25658_s14 + $0x88] sm:$0xff] }
 0xafe   : > { %19800 = vmatmul.mubr.bf16.gmra.mrb[36].mxu1 %v11694_v12  ;;  %v15178_v12 = vld [vmem:[%s25658_s14 + $0x90] sm:$0xff] }
 0xaff   : > { %20348 = vmatmul.mubr.bf16.gmra.mrb[88].mxu0 %v14508_v11  ;;  %19803 = vmatprep.mubr.bf16.mxu1 %v11695_v24  ;;  %v11722_v11 = vld [vmem:[%s25594_s4 + $0x178] sm:$0xff] }
 0xb00   : > { %20351 = vmatprep.mubr.bf16.mxu0 %v14509_v57  ;;  %v15179_v24 = vld [vmem:[%s25658_s14 + $0x98] sm:$0xff]  ;;  %v11723_v57 = vld [vmem:[%s25594_s4 + $0x180] sm:$0xff] }
 0xb06   : > { %19804 = vmatmul.mubr.bf16.gmra.mrb[40].mxu1 %v11696_v35  ;;  %v15180_v35 = vld [vmem:[%s25658_s14 + $0xa0] sm:$0xff] }
 0xb07   : > { %20352 = vmatmul.mubr.bf16.gmra.mrb[92].mxu0 %v14510_v25  ;;  %19807 = vmatprep.mubr.bf16.mxu1 %v11697_v58  ;;  %v11724_v25 = vld [vmem:[%s25594_s4 + $0x188] sm:$0xff] }
 0xb08   : > { %20355 = vmatprep.mubr.bf16.mxu0 %v14511_v9  ;;  %v15181_v58 = vld [vmem:[%s25658_s14 + $0xa8] sm:$0xff]  ;;  %v11725_v9 = vld [vmem:[%s25594_s4 + $0x190] sm:$0xff] }
 0xb0e   : > { %19808 = vmatmul.mubr.bf16.gmra.mrb[44].mxu1 %v11698_v51  ;;  %v15182_v51 = vld [vmem:[%s25658_s14 + $0xb0] sm:$0xff] }
 0xb0f   : > { %20356 = vmatmul.mubr.bf16.gmra.mrb[96].mxu0 %v14512_v29  ;;  %19811 = vmatprep.mubr.bf16.mxu1 %v11699_v8  ;;  %v11726_v29 = vld [vmem:[%s25594_s4 + $0x198] sm:$0xff] }
 0xb10   : > { %20359 = vmatprep.mubr.bf16.mxu0 %v14513_v21  ;;  %v15183_v8 = vld [vmem:[%s25658_s14 + $0xb8] sm:$0xff]  ;;  %v11727_v21 = vld [vmem:[%s25594_s4 + $0x1a0] sm:$0xff] }
 0xb16   : > { %19812 = vmatmul.mubr.bf16.gmra.mrb[48].mxu1 %v11700_v6  ;;  %v15184_v6 = vld [vmem:[%s25658_s14 + $0xc0] sm:$0xff] }
 0xb17   : > { %20360 = vmatmul.mubr.bf16.gmra.mrb[100].mxu0 %v14514_v47  ;;  %19815 = vmatprep.mubr.bf16.mxu1 %v11701_v28  ;;  %v11728_v47 = vld [vmem:[%s25594_s4 + $0x1a8] sm:$0xff] }
 0xb18   : > { %20363 = vmatprep.mubr.bf16.mxu0 %v14515_v15  ;;  %v15185_v28 = vld [vmem:[%s25658_s14 + $0xc8] sm:$0xff]  ;;  %v12372_v15 = vld [vmem:[%s25713_s19] sm:$0xff] }
 0xb1e   : > { %19816 = vmatmul.mubr.bf16.gmra.mrb[52].mxu1 %v11702_v0  ;;  %v15186_v0 = vld [vmem:[%s25658_s14 + $0xd0] sm:$0xff] }
 0xb1f   : > { %20364 = vmatmul.mubr.bf16.gmra.mrb[104].mxu0 %v14516_v1  ;;  %19819 = vmatprep.mubr.bf16.mxu1 %v11703_v50  ;;  %v12373_v1 = vld [vmem:[%s25713_s19 + $0x8] sm:$0xff]  ;;  %v15187_v50 = vld [vmem:[%s25658_s14 + $0xd8] sm:$0xff] }
 0xb20   : > { %20383 = vmatprep.mubr.bf16.mxu0 %v15160_v36  ;;  %v12374_v36 = vld [vmem:[%s25713_s19 + $0x10] sm:$0xff] }
 0xb26   : > { %19820 = vmatmul.mubr.bf16.gmra.mrb[56].mxu1 %v11704_v31  ;;  %v15188_v31 = vld [vmem:[%s25658_s14 + $0xe0] sm:$0xff] }
 0xb27   : > { %20384 = vmatmul.mubr.bf16.vlgmr.msra.gmra.mrb[0].mxu0 %v15161_v23  ;;  %19823 = vmatprep.mubr.bf16.mxu1 %v11705_v45  ;;  %v22621_v23 = vld [vmem:[#allocation6 + $0x108] sm:$0xff]  }
 0xb28   : > { %20492 = vmatpush3.bf16.msra.mxu0 %v25589_v40  ;;  %20387 = vmatprep.mubr.bf16.mxu0 %v15162_v26  ;;  %v22616_v40 = vld [vmem:[#allocation6 + $0x220] sm:$0xff]   ;;  %v12375_v45 = vld [vmem:[%s25713_s19 + $0x18] sm:$0xff]  ;;  %v15189_v26 = vld [vmem:[%s25658_s14 + $0xe8] sm:$0xff] }
 0xb29   : > { %20493 = vmatprep.subr.bf16.mxu0 %v22610_v56 }
 0xb2c   : > { %20494 = vmatpush3.bf16.msra.mxu0 %v22610_v56  ;;  %v12376_v56 = vld [vmem:[%s25713_s19 + $0x20] sm:$0xff] }
 0xb2d   : > { %20495 = vmatprep.subr.bf16.mxu0 %v22612_v17 }
 0xb2e   : > { %19824 = vmatmul.mubr.bf16.gmra.mrb[60].mxu1 %v11706_v19  ;;  %v22622_v19 = vld [vmem:[#allocation6 + $0x110] sm:$0xff]  }
 0xb2f   : > { %20388 = vmatmul.mubr.bf16.gmra.mrb[4].mxu0 %v15163_v44  ;;  %19827 = vmatprep.mubr.bf16.mxu1 %v11707_v22  ;;  %v22623_v44 = vld [vmem:[#allocation6 + $0x118] sm:$0xff]   ;;  %v15191_v22 = vld [vmem:[%s25658_s14 + $0xf8] sm:$0xff] }
 0xb30   : > { %20391 = vmatprep.mubr.bf16.mxu0 %v15164_v48  ;;  %20496 = vmatpush3.bf16.msra.mxu0 %v22612_v17  ;;  %v15190_v17 = vld [vmem:[%s25658_s14 + $0xf0] sm:$0xff] }
 0xb31   : > { %20497 = vmatprep.subr.bf16.mxu0 %v22614_v39  ;;  %v12378_v48 = vld [vmem:[%s25713_s19 + $0x30] sm:$0xff] }
 0xb34   : > { %20498 = vmatpush3.bf16.msra.mxu0 %v22614_v39  ;;  %v15192_v39 = vld [vmem:[%s25658_s14 + $0x100] sm:$0xff] }
 0xb35   : > { %20499 = vmatprep.subr.bf16.mxu0 %v22616_v40 }
 0xb36   : > { %19828 = vmatmul.mubr.bf16.gmra.mrb[64].mxu1 %v11708_v5  ;;  %v22625_v5 = vld [vmem:[#allocation6 + $0x128] sm:$0xff]  }
 0xb37   : > { %20392 = vmatmul.mubr.bf16.gmra.mrb[8].mxu0 %v15165_v16  ;;  %19831 = vmatprep.mubr.bf16.mxu1 %v11709_v18  ;;  %v12379_v16 = vld [vmem:[%s25713_s19 + $0x38] sm:$0xff]  ;;  %v15193_v18 = vld [vmem:[%s25658_s14 + $0x108] sm:$0xff] }
 0xb38   : > { %20395 = vmatprep.mubr.bf16.mxu0 %v15166_v42  ;;  %20500 = vmatpush3.bf16.msra.mxu0 %v22616_v40  ;;  %v22624_v40 = vld [vmem:[#allocation6 + $0x120] sm:$0xff]   ;;  %v12380_v42 = vld [vmem:[%s25713_s19 + $0x40] sm:$0xff] }
 0xb39   : > { %20501 = vmatprep.subr.bf16.mxu0 %v22617_v27 }
 0xb3c   : > { %20502 = vmatpush3.bf16.msra.mxu0 %v22617_v27  ;;  %v15194_v27 = vld [vmem:[%s25658_s14 + $0x110] sm:$0xff] }
 0xb3d   : > { %20503 = vmatprep.subr.bf16.mxu0 %v22618_v38 }
 0xb3e   : > { %19832 = vmatmul.mubr.bf16.gmra.mrb[68].mxu1 %v11710_v10  ;;  %v22626_v10 = vld [vmem:[#allocation6 + $0x130] sm:$0xff]  }
 0xb3f   : > { %20396 = vmatmul.mubr.bf16.gmra.mrb[12].mxu0 %v15167_v33  ;;  %19835 = vmatprep.mubr.bf16.mxu1 %v11711_v62  ;;  %v22627_v33 = vld [vmem:[#allocation6 + $0x138] sm:$0xff]  }
 0xb40   : > { %20399 = vmatprep.mubr.bf16.mxu0 %v15168_v30  ;;  %20504 = vmatpush3.bf16.msra.mxu0 %v22618_v38  ;;  %v12381_v62 = vld [vmem:[%s25713_s19 + $0x48] sm:$0xff]  ;;  %v15195_v30 = vld [vmem:[%s25658_s14 + $0x118] sm:$0xff]  ;;  %v12384_v38 = vld [vmem:[%s25713_s19 + $0x60] sm:$0xff] }
 0xb41   : > { %20505 = vmatprep.subr.bf16.mxu0 %v22619_v55 }
 0xb44   : > { %20506 = vmatpush3.bf16.msra.mxu0 %v22619_v55  ;;  %v15204_v55 = vld [vmem:[%s25658_s14 + $0x160] sm:$0xff] }
 0xb46   : > { %19836 = vmatmul.mubr.bf16.gmra.mrb[72].mxu1 %v11712_v59  ;;  %v12382_v59 = vld [vmem:[%s25713_s19 + $0x50] sm:$0xff] }
 0xb47   : > { %20400 = vmatmul.mubr.bf16.gmra.mrb[16].mxu0 %v15169_v53  ;;  %19839 = vmatprep.mubr.bf16.mxu1 %v11713_v2  ;;  %v15196_v53 = vld [vmem:[%s25658_s14 + $0x120] sm:$0xff]  ;;  %v12383_v2 = vld [vmem:[%s25713_s19 + $0x58] sm:$0xff] }
 0xb48   : > { %20403 = vmatprep.mubr.bf16.mxu0 %v15170_v20  ;;  %v15197_v20 = vld [vmem:[%s25658_s14 + $0x128] sm:$0xff] }
 0xb4e   : > { %19840 = vmatmul.mubr.bf16.gmra.mrb[76].mxu1 %v11714_v37  ;;  %v15198_v37 = vld [vmem:[%s25658_s14 + $0x130] sm:$0xff] }
 0xb4f   : > { %20404 = vmatmul.mubr.bf16.gmra.mrb[20].mxu0 %v15171_v43  ;;  %19843 = vmatprep.mubr.bf16.mxu1 %v11715_v3  ;;  %v12385_v43 = vld [vmem:[%s25713_s19 + $0x68] sm:$0xff]  ;;  %v15199_v3 = vld [vmem:[%s25658_s14 + $0x138] sm:$0xff] }
 0xb50   : > { %20407 = vmatprep.mubr.bf16.mxu0 %v15172_v52  ;;  %v12386_v52 = vld [vmem:[%s25713_s19 + $0x70] sm:$0xff] }
 0xb56   : > { %19844 = vmatmul.mubr.bf16.gmra.mrb[80].mxu1 %v11716_v60  ;;  %v15200_v60 = vld [vmem:[%s25658_s14 + $0x140] sm:$0xff] }
 0xb57   : > { %20408 = vmatmul.mubr.bf16.gmra.mrb[24].mxu0 %v15173_v14  ;;  %19847 = vmatprep.mubr.bf16.mxu1 %v11717_v54  ;;  %v12387_v14 = vld [vmem:[%s25713_s19 + $0x78] sm:$0xff]  ;;  %v15201_v54 = vld [vmem:[%s25658_s14 + $0x148] sm:$0xff] }
 0xb58   : > { %20411 = vmatprep.mubr.bf16.mxu0 %v15174_v4  ;;  %v12388_v4 = vld [vmem:[%s25713_s19 + $0x80] sm:$0xff] }
 0xb5e   : > { %19848 = vmatmul.mubr.bf16.gmra.mrb[84].mxu1 %v11718_v32  ;;  %v15202_v32 = vld [vmem:[%s25658_s14 + $0x150] sm:$0xff] }
 0xb5f   : > { %20412 = vmatmul.mubr.bf16.gmra.mrb[28].mxu0 %v15175_v34  ;;  %19851 = vmatprep.mubr.bf16.mxu1 %v11719_v49  ;;  %v12389_v34 = vld [vmem:[%s25713_s19 + $0x88] sm:$0xff]  ;;  %v15203_v49 = vld [vmem:[%s25658_s14 + $0x158] sm:$0xff] }
 0xb60   : > { %20415 = vmatprep.mubr.bf16.mxu0 %v15176_v63  ;;  %v12390_v63 = vld [vmem:[%s25713_s19 + $0x90] sm:$0xff] }
 0xb66   : > { %19852 = vmatmul.mubr.bf16.gmra.mrb[88].mxu1 %v11720_v46  ;;  %v12391_v46 = vld [vmem:[%s25713_s19 + $0x98] sm:$0xff] }
 0xb67   : > { %20416 = vmatmul.mubr.bf16.gmra.mrb[32].mxu0 %v15177_v13  ;;  %19855 = vmatprep.mubr.bf16.mxu1 %v11721_v41  ;;  %v15205_v13 = vld [vmem:[%s25658_s14 + $0x168] sm:$0xff]  ;;  %v12392_v41 = vld [vmem:[%s25713_s19 + $0xa0] sm:$0xff] }
 0xb68   : > { %20419 = vmatprep.mubr.bf16.mxu0 %v15178_v12  ;;  %v15206_v12 = vld [vmem:[%s25658_s14 + $0x170] sm:$0xff] }
 0xb6e   : > { %19856 = vmatmul.mubr.bf16.gmra.mrb[92].mxu1 %v11722_v11  ;;  %v12393_v11 = vld [vmem:[%s25713_s19 + $0xa8] sm:$0xff] }
 0xb6f   : > { %20420 = vmatmul.mubr.bf16.gmra.mrb[36].mxu0 %v15179_v24  ;;  %19859 = vmatprep.mubr.bf16.mxu1 %v11723_v57  ;;  %v15207_v24 = vld [vmem:[%s25658_s14 + $0x178] sm:$0xff]  ;;  %v12394_v57 = vld [vmem:[%s25713_s19 + $0xb0] sm:$0xff] }
 0xb70   : > { %20423 = vmatprep.mubr.bf16.mxu0 %v15180_v35  ;;  %v15208_v35 = vld [vmem:[%s25658_s14 + $0x180] sm:$0xff] }
 0xb76   : > { %19860 = vmatmul.mubr.bf16.gmra.mrb[96].mxu1 %v11724_v25  ;;  %v12395_v25 = vld [vmem:[%s25713_s19 + $0xb8] sm:$0xff] }
 0xb77   : > { %20424 = vmatmul.mubr.bf16.gmra.mrb[40].mxu0 %v15181_v58  ;;  %19863 = vmatprep.mubr.bf16.mxu1 %v11725_v9  ;;  %v15209_v58 = vld [vmem:[%s25658_s14 + $0x188] sm:$0xff]  ;;  %v12396_v9 = vld [vmem:[%s25713_s19 + $0xc0] sm:$0xff] }
 0xb78   : > { %20427 = vmatprep.mubr.bf16.mxu0 %v15182_v51  ;;  %v15210_v51 = vld [vmem:[%s25658_s14 + $0x190] sm:$0xff] }
 0xb7e   : > { %19864 = vmatmul.mubr.bf16.gmra.mrb[100].mxu1 %v11726_v29  ;;  %v12397_v29 = vld [vmem:[%s25713_s19 + $0xc8] sm:$0xff] }
 0xb7f   : > { %20428 = vmatmul.mubr.bf16.gmra.mrb[44].mxu0 %v15183_v8  ;;  %19867 = vmatprep.mubr.bf16.mxu1 %v11727_v21  ;;  %v15211_v8 = vld [vmem:[%s25658_s14 + $0x198] sm:$0xff]  ;;  %v12398_v21 = vld [vmem:[%s25713_s19 + $0xd0] sm:$0xff] }
 0xb80   : > { %20431 = vmatprep.mubr.bf16.mxu0 %v15184_v6  ;;  %v15212_v6 = vld [vmem:[%s25658_s14 + $0x1a0] sm:$0xff] }
 0xb86   : > { %19868 = vmatmul.mubr.bf16.gmra.mrb[104].mxu1 %v11728_v47  ;;  %v12399_v47 = vld [vmem:[%s25713_s19 + $0xd8] sm:$0xff] }
 0xb87   : > { %20432 = vmatmul.mubr.bf16.gmra.mrb[48].mxu0 %v15185_v28  ;;  %19887 = vmatprep.mubr.bf16.mxu1 %v12372_v15  ;;  %v15213_v28 = vld [vmem:[%s25658_s14 + $0x1a8] sm:$0xff]  ;;  %v12400_v15 = vld [vmem:[%s25713_s19 + $0xe0] sm:$0xff] }
 0xb88   : > { %20435 = vmatprep.mubr.bf16.mxu0 %v15186_v0  ;;  %v15857_v0 = vld [vmem:[%s25774_s22] sm:$0xff] }
 0xb8e   : > { %19888 = vmatmul.mubr.bf16.vlgmr.msra.gmra.mrb[0].mxu1 %v12373_v1  ;;  %v12401_v1 = vld [vmem:[%s25713_s19 + $0xe8] sm:$0xff] }
 0xb8f   : > { %20436 = vmatmul.mubr.bf16.gmra.mrb[52].mxu0 %v15187_v50  ;;  %19891 = vmatprep.mubr.bf16.mxu1 %v12374_v36  ;;  %v15858_v50 = vld [vmem:[%s25774_s22 + $0x8] sm:$0xff]  ;;  %v12402_v36 = vld [vmem:[%s25713_s19 + $0xf0] sm:$0xff] }
 0xb90   : > { %20439 = vmatprep.mubr.bf16.mxu0 %v15188_v31  ;;  %21503 = vmatpush3.bf16.msra.mxu1 %v25636_v61  ;;  %v12377_v61 = vld [vmem:[%s25713_s19 + $0x28] sm:$0xff]  ;;  %v15859_v31 = vld [vmem:[%s25774_s22 + $0x10] sm:$0xff] }
 0xb91   : > { %21496 = vmatprep.subr.bf16.mxu1 %v22621_v23 }
 0xb94   : > { %21504 = vmatpush3.bf16.msra.mxu1 %v22621_v23  ;;  %v12403_v23 = vld [vmem:[%s25713_s19 + $0xf8] sm:$0xff] }
 0xb95   : > { %21497 = vmatprep.subr.bf16.mxu1 %v22622_v19 }
 0xb96   : > { %19892 = vmatmul.mubr.bf16.gmra.mrb[4].mxu1 %v12375_v45  ;;  %v15860_v45 = vld [vmem:[%s25774_s22 + $0x18] sm:$0xff] }
 0xb97   : > { %20440 = vmatmul.mubr.bf16.gmra.mrb[56].mxu0 %v15189_v26  ;;  %19895 = vmatprep.mubr.bf16.mxu1 %v12376_v56  ;;  %v12404_v26 = vld [vmem:[%s25713_s19 + $0x100] sm:$0xff] }
 0xb98   : > { %20443 = vmatprep.mubr.bf16.mxu0 %v15190_v17  ;;  %21505 = vmatpush3.bf16.msra.mxu1 %v22622_v19  ;;  %v15861_v56 = vld [vmem:[%s25774_s22 + $0x20] sm:$0xff]  ;;  %v12405_v17 = vld [vmem:[%s25713_s19 + $0x108] sm:$0xff] }
 0xb99   : > { %21498 = vmatprep.subr.bf16.mxu1 %v22623_v44  ;;  %v15862_v19 = vld [vmem:[%s25774_s22 + $0x28] sm:$0xff] }
 0xb9c   : > { %21506 = vmatpush3.bf16.msra.mxu1 %v22623_v44  ;;  %v12406_v44 = vld [vmem:[%s25713_s19 + $0x110] sm:$0xff] }
 0xb9d   : > { %21499 = vmatprep.subr.bf16.mxu1 %v22624_v40 }
 0xb9e   : > { %19896 = vmatmul.mubr.bf16.gmra.mrb[8].mxu1 %v12377_v61  ;;  %v15863_v61 = vld [vmem:[%s25774_s22 + $0x30] sm:$0xff] }
 0xb9f   : > { %20444 = vmatmul.mubr.bf16.gmra.mrb[60].mxu0 %v15191_v22  ;;  %19899 = vmatprep.mubr.bf16.mxu1 %v12378_v48  ;;  %v12407_v22 = vld [vmem:[%s25713_s19 + $0x118] sm:$0xff] }
 0xba0   : > { %20447 = vmatprep.mubr.bf16.mxu0 %v15192_v39  ;;  %21507 = vmatpush3.bf16.msra.mxu1 %v22624_v40  ;;  %v15864_v48 = vld [vmem:[%s25774_s22 + $0x38] sm:$0xff]  ;;  %v12408_v39 = vld [vmem:[%s25713_s19 + $0x120] sm:$0xff] }
 0xba1   : > { %21500 = vmatprep.subr.bf16.mxu1 %v22625_v5  ;;  %v15865_v40 = vld [vmem:[%s25774_s22 + $0x40] sm:$0xff] }
 0xba4   : > { %21508 = vmatpush3.bf16.msra.mxu1 %v22625_v5  ;;  %v12409_v5 = vld [vmem:[%s25713_s19 + $0x128] sm:$0xff] }
 0xba5   : > { %21501 = vmatprep.subr.bf16.mxu1 %v22626_v10 }
 0xba6   : > { %19900 = vmatmul.mubr.bf16.gmra.mrb[12].mxu1 %v12379_v16  ;;  %v15866_v16 = vld [vmem:[%s25774_s22 + $0x48] sm:$0xff] }
 0xba7   : > { %20448 = vmatmul.mubr.bf16.gmra.mrb[64].mxu0 %v15193_v18  ;;  %19903 = vmatprep.mubr.bf16.mxu1 %v12380_v42  ;;  %v12410_v18 = vld [vmem:[%s25713_s19 + $0x130] sm:$0xff] }
 0xba8   : > { %20451 = vmatprep.mubr.bf16.mxu0 %v15194_v27  ;;  %21509 = vmatpush3.bf16.msra.mxu1 %v22626_v10  ;;  %v15867_v42 = vld [vmem:[%s25774_s22 + $0x50] sm:$0xff]  ;;  %v12411_v27 = vld [vmem:[%s25713_s19 + $0x138] sm:$0xff] }
 0xba9   : > { %21502 = vmatprep.subr.bf16.mxu1 %v22627_v33  ;;  %v15868_v10 = vld [vmem:[%s25774_s22 + $0x58] sm:$0xff] }
 0xbac   : > { %21510 = vmatpush3.bf16.msra.mxu1 %v22627_v33  ;;  %v12412_v33 = vld [vmem:[%s25713_s19 + $0x140] sm:$0xff] }
 0xbae   : > { %19904 = vmatmul.mubr.bf16.gmra.mrb[16].mxu1 %v12381_v62  ;;  %v15869_v62 = vld [vmem:[%s25774_s22 + $0x60] sm:$0xff] }
 0xbaf   : > { %20452 = vmatmul.mubr.bf16.gmra.mrb[68].mxu0 %v15195_v30  ;;  %19907 = vmatprep.mubr.bf16.mxu1 %v12382_v59  ;;  %v12413_v30 = vld [vmem:[%s25713_s19 + $0x148] sm:$0xff] }
 0xbb0   : > { %20455 = vmatprep.mubr.bf16.mxu0 %v15196_v53  ;;  %v15870_v59 = vld [vmem:[%s25774_s22 + $0x68] sm:$0xff]  ;;  %v12414_v53 = vld [vmem:[%s25713_s19 + $0x150] sm:$0xff] }
 0xbb6   : > { %19908 = vmatmul.mubr.bf16.gmra.mrb[20].mxu1 %v12383_v2  ;;  %v15871_v2 = vld [vmem:[%s25774_s22 + $0x70] sm:$0xff] }
 0xbb7   : > { %20456 = vmatmul.mubr.bf16.gmra.mrb[72].mxu0 %v15197_v20  ;;  %19911 = vmatprep.mubr.bf16.mxu1 %v12384_v38  ;;  %v12415_v20 = vld [vmem:[%s25713_s19 + $0x158] sm:$0xff] }
 0xbb8   : > { %20459 = vmatprep.mubr.bf16.mxu0 %v15198_v37  ;;  %v15872_v38 = vld [vmem:[%s25774_s22 + $0x78] sm:$0xff]  ;;  %v12416_v37 = vld [vmem:[%s25713_s19 + $0x160] sm:$0xff] }
 0xbbe   : > { %19912 = vmatmul.mubr.bf16.gmra.mrb[24].mxu1 %v12385_v43  ;;  %v15873_v43 = vld [vmem:[%s25774_s22 + $0x80] sm:$0xff] }
 0xbbf   : > { %20460 = vmatmul.mubr.bf16.gmra.mrb[76].mxu0 %v15199_v3  ;;  %19915 = vmatprep.mubr.bf16.mxu1 %v12386_v52  ;;  %v12417_v3 = vld [vmem:[%s25713_s19 + $0x168] sm:$0xff] }
 0xbc0   : > { %20463 = vmatprep.mubr.bf16.mxu0 %v15200_v60  ;;  %v15874_v52 = vld [vmem:[%s25774_s22 + $0x88] sm:$0xff]  ;;  %v12418_v60 = vld [vmem:[%s25713_s19 + $0x170] sm:$0xff] }
 0xbc6   : > { %19916 = vmatmul.mubr.bf16.gmra.mrb[28].mxu1 %v12387_v14  ;;  %v15875_v14 = vld [vmem:[%s25774_s22 + $0x90] sm:$0xff] }
 0xbc7   : > { %20464 = vmatmul.mubr.bf16.gmra.mrb[80].mxu0 %v15201_v54  ;;  %19919 = vmatprep.mubr.bf16.mxu1 %v12388_v4  ;;  %v12419_v54 = vld [vmem:[%s25713_s19 + $0x178] sm:$0xff] }
 0xbc8   : > { %20467 = vmatprep.mubr.bf16.mxu0 %v15202_v32  ;;  %v15876_v4 = vld [vmem:[%s25774_s22 + $0x98] sm:$0xff]  ;;  %v12420_v32 = vld [vmem:[%s25713_s19 + $0x180] sm:$0xff] }
 0xbce   : > { %19920 = vmatmul.mubr.bf16.gmra.mrb[32].mxu1 %v12389_v34  ;;  %v15877_v34 = vld [vmem:[%s25774_s22 + $0xa0] sm:$0xff] }
 0xbcf   : > { %20468 = vmatmul.mubr.bf16.gmra.mrb[84].mxu0 %v15203_v49  ;;  %19923 = vmatprep.mubr.bf16.mxu1 %v12390_v63  ;;  %v12421_v49 = vld [vmem:[%s25713_s19 + $0x188] sm:$0xff] }
 0xbd0   : > { %20471 = vmatprep.mubr.bf16.mxu0 %v15204_v55  ;;  %v15878_v63 = vld [vmem:[%s25774_s22 + $0xa8] sm:$0xff]  ;;  %v12422_v55 = vld [vmem:[%s25713_s19 + $0x190] sm:$0xff] }
 0xbd6   : > { %19924 = vmatmul.mubr.bf16.gmra.mrb[36].mxu1 %v12391_v46  ;;  %v15879_v46 = vld [vmem:[%s25774_s22 + $0xb0] sm:$0xff] }
 0xbd7   : > { %20472 = vmatmul.mubr.bf16.gmra.mrb[88].mxu0 %v15205_v13  ;;  %19927 = vmatprep.mubr.bf16.mxu1 %v12392_v41  ;;  %v12423_v13 = vld [vmem:[%s25713_s19 + $0x198] sm:$0xff] }
 0xbd8   : > { %20475 = vmatprep.mubr.bf16.mxu0 %v15206_v12  ;;  %v15880_v41 = vld [vmem:[%s25774_s22 + $0xb8] sm:$0xff]  ;;  %v12424_v12 = vld [vmem:[%s25713_s19 + $0x1a0] sm:$0xff] }
 0xbde   : > { %19928 = vmatmul.mubr.bf16.gmra.mrb[40].mxu1 %v12393_v11  ;;  %v15881_v11 = vld [vmem:[%s25774_s22 + $0xc0] sm:$0xff] }
 0xbdf   : > { %20476 = vmatmul.mubr.bf16.gmra.mrb[92].mxu0 %v15207_v24  ;;  %19931 = vmatprep.mubr.bf16.mxu1 %v12394_v57  ;;  %v12425_v24 = vld [vmem:[%s25713_s19 + $0x1a8] sm:$0xff] }
 0xbe0   : > { %20479 = vmatprep.mubr.bf16.mxu0 %v15208_v35  ;;  %v15882_v57 = vld [vmem:[%s25774_s22 + $0xc8] sm:$0xff]  ;;  %v13097_v35 = vld [vmem:[%s25349_s3 + $0xe0] sm:$0xff] }
 0xbe6   : > { %19932 = vmatmul.mubr.bf16.gmra.mrb[44].mxu1 %v12395_v25  ;;  %v15883_v25 = vld [vmem:[%s25774_s22 + $0xd0] sm:$0xff] }
 0xbe7   : > { %20480 = vmatmul.mubr.bf16.gmra.mrb[96].mxu0 %v15209_v58  ;;  %19935 = vmatprep.mubr.bf16.mxu1 %v12396_v9 }
 0xbe8   : > { %20483 = vmatprep.mubr.bf16.mxu0 %v15210_v51 }
 0xbee   : > { %19936 = vmatmul.mubr.bf16.gmra.mrb[48].mxu1 %v12397_v29  ;;  %v13098_v29 = vld [vmem:[%s25349_s3 + $0xe8] sm:$0xff] }
 0xbef   : > { %20484 = vmatmul.mubr.bf16.gmra.mrb[100].mxu0 %v15211_v8  ;;  %19939 = vmatprep.mubr.bf16.mxu1 %v12398_v21  ;;  %v15884_v21 = vld [vmem:[%s25774_s22 + $0xd8] sm:$0xff] }
 0xbf0   : > { %20487 = vmatprep.mubr.bf16.mxu0 %v15212_v6  ;;  %v13099_v6 = vld [vmem:[%s25349_s3 + $0xf0] sm:$0xff] }
 0xbf6   : > { %19940 = vmatmul.mubr.bf16.gmra.mrb[52].mxu1 %v12399_v47  ;;  %v15885_v47 = vld [vmem:[%s25774_s22 + $0xe0] sm:$0xff] }
 0xbf7   : > { %20488 = vmatmul.mubr.bf16.gmra.mrb[104].mxu0 %v15213_v28  ;;  %19943 = vmatprep.mubr.bf16.mxu1 %v12400_v15 }
 0xbf8   : > { %20507 = vmatprep.mubr.bf16.mxu0 %v15857_v0 }
 0xbfe   : > { %19944 = vmatmul.mubr.bf16.gmra.mrb[56].mxu1 %v12401_v1  ;;  %v13100_v1 = vld [vmem:[%s25349_s3 + $0xf8] sm:$0xff] }
 0xbff   : > { %20508 = vmatmul.mubr.bf16.vlgmr.msra.gmra.mrb[0].mxu0 %v15858_v50  ;;  %19947 = vmatprep.mubr.bf16.mxu1 %v12402_v36  ;;  %v15886_v36 = vld [vmem:[%s25774_s22 + $0xe8] sm:$0xff] }
 0xc00   : > { %20511 = vmatprep.mubr.bf16.mxu0 %v15859_v31  ;;  %v13101_v31 = vld [vmem:[%s25349_s3 + $0x100] sm:$0xff] }
 0xc06   : > { %19948 = vmatmul.mubr.bf16.gmra.mrb[60].mxu1 %v12403_v23  ;;  %v15887_v23 = vld [vmem:[%s25774_s22 + $0xf0] sm:$0xff] }
 0xc07   : > { %20512 = vmatmul.mubr.bf16.gmra.mrb[4].mxu0 %v15860_v45  ;;  %19951 = vmatprep.mubr.bf16.mxu1 %v12404_v26 }
 0xc08   : > { %20515 = vmatprep.mubr.bf16.mxu0 %v15861_v56 }
 0xc0e   : > { %19952 = vmatmul.mubr.bf16.gmra.mrb[64].mxu1 %v12405_v17  ;;  %v13102_v17 = vld [vmem:[%s25349_s3 + $0x108] sm:$0xff] }
 0xc0f   : > { %20516 = vmatmul.mubr.bf16.gmra.mrb[8].mxu0 %v15862_v19  ;;  %19955 = vmatprep.mubr.bf16.mxu1 %v12406_v44  ;;  %v15888_v44 = vld [vmem:[%s25774_s22 + $0xf8] sm:$0xff] }
 0xc10   : > { %20519 = vmatprep.mubr.bf16.mxu0 %v15863_v61  ;;  %v13103_v61 = vld [vmem:[%s25349_s3 + $0x110] sm:$0xff] }
 0xc16   : > { %19956 = vmatmul.mubr.bf16.gmra.mrb[68].mxu1 %v12407_v22  ;;  %v15889_v22 = vld [vmem:[%s25774_s22 + $0x100] sm:$0xff] }
 0xc17   : > { %20520 = vmatmul.mubr.bf16.gmra.mrb[12].mxu0 %v15864_v48  ;;  %19959 = vmatprep.mubr.bf16.mxu1 %v12408_v39 }
 0xc18   : > { %20523 = vmatprep.mubr.bf16.mxu0 %v15865_v40 }
 0xc1e   : > { %19960 = vmatmul.mubr.bf16.gmra.mrb[72].mxu1 %v12409_v5  ;;  %v13104_v5 = vld [vmem:[%s25349_s3 + $0x118] sm:$0xff] }
 0xc1f   : > { %20524 = vmatmul.mubr.bf16.gmra.mrb[16].mxu0 %v15866_v16  ;;  %19963 = vmatprep.mubr.bf16.mxu1 %v12410_v18  ;;  %v15890_v18 = vld [vmem:[%s25774_s22 + $0x108] sm:$0xff] }
 0xc20   : > { %20527 = vmatprep.mubr.bf16.mxu0 %v15867_v42  ;;  %v13105_v42 = vld [vmem:[%s25349_s3 + $0x120] sm:$0xff] }
 0xc26   : > { %19964 = vmatmul.mubr.bf16.gmra.mrb[76].mxu1 %v12411_v27  ;;  %v15891_v27 = vld [vmem:[%s25774_s22 + $0x110] sm:$0xff] }
 0xc27   : > { %20528 = vmatmul.mubr.bf16.gmra.mrb[20].mxu0 %v15868_v10  ;;  %19967 = vmatprep.mubr.bf16.mxu1 %v12412_v33 }
 0xc28   : > { %20531 = vmatprep.mubr.bf16.mxu0 %v15869_v62 }
 0xc2e   : > { %19968 = vmatmul.mubr.bf16.gmra.mrb[80].mxu1 %v12413_v30  ;;  %v13106_v30 = vld [vmem:[%s25349_s3 + $0x128] sm:$0xff] }
 0xc2f   : > { %20532 = vmatmul.mubr.bf16.gmra.mrb[24].mxu0 %v15870_v59  ;;  %19971 = vmatprep.mubr.bf16.mxu1 %v12414_v53  ;;  %v15892_v53 = vld [vmem:[%s25774_s22 + $0x118] sm:$0xff] }
 0xc30   : > { %20535 = vmatprep.mubr.bf16.mxu0 %v15871_v2  ;;  %v13107_v2 = vld [vmem:[%s25349_s3 + $0x130] sm:$0xff] }
 0xc36   : > { %19972 = vmatmul.mubr.bf16.gmra.mrb[84].mxu1 %v12415_v20  ;;  %v15893_v20 = vld [vmem:[%s25774_s22 + $0x120] sm:$0xff] }
 0xc37   : > { %20536 = vmatmul.mubr.bf16.gmra.mrb[28].mxu0 %v15872_v38  ;;  %19975 = vmatprep.mubr.bf16.mxu1 %v12416_v37 }
 0xc38   : > { %20539 = vmatprep.mubr.bf16.mxu0 %v15873_v43 }
 0xc3e   : > { %19976 = vmatmul.mubr.bf16.gmra.mrb[88].mxu1 %v12417_v3  ;;  %v13108_v3 = vld [vmem:[%s25349_s3 + $0x138] sm:$0xff] }
 0xc3f   : > { %20540 = vmatmul.mubr.bf16.gmra.mrb[32].mxu0 %v15874_v52  ;;  %19979 = vmatprep.mubr.bf16.mxu1 %v12418_v60  ;;  %v15894_v60 = vld [vmem:[%s25774_s22 + $0x128] sm:$0xff] }
 0xc40   : > { %20543 = vmatprep.mubr.bf16.mxu0 %v15875_v14  ;;  %v13109_v14 = vld [vmem:[%s25349_s3 + $0x140] sm:$0xff] }
 0xc46   : > { %19980 = vmatmul.mubr.bf16.gmra.mrb[92].mxu1 %v12419_v54  ;;  %v15895_v54 = vld [vmem:[%s25774_s22 + $0x130] sm:$0xff] }
 0xc47   : > { %20544 = vmatmul.mubr.bf16.gmra.mrb[36].mxu0 %v15876_v4  ;;  %19983 = vmatprep.mubr.bf16.mxu1 %v12420_v32 }
 0xc48   : > { %20547 = vmatprep.mubr.bf16.mxu0 %v15877_v34 }
 0xc4e   : > { %19984 = vmatmul.mubr.bf16.gmra.mrb[96].mxu1 %v12421_v49  ;;  %v13110_v49 = vld [vmem:[%s25349_s3 + $0x148] sm:$0xff] }
 0xc4f   : > { %20548 = vmatmul.mubr.bf16.gmra.mrb[40].mxu0 %v15878_v63  ;;  %19987 = vmatprep.mubr.bf16.mxu1 %v12422_v55  ;;  %v15896_v55 = vld [vmem:[%s25774_s22 + $0x138] sm:$0xff] }
 0xc50   : > { %20551 = vmatprep.mubr.bf16.mxu0 %v15879_v46  ;;  %v13111_v46 = vld [vmem:[%s25349_s3 + $0x150] sm:$0xff] }
 0xc56   : > { %19988 = vmatmul.mubr.bf16.gmra.mrb[100].mxu1 %v12423_v13  ;;  %v15897_v13 = vld [vmem:[%s25774_s22 + $0x140] sm:$0xff] }
 0xc57   : > { %20552 = vmatmul.mubr.bf16.gmra.mrb[44].mxu0 %v15880_v41  ;;  %19991 = vmatprep.mubr.bf16.mxu1 %v12424_v12 }
 0xc58   : > { %20555 = vmatprep.mubr.bf16.mxu0 %v15881_v11 }
 0xc5e   : > { %19992 = vmatmul.mubr.bf16.gmra.mrb[104].mxu1 %v12425_v24  ;;  %v13112_v24 = vld [vmem:[%s25349_s3 + $0x158] sm:$0xff] }
 0xc5f   : > { %20556 = vmatmul.mubr.bf16.gmra.mrb[48].mxu0 %v15882_v57  ;;  %20067 = vmatprep.mubr.bf16.mxu1 %v13097_v35  ;;  %v15898_v35 = vld [vmem:[%s25774_s22 + $0x148] sm:$0xff] }
 0xc60   : > { %20559 = vmatprep.mubr.bf16.mxu0 %v15883_v25  ;;  %v13113_v25 = vld [vmem:[%s25349_s3 + $0x160] sm:$0xff] }
 0xc61   : > { %v25829_v58 = vpop.f32.mrb[0].mxu1 }
 0xc62   : > { %v25831_v9 = vpop.f32.mrb[1].mxu1 }
 0xc63   : > { %v25833_v51 = vpop.f32.mrb[2].mxu1 }
 0xc64   : > { %v25836_v8 = vpop.f32.mrb[3].mxu1 }
 0xc66   : > { %20068 = vmatmul.mubr.bf16.vlgmr.msra.gmra.mrb[56].mxu1 %v13098_v29  ;;  %v15899_v29 = vld [vmem:[%s25774_s22 + $0x150] sm:$0xff] }
 0xc67   : > { %20560 = vmatmul.mubr.bf16.gmra.mrb[52].mxu0 %v15884_v21  ;;  %20071 = vmatprep.mubr.bf16.mxu1 %v13099_v6 }
 0xc68   : > { %20563 = vmatprep.mubr.bf16.mxu0 %v15885_v47 }
 0xc69   : > { %v25841_v28 = vpop.f32.mrb[4].mxu1 }
 0xc6a   : > { %v25843_v15 = vpop.f32.mrb[5].mxu1 }
 0xc6b   : > { %v25845_v0 = vpop.f32.mrb[6].mxu1 }
 0xc6c   : > { %v25848_v50 = vpop.f32.mrb[7].mxu1 }
 0xc6e   : > { %20072 = vmatmul.mubr.bf16.gmra.mrb[60].mxu1 %v13100_v1  ;;  %v13114_v1 = vld [vmem:[%s25349_s3 + $0x168] sm:$0xff] }
 0xc6f   : > { %20564 = vmatmul.mubr.bf16.gmra.mrb[56].mxu0 %v15886_v36  ;;  %20075 = vmatprep.mubr.bf16.mxu1 %v13101_v31  ;;  %v15900_v31 = vld [vmem:[%s25774_s22 + $0x158] sm:$0xff] }
 0xc70   : > { %20567 = vmatprep.mubr.bf16.mxu0 %v15887_v23  ;;  %v13115_v23 = vld [vmem:[%s25349_s3 + $0x170] sm:$0xff] }
 0xc71   : > { %v25853_v45 = vpop.f32.mrb[8].mxu1 }
 0xc72   : > { %v25855_v26 = vpop.f32.mrb[9].mxu1 }
 0xc73   : > { %v25857_v56 = vpop.f32.mrb[10].mxu1 }
 0xc74   : > { %v25860_v19 = vpop.f32.mrb[11].mxu1 }
 0xc76   : > { %20076 = vmatmul.mubr.bf16.gmra.mrb[64].mxu1 %v13102_v17  ;;  %v15901_v17 = vld [vmem:[%s25774_s22 + $0x160] sm:$0xff] }
 0xc77   : > { %20568 = vmatmul.mubr.bf16.gmra.mrb[60].mxu0 %v15888_v44  ;;  %20079 = vmatprep.mubr.bf16.mxu1 %v13103_v61 }
 0xc78   : > { %20571 = vmatprep.mubr.bf16.mxu0 %v15889_v22 }
 0xc79   : > { %v25865_v48 = vpop.f32.mrb[12].mxu1 }
 0xc7a   : > { %v25867_v39 = vpop.f32.mrb[13].mxu1 }
 0xc7b   : > { %v25869_v40 = vpop.f32.mrb[14].mxu1 }
 0xc7c   : > { %v25872_v16 = vpop.f32.mrb[15].mxu1 }
 0xc7e   : > { %20080 = vmatmul.mubr.bf16.gmra.mrb[68].mxu1 %v13104_v5  ;;  %v13116_v5 = vld [vmem:[%s25349_s3 + $0x178] sm:$0xff] }
 0xc7f   : > { %20572 = vmatmul.mubr.bf16.gmra.mrb[64].mxu0 %v15890_v18  ;;  %20083 = vmatprep.mubr.bf16.mxu1 %v13105_v42  ;;  %v15902_v42 = vld [vmem:[%s25774_s22 + $0x168] sm:$0xff] }
 0xc80   : > { %20575 = vmatprep.mubr.bf16.mxu0 %v15891_v27  ;;  %v13117_v27 = vld [vmem:[%s25349_s3 + $0x180] sm:$0xff] }
 0xc81   : > { %v25877_v10 = vpop.f32.mrb[16].mxu1 }
 0xc82   : > { %v25879_v33 = vpop.f32.mrb[17].mxu1 }
 0xc83   : > { %v25881_v62 = vpop.f32.mrb[18].mxu1 }
 0xc84   : > { %v25884_v59 = vpop.f32.mrb[19].mxu1 }
 0xc86   : > { %20084 = vmatmul.mubr.bf16.gmra.mrb[72].mxu1 %v13106_v30  ;;  %v15903_v30 = vld [vmem:[%s25774_s22 + $0x170] sm:$0xff] }
 0xc87   : > { %20576 = vmatmul.mubr.bf16.gmra.mrb[68].mxu0 %v15892_v53  ;;  %20087 = vmatprep.mubr.bf16.mxu1 %v13107_v2 }
 0xc88   : > { %20579 = vmatprep.mubr.bf16.mxu0 %v15893_v20 }
 0xc89   : > { %v25889_v38 = vpop.f32.mrb[20].mxu1 }
 0xc8a   : > { %v25891_v37 = vpop.f32.mrb[21].mxu1 }
 0xc8b   : > { %v25893_v43 = vpop.f32.mrb[22].mxu1 }
 0xc8c   : > { %v25896_v52 = vpop.f32.mrb[23].mxu1 }
 0xc8e   : > { %20088 = vmatmul.mubr.bf16.gmra.mrb[76].mxu1 %v13108_v3  ;;  %v13118_v3 = vld [vmem:[%s25349_s3 + $0x188] sm:$0xff] }
 0xc8f   : > { %20580 = vmatmul.mubr.bf16.gmra.mrb[72].mxu0 %v15894_v60  ;;  %20091 = vmatprep.mubr.bf16.mxu1 %v13109_v14  ;;  %v15904_v14 = vld [vmem:[%s25774_s22 + $0x178] sm:$0xff] }
 0xc90   : > { %20583 = vmatprep.mubr.bf16.mxu0 %v15895_v54  ;;  %v13119_v54 = vld [vmem:[%s25349_s3 + $0x190] sm:$0xff] }
 0xc91   : > { %v25901_v4 = vpop.f32.mrb[24].mxu1 }
 0xc92   : > { %v25903_v32 = vpop.f32.mrb[25].mxu1 }
 0xc93   : > { %v25905_v34 = vpop.f32.mrb[26].mxu1 }
 0xc94   : > { %v25908_v63 = vpop.f32.mrb[27].mxu1 }
 0xc96   : > { %20092 = vmatmul.mubr.bf16.gmra.mrb[80].mxu1 %v13110_v49  ;;  %v15905_v49 = vld [vmem:[%s25774_s22 + $0x180] sm:$0xff] }
 0xc97   : > { %20584 = vmatmul.mubr.bf16.gmra.mrb[76].mxu0 %v15896_v55  ;;  %20095 = vmatprep.mubr.bf16.mxu1 %v13111_v46 }
 0xc98   : > { %20587 = vmatprep.mubr.bf16.mxu0 %v15897_v13 }
 0xc99   : > { %v25913_v41 = vpop.f32.mrb[28].mxu1 }
 0xc9a   : > { %v25915_v12 = vpop.f32.mrb[29].mxu1 }
 0xc9b   : > { %v25917_v11 = vpop.f32.mrb[30].mxu1 }
 0xc9c   : > { %v25920_v57 = vpop.f32.mrb[31].mxu1 }
 0xc9e   : > { %20096 = vmatmul.mubr.bf16.gmra.mrb[84].mxu1 %v13112_v24  ;;  %v13120_v24 = vld [vmem:[%s25349_s3 + $0x198] sm:$0xff] }
 0xc9f   : > { %20588 = vmatmul.mubr.bf16.gmra.mrb[80].mxu0 %v15898_v35  ;;  %20099 = vmatprep.mubr.bf16.mxu1 %v13113_v25  ;;  %v15906_v25 = vld [vmem:[%s25774_s22 + $0x188] sm:$0xff] }
 0xca0   : > { %20591 = vmatprep.mubr.bf16.mxu0 %v15899_v29  ;;  %v13121_v29 = vld [vmem:[%s25349_s3 + $0x1a0] sm:$0xff] }
 0xca1   : > { %v25925_v21 = vpop.f32.mrb[32].mxu1 }
 0xca2   : > { %v25927_v6 = vpop.f32.mrb[33].mxu1 }
 0xca3   : > { %v25929_v47 = vpop.f32.mrb[34].mxu1 }
 0xca4   : > { %v25932_v36 = vpop.f32.mrb[35].mxu1 }
 0xca6   : > { %20100 = vmatmul.mubr.bf16.gmra.mrb[88].mxu1 %v13114_v1  ;;  %v15907_v1 = vld [vmem:[%s25774_s22 + $0x190] sm:$0xff] }
 0xca7   : > { %20592 = vmatmul.mubr.bf16.gmra.mrb[84].mxu0 %v15900_v31  ;;  %20103 = vmatprep.mubr.bf16.mxu1 %v13115_v23 }
 0xca8   : > { %20595 = vmatprep.mubr.bf16.mxu0 %v15901_v17 }
 0xca9   : > { %v25937_v44 = vpop.f32.mrb[36].mxu1 }
 0xcaa   : > { %v25939_v61 = vpop.f32.mrb[37].mxu1 }
 0xcab   : > { %v25941_v22 = vpop.f32.mrb[38].mxu1 }
 0xcac   : > { %v25944_v18 = vpop.f32.mrb[39].mxu1 }
 0xcae   : > { %20104 = vmatmul.mubr.bf16.gmra.mrb[92].mxu1 %v13116_v5  ;;  %v13122_v5 = vld [vmem:[%s25349_s3 + $0x1a8] sm:$0xff]  ;;  %s25997_s3 = scalar_lea.vmem %s26397_s0, %s25342_s16  ;;  %s22780_s16 = smov (%p10489_p6), [#allocation8]  }
 0xcaf   : > { %20596 = vmatmul.mubr.bf16.gmra.mrb[88].mxu0 %v15902_v42  ;;  %20107 = vmatprep.mubr.bf16.mxu1 %v13117_v27  ;;  %v15908_v27 = vld [vmem:[%s25774_s22 + $0x198] sm:$0xff]  ;;  %s16994_s24 = sshll.u32 (%p10489_p6), %s22780_s16, 4  ;;  %s16995_s24 = int_to_ptr.vmem [resolvable:$true] %s16994_s24 }
 0xcb0   : > { %20599 = vmatprep.mubr.bf16.mxu0 %v15903_v30  ;;  %v15909_v30 = vld [vmem:[%s25774_s22 + $0x1a0] sm:$0xff]  ;;  %s22672_s25 = scalar_lea.vmem (%p10489_p6), %s16995_s24, 82944  ;;  %p22677_p8 = scmp.lt.s32.totalorder (%p10489_p6), %s16995_s24, %s16995_s24 }
 0xcb1   : > { %v25949_v53 = vpop.f32.mrb[40].mxu1  ;;  %p22673_p7 = scmp.ne.s32.totalorder (%p10489_p6), %s16995_s24, %s22672_s25  ;;  %p22678_p9 = scmp.lt.s32.totalorder (%p10489_p6), %s22672_s25, %s22672_s25 }
 0xcb2   : > { %v25951_v2 = vpop.f32.mrb[41].mxu1 }
 0xcb3   : > { %v25953_v20 = vpop.f32.mrb[42].mxu1  ;;  %p22679_p10 = por (%p10489_p6), %p22678_p9, %p22677_p8 }
 0xcb4   : > { %v25956_v60 = vpop.f32.mrb[43].mxu1 }
 0xcb5   :  { %p22680_p11 = pnand (%p10489_p6), %p22679_p10, %p22673_p7 }
 0xcb6   : > { %20108 = vmatmul.mubr.bf16.gmra.mrb[96].mxu1 %v13118_v3 }
 0xcb7   : > { %20600 = vmatmul.mubr.bf16.gmra.mrb[92].mxu0 %v15904_v14  ;;  %20111 = vmatprep.mubr.bf16.mxu1 %v13119_v54 }
 0xcb8   : > { %20603 = vmatprep.mubr.bf16.mxu0 %v15905_v49 }
 0xcb9   : > { %v25961_v55 = vpop.f32.mrb[44].mxu1 }
 0xcba   : > { %v25963_v46 = vpop.f32.mrb[45].mxu1 }
 0xcbb   : > { %v25965_v13 = vpop.f32.mrb[46].mxu1 }
 0xcbc   : > { %v25968_v35 = vpop.f32.mrb[47].mxu1 }
 0xcbe   : > { %20112 = vmatmul.mubr.bf16.gmra.mrb[100].mxu1 %v13120_v24  ;;  %v15910_v24 = vld [vmem:[%s25774_s22 + $0x1a8] sm:$0xff] }
 0xcbf   : > { %20604 = vmatmul.mubr.bf16.gmra.mrb[96].mxu0 %v15906_v25  ;;  %20115 = vmatprep.mubr.bf16.mxu1 %v13121_v29 }
 0xcc0   : > { %20607 = vmatprep.mubr.bf16.mxu0 %v15907_v1 }
 0xcc1   : > { %v25973_v31 = vpop.f32.mrb[48].mxu1 }
 0xcc2   : > { %26521 = vst [vmem:[#allocation66_spill] sm:$0xff] %v25973_v31  ;;  %v25975_v23 = vpop.f32.mrb[49].mxu1 }
 0xcc3   : > { %26522 = vst [vmem:[#allocation67_spill] sm:$0xff] %v25975_v23  ;;  %v25977_v17 = vpop.f32.mrb[50].mxu1 }
 0xcc4   : > { %26523 = vst [vmem:[#allocation68_spill] sm:$0xff] %v25977_v17  ;;  %v25980_v42 = vpop.f32.mrb[51].mxu1 }
 0xcc5   : > { %26524 = vst [vmem:[#allocation69_spill] sm:$0xff] %v25980_v42  ;;  %v16667_v42 = vld [vmem:[%s25997_s3 + $0x18] sm:$0xff] }
 0xcc6   : > { %20116 = vmatmul.mubr.bf16.gmra.mrb[104].mxu1 %v13122_v5  ;;  %v16666_v5 = vld [vmem:[%s25997_s3 + $0x10] sm:$0xff] }
 0xcc7   : > { %20608 = vmatmul.mubr.bf16.gmra.mrb[100].mxu0 %v15908_v27 }
 0xcc8   : > { %20611 = vmatprep.mubr.bf16.mxu0 %v15909_v30 }
 0xcc9   : > { %v25984_v3 = vpop.f32.mrb[52].mxu1 }
 0xcca   : > { %26525 = vst [vmem:[#allocation70_spill] sm:$0xff] %v25984_v3  ;;  %v25986_v14 = vpop.f32.mrb[53].mxu1 }
 0xccb   : > { %26526 = vst [vmem:[#allocation71_spill] sm:$0xff] %v25986_v14  ;;  %v25988_v54 = vpop.f32.mrb[54].mxu1 }
 0xccc   : > { %26527 = vst [vmem:[#allocation72_spill] sm:$0xff] %v25988_v54  ;;  %v25990_v49 = vpop.f32.mrb[55].mxu1 }
 0xccd   : > { %26528 = vst [vmem:[#allocation73_spill] sm:$0xff] %v25990_v49  ;;  %v16664_v49 = vld [vmem:[%s25997_s3] sm:$0xff] }
 0xccf   : > { %20612 = vmatmul.mubr.bf16.gmra.mrb[104].mxu0 %v15910_v24 }
 0xcd2   : > { %v20509_v25 = vpop.f32.mrb[0].mxu0 }
 0xcd3   : > { %v21511_v29 = vadd.f32 %v20509_v25, %v25829_v58  ;;  %v16010_v1 = vpop.f32.mrb[1].mxu0  ;;  %v16665_v25 = vld [vmem:[%s25997_s3 + $0x8] sm:$0xff] }
 0xcd4   : > { %v21512_v27 = vadd.f32 %v16010_v1, %v25831_v9  ;;  %v20510_v30 = vpop.f32.mrb[2].mxu0 }
 0xcd5   : > { %v16557_v24 = vadd.f32 %v21511_v29, %v25334_v7  ;;  %v21513_v54 = vadd.f32 %v20510_v30, %v25833_v51  ;;  %v16013_v14 = vpop.f32.mrb[3].mxu0 }
 0xcd6   : > { %v16555_v3 = vadd.f32 %v21512_v27, %v25334_v7  ;;  %v21514_v17 = vadd.f32 %v16013_v14, %v25836_v8  ;;  %v16671_v27 = vld [vmem:[%s25997_s3 + $0x38] sm:$0xff] }
 0xcd7   : > { %v16774_v23 = vadd.f32 %v16666_v5, %v16557_v24  ;;  %v16558_v58 = vadd.f32 %v21513_v54, %v25334_v7 }
 0xcd8   : > { %v16772_v31 = vadd.f32 %v16664_v49, %v16555_v3  ;;  %v16556_v9 = vadd.f32 %v21514_v17, %v25334_v7  ;;  %v16670_v17 = vld [vmem:[%s25997_s3 + $0x30] sm:$0xff] }
 0xcd9   : > { %16883 = vst [vmem:[%s26012_s12 + $0x10] sm:$0xff] %v16774_v23  ;;  %v16775_v51 = vadd.f32 %v16667_v42, %v16558_v58  ;;  %v16668_v23 = vld [vmem:[%s25997_s3 + $0x20] sm:$0xff] }
 0xcda   : > { %16881 = vst [vmem:[%s26012_s12] sm:$0xff] %v16772_v31  ;;  %v16773_v8 = vadd.f32 %v16665_v25, %v16556_v9  ;;  %v20513_v14 = vpop.f32.mrb[4].mxu0 }
 0xcdb   : > { %16884 = vst [vmem:[%s26012_s12 + $0x18] sm:$0xff] %v16775_v51  ;;  %v21515_v54 = vadd.f32 %v20513_v14, %v25841_v28  ;;  %v16026_v3 = vpop.f32.mrb[5].mxu0 }
 0xcdc   : > { %16882 = vst [vmem:[%s26012_s12 + $0x8] sm:$0xff] %v16773_v8  ;;  %v21516_v49 = vadd.f32 %v16026_v3, %v25843_v15  ;;  %v20514_v29 = vpop.f32.mrb[6].mxu0  ;;  %v16669_v15 = vld [vmem:[%s25997_s3 + $0x28] sm:$0xff] }
 0xcdd   : > { %v16561_v1 = vadd.f32 %v21515_v54, %v25334_v7  ;;  %v21517_v31 = vadd.f32 %v20514_v29, %v25845_v0  ;;  %v16029_v42 = vpop.f32.mrb[7].mxu0 }
 0xcde   : > { %v16559_v5 = vadd.f32 %v21516_v49, %v25334_v7  ;;  %v21518_v28 = vadd.f32 %v16029_v42, %v25848_v50  ;;  %v16674_v50 = vld [vmem:[%s25997_s3 + $0x50] sm:$0xff]  ;;  %v16672_v49 = vld [vmem:[%s25997_s3 + $0x40] sm:$0xff] }
 0xcdf   : > { %v16778_v30 = vadd.f32 %v16670_v17, %v16561_v1  ;;  %v16562_v24 = vadd.f32 %v21517_v31, %v25334_v7  ;;  %v16675_v31 = vld [vmem:[%s25997_s3 + $0x58] sm:$0xff] }
 0xce0   : > { %v16776_v58 = vadd.f32 %v16668_v23, %v16559_v5  ;;  %v16560_v25 = vadd.f32 %v21518_v28, %v25334_v7 }
 0xce1   : > { %16887 = vst [vmem:[%s26012_s12 + $0x30] sm:$0xff] %v16778_v30  ;;  %v16779_v9 = vadd.f32 %v16671_v27, %v16562_v24 }
 0xce2   : > { %16885 = vst [vmem:[%s26012_s12 + $0x20] sm:$0xff] %v16776_v58  ;;  %v16777_v0 = vadd.f32 %v16669_v15, %v16560_v25  ;;  %v20517_v51 = vpop.f32.mrb[8].mxu0 }
 0xce3   : > { %16888 = vst [vmem:[%s26012_s12 + $0x38] sm:$0xff] %v16779_v9  ;;  %v21519_v8 = vadd.f32 %v20517_v51, %v25853_v45  ;;  %v16042_v14 = vpop.f32.mrb[9].mxu0  ;;  %v16676_v51 = vld [vmem:[%s25997_s3 + $0x60] sm:$0xff] }
 0xce4   : > { %16886 = vst [vmem:[%s26012_s12 + $0x28] sm:$0xff] %v16777_v0  ;;  %v21520_v54 = vadd.f32 %v16042_v14, %v25855_v26  ;;  %v20518_v3 = vpop.f32.mrb[10].mxu0  ;;  %v16673_v26 = vld [vmem:[%s25997_s3 + $0x48] sm:$0xff] }
 0xce5   : > { %v16565_v17 = vadd.f32 %v21519_v8, %v25334_v7  ;;  %v21521_v29 = vadd.f32 %v20518_v3, %v25857_v56  ;;  %v16045_v1 = vpop.f32.mrb[11].mxu0 }
 0xce6   : > { %v16563_v23 = vadd.f32 %v21520_v54, %v25334_v7  ;;  %v21522_v45 = vadd.f32 %v16045_v1, %v25860_v19  ;;  %v16678_v19 = vld [vmem:[%s25997_s3 + $0x70] sm:$0xff]  ;;  %v16679_v54 = vld [vmem:[%s25997_s3 + $0x78] sm:$0xff] }
 0xce7   : > { %v16782_v42 = vadd.f32 %v16674_v50, %v16565_v17  ;;  %v16566_v5 = vadd.f32 %v21521_v29, %v25334_v7 }
 0xce8   : > { %v16780_v27 = vadd.f32 %v16672_v49, %v16563_v23  ;;  %v16564_v28 = vadd.f32 %v21522_v45, %v25334_v7 }
 0xce9   : > { %16891 = vst [vmem:[%s26012_s12 + $0x50] sm:$0xff] %v16782_v42  ;;  %v16783_v30 = vadd.f32 %v16675_v31, %v16566_v5 }
 0xcea   : > { %16889 = vst [vmem:[%s26012_s12 + $0x40] sm:$0xff] %v16780_v27  ;;  %v16781_v56 = vadd.f32 %v16673_v26, %v16564_v28  ;;  %v20521_v24 = vpop.f32.mrb[12].mxu0  ;;  %v16680_v27 = vld [vmem:[%s25997_s3 + $0x80] sm:$0xff] }
 0xceb   : > { %16892 = vst [vmem:[%s26012_s12 + $0x58] sm:$0xff] %v16783_v30  ;;  %v21523_v15 = vadd.f32 %v20521_v24, %v25865_v48  ;;  %v16058_v58 = vpop.f32.mrb[13].mxu0  ;;  %v16683_v24 = vld [vmem:[%s25997_s3 + $0x98] sm:$0xff] }
 0xcec   : > { %16890 = vst [vmem:[%s26012_s12 + $0x48] sm:$0xff] %v16781_v56  ;;  %v21524_v25 = vadd.f32 %v16058_v58, %v25867_v39  ;;  %v20522_v9 = vpop.f32.mrb[14].mxu0  ;;  %v16677_v39 = vld [vmem:[%s25997_s3 + $0x68] sm:$0xff] }
 0xced   : > { %v16569_v0 = vadd.f32 %v21523_v15, %v25334_v7  ;;  %v21525_v8 = vadd.f32 %v20522_v9, %v25869_v40  ;;  %v16061_v14 = vpop.f32.mrb[15].mxu0 }
 0xcee   : > { %v16567_v50 = vadd.f32 %v21524_v25, %v25334_v7  ;;  %v21526_v48 = vadd.f32 %v16061_v14, %v25872_v16  ;;  %v16682_v16 = vld [vmem:[%s25997_s3 + $0x90] sm:$0xff] }
 0xcef   : > { %v16786_v3 = vadd.f32 %v16678_v19, %v16569_v0  ;;  %v16570_v17 = vadd.f32 %v21525_v8, %v25334_v7 }
 0xcf0   : > { %v16784_v49 = vadd.f32 %v16676_v51, %v16567_v50  ;;  %v16568_v29 = vadd.f32 %v21526_v48, %v25334_v7  ;;  %v16684_v48 = vld [vmem:[%s25997_s3 + $0xa0] sm:$0xff] }
 0xcf1   : > { %16895 = vst [vmem:[%s26012_s12 + $0x70] sm:$0xff] %v16786_v3  ;;  %v16787_v1 = vadd.f32 %v16679_v54, %v16570_v17 }
 0xcf2   : > { %16893 = vst [vmem:[%s26012_s12 + $0x60] sm:$0xff] %v16784_v49  ;;  %v16785_v40 = vadd.f32 %v16677_v39, %v16568_v29  ;;  %v20525_v23 = vpop.f32.mrb[16].mxu0  ;;  %v16687_v49 = vld [vmem:[%s25997_s3 + $0xb8] sm:$0xff] }
 0xcf3   : > { %16896 = vst [vmem:[%s26012_s12 + $0x78] sm:$0xff] %v16787_v1  ;;  %v21527_v31 = vadd.f32 %v20525_v23, %v25877_v10  ;;  %v16074_v45 = vpop.f32.mrb[17].mxu0 }
 0xcf4   : > { %16894 = vst [vmem:[%s26012_s12 + $0x68] sm:$0xff] %v16785_v40  ;;  %v21528_v42 = vadd.f32 %v16074_v45, %v25879_v33  ;;  %v20526_v5 = vpop.f32.mrb[18].mxu0  ;;  %v16681_v33 = vld [vmem:[%s25997_s3 + $0x88] sm:$0xff] }
 0xcf5   : > { %v16573_v26 = vadd.f32 %v21527_v31, %v25334_v7  ;;  %v21529_v28 = vadd.f32 %v20526_v5, %v25881_v62  ;;  %v16077_v30 = vpop.f32.mrb[19].mxu0 }
 0xcf6   : > { %v16571_v56 = vadd.f32 %v21528_v42, %v25334_v7  ;;  %v21530_v10 = vadd.f32 %v16077_v30, %v25884_v59  ;;  %v16686_v59 = vld [vmem:[%s25997_s3 + $0xb0] sm:$0xff] }
 0xcf7   : > { %v16790_v15 = vadd.f32 %v16682_v16, %v16573_v26  ;;  %v16574_v58 = vadd.f32 %v21529_v28, %v25334_v7  ;;  %v16688_v28 = vld [vmem:[%s25997_s3 + $0xc0] sm:$0xff] }
 0xcf8   : > { %v16788_v19 = vadd.f32 %v16680_v27, %v16571_v56  ;;  %v16572_v25 = vadd.f32 %v21530_v10, %v25334_v7  ;;  %v16691_v10 = vld [vmem:[%s25997_s3 + $0xd8] sm:$0xff] }
 0xcf9   : > { %16899 = vst [vmem:[%s26012_s12 + $0x90] sm:$0xff] %v16790_v15  ;;  %v16791_v9 = vadd.f32 %v16683_v24, %v16574_v58 }
 0xcfa   : > { %16897 = vst [vmem:[%s26012_s12 + $0x80] sm:$0xff] %v16788_v19  ;;  %v16789_v62 = vadd.f32 %v16681_v33, %v16572_v25  ;;  %v20529_v0 = vpop.f32.mrb[20].mxu0 }
 0xcfb   : > { %16900 = vst [vmem:[%s26012_s12 + $0x98] sm:$0xff] %v16791_v9  ;;  %v21531_v51 = vadd.f32 %v20529_v0, %v25889_v38  ;;  %v16090_v8 = vpop.f32.mrb[21].mxu0 }
 0xcfc   : > { %16898 = vst [vmem:[%s26012_s12 + $0x88] sm:$0xff] %v16789_v62  ;;  %v21532_v14 = vadd.f32 %v16090_v8, %v25891_v37  ;;  %v20530_v50 = vpop.f32.mrb[22].mxu0  ;;  %v16685_v37 = vld [vmem:[%s25997_s3 + $0xa8] sm:$0xff] }
 0xcfd   : > { %v16577_v54 = vadd.f32 %v21531_v51, %v25334_v7  ;;  %v21533_v3 = vadd.f32 %v20530_v50, %v25893_v43  ;;  %v16093_v17 = vpop.f32.mrb[23].mxu0 }
 0xcfe   : > { %v16575_v39 = vadd.f32 %v21532_v14, %v25334_v7  ;;  %v21534_v38 = vadd.f32 %v16093_v17, %v25896_v52  ;;  %v16690_v52 = vld [vmem:[%s25997_s3 + $0xd0] sm:$0xff]  ;;  %v16692_v14 = vld [vmem:[%s25997_s3 + $0xe0] sm:$0xff] }
 0xcff   : > { %v16794_v29 = vadd.f32 %v16686_v59, %v16577_v54  ;;  %v16578_v1 = vadd.f32 %v21533_v3, %v25334_v7  ;;  %v16695_v3 = vld [vmem:[%s25997_s3 + $0xf8] sm:$0xff] }
 0xd00   : > { %v16792_v40 = vadd.f32 %v16684_v48, %v16575_v39  ;;  %v16576_v23 = vadd.f32 %v21534_v38, %v25334_v7 }
 0xd01   : > { %16903 = vst [vmem:[%s26012_s12 + $0xb0] sm:$0xff] %v16794_v29  ;;  %v16795_v31 = vadd.f32 %v16687_v49, %v16578_v1 }
 0xd02   : > { %16901 = vst [vmem:[%s26012_s12 + $0xa0] sm:$0xff] %v16792_v40  ;;  %v16793_v43 = vadd.f32 %v16685_v37, %v16576_v23  ;;  %v20533_v45 = vpop.f32.mrb[24].mxu0 }
 0xd03   : > { %16904 = vst [vmem:[%s26012_s12 + $0xb8] sm:$0xff] %v16795_v31  ;;  %v21535_v16 = vadd.f32 %v20533_v45, %v25901_v4  ;;  %v16106_v42 = vpop.f32.mrb[25].mxu0  ;;  %v16696_v45 = vld [vmem:[%s25997_s3 + $0x100] sm:$0xff] }
 0xd04   : > { %16902 = vst [vmem:[%s26012_s12 + $0xa8] sm:$0xff] %v16793_v43  ;;  %v21536_v5 = vadd.f32 %v16106_v42, %v25903_v32  ;;  %v20534_v26 = vpop.f32.mrb[26].mxu0  ;;  %v16689_v32 = vld [vmem:[%s25997_s3 + $0xc8] sm:$0xff] }
 0xd05   : > { %v16581_v27 = vadd.f32 %v21535_v16, %v25334_v7  ;;  %v21537_v30 = vadd.f32 %v20534_v26, %v25905_v34  ;;  %v16109_v56 = vpop.f32.mrb[27].mxu0 }
 0xd06   : > { %v16579_v24 = vadd.f32 %v21536_v5, %v25334_v7  ;;  %v21538_v4 = vadd.f32 %v16109_v56, %v25908_v63  ;;  %v16694_v63 = vld [vmem:[%s25997_s3 + $0xf0] sm:$0xff]  ;;  %v16699_v5 = vld [vmem:[%s25997_s3 + $0x118] sm:$0xff] }
 0xd07   : > { %v16798_v15 = vadd.f32 %v16690_v52, %v16581_v27  ;;  %v16582_v58 = vadd.f32 %v21537_v30, %v25334_v7 }
 0xd08   : > { %v16796_v33 = vadd.f32 %v16688_v28, %v16579_v24  ;;  %v16580_v19 = vadd.f32 %v21538_v4, %v25334_v7 }
 0xd09   : > { %16907 = vst [vmem:[%s26012_s12 + $0xd0] sm:$0xff] %v16798_v15  ;;  %v16799_v25 = vadd.f32 %v16691_v10, %v16582_v58 }
 0xd0a   : > { %16905 = vst [vmem:[%s26012_s12 + $0xc0] sm:$0xff] %v16796_v33  ;;  %v16797_v34 = vadd.f32 %v16689_v32, %v16580_v19  ;;  %v20537_v9 = vpop.f32.mrb[28].mxu0  ;;  %v16700_v33 = vld [vmem:[%s25997_s3 + $0x120] sm:$0xff] }
 0xd0b   : > { %16908 = vst [vmem:[%s26012_s12 + $0xd8] sm:$0xff] %v16799_v25  ;;  %v21539_v62 = vadd.f32 %v20537_v9, %v25913_v41  ;;  %v16122_v0 = vpop.f32.mrb[29].mxu0  ;;  %v16703_v9 = vld [vmem:[%s25997_s3 + $0x138] sm:$0xff] }
 0xd0c   : > { %16906 = vst [vmem:[%s26012_s12 + $0xc8] sm:$0xff] %v16797_v34  ;;  %v21540_v51 = vadd.f32 %v16122_v0, %v25915_v12  ;;  %v20538_v8 = vpop.f32.mrb[30].mxu0  ;;  %v16693_v12 = vld [vmem:[%s25997_s3 + $0xe8] sm:$0xff] }
 0xd0d   : > { %v16585_v59 = vadd.f32 %v21539_v62, %v25334_v7  ;;  %v21541_v50 = vadd.f32 %v20538_v8, %v25917_v11  ;;  %v16125_v54 = vpop.f32.mrb[31].mxu0 }
 0xd0e   : > { %v16583_v48 = vadd.f32 %v21540_v51, %v25334_v7  ;;  %v21542_v41 = vadd.f32 %v16125_v54, %v25920_v57  ;;  %v16698_v57 = vld [vmem:[%s25997_s3 + $0x110] sm:$0xff] }
 0xd0f   : > { %v16802_v17 = vadd.f32 %v16694_v63, %v16585_v59  ;;  %v16586_v39 = vadd.f32 %v21541_v50, %v25334_v7 }
 0xd10   : > { %v16800_v49 = vadd.f32 %v16692_v14, %v16583_v48  ;;  %v16584_v38 = vadd.f32 %v21542_v41, %v25334_v7  ;;  %v16704_v41 = vld [vmem:[%s25997_s3 + $0x140] sm:$0xff] }
 0xd11   : > { %16911 = vst [vmem:[%s26012_s12 + $0xf0] sm:$0xff] %v16802_v17  ;;  %v16803_v29 = vadd.f32 %v16695_v3, %v16586_v39 }
 0xd12   : > { %16909 = vst [vmem:[%s26012_s12 + $0xe0] sm:$0xff] %v16800_v49  ;;  %v16801_v11 = vadd.f32 %v16693_v12, %v16584_v38  ;;  %v20541_v1 = vpop.f32.mrb[32].mxu0  ;;  %v16707_v49 = vld [vmem:[%s25997_s3 + $0x158] sm:$0xff] }
 0xd13   : > { %16912 = vst [vmem:[%s26012_s12 + $0xf8] sm:$0xff] %v16803_v29  ;;  %v21543_v37 = vadd.f32 %v20541_v1, %v25925_v21  ;;  %v16138_v40 = vpop.f32.mrb[33].mxu0 }
 0xd14   : > { %16910 = vst [vmem:[%s26012_s12 + $0xe8] sm:$0xff] %v16801_v11  ;;  %v21544_v23 = vadd.f32 %v16138_v40, %v25927_v6  ;;  %v20542_v31 = vpop.f32.mrb[34].mxu0  ;;  %v16697_v6 = vld [vmem:[%s25997_s3 + $0x108] sm:$0xff] }
 0xd15   : > { %v16589_v43 = vadd.f32 %v21543_v37, %v25334_v7  ;;  %v21545_v16 = vadd.f32 %v20542_v31, %v25929_v47  ;;  %v16141_v42 = vpop.f32.mrb[35].mxu0 }
 0xd16   : > { %v16587_v52 = vadd.f32 %v21544_v23, %v25334_v7  ;;  %v21546_v21 = vadd.f32 %v16141_v42, %v25932_v36  ;;  %v16702_v36 = vld [vmem:[%s25997_s3 + $0x130] sm:$0xff] }
 0xd17   : > { %v16806_v26 = vadd.f32 %v16698_v57, %v16589_v43  ;;  %v16590_v27 = vadd.f32 %v21545_v16, %v25334_v7  ;;  %v16708_v16 = vld [vmem:[%s25997_s3 + $0x160] sm:$0xff] }
 0xd18   : > { %v16804_v28 = vadd.f32 %v16696_v45, %v16587_v52  ;;  %v16588_v30 = vadd.f32 %v21546_v21, %v25334_v7  ;;  %v16711_v21 = vld [vmem:[%s25997_s3 + $0x178] sm:$0xff] }
 0xd19   : > { %16915 = vst [vmem:[%s26012_s12 + $0x110] sm:$0xff] %v16806_v26  ;;  %v16807_v56 = vadd.f32 %v16699_v5, %v16590_v27 }
 0xd1a   : > { %16913 = vst [vmem:[%s26012_s12 + $0x100] sm:$0xff] %v16804_v28  ;;  %v16805_v47 = vadd.f32 %v16697_v6, %v16588_v30  ;;  %v20545_v24 = vpop.f32.mrb[36].mxu0 }
 0xd1b   : > { %16916 = vst [vmem:[%s26012_s12 + $0x118] sm:$0xff] %v16807_v56  ;;  %v21547_v10 = vadd.f32 %v20545_v24, %v25937_v44  ;;  %v16154_v4 = vpop.f32.mrb[37].mxu0 }
 0xd1c   : > { %16914 = vst [vmem:[%s26012_s12 + $0x108] sm:$0xff] %v16805_v47  ;;  %v21548_v15 = vadd.f32 %v16154_v4, %v25939_v61  ;;  %v20546_v58 = vpop.f32.mrb[38].mxu0  ;;  %v16701_v61 = vld [vmem:[%s25997_s3 + $0x128] sm:$0xff]  ;;  %v26529_v47 = vld [vmem:[#allocation66_spill] sm:$0xff]  ;;  %v26530_v4 = vld [vmem:[#allocation67_spill] sm:$0xff] }
 0xd1d   : > { %v16593_v32 = vadd.f32 %v21547_v10, %v25334_v7  ;;  %v21549_v19 = vadd.f32 %v20546_v58, %v25941_v22  ;;  %v16157_v25 = vpop.f32.mrb[39].mxu0 }
 0xd1e   : > { %v16591_v34 = vadd.f32 %v21548_v15, %v25334_v7  ;;  %v21550_v44 = vadd.f32 %v16157_v25, %v25944_v18  ;;  %v16706_v18 = vld [vmem:[%s25997_s3 + $0x150] sm:$0xff] }
 0xd1f   : > { %v16810_v62 = vadd.f32 %v16702_v36, %v16593_v32  ;;  %v16594_v0 = vadd.f32 %v21549_v19, %v25334_v7  ;;  %v16712_v32 = vld [vmem:[%s25997_s3 + $0x180] sm:$0xff] }
 0xd20   : > { %v16808_v63 = vadd.f32 %v16700_v33, %v16591_v34  ;;  %v16592_v51 = vadd.f32 %v21550_v44, %v25334_v7  ;;  %v26531_v33 = vld [vmem:[#allocation68_spill] sm:$0xff]  ;;  %v26532_v44 = vld [vmem:[#allocation69_spill] sm:$0xff] }
 0xd21   : > { %16919 = vst [vmem:[%s26012_s12 + $0x130] sm:$0xff] %v16810_v62  ;;  %v16811_v8 = vadd.f32 %v16703_v9, %v16594_v0  ;;  %v16715_v9 = vld [vmem:[%s25997_s3 + $0x198] sm:$0xff] }
 0xd22   : > { %16917 = vst [vmem:[%s26012_s12 + $0x120] sm:$0xff] %v16808_v63  ;;  %v16809_v22 = vadd.f32 %v16701_v61, %v16592_v51  ;;  %v20549_v59 = vpop.f32.mrb[40].mxu0  ;;  %v16713_v63 = vld [vmem:[%s25997_s3 + $0x188] sm:$0xff] }
 0xd23   : > { %16920 = vst [vmem:[%s26012_s12 + $0x138] sm:$0xff] %v16811_v8  ;;  %v21551_v14 = vadd.f32 %v20549_v59, %v25949_v53  ;;  %v16170_v50 = vpop.f32.mrb[41].mxu0 }
 0xd24   : > { %16918 = vst [vmem:[%s26012_s12 + $0x128] sm:$0xff] %v16809_v22  ;;  %v21552_v54 = vadd.f32 %v16170_v50, %v25951_v2  ;;  %v20550_v48 = vpop.f32.mrb[42].mxu0  ;;  %v16705_v2 = vld [vmem:[%s25997_s3 + $0x148] sm:$0xff] }
 0xd25   : > { %v16597_v3 = vadd.f32 %v21551_v14, %v25334_v7  ;;  %v21553_v17 = vadd.f32 %v20550_v48, %v25953_v20  ;;  %v16173_v39 = vpop.f32.mrb[43].mxu0 }
 0xd26   : > { %v16595_v12 = vadd.f32 %v21552_v54, %v25334_v7  ;;  %v21554_v53 = vadd.f32 %v16173_v39, %v25956_v60  ;;  %v16710_v60 = vld [vmem:[%s25997_s3 + $0x170] sm:$0xff]  ;;  %v26533_v54 = vld [vmem:[#allocation70_spill] sm:$0xff]  ;;  %v26534_v39 = vld [vmem:[#allocation71_spill] sm:$0xff] }
 0xd27   : > { %v16814_v38 = vadd.f32 %v16706_v18, %v16597_v3  ;;  %v16598_v29 = vadd.f32 %v21553_v17, %v25334_v7  ;;  %v16718_v17 = vld [vmem:[%s25997_s3 + $0x1b0] sm:$0xff] }
 0xd28   : > { %v16812_v11 = vadd.f32 %v16704_v41, %v16595_v12  ;;  %v16596_v1 = vadd.f32 %v21554_v53, %v25334_v7 }
 0xd29   : > { %16923 = vst [vmem:[%s26012_s12 + $0x150] sm:$0xff] %v16814_v38  ;;  %v16815_v37 = vadd.f32 %v16707_v49, %v16598_v29  ;;  %v16716_v29 = vld [vmem:[%s25997_s3 + $0x1a0] sm:$0xff] }
 0xd2a   : > { %16921 = vst [vmem:[%s26012_s12 + $0x140] sm:$0xff] %v16812_v11  ;;  %v16813_v20 = vadd.f32 %v16705_v2, %v16596_v1  ;;  %v20553_v40 = vpop.f32.mrb[44].mxu0  ;;  %v26535_v2 = vld [vmem:[#allocation72_spill] sm:$0xff] }
 0xd2b   : > { %16924 = vst [vmem:[%s26012_s12 + $0x158] sm:$0xff] %v16815_v37  ;;  %v21555_v57 = vadd.f32 %v20553_v40, %v25961_v55  ;;  %v16186_v23 = vpop.f32.mrb[45].mxu0  ;;  %v26536_v40 = vld [vmem:[#allocation73_spill] sm:$0xff] }
 0xd2c   : > { %16922 = vst [vmem:[%s26012_s12 + $0x148] sm:$0xff] %v16813_v20  ;;  %v21556_v31 = vadd.f32 %v16186_v23, %v25963_v46  ;;  %v20554_v43 = vpop.f32.mrb[46].mxu0  ;;  %v16709_v46 = vld [vmem:[%s25997_s3 + $0x168] sm:$0xff]  ;;  %v16719_v20 = vld [vmem:[%s25997_s3 + $0x1b8] sm:$0xff] }
 0xd2d   : > { %v16601_v45 = vadd.f32 %v21555_v57, %v25334_v7  ;;  %v21557_v42 = vadd.f32 %v20554_v43, %v25965_v13  ;;  %v16189_v52 = vpop.f32.mrb[47].mxu0 }
 0xd2e   : > { %v16599_v5 = vadd.f32 %v21556_v31, %v25334_v7  ;;  %v21558_v55 = vadd.f32 %v16189_v52, %v25968_v35  ;;  %v16714_v35 = vld [vmem:[%s25997_s3 + $0x190] sm:$0xff]  ;;  %v16717_v31 = vld [vmem:[%s25997_s3 + $0x1a8] sm:$0xff] }
 0xd2f   : > { %v16818_v26 = vadd.f32 %v16710_v60, %v16601_v45  ;;  %v16602_v27 = vadd.f32 %v21557_v42, %v25334_v7 }
 0xd30   : > { %v16816_v6 = vadd.f32 %v16708_v16, %v16599_v5  ;;  %v16600_v28 = vadd.f32 %v21558_v55, %v25334_v7 }
 0xd31   : > { %16927 = vst [vmem:[%s26012_s12 + $0x170] sm:$0xff] %v16818_v26  ;;  %v16819_v30 = vadd.f32 %v16711_v21, %v16602_v27 }
 0xd32   : > { %16925 = vst [vmem:[%s26012_s12 + $0x160] sm:$0xff] %v16816_v6  ;;  %v16817_v13 = vadd.f32 %v16709_v46, %v16600_v28  ;;  %v20557_v56 = vpop.f32.mrb[48].mxu0  ;;  %v16722_v46 = vld [vmem:[%s25997_s3 + $0x1d0] sm:$0xff] }
 0xd33   : > { %16928 = vst [vmem:[%s26012_s12 + $0x178] sm:$0xff] %v16819_v30  ;;  %v21559_v24 = vadd.f32 %v20557_v56, %v26529_v47  ;;  %v16202_v10 = vpop.f32.mrb[49].mxu0  ;;  %v16720_v56 = vld [vmem:[%s25997_s3 + $0x1c0] sm:$0xff] }
 0xd34   : > { %16926 = vst [vmem:[%s26012_s12 + $0x168] sm:$0xff] %v16817_v13  ;;  %v21560_v36 = vadd.f32 %v16202_v10, %v26530_v4  ;;  %v20558_v15 = vpop.f32.mrb[50].mxu0 }
 0xd35   : > { %v16605_v58 = vadd.f32 %v21559_v24, %v25334_v7  ;;  %v21561_v19 = vadd.f32 %v20558_v15, %v26531_v33  ;;  %v16205_v25 = vpop.f32.mrb[51].mxu0 }
 0xd36   : > { %v16603_v34 = vadd.f32 %v21560_v36, %v25334_v7  ;;  %v21562_v62 = vadd.f32 %v16205_v25, %v26532_v44 }
 0xd37   : > { %v16822_v0 = vadd.f32 %v16714_v35, %v16605_v58  ;;  %v16606_v61 = vadd.f32 %v21561_v19, %v25334_v7  ;;  %v16723_v35 = vld [vmem:[%s25997_s3 + $0x1d8] sm:$0xff]  ;;  %v16721_v58 = vld [vmem:[%s25997_s3 + $0x1c8] sm:$0xff] }
 0xd38   : > { %v16820_v51 = vadd.f32 %v16712_v32, %v16603_v34  ;;  %v16604_v8 = vadd.f32 %v21562_v62, %v25334_v7 }
 0xd39   : > { %16931 = vst [vmem:[%s26012_s12 + $0x190] sm:$0xff] %v16822_v0  ;;  %v16823_v22 = vadd.f32 %v16715_v9, %v16606_v61  ;;  %v20069_v59 = vpop.f32.mrb[56].mxu1 }
 0xd3a   : > { %16929 = vst [vmem:[%s26012_s12 + $0x180] sm:$0xff] %v16820_v51  ;;  %v16821_v14 = vadd.f32 %v16713_v63, %v16604_v8  ;;  %v20561_v50 = vpop.f32.mrb[52].mxu0  ;;  %v13446_v18 = vpop.f32.mrb[57].mxu1  ;;  %v16726_v63 = vld [vmem:[%s25997_s3 + $0x1f0] sm:$0xff] }
 0xd3b   : > { %16932 = vst [vmem:[%s26012_s12 + $0x198] sm:$0xff] %v16823_v22  ;;  %v21563_v48 = vadd.f32 %v20561_v50, %v26533_v54  ;;  %v16218_v3 = vpop.f32.mrb[53].mxu0  ;;  %v20070_v41 = vpop.f32.mrb[58].mxu1 }
 0xd3c   : > { %16930 = vst [vmem:[%s26012_s12 + $0x188] sm:$0xff] %v16821_v14  ;;  %v21564_v12 = vadd.f32 %v16218_v3, %v26534_v39  ;;  %v20562_v49 = vpop.f32.mrb[54].mxu0  ;;  %v13449_v53 = vpop.f32.mrb[59].mxu1  ;;  %v16724_v14 = vld [vmem:[%s25997_s3 + $0x1e0] sm:$0xff]  ;;  %v16725_v39 = vld [vmem:[%s25997_s3 + $0x1e8] sm:$0xff] }
 0xd3d   : > { %v16609_v38 = vadd.f32 %v21563_v48, %v25334_v7  ;;  %v21565_v11 = vadd.f32 %v20562_v49, %v26535_v2  ;;  %v16221_v1 = vpop.f32.mrb[55].mxu0  ;;  %v16727_v48 = vld [vmem:[%s25997_s3 + $0x1f8] sm:$0xff] }
 0xd3e   : > { %v16607_v37 = vadd.f32 %v21564_v12, %v25334_v7  ;;  %v21566_v57 = vadd.f32 %v16221_v1, %v26536_v40  ;;  %v16730_v40 = vld [vmem:[%s25997_s3 + $0x210] sm:$0xff] }
 0xd3f   : > { %v16826_v23 = vadd.f32 %v16718_v17, %v16609_v38  ;;  %v16610_v60 = vadd.f32 %v21565_v11, %v25334_v7 }
 0xd40   : > { %v16824_v43 = vadd.f32 %v16716_v29, %v16607_v37  ;;  %v16608_v45 = vadd.f32 %v21566_v57, %v25334_v7 }
 0xd41   : > { %16935 = vst [vmem:[%s26012_s12 + $0x1b0] sm:$0xff] %v16826_v23  ;;  %v16827_v16 = vadd.f32 %v16719_v20, %v16610_v60  ;;  %v20073_v42 = vpop.f32.mrb[60].mxu1 }
 0xd42   : > { %16933 = vst [vmem:[%s26012_s12 + $0x1a0] sm:$0xff] %v16824_v43  ;;  %v16825_v52 = vadd.f32 %v16717_v31, %v16608_v45  ;;  %v20565_v5 = vpop.f32.mrb[56].mxu0  ;;  %v13462_v21 = vpop.f32.mrb[61].mxu1  ;;  %v16728_v43 = vld [vmem:[%s25997_s3 + $0x200] sm:$0xff] }
 0xd43   : > { %16936 = vst [vmem:[%s26012_s12 + $0x1b8] sm:$0xff] %v16827_v16  ;;  %v21567_v55 = vadd.f32 %v20565_v5, %v20069_v59  ;;  %v16234_v26 = vpop.f32.mrb[57].mxu0  ;;  %v20074_v27 = vpop.f32.mrb[62].mxu1 }
 0xd44   : > { %16934 = vst [vmem:[%s26012_s12 + $0x1a8] sm:$0xff] %v16825_v52  ;;  %v21568_v6 = vadd.f32 %v16234_v26, %v13446_v18  ;;  %v20566_v28 = vpop.f32.mrb[58].mxu0  ;;  %v13465_v30 = vpop.f32.mrb[63].mxu1  ;;  %v16731_v52 = vld [vmem:[%s25997_s3 + $0x218] sm:$0xff]  ;;  %v16729_v26 = vld [vmem:[%s25997_s3 + $0x208] sm:$0xff] }
 0xd45   : > { %v16613_v13 = vadd.f32 %v21567_v55, %v25334_v7  ;;  %v21569_v47 = vadd.f32 %v20566_v28, %v20070_v41  ;;  %v16237_v24 = vpop.f32.mrb[59].mxu0 }
 0xd46   : > { %v16611_v10 = vadd.f32 %v21568_v6, %v25334_v7  ;;  %v21570_v4 = vadd.f32 %v16237_v24, %v13449_v53 }
 0xd47   : > { %v16830_v36 = vadd.f32 %v16722_v46, %v16613_v13  ;;  %v16614_v15 = vadd.f32 %v21569_v47, %v25334_v7 }
 0xd48   : > { %v16828_v32 = vadd.f32 %v16720_v56, %v16611_v10  ;;  %v16612_v33 = vadd.f32 %v21570_v4, %v25334_v7 }
 0xd49   : > { %16939 = vst [vmem:[%s26012_s12 + $0x1d0] sm:$0xff] %v16830_v36  ;;  %v16831_v19 = vadd.f32 %v16723_v35, %v16614_v15  ;;  %v20077_v25 = vpop.f32.mrb[64].mxu1  ;;  %v16734_v35 = vld [vmem:[%s25997_s3 + $0x230] sm:$0xff] }
 0xd4a   : > { %16937 = vst [vmem:[%s26012_s12 + $0x1c0] sm:$0xff] %v16828_v32  ;;  %v16829_v34 = vadd.f32 %v16721_v58, %v16612_v33  ;;  %v20569_v9 = vpop.f32.mrb[60].mxu0  ;;  %v13478_v44 = vpop.f32.mrb[65].mxu1  ;;  %v16732_v32 = vld [vmem:[%s25997_s3 + $0x220] sm:$0xff] }
 0xd4b   : > { %16940 = vst [vmem:[%s26012_s12 + $0x1d8] sm:$0xff] %v16831_v19  ;;  %v21571_v62 = vadd.f32 %v20569_v9, %v20073_v42  ;;  %v16250_v0 = vpop.f32.mrb[61].mxu0  ;;  %v20078_v61 = vpop.f32.mrb[66].mxu1 }
 0xd4c   : > { %16938 = vst [vmem:[%s26012_s12 + $0x1c8] sm:$0xff] %v16829_v34  ;;  %v21572_v51 = vadd.f32 %v16250_v0, %v13462_v21  ;;  %v20570_v8 = vpop.f32.mrb[62].mxu0  ;;  %v13481_v22 = vpop.f32.mrb[67].mxu1  ;;  %v16735_v34 = vld [vmem:[%s25997_s3 + $0x238] sm:$0xff]  ;;  %v16733_v0 = vld [vmem:[%s25997_s3 + $0x228] sm:$0xff] }
 0xd4d   : > { %v16617_v59 = vadd.f32 %v21571_v62, %v25334_v7  ;;  %v21573_v50 = vadd.f32 %v20570_v8, %v20074_v27  ;;  %v16253_v18 = vpop.f32.mrb[63].mxu0 }
 0xd4e   : > { %v16615_v54 = vadd.f32 %v21572_v51, %v25334_v7  ;;  %v21574_v3 = vadd.f32 %v16253_v18, %v13465_v30 }
 0xd4f   : > { %v16834_v41 = vadd.f32 %v16726_v63, %v16617_v59  ;;  %v16618_v17 = vadd.f32 %v21573_v50, %v25334_v7 }
 0xd50   : > { %v16832_v12 = vadd.f32 %v16724_v14, %v16615_v54  ;;  %v16616_v49 = vadd.f32 %v21574_v3, %v25334_v7 }
 0xd51   : > { %16943 = vst [vmem:[%s26012_s12 + $0x1f0] sm:$0xff] %v16834_v41  ;;  %v16835_v53 = vadd.f32 %v16727_v48, %v16618_v17  ;;  %v20081_v38 = vpop.f32.mrb[68].mxu1  ;;  %v16738_v48 = vld [vmem:[%s25997_s3 + $0x250] sm:$0xff] }
 0xd52   : > { %16941 = vst [vmem:[%s26012_s12 + $0x1e0] sm:$0xff] %v16832_v12  ;;  %v16833_v29 = vadd.f32 %v16725_v39, %v16616_v49  ;;  %v20573_v2 = vpop.f32.mrb[64].mxu0  ;;  %v13494_v11 = vpop.f32.mrb[69].mxu1  ;;  %v16736_v12 = vld [vmem:[%s25997_s3 + $0x240] sm:$0xff] }
 0xd53   : > { %16944 = vst [vmem:[%s26012_s12 + $0x1f8] sm:$0xff] %v16835_v53  ;;  %v21575_v1 = vadd.f32 %v20573_v2, %v20077_v25  ;;  %v16266_v37 = vpop.f32.mrb[65].mxu0  ;;  %v20082_v20 = vpop.f32.mrb[70].mxu1 }
 0xd54   : > { %16942 = vst [vmem:[%s26012_s12 + $0x1e8] sm:$0xff] %v16833_v29  ;;  %v21576_v57 = vadd.f32 %v16266_v37, %v13478_v44  ;;  %v20574_v23 = vpop.f32.mrb[66].mxu0  ;;  %v13497_v60 = vpop.f32.mrb[71].mxu1  ;;  %v16739_v29 = vld [vmem:[%s25997_s3 + $0x258] sm:$0xff]  ;;  %v16737_v37 = vld [vmem:[%s25997_s3 + $0x248] sm:$0xff] }
 0xd55   : > { %v16621_v31 = vadd.f32 %v21575_v1, %v25334_v7  ;;  %v21577_v45 = vadd.f32 %v20574_v23, %v20078_v61  ;;  %v16269_v16 = vpop.f32.mrb[67].mxu0 }
 0xd56   : > { %v16619_v42 = vadd.f32 %v21576_v57, %v25334_v7  ;;  %v21578_v5 = vadd.f32 %v16269_v16, %v13481_v22 }
 0xd57   : > { %v16838_v21 = vadd.f32 %v16730_v40, %v16621_v31  ;;  %v16622_v55 = vadd.f32 %v21577_v45, %v25334_v7 }
 0xd58   : > { %v16836_v27 = vadd.f32 %v16728_v43, %v16619_v42  ;;  %v16620_v46 = vadd.f32 %v21578_v5, %v25334_v7 }
 0xd59   : > { %16947 = vst [vmem:[%s26012_s12 + $0x210] sm:$0xff] %v16838_v21  ;;  %v16839_v6 = vadd.f32 %v16731_v52, %v16622_v55  ;;  %v20085_v28 = vpop.f32.mrb[72].mxu1  ;;  %v16742_v52 = vld [vmem:[%s25997_s3 + $0x270] sm:$0xff] }
 0xd5a   : > { %16945 = vst [vmem:[%s26012_s12 + $0x200] sm:$0xff] %v16836_v27  ;;  %v16837_v30 = vadd.f32 %v16729_v26, %v16620_v46  ;;  %v20577_v13 = vpop.f32.mrb[68].mxu0  ;;  %v13510_v56 = vpop.f32.mrb[73].mxu1  ;;  %v16740_v27 = vld [vmem:[%s25997_s3 + $0x260] sm:$0xff] }
 0xd5b   : > { %16948 = vst [vmem:[%s26012_s12 + $0x218] sm:$0xff] %v16839_v6  ;;  %v21579_v47 = vadd.f32 %v20577_v13, %v20081_v38  ;;  %v16282_v24 = vpop.f32.mrb[69].mxu0  ;;  %v20086_v10 = vpop.f32.mrb[74].mxu1 }
 0xd5c   : > { %16946 = vst [vmem:[%s26012_s12 + $0x208] sm:$0xff] %v16837_v30  ;;  %v21580_v4 = vadd.f32 %v16282_v24, %v13494_v11  ;;  %v20578_v36 = vpop.f32.mrb[70].mxu0  ;;  %v13513_v15 = vpop.f32.mrb[75].mxu1  ;;  %v16743_v30 = vld [vmem:[%s25997_s3 + $0x278] sm:$0xff]  ;;  %v16741_v24 = vld [vmem:[%s25997_s3 + $0x268] sm:$0xff] }
 0xd5d   : > { %v16625_v58 = vadd.f32 %v21579_v47, %v25334_v7  ;;  %v21581_v33 = vadd.f32 %v20578_v36, %v20082_v20  ;;  %v16285_v19 = vpop.f32.mrb[71].mxu0 }
 0xd5e   : > { %v16623_v25 = vadd.f32 %v21580_v4, %v25334_v7  ;;  %v21582_v9 = vadd.f32 %v16285_v19, %v13497_v60 }
 0xd5f   : > { %v16842_v44 = vadd.f32 %v16734_v35, %v16625_v58  ;;  %v16626_v62 = vadd.f32 %v21581_v33, %v25334_v7 }
 0xd60   : > { %v16840_v61 = vadd.f32 %v16732_v32, %v16623_v25  ;;  %v16624_v63 = vadd.f32 %v21582_v9, %v25334_v7 }
 0xd61   : > { %16951 = vst [vmem:[%s26012_s12 + $0x230] sm:$0xff] %v16842_v44  ;;  %v16843_v51 = vadd.f32 %v16735_v34, %v16626_v62  ;;  %v20089_v8 = vpop.f32.mrb[76].mxu1  ;;  %v16746_v34 = vld [vmem:[%s25997_s3 + $0x290] sm:$0xff] }
 0xd62   : > { %16949 = vst [vmem:[%s26012_s12 + $0x220] sm:$0xff] %v16840_v61  ;;  %v16841_v22 = vadd.f32 %v16733_v0, %v16624_v63  ;;  %v20581_v59 = vpop.f32.mrb[72].mxu0  ;;  %v13526_v14 = vpop.f32.mrb[77].mxu1  ;;  %v16744_v61 = vld [vmem:[%s25997_s3 + $0x280] sm:$0xff] }
 0xd63   : > { %16952 = vst [vmem:[%s26012_s12 + $0x238] sm:$0xff] %v16843_v51  ;;  %v21583_v50 = vadd.f32 %v20581_v59, %v20085_v28  ;;  %v16298_v18 = vpop.f32.mrb[73].mxu0  ;;  %v20090_v54 = vpop.f32.mrb[78].mxu1 }
 0xd64   : > { %16950 = vst [vmem:[%s26012_s12 + $0x228] sm:$0xff] %v16841_v22  ;;  %v21584_v3 = vadd.f32 %v16298_v18, %v13510_v56  ;;  %v20582_v41 = vpop.f32.mrb[74].mxu0  ;;  %v13529_v17 = vpop.f32.mrb[79].mxu1  ;;  %v16747_v22 = vld [vmem:[%s25997_s3 + $0x298] sm:$0xff]  ;;  %v16745_v18 = vld [vmem:[%s25997_s3 + $0x288] sm:$0xff] }
 0xd65   : > { %v16629_v39 = vadd.f32 %v21583_v50, %v25334_v7  ;;  %v21585_v49 = vadd.f32 %v20582_v41, %v20086_v10  ;;  %v16301_v53 = vpop.f32.mrb[75].mxu0 }
 0xd66   : > { %v16627_v38 = vadd.f32 %v21584_v3, %v25334_v7  ;;  %v21586_v2 = vadd.f32 %v16301_v53, %v13513_v15 }
 0xd67   : > { %v16846_v11 = vadd.f32 %v16738_v48, %v16629_v39  ;;  %v16630_v1 = vadd.f32 %v21585_v49, %v25334_v7 }
 0xd68   : > { %v16844_v20 = vadd.f32 %v16736_v12, %v16627_v38  ;;  %v16628_v40 = vadd.f32 %v21586_v2, %v25334_v7 }
 0xd69   : > { %16955 = vst [vmem:[%s26012_s12 + $0x250] sm:$0xff] %v16846_v11  ;;  %v16847_v57 = vadd.f32 %v16739_v29, %v16630_v1  ;;  %v20093_v23 = vpop.f32.mrb[80].mxu1  ;;  %v16750_v29 = vld [vmem:[%s25997_s3 + $0x2b0] sm:$0xff] }
 0xd6a   : > { %16953 = vst [vmem:[%s26012_s12 + $0x240] sm:$0xff] %v16844_v20  ;;  %v16845_v60 = vadd.f32 %v16737_v37, %v16628_v40  ;;  %v20585_v31 = vpop.f32.mrb[76].mxu0  ;;  %v13542_v43 = vpop.f32.mrb[81].mxu1  ;;  %v16748_v20 = vld [vmem:[%s25997_s3 + $0x2a0] sm:$0xff] }
 0xd6b   : > { %16956 = vst [vmem:[%s26012_s12 + $0x258] sm:$0xff] %v16847_v57  ;;  %v21587_v45 = vadd.f32 %v20585_v31, %v20089_v8  ;;  %v16314_v16 = vpop.f32.mrb[77].mxu0  ;;  %v20094_v42 = vpop.f32.mrb[82].mxu1 }
 0xd6c   : > { %16954 = vst [vmem:[%s26012_s12 + $0x248] sm:$0xff] %v16845_v60  ;;  %v21588_v5 = vadd.f32 %v16314_v16, %v13526_v14  ;;  %v20586_v21 = vpop.f32.mrb[78].mxu0  ;;  %v13545_v55 = vpop.f32.mrb[83].mxu1  ;;  %v16751_v60 = vld [vmem:[%s25997_s3 + $0x2b8] sm:$0xff]  ;;  %v16749_v16 = vld [vmem:[%s25997_s3 + $0x2a8] sm:$0xff] }
 0xd6d   : > { %v16633_v26 = vadd.f32 %v21587_v45, %v25334_v7  ;;  %v21589_v46 = vadd.f32 %v20586_v21, %v20090_v54  ;;  %v16317_v6 = vpop.f32.mrb[79].mxu0 }
 0xd6e   : > { %v16631_v28 = vadd.f32 %v21588_v5, %v25334_v7  ;;  %v21590_v13 = vadd.f32 %v16317_v6, %v13529_v17 }
 0xd6f   : > { %v16850_v56 = vadd.f32 %v16742_v52, %v16633_v26  ;;  %v16634_v47 = vadd.f32 %v21589_v46, %v25334_v7 }
 0xd70   : > { %v16848_v10 = vadd.f32 %v16740_v27, %v16631_v28  ;;  %v16632_v35 = vadd.f32 %v21590_v13, %v25334_v7 }
 0xd71   : > { %16959 = vst [vmem:[%s26012_s12 + $0x270] sm:$0xff] %v16850_v56  ;;  %v16851_v4 = vadd.f32 %v16743_v30, %v16634_v47  ;;  %v20097_v36 = vpop.f32.mrb[84].mxu1  ;;  %v16754_v30 = vld [vmem:[%s25997_s3 + $0x2d0] sm:$0xff] }
 0xd72   : > { %16957 = vst [vmem:[%s26012_s12 + $0x260] sm:$0xff] %v16848_v10  ;;  %v16849_v15 = vadd.f32 %v16741_v24, %v16632_v35  ;;  %v20589_v58 = vpop.f32.mrb[80].mxu0  ;;  %v13558_v32 = vpop.f32.mrb[85].mxu1  ;;  %v16752_v10 = vld [vmem:[%s25997_s3 + $0x2c0] sm:$0xff] }
 0xd73   : > { %16960 = vst [vmem:[%s26012_s12 + $0x278] sm:$0xff] %v16851_v4  ;;  %v21591_v33 = vadd.f32 %v20589_v58, %v20093_v23  ;;  %v16330_v19 = vpop.f32.mrb[81].mxu0  ;;  %v20098_v25 = vpop.f32.mrb[86].mxu1 }
 0xd74   : > { %16958 = vst [vmem:[%s26012_s12 + $0x268] sm:$0xff] %v16849_v15  ;;  %v21592_v9 = vadd.f32 %v16330_v19, %v13542_v43  ;;  %v20590_v44 = vpop.f32.mrb[82].mxu0  ;;  %v13561_v62 = vpop.f32.mrb[87].mxu1  ;;  %v16755_v15 = vld [vmem:[%s25997_s3 + $0x2d8] sm:$0xff]  ;;  %v16753_v19 = vld [vmem:[%s25997_s3 + $0x2c8] sm:$0xff] }
 0xd75   : > { %v16637_v0 = vadd.f32 %v21591_v33, %v25334_v7  ;;  %v21593_v63 = vadd.f32 %v20590_v44, %v20094_v42  ;;  %v16333_v51 = vpop.f32.mrb[83].mxu0 }
 0xd76   : > { %v16635_v8 = vadd.f32 %v21592_v9, %v25334_v7  ;;  %v21594_v59 = vadd.f32 %v16333_v51, %v13545_v55 }
 0xd77   : > { %v16854_v14 = vadd.f32 %v16746_v34, %v16637_v0  ;;  %v16638_v50 = vadd.f32 %v21593_v63, %v25334_v7 }
 0xd78   : > { %v16852_v54 = vadd.f32 %v16744_v61, %v16635_v8  ;;  %v16636_v48 = vadd.f32 %v21594_v59, %v25334_v7 }
 0xd79   : > { %16963 = vst [vmem:[%s26012_s12 + $0x290] sm:$0xff] %v16854_v14  ;;  %v16855_v3 = vadd.f32 %v16747_v22, %v16638_v50  ;;  %v20101_v41 = vpop.f32.mrb[88].mxu1  ;;  %v16758_v22 = vld [vmem:[%s25997_s3 + $0x2f0] sm:$0xff] }
 0xd7a   : > { %16961 = vst [vmem:[%s26012_s12 + $0x280] sm:$0xff] %v16852_v54  ;;  %v16853_v17 = vadd.f32 %v16745_v18, %v16636_v48  ;;  %v20593_v39 = vpop.f32.mrb[84].mxu0  ;;  %v13574_v12 = vpop.f32.mrb[89].mxu1  ;;  %v16756_v54 = vld [vmem:[%s25997_s3 + $0x2e0] sm:$0xff] }
 0xd7b   : > { %16964 = vst [vmem:[%s26012_s12 + $0x298] sm:$0xff] %v16855_v3  ;;  %v21595_v49 = vadd.f32 %v20593_v39, %v20097_v36  ;;  %v16346_v53 = vpop.f32.mrb[85].mxu0  ;;  %v20102_v38 = vpop.f32.mrb[90].mxu1 }
 0xd7c   : > { %16962 = vst [vmem:[%s26012_s12 + $0x288] sm:$0xff] %v16853_v17  ;;  %v21596_v2 = vadd.f32 %v16346_v53, %v13558_v32  ;;  %v20594_v11 = vpop.f32.mrb[86].mxu0  ;;  %v13577_v1 = vpop.f32.mrb[91].mxu1  ;;  %v16759_v17 = vld [vmem:[%s25997_s3 + $0x2f8] sm:$0xff]  ;;  %v16757_v53 = vld [vmem:[%s25997_s3 + $0x2e8] sm:$0xff] }
 0xd7d   : > { %v16641_v37 = vadd.f32 %v21595_v49, %v25334_v7  ;;  %v21597_v40 = vadd.f32 %v20594_v11, %v20098_v25  ;;  %v16349_v57 = vpop.f32.mrb[87].mxu0 }
 0xd7e   : > { %v16639_v23 = vadd.f32 %v21596_v2, %v25334_v7  ;;  %v21598_v31 = vadd.f32 %v16349_v57, %v13561_v62 }
 0xd7f   : > { %v16858_v43 = vadd.f32 %v16750_v29, %v16641_v37  ;;  %v16642_v45 = vadd.f32 %v21597_v40, %v25334_v7 }
 0xd80   : > { %v16856_v42 = vadd.f32 %v16748_v20, %v16639_v23  ;;  %v16640_v52 = vadd.f32 %v21598_v31, %v25334_v7 }
 0xd81   : > { %16967 = vst [vmem:[%s26012_s12 + $0x2b0] sm:$0xff] %v16858_v43  ;;  %v16859_v5 = vadd.f32 %v16751_v60, %v16642_v45  ;;  %v20105_v21 = vpop.f32.mrb[92].mxu1  ;;  %v16762_v60 = vld [vmem:[%s25997_s3 + $0x310] sm:$0xff] }
 0xd82   : > { %16965 = vst [vmem:[%s26012_s12 + $0x2a0] sm:$0xff] %v16856_v42  ;;  %v16857_v55 = vadd.f32 %v16749_v16, %v16640_v52  ;;  %v20597_v26 = vpop.f32.mrb[88].mxu0  ;;  %v13590_v27 = vpop.f32.mrb[93].mxu1  ;;  %v16760_v42 = vld [vmem:[%s25997_s3 + $0x300] sm:$0xff] }
 0xd83   : > { %16968 = vst [vmem:[%s26012_s12 + $0x2b8] sm:$0xff] %v16859_v5  ;;  %v21599_v46 = vadd.f32 %v20597_v26, %v20101_v41  ;;  %v16362_v6 = vpop.f32.mrb[89].mxu0  ;;  %v20106_v28 = vpop.f32.mrb[94].mxu1 }
 0xd84   : > { %16966 = vst [vmem:[%s26012_s12 + $0x2a8] sm:$0xff] %v16857_v55  ;;  %v21600_v13 = vadd.f32 %v16362_v6, %v13574_v12  ;;  %v20598_v56 = vpop.f32.mrb[90].mxu0  ;;  %v13593_v47 = vpop.f32.mrb[95].mxu1  ;;  %v16763_v55 = vld [vmem:[%s25997_s3 + $0x318] sm:$0xff]  ;;  %v16761_v6 = vld [vmem:[%s25997_s3 + $0x308] sm:$0xff] }
 0xd85   : > { %v16645_v24 = vadd.f32 %v21599_v46, %v25334_v7  ;;  %v21601_v35 = vadd.f32 %v20598_v56, %v20102_v38  ;;  %v16365_v4 = vpop.f32.mrb[91].mxu0 }
 0xd86   : > { %v16643_v36 = vadd.f32 %v21600_v13, %v25334_v7  ;;  %v21602_v58 = vadd.f32 %v16365_v4, %v13577_v1 }
 0xd87   : > { %v16862_v32 = vadd.f32 %v16754_v30, %v16645_v24  ;;  %v16646_v33 = vadd.f32 %v21601_v35, %v25334_v7 }
 0xd88   : > { %v16860_v25 = vadd.f32 %v16752_v10, %v16643_v36  ;;  %v16644_v34 = vadd.f32 %v21602_v58, %v25334_v7 }
 0xd89   : > { %16971 = vst [vmem:[%s26012_s12 + $0x2d0] sm:$0xff] %v16862_v32  ;;  %v16863_v9 = vadd.f32 %v16755_v15, %v16646_v33  ;;  %v20109_v44 = vpop.f32.mrb[96].mxu1  ;;  %v16766_v15 = vld [vmem:[%s25997_s3 + $0x330] sm:$0xff] }
 0xd8a   : > { %16969 = vst [vmem:[%s26012_s12 + $0x2c0] sm:$0xff] %v16860_v25  ;;  %v16861_v62 = vadd.f32 %v16753_v19, %v16644_v34  ;;  %v20601_v0 = vpop.f32.mrb[92].mxu0  ;;  %v13606_v61 = vpop.f32.mrb[97].mxu1  ;;  %v16764_v25 = vld [vmem:[%s25997_s3 + $0x320] sm:$0xff] }
 0xd8b   : > { %16972 = vst [vmem:[%s26012_s12 + $0x2d8] sm:$0xff] %v16863_v9  ;;  %v21603_v63 = vadd.f32 %v20601_v0, %v20105_v21  ;;  %v16378_v51 = vpop.f32.mrb[93].mxu0  ;;  %v20110_v8 = vpop.f32.mrb[98].mxu1 }
 0xd8c   : > { %16970 = vst [vmem:[%s26012_s12 + $0x2c8] sm:$0xff] %v16861_v62  ;;  %v21604_v59 = vadd.f32 %v16378_v51, %v13590_v27  ;;  %v20602_v14 = vpop.f32.mrb[94].mxu0  ;;  %v13609_v50 = vpop.f32.mrb[99].mxu1  ;;  %v16767_v62 = vld [vmem:[%s25997_s3 + $0x338] sm:$0xff]  ;;  %v16765_v51 = vld [vmem:[%s25997_s3 + $0x328] sm:$0xff] }
 0xd8d   : > { %v16649_v18 = vadd.f32 %v21603_v63, %v25334_v7  ;;  %v21605_v48 = vadd.f32 %v20602_v14, %v20106_v28  ;;  %v16381_v3 = vpop.f32.mrb[95].mxu0 }
 0xd8e   : > { %v16647_v41 = vadd.f32 %v21604_v59, %v25334_v7  ;;  %v21606_v39 = vadd.f32 %v16381_v3, %v13593_v47 }
 0xd8f   : > { %v16866_v12 = vadd.f32 %v16758_v22, %v16649_v18  ;;  %v16650_v49 = vadd.f32 %v21605_v48, %v25334_v7  ;;  %v16770_v48 = vld [vmem:[%s25997_s3 + $0x350] sm:$0xff] }
 0xd90   : > { %v16864_v38 = vadd.f32 %v16756_v54, %v16647_v41  ;;  %v16648_v29 = vadd.f32 %v21606_v39, %v25334_v7  ;;  %v16768_v39 = vld [vmem:[%s25997_s3 + $0x340] sm:$0xff] }
 0xd91   : > { %16975 = vst [vmem:[%s26012_s12 + $0x2f0] sm:$0xff] %v16866_v12  ;;  %v16867_v2 = vadd.f32 %v16759_v17, %v16650_v49  ;;  %v20113_v11 = vpop.f32.mrb[100].mxu1 }
 0xd92   : > { %16973 = vst [vmem:[%s26012_s12 + $0x2e0] sm:$0xff] %v16864_v38  ;;  %v16865_v1 = vadd.f32 %v16757_v53, %v16648_v29  ;;  %v20605_v37 = vpop.f32.mrb[96].mxu0  ;;  %v13622_v20 = vpop.f32.mrb[101].mxu1  ;;  %v16771_v38 = vld [vmem:[%s25997_s3 + $0x358] sm:$0xff] }
 0xd93   : > { %16976 = vst [vmem:[%s26012_s12 + $0x2f8] sm:$0xff] %v16867_v2  ;;  %v21607_v40 = vadd.f32 %v20605_v37, %v20109_v44  ;;  %v16394_v57 = vpop.f32.mrb[97].mxu0  ;;  %v20114_v23 = vpop.f32.mrb[102].mxu1 }
 0xd94   : > { %16974 = vst [vmem:[%s26012_s12 + $0x2e8] sm:$0xff] %v16865_v1  ;;  %v21608_v31 = vadd.f32 %v16394_v57, %v13606_v61  ;;  %v20606_v43 = vpop.f32.mrb[98].mxu0  ;;  %v13625_v45 = vpop.f32.mrb[103].mxu1  ;;  %v16769_v1 = vld [vmem:[%s25997_s3 + $0x348] sm:$0xff] }
 0xd95   : > { %v16653_v16 = vadd.f32 %v21607_v40, %v25334_v7  ;;  %v21609_v52 = vadd.f32 %v20606_v43, %v20110_v8  ;;  %v16397_v5 = vpop.f32.mrb[99].mxu0 }
 0xd96   : > { %v16651_v21 = vadd.f32 %v21608_v31, %v25334_v7  ;;  %v21610_v26 = vadd.f32 %v16397_v5, %v13609_v50 }
 0xd97   : > { %v16870_v27 = vadd.f32 %v16762_v60, %v16653_v16  ;;  %v16654_v46 = vadd.f32 %v21609_v52, %v25334_v7 }
 0xd98   : > { %v16868_v28 = vadd.f32 %v16760_v42, %v16651_v21  ;;  %v16652_v30 = vadd.f32 %v21610_v26, %v25334_v7 }
 0xd99   : > { %16979 = vst [vmem:[%s26012_s12 + $0x310] sm:$0xff] %v16870_v27  ;;  %v16871_v13 = vadd.f32 %v16763_v55, %v16654_v46  ;;  %v20117_v56 = vpop.f32.mrb[104].mxu1 }
 0xd9a   : > { %16977 = vst [vmem:[%s26012_s12 + $0x300] sm:$0xff] %v16868_v28  ;;  %v16869_v47 = vadd.f32 %v16761_v6, %v16652_v30  ;;  %v20609_v24 = vpop.f32.mrb[100].mxu0  ;;  %v13638_v10 = vpop.f32.mrb[105].mxu1 }
 0xd9b   : > { %16980 = vst [vmem:[%s26012_s12 + $0x318] sm:$0xff] %v16871_v13  ;;  %v21611_v35 = vadd.f32 %v20609_v24, %v20113_v11  ;;  %v16410_v4 = vpop.f32.mrb[101].mxu0  ;;  %v20118_v36 = vpop.f32.mrb[106].mxu1 }
 0xd9c   : > { %16978 = vst [vmem:[%s26012_s12 + $0x308] sm:$0xff] %v16869_v47  ;;  %v21612_v58 = vadd.f32 %v16410_v4, %v13622_v20  ;;  %v20610_v32 = vpop.f32.mrb[102].mxu0  ;;  %v13641_v33 = vpop.f32.mrb[107].mxu1 }
 0xd9d   : > { %v16657_v19 = vadd.f32 %v21611_v35, %v25334_v7  ;;  %v21613_v34 = vadd.f32 %v20610_v32, %v20114_v23  ;;  %v16413_v9 = vpop.f32.mrb[103].mxu0 }
 0xd9e   : > { %v16655_v44 = vadd.f32 %v21612_v58, %v25334_v7  ;;  %v21614_v0 = vadd.f32 %v16413_v9, %v13625_v45 }
 0xd9f   : > { %v16874_v61 = vadd.f32 %v16766_v15, %v16657_v19  ;;  %v16658_v63 = vadd.f32 %v21613_v34, %v25334_v7 }
 0xda0   : > { %v16872_v8 = vadd.f32 %v16764_v25, %v16655_v44  ;;  %v16656_v22 = vadd.f32 %v21614_v0, %v25334_v7 }
 0xda1   : > { %16983 = vst [vmem:[%s26012_s12 + $0x330] sm:$0xff] %v16874_v61  ;;  %v16875_v59 = vadd.f32 %v16767_v62, %v16658_v63 }
 0xda2   : > { %16981 = vst [vmem:[%s26012_s12 + $0x320] sm:$0xff] %v16872_v8  ;;  %v16873_v14 = vadd.f32 %v16765_v51, %v16656_v22  ;;  %v20613_v50 = vpop.f32.mrb[104].mxu0 }
 0xda3   : > { %16984 = vst [vmem:[%s26012_s12 + $0x338] sm:$0xff] %v16875_v59  ;;  %v21615_v18 = vadd.f32 %v20613_v50, %v20117_v56  ;;  %v16426_v54 = vpop.f32.mrb[105].mxu0 }
 0xda4   : > { %16982 = vst [vmem:[%s26012_s12 + $0x328] sm:$0xff] %v16873_v14  ;;  %v21616_v3 = vadd.f32 %v16426_v54, %v13638_v10  ;;  %v20614_v41 = vpop.f32.mrb[106].mxu0 }
 0xda5   : > { %v16661_v17 = vadd.f32 %v21615_v18, %v25334_v7  ;;  %v21617_v12 = vadd.f32 %v20614_v41, %v20118_v36  ;;  %v16429_v49 = vpop.f32.mrb[107].mxu0 }
 0xda6   : > { %v16659_v53 = vadd.f32 %v21616_v3, %v25334_v7  ;;  %v21618_v29 = vadd.f32 %v16429_v49, %v13641_v33  ;;  %10491 = sbr.rel (!%p10489_p6) target bundleno = 2277 (0x8e5), region = 188 }
 0xda7   : > { %v16878_v2 = vadd.f32 %v16770_v48, %v16661_v17  ;;  %v16662_v11 = vadd.f32 %v21617_v12, %v25334_v7 }
 0xda8   : > { %v16876_v37 = vadd.f32 %v16768_v39, %v16659_v53  ;;  %v16660_v20 = vadd.f32 %v21618_v29, %v25334_v7 }
 0xda9   : > { %16987 = vst [vmem:[%s26012_s12 + $0x350] sm:$0xff] %v16878_v2  ;;  %v16879_v40 = vadd.f32 %v16771_v38, %v16662_v11 }
 0xdaa   : > { %16985 = vst [vmem:[%s26012_s12 + $0x340] sm:$0xff] %v16876_v37  ;;  %v16877_v57 = vadd.f32 %v16769_v1, %v16660_v20 }
 0xdab   : > { %16988 = vst [vmem:[%s26012_s12 + $0x358] sm:$0xff] %v16879_v40 }
 0xdac   : > { %16986 = vst [vmem:[%s26012_s12 + $0x348] sm:$0xff] %v16877_v57 }
 0xdad   :  { %22683 = shalt.err (!%p22680_p11)
}
 0xdae   :  { %s22684_s5 = scalar_lea.hbm %s26406_s9, 82944 }
 0xdaf   :  { %p22685_p12 = scmp.ne.s32.totalorder %s26406_s9, %s22684_s5  ;;  %p22688_p13 = scmp.lt.u32.totalorder %s22684_s5, %s26406_s9 }
 0xdb1   :  { %p22690_p0 = pnand %p22688_p13, %p22685_p12 }
 0xdb3   :  { %22693 = shalt.err (!%p22690_p0)
}
 0xdb4   :  { %s22781_s0 = smov 128   ;;  %s22782_s29 = smov 8  }
 0xdb5   :  { %17000 = dma.vmem_to_hbm [thread:$0]  %s16995_s24, 82944, %s26406_s9, [#allocation5], %s22781_s0, %s22781_s0, %s22782_s29  }
 0xdb6   :  { %22734 = dma.done.wait [#allocation5], 82944  }
 0xdb7   :  { %22735 = vsyncadd [#allocation5], 4294884352 }
 0xdb8   :  { %17004 = vsyncpa [#allocation4], 1 }
 0xdb9   :  { %17005 = vsyncpa [#allocation7], 1 }
 0xdba   :  { %17006 = vsyncpa [#allocation5], 1 }

</bundles_post_ra>
